<compile_context>
chip_gen: v6e
topology: v6e:2x2x1
jax: 0.10.0
libtpu: 0.0.40
codegen_flags: <defaults>
</compile_context>

<pallas_src>
import jax
import jax.numpy as jnp
from jax.experimental import pallas as pl
from jax.experimental.pallas import tpu as pltpu


# ---------------- Fused Pallas kernel ----------------

def _fused_forward_kernel(x_ref, w1_ref, b1_ref, w2_ref, b2_ref, w3_ref, b3_ref,
                          wfc_ref, bfc_ref, o_ref, pad1_ref, pad2_ref):
    # x_ref:   (1, H+2, W+2, Cin_pad)  spatially pre-padded input image (f32)
    # w*_ref:  (9, Cin, Cout) bf16 folded conv+BN weights; b*_ref: (1, Cout) f32
    # wfc_ref: (512, NPAD) f32; bfc_ref: (1, NPAD) f32 (padded lanes = -1e30)
    # o_ref:   (1, 1, NPAD) f32 softmax probabilities
    # pad1_ref/pad2_ref: VMEM scratch (H+2, W+2, C) bf16 padded activations
    _, hp, wp, _ = x_ref.shape
    h, w = hp - 2, wp - 2
    m = h * w
    taps = [(dy, dx) for dy in range(3) for dx in range(3)]

    def conv3x3(padded, w_ref_, b_ref_):
        # padded: (hp, wp, cin) bf16 value -> (m, cout) f32 after bias+ReLU.
        cin = padded.shape[-1]
        cout = w_ref_.shape[-1]
        acc = jnp.zeros((m, cout), jnp.float32)
        for t, (dy, dx) in enumerate(taps):
            patch = padded[dy:dy + h, dx:dx + w, :].reshape(m, cin)
            acc = acc + jnp.dot(patch, w_ref_[t],
                                preferred_element_type=jnp.float32)
        return jnp.maximum(acc + b_ref_[...], 0.0)

    # ---- layer 1: input block is already spatially zero-padded ----
    a1 = conv3x3(x_ref[0].astype(jnp.bfloat16), w1_ref, b1_ref)      # (m, 128)

    # ---- layer 2 ----
    pad1_ref[...] = jnp.zeros_like(pad1_ref)
    pad1_ref[1:h + 1, 1:w + 1, :] = a1.reshape(h, w, -1).astype(pad1_ref.dtype)
    a2 = conv3x3(pad1_ref[...], w2_ref, b2_ref)                      # (m, 256)

    # ---- layer 3 ----
    pad2_ref[...] = jnp.zeros_like(pad2_ref)
    pad2_ref[1:h + 1, 1:w + 1, :] = a2.reshape(h, w, -1).astype(pad2_ref.dtype)
    a3 = conv3x3(pad2_ref[...], w3_ref, b3_ref)                      # (m, 512)

    # ---- head: GlobalAveragePooling2D + Linear + Softmax (all f32) ----
    pooled = jnp.sum(a3, axis=0, keepdims=True) * (1.0 / m)          # (1, 512)
    logits = jnp.dot(pooled, wfc_ref[...],
                     preferred_element_type=jnp.float32) + bfc_ref[...]
    mx = jnp.max(logits, axis=-1, keepdims=True)
    e = jnp.exp(logits - mx)                      # padded lanes underflow to 0
    probs = e / jnp.sum(e, axis=-1, keepdims=True)
    o_ref[...] = probs.reshape(o_ref.shape)


# ---------------- Wrapper (parameter folding + pallas_call) ----------------

def _fold_bn(w_hwio, conv_b, gamma, beta, mean, var, eps):
    scale = gamma / jnp.sqrt(var + eps)
    w_fold = w_hwio * scale[None, None, None, :]
    b_fold = beta + (conv_b - mean) * scale
    return w_fold, b_fold


def experimental_model_forward(x, params, eps=1e-5):
    n, h, w, cin = x.shape
    hp, wp = h + 2, w + 2

    # Fold eval-mode BatchNorm into each conv; operands to the MXU go bf16.
    # TODO(synk): PyTorch default is training-mode BN (batch stats); we implement
    # eval-mode BN with deterministic running statistics folded into the conv.
    folded = [_fold_bn(*p, eps) for p in params["convs"]]
    cin_pad = ((cin + 7) // 8) * 8

    w1, b1 = folded[0]
    w2, b2 = folded[1]
    w3, b3 = folded[2]
    w1 = jnp.pad(w1, ((0, 0), (0, 0), (0, cin_pad - cin), (0, 0)))
    c1, c2, c3 = w1.shape[-1], w2.shape[-1], w3.shape[-1]

    w1 = w1.reshape(9, cin_pad, c1).astype(jnp.bfloat16)
    w2 = w2.reshape(9, c1, c2).astype(jnp.bfloat16)
    w3 = w3.reshape(9, c2, c3).astype(jnp.bfloat16)
    b1 = b1.reshape(1, c1).astype(jnp.float32)
    b2 = b2.reshape(1, c2).astype(jnp.float32)
    b3 = b3.reshape(1, c3).astype(jnp.float32)

    # Pre-pad input once: spatial 'same' halo + channel pad to a multiple of 8.
    xp = jnp.pad(x, ((0, 0), (1, 1), (1, 1), (0, cin_pad - cin)))

    # Lane-dense classifier: pad classes to 128; padded logits pinned at -1e30
    # so they vanish under softmax.
    w_fc, b_fc = params["w_fc"], params["b_fc"]
    ncls = w_fc.shape[-1]
    npad = ((ncls + 127) // 128) * 128
    wfc_p = jnp.pad(w_fc, ((0, 0), (0, npad - ncls))).astype(jnp.float32)
    bfc_p = jnp.concatenate(
        [b_fc.astype(jnp.float32),
         jnp.full((npad - ncls,), -1e30, jnp.float32)]).reshape(1, npad)

    out = pl.pallas_call(
        _fused_forward_kernel,
        out_shape=jax.ShapeDtypeStruct((n, 1, npad), jnp.float32),
        grid_spec=pltpu.PrefetchScalarGridSpec(
            num_scalar_prefetch=0,
            grid=(n,),                      # one image per grid step
            in_specs=[
                pl.BlockSpec((1, hp, wp, cin_pad), lambda i: (i, 0, 0, 0)),
                pl.BlockSpec((9, cin_pad, c1), lambda i: (0, 0, 0)),
                pl.BlockSpec((1, c1), lambda i: (0, 0)),
                pl.BlockSpec((9, c1, c2), lambda i: (0, 0, 0)),
                pl.BlockSpec((1, c2), lambda i: (0, 0)),
                pl.BlockSpec((9, c2, c3), lambda i: (0, 0, 0)),
                pl.BlockSpec((1, c3), lambda i: (0, 0)),
                pl.BlockSpec((c3, npad), lambda i: (0, 0)),
                pl.BlockSpec((1, npad), lambda i: (0, 0)),
            ],
            out_specs=pl.BlockSpec((1, 1, npad), lambda i: (i, 0, 0)),
            scratch_shapes=[
                pltpu.VMEM((hp, wp, c1), jnp.bfloat16),
                pltpu.VMEM((hp, wp, c2), jnp.bfloat16),
            ],
        ),
        compiler_params=pltpu.CompilerParams(
            dimension_semantics=("parallel",)),
    )(xp, w1, b1, w2, b2, w3, b3, wfc_p, bfc_p)

    return out.reshape(n, npad)[:, :ncls]


# ---------------- Deterministic parameter init ----------------

def init_params(key, in_features, out_features):
    channels = [(in_features, 128), (128, 256), (256, 512)]
    convs = []
    for cin, cout in channels:
        key, k1, k2, k3, k4, k5, k6 = jax.random.split(key, 7)
        w = jax.random.normal(k1, (3, 3, cin, cout), jnp.float32) * jnp.sqrt(2.0 / (9 * cin))
        b = 0.01 * jax.random.normal(k2, (cout,), jnp.float32)
        gamma = 1.0 + 0.1 * jax.random.normal(k3, (cout,), jnp.float32)
        beta = 0.1 * jax.random.normal(k4, (cout,), jnp.float32)
        mean = 0.1 * jax.random.normal(k5, (cout,), jnp.float32)
        var = 0.5 + jnp.abs(jax.random.normal(k6, (cout,), jnp.float32)) * 0.5
        convs.append((w, b, gamma, beta, mean, var))
    key, kf1, kf2 = jax.random.split(key, 3)
    w_fc = jax.random.normal(kf1, (512, out_features), jnp.float32) / jnp.sqrt(512.0)
    b_fc = 0.01 * jax.random.normal(kf2, (out_features,), jnp.float32)
    return {"convs": convs, "w_fc": w_fc, "b_fc": b_fc}


# ---------------- Pure-JAX (f32) reference ----------------

def ref_forward(x, params, eps=1e-5):
    y = x
    for (w, b, g, be, mu, var) in params["convs"]:
        y = jax.lax.conv_general_dilated(
            y, w, window_strides=(1, 1), padding="SAME",
            dimension_numbers=("NHWC", "HWIO", "NHWC"))
        y = y + b
        y = g * (y - mu) / jnp.sqrt(var + eps) + be
        y = jnp.maximum(y, 0.0)
    pooled = jnp.mean(y, axis=(1, 2))
    logits = pooled @ params["w_fc"] + params["b_fc"]
    return jax.nn.softmax(logits, axis=1)


if __name__ == "__main__":
    key = jax.random.PRNGKey(0)
    key, kx, kp = jax.random.split(key, 3)

    batch, in_features, spatial, out_features = 2, 4, 8, 10
    # NHWC input (PyTorch NCHW equivalent shape: (2, 4, 8, 8))
    x = jax.random.normal(kx, (batch, spatial, spatial, in_features), jnp.float32)
    params = init_params(kp, in_features, out_features)

    probs = experimental_model_forward(x, params)
    probs = jax.block_until_ready(probs)

    ref = ref_forward(x, params)
    assert probs.shape == (batch, out_features)
    assert bool(jnp.all(jnp.isfinite(probs)))
    assert jnp.allclose(jnp.sum(probs, axis=1), 1.0, atol=1e-4)
    # Kernel uses bf16 MXU operands with f32 accumulation; compare against the
    # full-f32 XLA reference with a correspondingly relaxed tolerance.
    assert jnp.allclose(probs, ref, atol=2e-2, rtol=2e-2)

    print("KERNEL_OK")
</pallas_src>

<mosaic_0001>
module attributes {stable_mosaic.version = 11 : i64} {
  func.func @_fused_forward_kernel(%arg0: i32, %arg1: memref<1x10x10x8xf32, #tpu.memory_space<vmem>>, %arg2: memref<9x8x128xbf16, #tpu.memory_space<vmem>>, %arg3: memref<1x128xf32, #tpu.memory_space<vmem>>, %arg4: memref<9x128x256xbf16, #tpu.memory_space<vmem>>, %arg5: memref<1x256xf32, #tpu.memory_space<vmem>>, %arg6: memref<9x256x512xbf16, #tpu.memory_space<vmem>>, %arg7: memref<1x512xf32, #tpu.memory_space<vmem>>, %arg8: memref<512x128xf32, #tpu.memory_space<vmem>>, %arg9: memref<1x128xf32, #tpu.memory_space<vmem>>, %arg10: memref<1x1x128xf32, #tpu.memory_space<vmem>>, %arg11: memref<10x10x128xbf16, #tpu.memory_space<vmem>>, %arg12: memref<10x10x256xbf16, #tpu.memory_space<vmem>>) attributes {dimension_semantics = [#tpu.dimension_semantics<parallel>], iteration_bounds = array<i64: 2>, scalar_prefetch = 0 : i64, scratch_operands = 2 : i64, tpu.core_type = #tpu.core_type<tc>, window_params = [{transform_indices = @transform_0, window_bounds = array<i64: 1, 10, 10, 8>}, {pipeline_mode = #tpu.pipeline_mode<synchronous>, transform_indices = @transform_1, window_bounds = array<i64: 9, 8, 128>}, {pipeline_mode = #tpu.pipeline_mode<synchronous>, transform_indices = @transform_2, window_bounds = array<i64: 1, 128>}, {pipeline_mode = #tpu.pipeline_mode<synchronous>, transform_indices = @transform_3, window_bounds = array<i64: 9, 128, 256>}, {pipeline_mode = #tpu.pipeline_mode<synchronous>, transform_indices = @transform_4, window_bounds = array<i64: 1, 256>}, {pipeline_mode = #tpu.pipeline_mode<synchronous>, transform_indices = @transform_5, window_bounds = array<i64: 9, 256, 512>}, {pipeline_mode = #tpu.pipeline_mode<synchronous>, transform_indices = @transform_6, window_bounds = array<i64: 1, 512>}, {pipeline_mode = #tpu.pipeline_mode<synchronous>, transform_indices = @transform_7, window_bounds = array<i64: 512, 128>}, {pipeline_mode = #tpu.pipeline_mode<synchronous>, transform_indices = @transform_8, window_bounds = array<i64: 1, 128>}, {transform_indices = @transform_9, window_bounds = array<i64: 1, 1, 128>}]} {
    %c0 = arith.constant 0 : index
    %c0_0 = arith.constant 0 : index
    %c0_1 = arith.constant 0 : index
    %c0_2 = arith.constant 0 : index
    %0 = vector.load %arg1[%c0, %c0_0, %c0_1, %c0_2] : memref<1x10x10x8xf32, #tpu.memory_space<vmem>>, vector<1x10x10x8xf32>
    %1 = vector.shape_cast %0 : vector<1x10x10x8xf32> to vector<10x10x8xf32>
    %2 = arith.truncf %1 : vector<10x10x8xf32> to vector<10x10x8xbf16>
    %cst = arith.constant 0.000000e+00 : f32
    %3 = vector.broadcast %cst : f32 to vector<64x128xf32>
    %4 = vector.extract_strided_slice %2 {offsets = [0, 0, 0], sizes = [8, 8, 8], strides = [1, 1, 1]} : vector<10x10x8xbf16> to vector<8x8x8xbf16>
    %5 = vector.shape_cast %4 : vector<8x8x8xbf16> to vector<64x8xbf16>
    %c0_3 = arith.constant 0 : index
    %c0_4 = arith.constant 0 : index
    %c0_5 = arith.constant 0 : index
    %6 = vector.load %arg2[%c0_3, %c0_4, %c0_5] : memref<9x8x128xbf16, #tpu.memory_space<vmem>>, vector<1x8x128xbf16>
    %7 = vector.shape_cast %6 : vector<1x8x128xbf16> to vector<8x128xbf16>
    %cst_6 = arith.constant dense<0.000000e+00> : vector<64x128xf32>
    %8 = tpu.matmul %5, %7, %cst_6 {dimension_numbers = #tpu.dot_dimension_numbers<[1], [0], [0], [1], [0, 0, 1, 1], [], []>} : vector<64x8xbf16>, vector<8x128xbf16>, vector<64x128xf32> -> vector<64x128xf32>
    %9 = arith.addf %3, %8 : vector<64x128xf32>
    %10 = vector.extract_strided_slice %2 {offsets = [0, 1, 0], sizes = [8, 8, 8], strides = [1, 1, 1]} : vector<10x10x8xbf16> to vector<8x8x8xbf16>
    %11 = vector.shape_cast %10 : vector<8x8x8xbf16> to vector<64x8xbf16>
    %c1 = arith.constant 1 : index
    %c0_7 = arith.constant 0 : index
    %c0_8 = arith.constant 0 : index
    %12 = vector.load %arg2[%c1, %c0_7, %c0_8] : memref<9x8x128xbf16, #tpu.memory_space<vmem>>, vector<1x8x128xbf16>
    %13 = vector.shape_cast %12 : vector<1x8x128xbf16> to vector<8x128xbf16>
    %cst_9 = arith.constant dense<0.000000e+00> : vector<64x128xf32>
    %14 = tpu.matmul %11, %13, %cst_9 {dimension_numbers = #tpu.dot_dimension_numbers<[1], [0], [0], [1], [0, 0, 1, 1], [], []>} : vector<64x8xbf16>, vector<8x128xbf16>, vector<64x128xf32> -> vector<64x128xf32>
    %15 = arith.addf %9, %14 : vector<64x128xf32>
    %16 = vector.extract_strided_slice %2 {offsets = [0, 2, 0], sizes = [8, 8, 8], strides = [1, 1, 1]} : vector<10x10x8xbf16> to vector<8x8x8xbf16>
    %17 = vector.shape_cast %16 : vector<8x8x8xbf16> to vector<64x8xbf16>
    %c2 = arith.constant 2 : index
    %c0_10 = arith.constant 0 : index
    %c0_11 = arith.constant 0 : index
    %18 = vector.load %arg2[%c2, %c0_10, %c0_11] : memref<9x8x128xbf16, #tpu.memory_space<vmem>>, vector<1x8x128xbf16>
    %19 = vector.shape_cast %18 : vector<1x8x128xbf16> to vector<8x128xbf16>
    %cst_12 = arith.constant dense<0.000000e+00> : vector<64x128xf32>
    %20 = tpu.matmul %17, %19, %cst_12 {dimension_numbers = #tpu.dot_dimension_numbers<[1], [0], [0], [1], [0, 0, 1, 1], [], []>} : vector<64x8xbf16>, vector<8x128xbf16>, vector<64x128xf32> -> vector<64x128xf32>
    %21 = arith.addf %15, %20 : vector<64x128xf32>
    %22 = vector.extract_strided_slice %2 {offsets = [1, 0, 0], sizes = [8, 8, 8], strides = [1, 1, 1]} : vector<10x10x8xbf16> to vector<8x8x8xbf16>
    %23 = vector.shape_cast %22 : vector<8x8x8xbf16> to vector<64x8xbf16>
    %c3 = arith.constant 3 : index
    %c0_13 = arith.constant 0 : index
    %c0_14 = arith.constant 0 : index
    %24 = vector.load %arg2[%c3, %c0_13, %c0_14] : memref<9x8x128xbf16, #tpu.memory_space<vmem>>, vector<1x8x128xbf16>
    %25 = vector.shape_cast %24 : vector<1x8x128xbf16> to vector<8x128xbf16>
    %cst_15 = arith.constant dense<0.000000e+00> : vector<64x128xf32>
    %26 = tpu.matmul %23, %25, %cst_15 {dimension_numbers = #tpu.dot_dimension_numbers<[1], [0], [0], [1], [0, 0, 1, 1], [], []>} : vector<64x8xbf16>, vector<8x128xbf16>, vector<64x128xf32> -> vector<64x128xf32>
    %27 = arith.addf %21, %26 : vector<64x128xf32>
    %28 = vector.extract_strided_slice %2 {offsets = [1, 1, 0], sizes = [8, 8, 8], strides = [1, 1, 1]} : vector<10x10x8xbf16> to vector<8x8x8xbf16>
    %29 = vector.shape_cast %28 : vector<8x8x8xbf16> to vector<64x8xbf16>
    %c4 = arith.constant 4 : index
    %c0_16 = arith.constant 0 : index
    %c0_17 = arith.constant 0 : index
    %30 = vector.load %arg2[%c4, %c0_16, %c0_17] : memref<9x8x128xbf16, #tpu.memory_space<vmem>>, vector<1x8x128xbf16>
    %31 = vector.shape_cast %30 : vector<1x8x128xbf16> to vector<8x128xbf16>
    %cst_18 = arith.constant dense<0.000000e+00> : vector<64x128xf32>
    %32 = tpu.matmul %29, %31, %cst_18 {dimension_numbers = #tpu.dot_dimension_numbers<[1], [0], [0], [1], [0, 0, 1, 1], [], []>} : vector<64x8xbf16>, vector<8x128xbf16>, vector<64x128xf32> -> vector<64x128xf32>
    %33 = arith.addf %27, %32 : vector<64x128xf32>
    %34 = vector.extract_strided_slice %2 {offsets = [1, 2, 0], sizes = [8, 8, 8], strides = [1, 1, 1]} : vector<10x10x8xbf16> to vector<8x8x8xbf16>
    %35 = vector.shape_cast %34 : vector<8x8x8xbf16> to vector<64x8xbf16>
    %c5 = arith.constant 5 : index
    %c0_19 = arith.constant 0 : index
    %c0_20 = arith.constant 0 : index
    %36 = vector.load %arg2[%c5, %c0_19, %c0_20] : memref<9x8x128xbf16, #tpu.memory_space<vmem>>, vector<1x8x128xbf16>
    %37 = vector.shape_cast %36 : vector<1x8x128xbf16> to vector<8x128xbf16>
    %cst_21 = arith.constant dense<0.000000e+00> : vector<64x128xf32>
    %38 = tpu.matmul %35, %37, %cst_21 {dimension_numbers = #tpu.dot_dimension_numbers<[1], [0], [0], [1], [0, 0, 1, 1], [], []>} : vector<64x8xbf16>, vector<8x128xbf16>, vector<64x128xf32> -> vector<64x128xf32>
    %39 = arith.addf %33, %38 : vector<64x128xf32>
    %40 = vector.extract_strided_slice %2 {offsets = [2, 0, 0], sizes = [8, 8, 8], strides = [1, 1, 1]} : vector<10x10x8xbf16> to vector<8x8x8xbf16>
    %41 = vector.shape_cast %40 : vector<8x8x8xbf16> to vector<64x8xbf16>
    %c6 = arith.constant 6 : index
    %c0_22 = arith.constant 0 : index
    %c0_23 = arith.constant 0 : index
    %42 = vector.load %arg2[%c6, %c0_22, %c0_23] : memref<9x8x128xbf16, #tpu.memory_space<vmem>>, vector<1x8x128xbf16>
    %43 = vector.shape_cast %42 : vector<1x8x128xbf16> to vector<8x128xbf16>
    %cst_24 = arith.constant dense<0.000000e+00> : vector<64x128xf32>
    %44 = tpu.matmul %41, %43, %cst_24 {dimension_numbers = #tpu.dot_dimension_numbers<[1], [0], [0], [1], [0, 0, 1, 1], [], []>} : vector<64x8xbf16>, vector<8x128xbf16>, vector<64x128xf32> -> vector<64x128xf32>
    %45 = arith.addf %39, %44 : vector<64x128xf32>
    %46 = vector.extract_strided_slice %2 {offsets = [2, 1, 0], sizes = [8, 8, 8], strides = [1, 1, 1]} : vector<10x10x8xbf16> to vector<8x8x8xbf16>
    %47 = vector.shape_cast %46 : vector<8x8x8xbf16> to vector<64x8xbf16>
    %c7 = arith.constant 7 : index
    %c0_25 = arith.constant 0 : index
    %c0_26 = arith.constant 0 : index
    %48 = vector.load %arg2[%c7, %c0_25, %c0_26] : memref<9x8x128xbf16, #tpu.memory_space<vmem>>, vector<1x8x128xbf16>
    %49 = vector.shape_cast %48 : vector<1x8x128xbf16> to vector<8x128xbf16>
    %cst_27 = arith.constant dense<0.000000e+00> : vector<64x128xf32>
    %50 = tpu.matmul %47, %49, %cst_27 {dimension_numbers = #tpu.dot_dimension_numbers<[1], [0], [0], [1], [0, 0, 1, 1], [], []>} : vector<64x8xbf16>, vector<8x128xbf16>, vector<64x128xf32> -> vector<64x128xf32>
    %51 = arith.addf %45, %50 : vector<64x128xf32>
    %52 = vector.extract_strided_slice %2 {offsets = [2, 2, 0], sizes = [8, 8, 8], strides = [1, 1, 1]} : vector<10x10x8xbf16> to vector<8x8x8xbf16>
    %53 = vector.shape_cast %52 : vector<8x8x8xbf16> to vector<64x8xbf16>
    %c8 = arith.constant 8 : index
    %c0_28 = arith.constant 0 : index
    %c0_29 = arith.constant 0 : index
    %54 = vector.load %arg2[%c8, %c0_28, %c0_29] : memref<9x8x128xbf16, #tpu.memory_space<vmem>>, vector<1x8x128xbf16>
    %55 = vector.shape_cast %54 : vector<1x8x128xbf16> to vector<8x128xbf16>
    %cst_30 = arith.constant dense<0.000000e+00> : vector<64x128xf32>
    %56 = tpu.matmul %53, %55, %cst_30 {dimension_numbers = #tpu.dot_dimension_numbers<[1], [0], [0], [1], [0, 0, 1, 1], [], []>} : vector<64x8xbf16>, vector<8x128xbf16>, vector<64x128xf32> -> vector<64x128xf32>
    %57 = arith.addf %51, %56 : vector<64x128xf32>
    %c0_31 = arith.constant 0 : index
    %c0_32 = arith.constant 0 : index
    %58 = vector.load %arg3[%c0_31, %c0_32] : memref<1x128xf32, #tpu.memory_space<vmem>>, vector<1x128xf32>
    %59 = vector.broadcast %58 : vector<1x128xf32> to vector<64x128xf32>
    %60 = arith.addf %57, %59 : vector<64x128xf32>
    %cst_33 = arith.constant 0.000000e+00 : f32
    %61 = vector.broadcast %cst_33 : f32 to vector<64x128xf32>
    %62 = arith.maximumf %60, %61 : vector<64x128xf32>
    %cst_34 = arith.constant 0.000000e+00 : bf16
    %63 = vector.broadcast %cst_34 : bf16 to vector<10x10x128xbf16>
    %c0_35 = arith.constant 0 : index
    %c0_36 = arith.constant 0 : index
    %c0_37 = arith.constant 0 : index
    %64 = vector.load %arg11[%c0_35, %c0_36, %c0_37] : memref<10x10x128xbf16, #tpu.memory_space<vmem>>, vector<10x10x128xbf16>
    tpu.vector_store %arg11[%c0_35, %c0_36, %c0_37], %63 {strides = array<i32>} : memref<10x10x128xbf16, #tpu.memory_space<vmem>>, vector<10x10x128xbf16>,
    %65 = vector.shape_cast %62 : vector<64x128xf32> to vector<8x8x128xf32>
    %66 = arith.truncf %65 : vector<8x8x128xf32> to vector<8x8x128xbf16>
    %c1_38 = arith.constant 1 : index
    %c1_39 = arith.constant 1 : index
    %c0_40 = arith.constant 0 : index
    %67 = vector.load %arg11[%c1_38, %c1_39, %c0_40] : memref<10x10x128xbf16, #tpu.memory_space<vmem>>, vector<8x8x128xbf16>
    tpu.vector_store %arg11[%c1_38, %c1_39, %c0_40], %66 {strides = array<i32>} : memref<10x10x128xbf16, #tpu.memory_space<vmem>>, vector<8x8x128xbf16>,
    %c0_41 = arith.constant 0 : index
    %c0_42 = arith.constant 0 : index
    %c0_43 = arith.constant 0 : index
    %68 = vector.load %arg11[%c0_41, %c0_42, %c0_43] : memref<10x10x128xbf16, #tpu.memory_space<vmem>>, vector<10x10x128xbf16>
    %cst_44 = arith.constant 0.000000e+00 : f32
    %69 = vector.broadcast %cst_44 : f32 to vector<64x256xf32>
    %70 = vector.extract_strided_slice %68 {offsets = [0, 0, 0], sizes = [8, 8, 128], strides = [1, 1, 1]} : vector<10x10x128xbf16> to vector<8x8x128xbf16>
    %71 = vector.shape_cast %70 : vector<8x8x128xbf16> to vector<64x128xbf16>
    %c0_45 = arith.constant 0 : index
    %c0_46 = arith.constant 0 : index
    %c0_47 = arith.constant 0 : index
    %72 = vector.load %arg4[%c0_45, %c0_46, %c0_47] : memref<9x128x256xbf16, #tpu.memory_space<vmem>>, vector<1x128x256xbf16>
    %73 = vector.shape_cast %72 : vector<1x128x256xbf16> to vector<128x256xbf16>
    %cst_48 = arith.constant dense<0.000000e+00> : vector<64x256xf32>
    %74 = tpu.matmul %71, %73, %cst_48 {dimension_numbers = #tpu.dot_dimension_numbers<[1], [0], [0], [1], [0, 0, 1, 1], [], []>} : vector<64x128xbf16>, vector<128x256xbf16>, vector<64x256xf32> -> vector<64x256xf32>
    %75 = arith.addf %69, %74 : vector<64x256xf32>
    %76 = vector.extract_strided_slice %68 {offsets = [0, 1, 0], sizes = [8, 8, 128], strides = [1, 1, 1]} : vector<10x10x128xbf16> to vector<8x8x128xbf16>
    %77 = vector.shape_cast %76 : vector<8x8x128xbf16> to vector<64x128xbf16>
    %c1_49 = arith.constant 1 : index
    %c0_50 = arith.constant 0 : index
    %c0_51 = arith.constant 0 : index
    %78 = vector.load %arg4[%c1_49, %c0_50, %c0_51] : memref<9x128x256xbf16, #tpu.memory_space<vmem>>, vector<1x128x256xbf16>
    %79 = vector.shape_cast %78 : vector<1x128x256xbf16> to vector<128x256xbf16>
    %cst_52 = arith.constant dense<0.000000e+00> : vector<64x256xf32>
    %80 = tpu.matmul %77, %79, %cst_52 {dimension_numbers = #tpu.dot_dimension_numbers<[1], [0], [0], [1], [0, 0, 1, 1], [], []>} : vector<64x128xbf16>, vector<128x256xbf16>, vector<64x256xf32> -> vector<64x256xf32>
    %81 = arith.addf %75, %80 : vector<64x256xf32>
    %82 = vector.extract_strided_slice %68 {offsets = [0, 2, 0], sizes = [8, 8, 128], strides = [1, 1, 1]} : vector<10x10x128xbf16> to vector<8x8x128xbf16>
    %83 = vector.shape_cast %82 : vector<8x8x128xbf16> to vector<64x128xbf16>
    %c2_53 = arith.constant 2 : index
    %c0_54 = arith.constant 0 : index
    %c0_55 = arith.constant 0 : index
    %84 = vector.load %arg4[%c2_53, %c0_54, %c0_55] : memref<9x128x256xbf16, #tpu.memory_space<vmem>>, vector<1x128x256xbf16>
    %85 = vector.shape_cast %84 : vector<1x128x256xbf16> to vector<128x256xbf16>
    %cst_56 = arith.constant dense<0.000000e+00> : vector<64x256xf32>
    %86 = tpu.matmul %83, %85, %cst_56 {dimension_numbers = #tpu.dot_dimension_numbers<[1], [0], [0], [1], [0, 0, 1, 1], [], []>} : vector<64x128xbf16>, vector<128x256xbf16>, vector<64x256xf32> -> vector<64x256xf32>
    %87 = arith.addf %81, %86 : vector<64x256xf32>
    %88 = vector.extract_strided_slice %68 {offsets = [1, 0, 0], sizes = [8, 8, 128], strides = [1, 1, 1]} : vector<10x10x128xbf16> to vector<8x8x128xbf16>
    %89 = vector.shape_cast %88 : vector<8x8x128xbf16> to vector<64x128xbf16>
    %c3_57 = arith.constant 3 : index
    %c0_58 = arith.constant 0 : index
    %c0_59 = arith.constant 0 : index
    %90 = vector.load %arg4[%c3_57, %c0_58, %c0_59] : memref<9x128x256xbf16, #tpu.memory_space<vmem>>, vector<1x128x256xbf16>
    %91 = vector.shape_cast %90 : vector<1x128x256xbf16> to vector<128x256xbf16>
    %cst_60 = arith.constant dense<0.000000e+00> : vector<64x256xf32>
    %92 = tpu.matmul %89, %91, %cst_60 {dimension_numbers = #tpu.dot_dimension_numbers<[1], [0], [0], [1], [0, 0, 1, 1], [], []>} : vector<64x128xbf16>, vector<128x256xbf16>, vector<64x256xf32> -> vector<64x256xf32>
    %93 = arith.addf %87, %92 : vector<64x256xf32>
    %94 = vector.extract_strided_slice %68 {offsets = [1, 1, 0], sizes = [8, 8, 128], strides = [1, 1, 1]} : vector<10x10x128xbf16> to vector<8x8x128xbf16>
    %95 = vector.shape_cast %94 : vector<8x8x128xbf16> to vector<64x128xbf16>
    %c4_61 = arith.constant 4 : index
    %c0_62 = arith.constant 0 : index
    %c0_63 = arith.constant 0 : index
    %96 = vector.load %arg4[%c4_61, %c0_62, %c0_63] : memref<9x128x256xbf16, #tpu.memory_space<vmem>>, vector<1x128x256xbf16>
    %97 = vector.shape_cast %96 : vector<1x128x256xbf16> to vector<128x256xbf16>
    %cst_64 = arith.constant dense<0.000000e+00> : vector<64x256xf32>
    %98 = tpu.matmul %95, %97, %cst_64 {dimension_numbers = #tpu.dot_dimension_numbers<[1], [0], [0], [1], [0, 0, 1, 1], [], []>} : vector<64x128xbf16>, vector<128x256xbf16>, vector<64x256xf32> -> vector<64x256xf32>
    %99 = arith.addf %93, %98 : vector<64x256xf32>
    %100 = vector.extract_strided_slice %68 {offsets = [1, 2, 0], sizes = [8, 8, 128], strides = [1, 1, 1]} : vector<10x10x128xbf16> to vector<8x8x128xbf16>
    %101 = vector.shape_cast %100 : vector<8x8x128xbf16> to vector<64x128xbf16>
    %c5_65 = arith.constant 5 : index
    %c0_66 = arith.constant 0 : index
    %c0_67 = arith.constant 0 : index
    %102 = vector.load %arg4[%c5_65, %c0_66, %c0_67] : memref<9x128x256xbf16, #tpu.memory_space<vmem>>, vector<1x128x256xbf16>
    %103 = vector.shape_cast %102 : vector<1x128x256xbf16> to vector<128x256xbf16>
    %cst_68 = arith.constant dense<0.000000e+00> : vector<64x256xf32>
    %104 = tpu.matmul %101, %103, %cst_68 {dimension_numbers = #tpu.dot_dimension_numbers<[1], [0], [0], [1], [0, 0, 1, 1], [], []>} : vector<64x128xbf16>, vector<128x256xbf16>, vector<64x256xf32> -> vector<64x256xf32>
    %105 = arith.addf %99, %104 : vector<64x256xf32>
    %106 = vector.extract_strided_slice %68 {offsets = [2, 0, 0], sizes = [8, 8, 128], strides = [1, 1, 1]} : vector<10x10x128xbf16> to vector<8x8x128xbf16>
    %107 = vector.shape_cast %106 : vector<8x8x128xbf16> to vector<64x128xbf16>
    %c6_69 = arith.constant 6 : index
    %c0_70 = arith.constant 0 : index
    %c0_71 = arith.constant 0 : index
    %108 = vector.load %arg4[%c6_69, %c0_70, %c0_71] : memref<9x128x256xbf16, #tpu.memory_space<vmem>>, vector<1x128x256xbf16>
    %109 = vector.shape_cast %108 : vector<1x128x256xbf16> to vector<128x256xbf16>
    %cst_72 = arith.constant dense<0.000000e+00> : vector<64x256xf32>
    %110 = tpu.matmul %107, %109, %cst_72 {dimension_numbers = #tpu.dot_dimension_numbers<[1], [0], [0], [1], [0, 0, 1, 1], [], []>} : vector<64x128xbf16>, vector<128x256xbf16>, vector<64x256xf32> -> vector<64x256xf32>
    %111 = arith.addf %105, %110 : vector<64x256xf32>
    %112 = vector.extract_strided_slice %68 {offsets = [2, 1, 0], sizes = [8, 8, 128], strides = [1, 1, 1]} : vector<10x10x128xbf16> to vector<8x8x128xbf16>
    %113 = vector.shape_cast %112 : vector<8x8x128xbf16> to vector<64x128xbf16>
    %c7_73 = arith.constant 7 : index
    %c0_74 = arith.constant 0 : index
    %c0_75 = arith.constant 0 : index
    %114 = vector.load %arg4[%c7_73, %c0_74, %c0_75] : memref<9x128x256xbf16, #tpu.memory_space<vmem>>, vector<1x128x256xbf16>
    %115 = vector.shape_cast %114 : vector<1x128x256xbf16> to vector<128x256xbf16>
    %cst_76 = arith.constant dense<0.000000e+00> : vector<64x256xf32>
    %116 = tpu.matmul %113, %115, %cst_76 {dimension_numbers = #tpu.dot_dimension_numbers<[1], [0], [0], [1], [0, 0, 1, 1], [], []>} : vector<64x128xbf16>, vector<128x256xbf16>, vector<64x256xf32> -> vector<64x256xf32>
    %117 = arith.addf %111, %116 : vector<64x256xf32>
    %118 = vector.extract_strided_slice %68 {offsets = [2, 2, 0], sizes = [8, 8, 128], strides = [1, 1, 1]} : vector<10x10x128xbf16> to vector<8x8x128xbf16>
    %119 = vector.shape_cast %118 : vector<8x8x128xbf16> to vector<64x128xbf16>
    %c8_77 = arith.constant 8 : index
    %c0_78 = arith.constant 0 : index
    %c0_79 = arith.constant 0 : index
    %120 = vector.load %arg4[%c8_77, %c0_78, %c0_79] : memref<9x128x256xbf16, #tpu.memory_space<vmem>>, vector<1x128x256xbf16>
    %121 = vector.shape_cast %120 : vector<1x128x256xbf16> to vector<128x256xbf16>
    %cst_80 = arith.constant dense<0.000000e+00> : vector<64x256xf32>
    %122 = tpu.matmul %119, %121, %cst_80 {dimension_numbers = #tpu.dot_dimension_numbers<[1], [0], [0], [1], [0, 0, 1, 1], [], []>} : vector<64x128xbf16>, vector<128x256xbf16>, vector<64x256xf32> -> vector<64x256xf32>
    %123 = arith.addf %117, %122 : vector<64x256xf32>
    %c0_81 = arith.constant 0 : index
    %c0_82 = arith.constant 0 : index
    %124 = vector.load %arg5[%c0_81, %c0_82] : memref<1x256xf32, #tpu.memory_space<vmem>>, vector<1x256xf32>
    %125 = vector.broadcast %124 : vector<1x256xf32> to vector<64x256xf32>
    %126 = arith.addf %123, %125 : vector<64x256xf32>
    %cst_83 = arith.constant 0.000000e+00 : f32
    %127 = vector.broadcast %cst_83 : f32 to vector<64x256xf32>
    %128 = arith.maximumf %126, %127 : vector<64x256xf32>
    %cst_84 = arith.constant 0.000000e+00 : bf16
    %129 = vector.broadcast %cst_84 : bf16 to vector<10x10x256xbf16>
    %c0_85 = arith.constant 0 : index
    %c0_86 = arith.constant 0 : index
    %c0_87 = arith.constant 0 : index
    %130 = vector.load %arg12[%c0_85, %c0_86, %c0_87] : memref<10x10x256xbf16, #tpu.memory_space<vmem>>, vector<10x10x256xbf16>
    tpu.vector_store %arg12[%c0_85, %c0_86, %c0_87], %129 {strides = array<i32>} : memref<10x10x256xbf16, #tpu.memory_space<vmem>>, vector<10x10x256xbf16>,
    %131 = vector.shape_cast %128 : vector<64x256xf32> to vector<8x8x256xf32>
    %132 = arith.truncf %131 : vector<8x8x256xf32> to vector<8x8x256xbf16>
    %c1_88 = arith.constant 1 : index
    %c1_89 = arith.constant 1 : index
    %c0_90 = arith.constant 0 : index
    %133 = vector.load %arg12[%c1_88, %c1_89, %c0_90] : memref<10x10x256xbf16, #tpu.memory_space<vmem>>, vector<8x8x256xbf16>
    tpu.vector_store %arg12[%c1_88, %c1_89, %c0_90], %132 {strides = array<i32>} : memref<10x10x256xbf16, #tpu.memory_space<vmem>>, vector<8x8x256xbf16>,
    %c0_91 = arith.constant 0 : index
    %c0_92 = arith.constant 0 : index
    %c0_93 = arith.constant 0 : index
    %134 = vector.load %arg12[%c0_91, %c0_92, %c0_93] : memref<10x10x256xbf16, #tpu.memory_space<vmem>>, vector<10x10x256xbf16>
    %cst_94 = arith.constant 0.000000e+00 : f32
    %135 = vector.broadcast %cst_94 : f32 to vector<64x512xf32>
    %136 = vector.extract_strided_slice %134 {offsets = [0, 0, 0], sizes = [8, 8, 256], strides = [1, 1, 1]} : vector<10x10x256xbf16> to vector<8x8x256xbf16>
    %137 = vector.shape_cast %136 : vector<8x8x256xbf16> to vector<64x256xbf16>
    %c0_95 = arith.constant 0 : index
    %c0_96 = arith.constant 0 : index
    %c0_97 = arith.constant 0 : index
    %138 = vector.load %arg6[%c0_95, %c0_96, %c0_97] : memref<9x256x512xbf16, #tpu.memory_space<vmem>>, vector<1x256x512xbf16>
    %139 = vector.shape_cast %138 : vector<1x256x512xbf16> to vector<256x512xbf16>
    %cst_98 = arith.constant dense<0.000000e+00> : vector<64x512xf32>
    %140 = tpu.matmul %137, %139, %cst_98 {dimension_numbers = #tpu.dot_dimension_numbers<[1], [0], [0], [1], [0, 0, 1, 1], [], []>} : vector<64x256xbf16>, vector<256x512xbf16>, vector<64x512xf32> -> vector<64x512xf32>
    %141 = arith.addf %135, %140 : vector<64x512xf32>
    %142 = vector.extract_strided_slice %134 {offsets = [0, 1, 0], sizes = [8, 8, 256], strides = [1, 1, 1]} : vector<10x10x256xbf16> to vector<8x8x256xbf16>
    %143 = vector.shape_cast %142 : vector<8x8x256xbf16> to vector<64x256xbf16>
    %c1_99 = arith.constant 1 : index
    %c0_100 = arith.constant 0 : index
    %c0_101 = arith.constant 0 : index
    %144 = vector.load %arg6[%c1_99, %c0_100, %c0_101] : memref<9x256x512xbf16, #tpu.memory_space<vmem>>, vector<1x256x512xbf16>
    %145 = vector.shape_cast %144 : vector<1x256x512xbf16> to vector<256x512xbf16>
    %cst_102 = arith.constant dense<0.000000e+00> : vector<64x512xf32>
    %146 = tpu.matmul %143, %145, %cst_102 {dimension_numbers = #tpu.dot_dimension_numbers<[1], [0], [0], [1], [0, 0, 1, 1], [], []>} : vector<64x256xbf16>, vector<256x512xbf16>, vector<64x512xf32> -> vector<64x512xf32>
    %147 = arith.addf %141, %146 : vector<64x512xf32>
    %148 = vector.extract_strided_slice %134 {offsets = [0, 2, 0], sizes = [8, 8, 256], strides = [1, 1, 1]} : vector<10x10x256xbf16> to vector<8x8x256xbf16>
    %149 = vector.shape_cast %148 : vector<8x8x256xbf16> to vector<64x256xbf16>
    %c2_103 = arith.constant 2 : index
    %c0_104 = arith.constant 0 : index
    %c0_105 = arith.constant 0 : index
    %150 = vector.load %arg6[%c2_103, %c0_104, %c0_105] : memref<9x256x512xbf16, #tpu.memory_space<vmem>>, vector<1x256x512xbf16>
    %151 = vector.shape_cast %150 : vector<1x256x512xbf16> to vector<256x512xbf16>
    %cst_106 = arith.constant dense<0.000000e+00> : vector<64x512xf32>
    %152 = tpu.matmul %149, %151, %cst_106 {dimension_numbers = #tpu.dot_dimension_numbers<[1], [0], [0], [1], [0, 0, 1, 1], [], []>} : vector<64x256xbf16>, vector<256x512xbf16>, vector<64x512xf32> -> vector<64x512xf32>
    %153 = arith.addf %147, %152 : vector<64x512xf32>
    %154 = vector.extract_strided_slice %134 {offsets = [1, 0, 0], sizes = [8, 8, 256], strides = [1, 1, 1]} : vector<10x10x256xbf16> to vector<8x8x256xbf16>
    %155 = vector.shape_cast %154 : vector<8x8x256xbf16> to vector<64x256xbf16>
    %c3_107 = arith.constant 3 : index
    %c0_108 = arith.constant 0 : index
    %c0_109 = arith.constant 0 : index
    %156 = vector.load %arg6[%c3_107, %c0_108, %c0_109] : memref<9x256x512xbf16, #tpu.memory_space<vmem>>, vector<1x256x512xbf16>
    %157 = vector.shape_cast %156 : vector<1x256x512xbf16> to vector<256x512xbf16>
    %cst_110 = arith.constant dense<0.000000e+00> : vector<64x512xf32>
    %158 = tpu.matmul %155, %157, %cst_110 {dimension_numbers = #tpu.dot_dimension_numbers<[1], [0], [0], [1], [0, 0, 1, 1], [], []>} : vector<64x256xbf16>, vector<256x512xbf16>, vector<64x512xf32> -> vector<64x512xf32>
    %159 = arith.addf %153, %158 : vector<64x512xf32>
    %160 = vector.extract_strided_slice %134 {offsets = [1, 1, 0], sizes = [8, 8, 256], strides = [1, 1, 1]} : vector<10x10x256xbf16> to vector<8x8x256xbf16>
    %161 = vector.shape_cast %160 : vector<8x8x256xbf16> to vector<64x256xbf16>
    %c4_111 = arith.constant 4 : index
    %c0_112 = arith.constant 0 : index
    %c0_113 = arith.constant 0 : index
    %162 = vector.load %arg6[%c4_111, %c0_112, %c0_113] : memref<9x256x512xbf16, #tpu.memory_space<vmem>>, vector<1x256x512xbf16>
    %163 = vector.shape_cast %162 : vector<1x256x512xbf16> to vector<256x512xbf16>
    %cst_114 = arith.constant dense<0.000000e+00> : vector<64x512xf32>
    %164 = tpu.matmul %161, %163, %cst_114 {dimension_numbers = #tpu.dot_dimension_numbers<[1], [0], [0], [1], [0, 0, 1, 1], [], []>} : vector<64x256xbf16>, vector<256x512xbf16>, vector<64x512xf32> -> vector<64x512xf32>
    %165 = arith.addf %159, %164 : vector<64x512xf32>
    %166 = vector.extract_strided_slice %134 {offsets = [1, 2, 0], sizes = [8, 8, 256], strides = [1, 1, 1]} : vector<10x10x256xbf16> to vector<8x8x256xbf16>
    %167 = vector.shape_cast %166 : vector<8x8x256xbf16> to vector<64x256xbf16>
    %c5_115 = arith.constant 5 : index
    %c0_116 = arith.constant 0 : index
    %c0_117 = arith.constant 0 : index
    %168 = vector.load %arg6[%c5_115, %c0_116, %c0_117] : memref<9x256x512xbf16, #tpu.memory_space<vmem>>, vector<1x256x512xbf16>
    %169 = vector.shape_cast %168 : vector<1x256x512xbf16> to vector<256x512xbf16>
    %cst_118 = arith.constant dense<0.000000e+00> : vector<64x512xf32>
    %170 = tpu.matmul %167, %169, %cst_118 {dimension_numbers = #tpu.dot_dimension_numbers<[1], [0], [0], [1], [0, 0, 1, 1], [], []>} : vector<64x256xbf16>, vector<256x512xbf16>, vector<64x512xf32> -> vector<64x512xf32>
    %171 = arith.addf %165, %170 : vector<64x512xf32>
    %172 = vector.extract_strided_slice %134 {offsets = [2, 0, 0], sizes = [8, 8, 256], strides = [1, 1, 1]} : vector<10x10x256xbf16> to vector<8x8x256xbf16>
    %173 = vector.shape_cast %172 : vector<8x8x256xbf16> to vector<64x256xbf16>
    %c6_119 = arith.constant 6 : index
    %c0_120 = arith.constant 0 : index
    %c0_121 = arith.constant 0 : index
    %174 = vector.load %arg6[%c6_119, %c0_120, %c0_121] : memref<9x256x512xbf16, #tpu.memory_space<vmem>>, vector<1x256x512xbf16>
    %175 = vector.shape_cast %174 : vector<1x256x512xbf16> to vector<256x512xbf16>
    %cst_122 = arith.constant dense<0.000000e+00> : vector<64x512xf32>
    %176 = tpu.matmul %173, %175, %cst_122 {dimension_numbers = #tpu.dot_dimension_numbers<[1], [0], [0], [1], [0, 0, 1, 1], [], []>} : vector<64x256xbf16>, vector<256x512xbf16>, vector<64x512xf32> -> vector<64x512xf32>
    %177 = arith.addf %171, %176 : vector<64x512xf32>
    %178 = vector.extract_strided_slice %134 {offsets = [2, 1, 0], sizes = [8, 8, 256], strides = [1, 1, 1]} : vector<10x10x256xbf16> to vector<8x8x256xbf16>
    %179 = vector.shape_cast %178 : vector<8x8x256xbf16> to vector<64x256xbf16>
    %c7_123 = arith.constant 7 : index
    %c0_124 = arith.constant 0 : index
    %c0_125 = arith.constant 0 : index
    %180 = vector.load %arg6[%c7_123, %c0_124, %c0_125] : memref<9x256x512xbf16, #tpu.memory_space<vmem>>, vector<1x256x512xbf16>
    %181 = vector.shape_cast %180 : vector<1x256x512xbf16> to vector<256x512xbf16>
    %cst_126 = arith.constant dense<0.000000e+00> : vector<64x512xf32>
    %182 = tpu.matmul %179, %181, %cst_126 {dimension_numbers = #tpu.dot_dimension_numbers<[1], [0], [0], [1], [0, 0, 1, 1], [], []>} : vector<64x256xbf16>, vector<256x512xbf16>, vector<64x512xf32> -> vector<64x512xf32>
    %183 = arith.addf %177, %182 : vector<64x512xf32>
    %184 = vector.extract_strided_slice %134 {offsets = [2, 2, 0], sizes = [8, 8, 256], strides = [1, 1, 1]} : vector<10x10x256xbf16> to vector<8x8x256xbf16>
    %185 = vector.shape_cast %184 : vector<8x8x256xbf16> to vector<64x256xbf16>
    %c8_127 = arith.constant 8 : index
    %c0_128 = arith.constant 0 : index
    %c0_129 = arith.constant 0 : index
    %186 = vector.load %arg6[%c8_127, %c0_128, %c0_129] : memref<9x256x512xbf16, #tpu.memory_space<vmem>>, vector<1x256x512xbf16>
    %187 = vector.shape_cast %186 : vector<1x256x512xbf16> to vector<256x512xbf16>
    %cst_130 = arith.constant dense<0.000000e+00> : vector<64x512xf32>
    %188 = tpu.matmul %185, %187, %cst_130 {dimension_numbers = #tpu.dot_dimension_numbers<[1], [0], [0], [1], [0, 0, 1, 1], [], []>} : vector<64x256xbf16>, vector<256x512xbf16>, vector<64x512xf32> -> vector<64x512xf32>
    %189 = arith.addf %183, %188 : vector<64x512xf32>
    %c0_131 = arith.constant 0 : index
    %c0_132 = arith.constant 0 : index
    %190 = vector.load %arg7[%c0_131, %c0_132] : memref<1x512xf32, #tpu.memory_space<vmem>>, vector<1x512xf32>
    %191 = vector.broadcast %190 : vector<1x512xf32> to vector<64x512xf32>
    %192 = arith.addf %189, %191 : vector<64x512xf32>
    %cst_133 = arith.constant 0.000000e+00 : f32
    %193 = vector.broadcast %cst_133 : f32 to vector<64x512xf32>
    %194 = arith.maximumf %192, %193 : vector<64x512xf32>
    %cst_134 = arith.constant dense<0.000000e+00> : vector<512xf32>
    %195 = vector.multi_reduction <add>, %194, %cst_134 [0] : vector<64x512xf32> to vector<512xf32>
    %196 = vector.shape_cast %195 : vector<512xf32> to vector<1x512xf32>
    %cst_135 = arith.constant 1.562500e-02 : f32
    %197 = vector.broadcast %cst_135 : f32 to vector<1x512xf32>
    %198 = arith.mulf %196, %197 : vector<1x512xf32>
    %c0_136 = arith.constant 0 : index
    %c0_137 = arith.constant 0 : index
    %199 = vector.load %arg8[%c0_136, %c0_137] : memref<512x128xf32, #tpu.memory_space<vmem>>, vector<512x128xf32>
    %cst_138 = arith.constant dense<0.000000e+00> : vector<1x128xf32>
    %200 = tpu.matmul %198, %199, %cst_138 {dimension_numbers = #tpu.dot_dimension_numbers<[1], [0], [0], [1], [0, 0, 1, 1], [], []>} : vector<1x512xf32>, vector<512x128xf32>, vector<1x128xf32> -> vector<1x128xf32>
    %c0_139 = arith.constant 0 : index
    %c0_140 = arith.constant 0 : index
    %201 = vector.load %arg9[%c0_139, %c0_140] : memref<1x128xf32, #tpu.memory_space<vmem>>, vector<1x128xf32>
    %202 = arith.addf %200, %201 : vector<1x128xf32>
    %cst_141 = arith.constant dense<0xFF800000> : vector<1xf32>
    %203 = vector.multi_reduction <maximumf>, %202, %cst_141 [1] : vector<1x128xf32> to vector<1xf32>
    %204 = vector.shape_cast %203 : vector<1xf32> to vector<1x1xf32>
    %205 = vector.broadcast %204 : vector<1x1xf32> to vector<1x128xf32>
    %206 = arith.subf %202, %205 : vector<1x128xf32>
    %207 = math.exp %206 : vector<1x128xf32>
    %cst_142 = arith.constant dense<0.000000e+00> : vector<1xf32>
    %208 = vector.multi_reduction <add>, %207, %cst_142 [1] : vector<1x128xf32> to vector<1xf32>
    %209 = vector.shape_cast %208 : vector<1xf32> to vector<1x1xf32>
    %210 = vector.broadcast %209 : vector<1x1xf32> to vector<1x128xf32>
    %211 = arith.divf %207, %210 : vector<1x128xf32>
    %212 = vector.shape_cast %211 : vector<1x128xf32> to vector<1x1x128xf32>
    %c0_143 = arith.constant 0 : index
    %c0_144 = arith.constant 0 : index
    %c0_145 = arith.constant 0 : index
    %213 = vector.load %arg10[%c0_143, %c0_144, %c0_145] : memref<1x1x128xf32, #tpu.memory_space<vmem>>, vector<1x1x128xf32>
    tpu.vector_store %arg10[%c0_143, %c0_144, %c0_145], %212 {strides = array<i32>} : memref<1x1x128xf32, #tpu.memory_space<vmem>>, vector<1x1x128xf32>,
    return
  }
  func.func @transform_0(%arg0: i32) -> (i32, i32, i32, i32) {
    %c0_i32 = arith.constant 0 : i32
    %c0_i32_0 = arith.constant 0 : i32
    %c0_i32_1 = arith.constant 0 : i32
    %c0_i32_2 = arith.constant 0 : i32
    return %arg0, %c0_i32, %c0_i32_0, %c0_i32_1 : i32, i32, i32, i32
  }
  func.func @transform_1(%arg0: i32) -> (i32, i32, i32) {
    %c0_i32 = arith.constant 0 : i32
    %c0_i32_0 = arith.constant 0 : i32
    %c0_i32_1 = arith.constant 0 : i32
    %c0_i32_2 = arith.constant 0 : i32
    return %c0_i32, %c0_i32_0, %c0_i32_1 : i32, i32, i32
  }
  func.func @transform_2(%arg0: i32) -> (i32, i32) {
    %c0_i32 = arith.constant 0 : i32
    %c0_i32_0 = arith.constant 0 : i32
    %c0_i32_1 = arith.constant 0 : i32
    return %c0_i32, %c0_i32_0 : i32, i32
  }
  func.func @transform_3(%arg0: i32) -> (i32, i32, i32) {
    %c0_i32 = arith.constant 0 : i32
    %c0_i32_0 = arith.constant 0 : i32
    %c0_i32_1 = arith.constant 0 : i32
    %c0_i32_2 = arith.constant 0 : i32
    return %c0_i32, %c0_i32_0, %c0_i32_1 : i32, i32, i32
  }
  func.func @transform_4(%arg0: i32) -> (i32, i32) {
    %c0_i32 = arith.constant 0 : i32
    %c0_i32_0 = arith.constant 0 : i32
    %c0_i32_1 = arith.constant 0 : i32
    return %c0_i32, %c0_i32_0 : i32, i32
  }
  func.func @transform_5(%arg0: i32) -> (i32, i32, i32) {
    %c0_i32 = arith.constant 0 : i32
    %c0_i32_0 = arith.constant 0 : i32
    %c0_i32_1 = arith.constant 0 : i32
    %c0_i32_2 = arith.constant 0 : i32
    return %c0_i32, %c0_i32_0, %c0_i32_1 : i32, i32, i32
  }
  func.func @transform_6(%arg0: i32) -> (i32, i32) {
    %c0_i32 = arith.constant 0 : i32
    %c0_i32_0 = arith.constant 0 : i32
    %c0_i32_1 = arith.constant 0 : i32
    return %c0_i32, %c0_i32_0 : i32, i32
  }
  func.func @transform_7(%arg0: i32) -> (i32, i32) {
    %c0_i32 = arith.constant 0 : i32
    %c0_i32_0 = arith.constant 0 : i32
    %c0_i32_1 = arith.constant 0 : i32
    return %c0_i32, %c0_i32_0 : i32, i32
  }
  func.func @transform_8(%arg0: i32) -> (i32, i32) {
    %c0_i32 = arith.constant 0 : i32
    %c0_i32_0 = arith.constant 0 : i32
    %c0_i32_1 = arith.constant 0 : i32
    return %c0_i32, %c0_i32_0 : i32, i32
  }
  func.func @transform_9(%arg0: i32) -> (i32, i32, i32) {
    %c0_i32 = arith.constant 0 : i32
    %c0_i32_0 = arith.constant 0 : i32
    %c0_i32_1 = arith.constant 0 : i32
    return %arg0, %c0_i32, %c0_i32_0 : i32, i32, i32
  }
}

</mosaic_0001>

<bundles_post_ra>
// kernel: tpu_custom_call.1
= control target key start
LH: loop header
LB: loop body
LE: loop exit
PB: predicated region body
PF: predicated region fallthrough
CT: control target
= control target key end

     0   :  { %s15194_s0 = inlined_call_operand.vmem [shape: f32[2,10,10,8], index: 0, kind: input, shape index: {}]   ;;  %s15195_s1 = inlined_call_operand.hbm [shape: bf16[9,8,128], index: 1, kind: input, shape index: {}]   ;;  %s15196_s2 = inlined_call_operand.hbm [shape: f32[1,128], index: 2, kind: input, shape index: {}]   ;;  %s15197_s3 = inlined_call_operand.hbm [shape: bf16[9,128,256], index: 3, kind: input, shape index: {}]   ;;  %s15198_s4 = inlined_call_operand.hbm [shape: f32[1,256], index: 4, kind: input, shape index: {}]   ;;  %s15199_s5 = inlined_call_operand.hbm [shape: bf16[9,256,512], index: 5, kind: input, shape index: {}]   ;;  %s15200_s6 = inlined_call_operand.hbm [shape: f32[1,512], index: 6, kind: input, shape index: {}]   ;;  %s15201_s7 = inlined_call_operand.hbm [shape: f32[512,128], index: 7, kind: input, shape index: {}]   ;;  %s15202_s8 = inlined_call_operand.hbm [shape: f32[1,128], index: 8, kind: input, shape index: {}]   ;;  %s15203_s9 = inlined_call_operand.hbm [shape: f32[2,1,128], index: 9, kind: output, shape index: {}]  }
   0x1   :  { %15258 = sst [smem:[#allocation69_spill]] %s15195_s1 }
   0x2   :  { %15259 = sst [smem:[#allocation70_spill]] %s15196_s2 }
   0x3   :  { %14 = vsyncpa [#allocation5], 0 }
   0x4   :  { %15 = vsyncpa [#allocation8], 0 }
   0x5   :  { %16 = vsyncpa [#allocation11], 0 }
   0x6   :  { %17 = vsyncpa [#allocation14], 0 }
   0x7   :  { %18 = vsyncpa [#allocation17], 0 }
   0x8   :  { %19 = vsyncpa [#allocation6], 0 }
   0x9   :  { %21 = vsyncpa [#allocation6 + $0x1], 0  ;;  %s12633_s30 = smov 0   ;;  %s12635_s10 = smov 0  }
   0xa   :  { %s12637_s11 = smov 0   ;;  %s12639_s12 = smov 0  }
   0xb LB: > { %s12654_s13 = sadd.s32 4294967295, %s12565_s12   ;;  %s9830_s14 = sadd.s32 4294967294, %s12565_s12   ;;  %s12565_s12 = sphi %s12639_s12, %s15493_s12   ;;  %s12561_s11 = sphi %s12637_s11, %s15492_s11   ;;  %s12557_s10 = sphi %s12635_s10, %s15491_s10   ;;  %s12553_s30 = sphi %s12633_s30, %s15490_s30  }
   0xc   : > { %s12658_s15 = sadd.s32 1, %s12565_s12   ;;  %s228_s16 = sadd.s32 1, %s12561_s11 }
   0xd   : > { %s225_s17 = ssub.s32 %s12565_s12, %s12658_s15  ;;  %p238_p0 = scmp.ne.s32.totalorder %s12561_s11, %s12557_s10 }
   0xe   : > { %p226_p1 = scmp.eq.s32.totalorder %s225_s17, 0  ;;  %p239_p2 = scmp.eq.s32.totalorder %s12654_s13, 1 }
   0xf   : > { %p244_p3 = scmp.ne.s32.totalorder %s12557_s10, %s12553_s30  ;;  %p245_p4 = scmp.eq.s32.totalorder %s9830_s14, 1 }
  0x10   : > { %s12669_s18 = scalar_select %p226_p1, %s12561_s11, %s228_s16  }
  0x11   : > { %p12671_p5 = por %p239_p2, %p238_p0  ;;  %p12675_p6 = por %p245_p4, %p244_p3 }
  0x12   : > { %p9831_p7 = scmp.ge.s32.totalorder %s12565_s12, 1  ;;  %p252_p8 = scmp.lt.s32.totalorder %s12565_s12, 3 }
  0x13   : > { %s15260_s19 = scalar_select %p12671_p5, 1, 0 }
  0x14   : > { %s15261_s20 = scalar_select %p12675_p6, 1, 0 }
  0x15   : > { %p15204_p9 = scmp.eq.s32.totalorder %s12654_s13, 0  ;;  %p12682_p10 = pnand %p9831_p7, %p252_p8 }
  0x16   : > { %s12567_s22 = smov [#allocation7]   ;;  %s12568_s24 = smov [#allocation10]  }
  0x17   : > { %s15262_s21 = scalar_select %p12682_p10, 1, 0 }
  0x18   : > { %s278_s23 = sshll.u32 %s12567_s22, 4  ;;  %p11082_p11 = pneg %p12682_p10  ;;  %s279_s23 = int_to_ptr.vmem [resolvable:$true] %s278_s23 }
  0x19   : > { %s302_s25 = sshll.u32 %s12568_s24, 4  ;;  %s12569_s27 = smov [#allocation13]   ;;  %s303_s25 = int_to_ptr.vmem [resolvable:$true] %s302_s25 }
  0x1a   : > { %p12690_p12 = pnand %p15204_p9, %p11082_p11  ;;  %s326_s28 = sshll.u32 %s12569_s27, 4  ;;  %s12694_s28 = int_to_ptr.vmem [resolvable:$true] %s326_s28 }
  0x1b   : > { %s12288_s14 = scalar_lea.vmem %s279_s23, 16  ;;  %s12295_s16 = scalar_lea.vmem %s279_s23, 32 }
  0x1c   : > { %p12698_p13 = pneg %p12690_p12  ;;  %p12289_p0 = scmp.ne.s32.totalorder %s279_s23, %s12288_s14 }
  0x1d   : > { %p12296_p3 = scmp.lt.s32.totalorder %s279_s23, %s279_s23  ;;  %p12297_p4 = scmp.lt.s32.totalorder %s12295_s16, %s12288_s14 }
  0x1e   : > { %p12291_p1 = pnand %p12289_p0, %p12698_p13 }
  0x1f   : > { %p12298_p7 = por %p12297_p4, %p12296_p3 }
  0x20   : > { %p12292_p2 = pneg %p12291_p1 }
  0x22   : > { %p12299_p8 = pnand %p12298_p7, %p12292_p2 }
  0x24   : > { %12302 = shalt.err (!%p12299_p8)
}
  0x25   : > { %s15265_s2 = sld [smem:[#allocation70_spill]]  ;;  %s12314_s24 = scalar_lea.vmem %s303_s25, 32 }
  0x26   : > { %p12315_p11 = scmp.ne.s32.totalorder %s303_s25, %s12314_s24  ;;  %p12322_p0 = scmp.lt.s32.totalorder %s303_s25, %s303_s25 }
  0x27   : > { %p12323_p1 = scmp.lt.s32.totalorder %s12314_s24, %s12314_s24 }
  0x28   : > { %p12317_p9 = pnand %p12315_p11, %p12698_p13 }
  0x29   : > { %p12324_p5 = por %p12323_p1, %p12322_p0 }
  0x2a   : > { %p12318_p6 = pneg %p12317_p9 }
  0x2b   : > { %11088 = dma.hbm_to_vmem [thread:$0]  (!%p12690_p12), %s15265_s2, 16, %s279_s23, [#allocation8]  }
  0x2c   : > { %p12325_p10 = pnand %p12324_p5, %p12318_p6 }
  0x2e   : > { %12328 = shalt.err (!%p12325_p10)
}
  0x2f   : > { %11094 = dma.hbm_to_vmem [thread:$0]  (!%p12690_p12), %s15198_s4, 32, %s303_s25, [#allocation11]  }
  0x30   : > { %s12340_s23 = scalar_lea.vmem %s12694_s28, 64  ;;  %p12348_p4 = scmp.lt.s32.totalorder %s12694_s28, %s12694_s28 }
  0x31   : > { %p12341_p2 = scmp.ne.s32.totalorder %s12694_s28, %s12340_s23  ;;  %p12349_p7 = scmp.lt.s32.totalorder %s12340_s23, %s12340_s23 }
  0x33   : > { %p12343_p3 = pnand %p12341_p2, %p12698_p13  ;;  %p12350_p5 = por %p12349_p7, %p12348_p4 }
  0x35   : > { %p12344_p9 = pneg %p12343_p3 }
  0x37   : > { %p12351_p6 = pnand %p12350_p5, %p12344_p9 }
  0x39   : > { %12354 = shalt.err (!%p12351_p6)
}
  0x3a   : > { %11100 = dma.hbm_to_vmem [thread:$0]  (!%p12690_p12), %s15200_s6, 64, %s12694_s28, [#allocation14]  }
  0x3b   : > { %s12570_s25 = smov [#allocation4]  }
  0x3c   : > { %s264_s22 = sshll.u32 %s12570_s25, 4  ;;  %s265_s22 = int_to_ptr.vmem [resolvable:$true] %s264_s22 }
  0x3d   : > { %s12366_s24 = scalar_lea.vmem %s265_s22, 576  ;;  %p12374_p0 = scmp.lt.s32.totalorder %s265_s22, %s265_s22 }
  0x3e   : > { %p12367_p10 = scmp.ne.s32.totalorder %s265_s22, %s12366_s24  ;;  %p12375_p1 = scmp.lt.s32.totalorder %s12366_s24, %s12366_s24 }
  0x40   : > { %p12369_p8 = pnand %p12367_p10, %p12698_p13  ;;  %p12376_p2 = por %p12375_p1, %p12374_p0 }
  0x42   : > { %p12370_p11 = pneg %p12369_p8 }
  0x44   : > { %p12377_p3 = pnand %p12376_p2, %p12370_p11 }
  0x46   : > { %12380 = shalt.err (!%p12377_p3)
}
  0x47   : > { %s12571_s27 = smov 64   ;;  %s12572_s14 = smov 4  }
  0x48   : > { %s15266_s1 = sld [smem:[#allocation69_spill]]  ;;  %s12573_s16 = smov [#allocation9]  }
  0x49   : > { %s288_s17 = sshll.u32 %s12573_s16, 4  ;;  %s289_s17 = int_to_ptr.vmem [resolvable:$true] %s288_s17 }
  0x4a   : > { %s12392_s25 = scalar_lea.vmem %s289_s17, 18432  ;;  %p12400_p5 = scmp.lt.s32.totalorder %s289_s17, %s289_s17 }
  0x4b   : > { %p12393_p9 = scmp.ne.s32.totalorder %s289_s17, %s12392_s25  ;;  %p12401_p6 = scmp.lt.s32.totalorder %s12392_s25, %s12392_s25 }
  0x4d   : > { %p12395_p4 = pnand %p12393_p9, %p12698_p13  ;;  %p12402_p10 = por %p12401_p6, %p12400_p5 }
  0x4e   : > { %11085 = dma.hbm_to_vmem [thread:$0]  (!%p12690_p12), %s15266_s1, 576, %s265_s22, [#allocation5], %s12571_s27, %s12571_s27, %s12572_s14  }
  0x4f   : > { %p12396_p7 = pneg %p12395_p4 }
  0x51   : > { %p12403_p8 = pnand %p12402_p10, %p12396_p7 }
  0x53   : > { %12406 = shalt.err (!%p12403_p8)
}
  0x54   : > { %s15207_s24 = smov 128   ;;  %s15208_s2 = smov 8  }
  0x55   : > { %11091 = dma.hbm_to_vmem [thread:$0]  (!%p12690_p12), %s15197_s3, 18432, %s289_s17, [#allocation8], %s15207_s24, %s15207_s24, %s15208_s2  }
  0x56   : > { %s12576_s14 = smov [#allocation12]  }
  0x57   : > { %s312_s23 = sshll.u32 %s12576_s14, 4  ;;  %s313_s23 = int_to_ptr.vmem [resolvable:$true] %s312_s23 }
  0x58   : > { %s12418_s28 = scalar_lea.vmem %s313_s23, 73728  ;;  %p12426_p2 = scmp.lt.s32.totalorder %s313_s23, %s313_s23 }
  0x59   : > { %p12419_p11 = scmp.ne.s32.totalorder %s313_s23, %s12418_s28  ;;  %p12427_p3 = scmp.lt.s32.totalorder %s12418_s28, %s12418_s28 }
  0x5b   : > { %p12421_p0 = pnand %p12419_p11, %p12698_p13  ;;  %p12428_p9 = por %p12427_p3, %p12426_p2 }
  0x5d   : > { %p12422_p1 = pneg %p12421_p0 }
  0x5f   : > { %p12429_p4 = pnand %p12428_p9, %p12422_p1 }
  0x61   : > { %12432 = shalt.err (!%p12429_p4)
}
  0x62   : > { %s12577_s16 = smov 256   ;;  %s12578_s25 = smov 16  }
  0x63   : > { %11097 = dma.hbm_to_vmem [thread:$0]  (!%p12690_p12), %s15199_s5, 73728, %s313_s23, [#allocation11], %s12577_s16, %s12577_s16, %s12578_s25  }
  0x64   : > { %s12579_s27 = smov [#allocation15]   ;;  %s12580_s24 = smov [#allocation16]  }
  0x65   : > { %s336_s14 = sshll.u32 %s12579_s27, 4  ;;  %s350_s2 = sshll.u32 %s12580_s24, 4  ;;  %s337_s14 = int_to_ptr.vmem [resolvable:$true] %s336_s14  ;;  %s351_s2 = int_to_ptr.vmem [resolvable:$true] %s350_s2 }
  0x66   : > { %s12444_s1 = scalar_lea.vmem %s337_s14, 8192  ;;  %p12452_p10 = scmp.lt.s32.totalorder %s337_s14, %s337_s14 }
  0x67   : > { %p12445_p7 = scmp.ne.s32.totalorder %s337_s14, %s12444_s1  ;;  %p12453_p8 = scmp.lt.s32.totalorder %s12444_s1, %s12444_s1 }
  0x69   : > { %p12447_p5 = pnand %p12445_p7, %p12698_p13  ;;  %p12454_p11 = por %p12453_p8, %p12452_p10 }
  0x6b   : > { %p12448_p6 = pneg %p12447_p5 }
  0x6d   : > { %p12455_p0 = pnand %p12454_p11, %p12448_p6 }
  0x6f   : > { %12458 = shalt.err (!%p12455_p0)
}
  0x70   : > { %s15267_s28 = smov 8   ;;  %s15268_s23 = smov 128  }
  0x71   : > { %11103 = dma.hbm_to_vmem [thread:$0]  (!%p12690_p12), %s15201_s7, 8192, %s337_s14, [#allocation14], %s15268_s23, %s15268_s23, %s15267_s28  }
  0x72   : > { %s12470_s24 = scalar_lea.vmem %s351_s2, 16  ;;  %s12477_s22 = scalar_lea.vmem %s351_s2, 32 }
  0x73   : > { %p12471_p1 = scmp.ne.s32.totalorder %s351_s2, %s12470_s24  ;;  %p12478_p9 = scmp.lt.s32.totalorder %s351_s2, %s351_s2 }
  0x74   : > { %p12479_p4 = scmp.lt.s32.totalorder %s12477_s22, %s12470_s24 }
  0x75   : > { %p12473_p2 = pnand %p12471_p1, %p12698_p13 }
  0x76   : > { %p12480_p7 = por %p12479_p4, %p12478_p9 }
  0x77   : > { %p12474_p3 = pneg %p12473_p2 }
  0x79   : > { %p12481_p5 = pnand %p12480_p7, %p12474_p3 }
  0x7b   : > { %12484 = shalt.err (!%p12481_p5)
}
  0x7c   : > { %11106 = dma.hbm_to_vmem [thread:$0]  (!%p12690_p12), %s15202_s8, 16, %s351_s2, [#allocation17]  }
  0x7d   : > { %p15269_p6 = scmp.ne.s32.totalorder %s15262_s21, 0 }
  0x7f   : > { %371 = sbr.rel (%p15269_p6) target bundleno = 2134 (0x856), region = 56 }
  0x84   : > { %p15270_p10 = scmp.eq.s32.totalorder %s12654_s13, 0 }
  0x86   : > { %12528 = dma.done.wait (%p15270_p10), [#allocation5], 576   ;;  %p15271_p13 = pmov %p15270_p10 }
  0x87   : > { %p15272_p8 = pmov %p15270_p10 }
  0x88   : > { %12530 = vsyncadd (%p15271_p13), [#allocation5], 4294966720 }
  0x89   : > { %12532 = dma.done.wait (%p15272_p8), [#allocation8], 18448   ;;  %p15273_p11 = pmov %p15272_p8 }
  0x8a   : > { %p15274_p0 = pmov %p15272_p8 }
  0x8b   : > { %12534 = vsyncadd (%p15273_p11), [#allocation8], 4294948848 }
  0x8c   : > { %12536 = dma.done.wait (%p15274_p0), [#allocation11], 73760   ;;  %p15275_p12 = pmov %p15274_p0 }
  0x8d   : > { %p15276_p1 = pmov %p15274_p0 }
  0x8e   : > { %12538 = vsyncadd (%p15275_p12), [#allocation11], 4294893536 }
  0x8f   : > { %12540 = dma.done.wait (%p15276_p1), [#allocation14], 8256   ;;  %p15277_p2 = pmov %p15274_p0 }
  0x90   : > { %p15278_p3 = pmov %p15274_p0 }
  0x91   : > { %12542 = vsyncadd (%p15277_p2), [#allocation14], 4294959040 }
  0x92   : > { %12544 = dma.done.wait (%p15278_p3), [#allocation17], 16   ;;  %p15279_p9 = pmov %p15274_p0 }
  0x93   : > { %p434_p4 = scmp.lt.s32.totalorder %s12654_s13, 1  ;;  %vm653_vm0 = vcmask 1043456   ;;  %vm511_vm1 = vsmask.f32 3328  ;;  %vm512_vm2 = vsmask.f32 7440 }
  0x94   : > { %12546 = vsyncadd (%p15279_p9), [#allocation17], 4294967280  ;;  %v627_v0 = vld [vmem:[#allocation4 + $0x4] sm:$0xf]  ;;  %v470_v20 = vld [vmem:[#allocation4] sm:$0xf] }
  0x95   : > { %s435_s2 = scalar_select %p434_p4, %s12654_s13, 1  ;;  %11037 = vmatprep.subr.msk.bf16.mxu0 %vm653_vm0, %v627_v0  ;;  %v655_v3 = vsel %vm653_vm0, %v627_v0, 0  ;;  %11039 = vmatprep.subr.msk.bf16.mxu1 %vm653_vm0, %v470_v20  ;;  %vm640_vm3 = vcmask 64512   ;;  %vm12864_vm4 = vmor %vm511_vm1, %vm512_vm2  ;;  %v15280_v41 = vmov 0  ;;  %vm806_vm5 = vcmask 1042432  }
  0x96   : > { %10946 = vmatpush3.bf16.msra.mxu0 %v655_v3  ;;  %v15281_v41 = vsel %vm12864_vm4, 4294967295, %v15280_v41  ;;  %vm807_vm6 = vcmask 1046532   ;;  %vm1678_vm8 = vsmask.f32 7938  ;;  %vm1683_vm10 = vcmask 1040384   ;;  %s432_s14 = sand.u32 1, %s12557_s10  }
  0x97   : > { %s11047_s21 = smul.u32 160, %s435_s2  ;;  %11038 = vmatprep.subr.msk.bf16.mxu0 %vm653_vm0, %v470_v20  ;;  %15282 = vst [vmem:[#allocation25_spill] sm:$0xff] %v15281_v41  ;;  %vm12958_vm7 = vmor %vm806_vm5, %vm807_vm6  ;;  %vm1684_vm11 = vsmask.f32 256  ;;  %vm3877_vm13 = vcmask 1047556   ;;  %vm3884_vm15 = vcmask 1044484  }
  0x98   : > { %vm13180_vm9 = vmand %vm653_vm0, %vm1678_vm8  ;;  %vm3878_vm14 = vsmask.f32 7954  ;;  %s10782_s28 = sshll.u32 %s12654_s13, 4  ;;  %s433_s23 = scalar_lea.vmem [#allocation18], %s432_s14 }
  0x99   : > { %s12796_s27 = scalar_lea.vmem %s15194_s0, %s11047_s21  ;;  %vm13190_vm12 = vmand %vm1683_vm10, %vm1684_vm11  ;;  %s9696_s16 = sshll.u32 %s433_s23, 4  ;;  %s9697_s16 = int_to_ptr.vmem [resolvable:$true] %s9696_s16 }
  0x9a   : > { %v12799_v1 = vld [vmem:[%s12796_s27] sm:$0xff]  ;;  %v441_v2 = vld [vmem:[%s12796_s27 + $0x8] sm:$0x3]  ;;  %v12805_v4 = vld [vmem:[%s12796_s27 + $0x10] sm:$0xff]  ;;  %s9694_s22 = scalar_lea.hbm %s15203_s9, %s10782_s28  ;;  %s9684_s1 = scalar_lea.sflag [#allocation6], %s432_s14 }
  0x9b   : > { %v443_v5 = vld [vmem:[%s12796_s27 + $0x18] sm:$0x3]  ;;  %v12809_v6 = vld [vmem:[%s12796_s27 + $0x20] sm:$0xff]  ;;  %v12813_v7 = vpack.c.bf16 %v12799_v1, %v12799_v1  ;;  %v12815_v8 = vpack.c.bf16 %v441_v2, %v441_v2  ;;  %v445_v9 = vld [vmem:[%s12796_s27 + $0x28] sm:$0x3]  ;;  %v12824_v12 = vpack.c.bf16 %v12805_v4, %v12805_v4  ;;  %s12485_s17 = scalar_lea.vmem %s9697_s16, 16 }
  0x9c   : > { %v12819_v10 = vld [vmem:[%s12796_s27 + $0x30] sm:$0xff]  ;;  %v447_v11 = vld [vmem:[%s12796_s27 + $0x38] sm:$0x3]  ;;  %v12826_v13 = vpack.c.bf16 %v443_v5, %v443_v5  ;;  %v12830_v14 = vpack.c.bf16 %v12809_v6, %v12809_v6  ;;  %v12833_v15 = vld [vmem:[%s12796_s27 + $0x40] sm:$0xff]  ;;  %v12836_v17 = vpack.c.bf16 %v445_v9, %v445_v9  ;;  %p12486_p7 = scmp.ne.s32.totalorder %s9697_s16, %s12485_s17  ;;  %p15488_p5 = scmp.ne.s32.totalorder %s15260_s19, 0 }
  0x9d   : > { %v449_v16 = vld [vmem:[%s12796_s27 + $0x48] sm:$0x3]  ;;  %v12840_v18 = vpack.c.bf16 %v12819_v10, %v12819_v10  ;;  %v515_v19 = vshrl.u32 %v12813_v7, 16  ;;  %v12843_v21 = vpack.c.bf16 %v447_v11, %v447_v11  ;;  %v12847_v22 = vpack.c.bf16 %v12833_v15, %v12833_v15  ;;  %v12880_v62 = vld [vmem:[%s12796_s27 + $0x50] sm:$0xff]  ;;  %v451_v63 = vld [vmem:[%s12796_s27 + $0x58] sm:$0x3] }
  0x9e   : > { %v518_v23 = vshll.u32 %v12813_v7, 16  ;;  %v524_v24 = vshll.u32 %v12815_v8, 16  ;;  %v529_v26 = vshrl.u32 %v12824_v12, 16  ;;  %v532_v27 = vshll.u32 %v12824_v12, 16  ;;  %v12884_v0 = vld [vmem:[%s12796_s27 + $0x60] sm:$0xff]  ;;  %v12889_v5 = vld [vmem:[%s12796_s27 + $0x70] sm:$0xff]  ;;  %vm13859_vm1 = vmand %vm3877_vm13, %vm3878_vm14  ;;  %p12487_p6 = pnand %p12486_p7, %p15488_p5 }
  0x9f   : > { %v517_v25 = vrot.slane %v515_v19, 4  ;;  %v538_v28 = vshll.u32 %v12826_v13, 16  ;;  %v12856_v29 = vpack.c.bf16 %v449_v16, %v449_v16  ;;  %v543_v31 = vshrl.u32 %v12830_v14, 16  ;;  %v453_v3 = vld [vmem:[%s12796_s27 + $0x68] sm:$0x3]  ;;  %s12582_s2 = smov [#allocation18]  }
  0xa0   : > { %v520_v30 = vrot.slane %v518_v23, 5  ;;  %v546_v32 = vshll.u32 %v12830_v14, 16  ;;  %v526_v33 = vrot.slane %v524_v24, 5  ;;  %v531_v34 = vrot.slane %v529_v26, 4  ;;  %v455_v9 = vld [vmem:[%s12796_s27 + $0x78] sm:$0x3]  ;;  %p12488_p10 = pneg %p12487_p6 }
  0xa1   : > { %v534_v35 = vrot.slane %v532_v27, 5  ;;  %v552_v36 = vshll.u32 %v12836_v17, 16  ;;  %v545_v38 = vrot.slane %v543_v31, 4  ;;  %v557_v40 = vshrl.u32 %v12840_v18, 16  ;;  %v944_v11 = vld [vmem:[#allocation4 + $0xc] sm:$0xf] }
  0xa2   : > { %v521_v37 = vor.u32 %v520_v30, %v517_v25  ;;  %v548_v39 = vrot.slane %v546_v32, 5  ;;  %v540_v43 = vrot.slane %v538_v28, 5  ;;  %v560_v44 = vshll.u32 %v12840_v18, 16  ;;  %v12916_v31 = vld [vmem:[#allocation4 + $0x8] sm:$0xf]  ;;  %s12489_s21 = sshll.u32 %s12582_s2, 4  ;;  %s12490_s21 = int_to_ptr.vmem [resolvable:$false] %s12489_s21 }
  0xa3   : > { %v535_v42 = vor.u32 %v534_v35, %v531_v34  ;;  %v566_v45 = vshll.u32 %v12843_v21, 16  ;;  %v559_v48 = vrot.slane %v557_v40, 4  ;;  %v571_v49 = vshrl.u32 %v12847_v22, 16  ;;  %s12491_s13 = scalar_lea.vmem %s12490_s21, 32  ;;  %p12492_p13 = scmp.lt.s32.totalorder %s9697_s16, %s12490_s21 }
  0xa4   : > { %v522_v46 = vrot.slane %v521_v37, 4  ;;  %v549_v47 = vor.u32 %v548_v39, %v545_v38  ;;  %v554_v51 = vrot.slane %v552_v36, 5  ;;  %v562_v52 = vrot.slane %v560_v44, 5  ;;  %p12493_p8 = scmp.lt.s32.totalorder %s12491_s13, %s12485_s17 }
  0xa5   : > { %v536_v50 = vrot.slane %v535_v42, 4  ;;  %v574_v53 = vshll.u32 %v12847_v22, 16  ;;  %v568_v56 = vrot.slane %v566_v45, 5  ;;  %v573_v57 = vrot.slane %v571_v49, 4 }
  0xa6   : > { %v527_v54 = vsel %vm12864_vm4, %v522_v46, %v526_v33  ;;  %v550_v55 = vrot.slane %v549_v47, 4  ;;  %v563_v59 = vor.u32 %v562_v52, %v559_v48  ;;  %v580_v61 = vshll.u32 %v12856_v29, 16  ;;  %p12494_p11 = por %p12493_p8, %p12492_p13 }
  0xa7   : > { %v12876_v58 = vsel %vm12864_vm4, %v536_v50, %v540_v43  ;;  %v576_v60 = vrot.slane %v574_v53, 5  ;;  %v739_v24 = vsel %vm653_vm0, %v470_v20, 0  ;;  %v12900_v25 = vpack.c.bf16 %v12880_v62, %v12880_v62 }
  0xa8   : > { %v9867_v2 = vcombine.low %v527_v54, %v12876_v58  ;;  %v12894_v16 = vsel %vm12864_vm4, %v550_v55, %v554_v51  ;;  %v564_v19 = vrot.slane %v563_v59, 4  ;;  %v12902_v26 = vpack.c.bf16 %v451_v63, %v451_v63  ;;  %11036 = vmatpush3.bf16.msra.mxu1 %v739_v24  ;;  %v1156_v55 = vld [vmem:[#allocation4 + $0x14] sm:$0xf]  ;;  %p12495_p0 = pnand %p12494_p11, %p12488_p10 }
  0xa9   : > { %v577_v23 = vor.u32 %v576_v60, %v573_v57  ;;  %v582_v28 = vrot.slane %v580_v61, 5  ;;  %v12910_v30 = vpack.c.bf16 %v12880_v62, %v12833_v15  ;;  %v12914_v20 = vpack.c.bf16 %v12884_v0, %v12884_v0  ;;  %11041 = vmatprep.subr.msk.bf16.mxu1 %vm653_vm0, %v944_v11 }
  0xaa   : > { %10947 = vmatprep.mubr.msk.bf16.mxu0 %vm640_vm3, %v9867_v2  ;;  %v12906_v27 = vsel %vm12864_vm4, %v564_v19, %v568_v56  ;;  %v585_v33 = vshrl.u32 %v12900_v25, 16  ;;  %v588_v34 = vshll.u32 %v12900_v25, 16  ;;  %v594_v35 = vshll.u32 %v12902_v26, 16 }
  0xab   : > { %v12920_v32 = vcombine.low %v12894_v16, %v12906_v27  ;;  %v578_v36 = vrot.slane %v577_v23, 4  ;;  %10961 = vmatprep.mubr.msk.bf16.mxu1 %vm640_vm3, %v12910_v30  ;;  %v12928_v37 = vpack.c.bf16 %v453_v3, %v453_v3  ;;  %v12932_v38 = vpack.c.bf16 %v12889_v5, %v12889_v5 }
  0xac   : > { %v12934_v39 = vpack.c.bf16 %v455_v9, %v455_v9  ;;  %v587_v40 = vrot.slane %v585_v33, 4  ;;  %v590_v42 = vrot.slane %v588_v34, 5  ;;  %v596_v43 = vrot.slane %v594_v35, 5 }
  0xad   : > { %10948 = vmatmul.mubr.msk.bf16.vlgmr.msra.gmra.mxu0 %vm640_vm3, %v12920_v32  ;;  %v599_v44 = vshrl.u32 %v12914_v20, 16  ;;  %v602_v45 = vshll.u32 %v12914_v20, 16  ;;  %v608_v46 = vshll.u32 %v12928_v37, 16  ;;  %v613_v47 = vshrl.u32 %v12932_v38, 16 }
  0xae   : > { %10956 = vmatpush3.bf16.msra.mxu0 %v739_v24  ;;  %v591_v48 = vor.u32 %v590_v42, %v587_v40  ;;  %v616_v49 = vshll.u32 %v12932_v38, 16  ;;  %v622_v50 = vshll.u32 %v12934_v39, 16  ;;  %v12946_v51 = vpack.c.bf16 %v12889_v5, %v12884_v0 }
  0xaf   : > { %11040 = vmatprep.subr.msk.bf16.mxu0 %vm653_vm0, %v12916_v31  ;;  %v601_v52 = vrot.slane %v599_v44, 4  ;;  %v604_v53 = vrot.slane %v602_v45, 5  ;;  %v615_v54 = vrot.slane %v613_v47, 4  ;;  %v12952_v56 = vsel %vm12864_vm4, %v578_v36, %v582_v28 }
  0xb0   : > { %v592_v57 = vrot.slane %v591_v48, 4  ;;  %v618_v59 = vrot.slane %v616_v49, 5  ;;  %10962 = vmatmul.mubr.msk.bf16.vlgmr.msra.gmra.mxu1 %vm640_vm3, %v12946_v51  ;;  %v15283_v60 = vmov 0  ;;  %v610_v63 = vrot.slane %v608_v46, 5 }
  0xb1   : > { %v15284_v60 = vsel %vm12958_vm7, 4294967295, %v15283_v60  ;;  %v605_v61 = vor.u32 %v604_v53, %v601_v52  ;;  %v624_v9 = vrot.slane %v622_v50, 5  ;;  %v964_v19 = vsel %vm653_vm0, %v944_v11, 0  ;;  %v1057_v52 = vld [vmem:[#allocation4 + $0x10] sm:$0xf] }
  0xb2   : > { %15285 = vst [vmem:[#allocation26_spill] sm:$0xff] %v15284_v60  ;;  %v12964_v2 = vsel %vm12864_vm4, %v592_v57, %v596_v43  ;;  %v619_v3 = vor.u32 %v618_v59, %v615_v54  ;;  %10976 = vmatpush3.bf16.msra.mxu1 %v964_v19  ;;  %v10805_v11 = vpack.c.bf16 %v12809_v6, %v12805_v4  ;;  %v811_v35 = vrot.slane %v12815_v8, 5  ;;  %v12998_v8 = vld [vmem:[%s12796_s27 + $0x80] sm:$0xff]  ;;  %v457_v53 = vld [vmem:[%s12796_s27 + $0x88] sm:$0x3] }
  0xb3   : > { %v12969_v23 = vcombine.low %v12952_v56, %v12964_v2  ;;  %v606_v24 = vrot.slane %v605_v61, 4  ;;  %11043 = vmatprep.subr.msk.bf16.mxu1 %vm653_vm0, %v1156_v55  ;;  %v10806_v34 = vpack.c.bf16 %v12833_v15, %v12819_v10  ;;  %v10801_v40 = vpack.c.bf16 %v12805_v4, %v12799_v1  ;;  %v1352_v1 = vld [vmem:[#allocation4 + $0x1c] sm:$0xf] }
  0xb4   : > { %v620_v28 = vrot.slane %v619_v3, 4  ;;  %v815_v42 = vrot.slane %v12826_v13, 5  ;;  %v9883_v44 = vrot.slane %v12813_v7, 9  ;;  %v9884_v45 = vrot.slane %v12824_v12, 9  ;;  %10977 = vmatprep.mubr.msk.bf16.mxu1 %vm640_vm3, %v10805_v11 }
  0xb5   : > { %10951 = vmatprep.mubr.msk.bf16.mxu0 %vm640_vm3, %v12969_v23  ;;  %v12976_v33 = vsel %vm12864_vm4, %v606_v24, %v610_v63  ;;  %v819_v15 = vrot.slane %v12836_v17, 5  ;;  %v9885_v46 = vrot.slane %v12830_v14, 9  ;;  %v10807_v4 = vpack.c.bf16 %v12884_v0, %v12880_v62 }
  0xb6   : > { %v12985_v36 = vsel %vm12864_vm4, %v620_v28, %v624_v9  ;;  %v812_v7 = vsel %vm12958_vm7, %v9883_v44, %v811_v35  ;;  %v816_v12 = vsel %vm12958_vm7, %v9884_v45, %v815_v42  ;;  %v1175_v13 = vsel %vm653_vm0, %v1156_v55, 0  ;;  %v13036_v55 = vld [vmem:[%s12796_s27 + $0x90] sm:$0xff]  ;;  %v1251_v28 = vld [vmem:[#allocation4 + $0x18] sm:$0xf]  ;;  %v459_v35 = vld [vmem:[%s12796_s27 + $0x98] sm:$0x3] }
  0xb7   : > { %v12992_v43 = vcombine.low %v12976_v33, %v12985_v36  ;;  %v820_v14 = vsel %vm12958_vm7, %v9885_v46, %v819_v15  ;;  %v10808_v17 = vpack.c.bf16 %v12998_v8, %v12889_v5  ;;  %v823_v62 = vrot.slane %v12843_v21, 5 }
  0xb8   : > { %10978 = vmatmul.mubr.msk.bf16.vlgmr.msra.gmra.mxu1 %vm640_vm3, %v10806_v34  ;;  %v13021_v0 = vpack.c.bf16 %v12819_v10, %v12809_v6  ;;  %v9886_v47 = vrot.slane %v12840_v18, 9  ;;  %v9918_v48 = vcombine.low %v816_v12, %v820_v14  ;;  %v868_v49 = vsel %vm653_vm0, %v12916_v31, 0 }
  0xb9   : > { %10952 = vmatmul.mubr.msk.bf16.gmra.mxu0 %vm640_vm3, %v12992_v43  ;;  %10981 = vmatprep.mubr.msk.bf16.mxu1 %vm640_vm3, %v10807_v4  ;;  %v9891_v50 = vcombine.low %v812_v7, %v816_v12  ;;  %v9887_v5 = vrot.slane %v12847_v22, 9  ;;  %v827_v21 = vrot.slane %v12856_v29, 5  ;;  %v9888_v54 = vrot.slane %v12900_v25, 9 }
  0xba   : > { %10957 = vmatprep.mubr.msk.bf16.mxu0 %vm640_vm3, %v10801_v40  ;;  %10996 = vmatpush3.bf16.msra.mxu1 %v1175_v13  ;;  %v831_v6 = vrot.slane %v12902_v26, 5  ;;  %v9889_v10 = vrot.slane %v12914_v20, 9  ;;  %v835_v18 = vrot.slane %v12928_v37, 5  ;;  %v824_v22 = vsel %vm12958_vm7, %v9886_v47, %v823_v62 }
  0xbb   : > { %11045 = vmatprep.subr.msk.bf16.mxu1 %vm653_vm0, %v1352_v1  ;;  %v828_v29 = vsel %vm12958_vm7, %v9887_v5, %v827_v21  ;;  %v10809_v26 = vpack.c.bf16 %v12998_v8, %v12998_v8  ;;  %v10810_v20 = vpack.c.bf16 %v457_v53, %v457_v53  ;;  %v13051_v31 = vcombine.low %v820_v14, %v824_v22  ;;  %v1439_v53 = vld [vmem:[#allocation4 + $0x20] sm:$0xf] }
  0xbc   : > { %v832_v25 = vsel %vm12958_vm7, %v9888_v54, %v831_v6  ;;  %v9919_v37 = vcombine.low %v824_v22, %v828_v29  ;;  %v836_v57 = vsel %vm12958_vm7, %v9889_v10, %v835_v18  ;;  %v13057_v3 = vpack.c.bf16 %v13036_v55, %v13036_v55  ;;  %v11180_v54 = vld [vmem:[#allocation9 + $0x64] ss:$8 sps:$4 sm:$0xff]   ;;  %v11178_v6 = vld [vmem:[#allocation9 + $0x60] ss:$8 sps:$4 sm:$0xff]   ;;  %v11186_v10 = vld [vmem:[#allocation9 + $0x54] ss:$8 sps:$4 sm:$0xff]  }
  0xbd   : > { %v9920_v59 = vcombine.low %v832_v25, %v836_v57  ;;  %v9917_v61 = vrot.slane %v10809_v26, 9  ;;  %v1153_v63 = vrot.slane %v10810_v20, 5  ;;  %v13059_v9 = vcombine.low %v828_v29, %v832_v25  ;;  %v11183_v18 = vld [vmem:[#allocation9 + $0xf4] ss:$8 sps:$4 sm:$0xff]   ;;  %v11181_v22 = vld [vmem:[#allocation9 + $0xf0] ss:$8 sps:$4 sm:$0xff]  }
  0xbe   : > { %v9890_v19 = vrot.slane %v12932_v38, 9  ;;  %v839_v24 = vrot.slane %v12934_v39, 5  ;;  %v1076_v11 = vsel %vm653_vm0, %v1057_v52, 0  ;;  %v1359_v34 = vsel %vm653_vm0, %v1352_v1, 0  ;;  %v11192_v25 = vld [vmem:[#allocation9 + $0x44] ss:$8 sps:$4 sm:$0xff]  }
  0xbf   : > { %v1154_v40 = vsel %vm12958_vm7, %v9917_v61, %v1153_v63  ;;  %v1338_v38 = vshrl.u32 %v13057_v3, 16  ;;  %v1341_v39 = vshll.u32 %v13057_v3, 16  ;;  %v1043_v44 = vshrl.u32 %v10809_v26, 16  ;;  %v11196_v61 = vld [vmem:[#allocation9 + $0x30] ss:$8 sps:$4 sm:$0xff]  }
  0xc0   : > { %10982 = vmatmul.mubr.msk.bf16.gmra.mxu1 %vm640_vm3, %v10808_v17  ;;  %v840_v42 = vsel %vm12958_vm7, %v9890_v19, %v839_v24  ;;  %v1046_v45 = vshll.u32 %v10809_v26, 16  ;;  %v10813_v7 = vpack.c.bf16 %v459_v35, %v459_v35  ;;  %v9909_v12 = vcombine.low %v12876_v58, %v12894_v16  ;;  %v11189_v26 = vld [vmem:[#allocation9 + $0xe4] ss:$8 sps:$4 sm:$0xff]   ;;  %v11199_v19 = vld [vmem:[#allocation9 + $0xc0] ss:$8 sps:$4 sm:$0xff]  }
  0xc1   : > { %10958 = vmatmul.mubr.msk.bf16.vlgmr.msra.gmra.mxu0 %vm640_vm3, %v13021_v0  ;;  %10997 = vmatprep.mubr.msk.bf16.mxu1 %vm640_vm3, %v9918_v48  ;;  %v9921_v15 = vcombine.low %v840_v42, %v1154_v40  ;;  %v9894_v46 = vcombine.low %v836_v57, %v840_v42  ;;  %v1340_v1 = vrot.slane %v1338_v38, 4  ;;  %v1343_v4 = vrot.slane %v1341_v39, 5  ;;  %v11195_v57 = vld [vmem:[#allocation9 + $0xd4] ss:$8 sps:$4 sm:$0xff]   ;;  %v11204_v63 = vld [vmem:[#allocation9 + $0x24] ss:$8 sps:$4 sm:$0xff]  }
  0xc2   : > { %10966 = vmatpush3.bf16.msra.mxu0 %v868_v49  ;;  %10967 = vmatprep.mubr.msk.bf16.mxu0 %vm640_vm3, %v9891_v50  ;;  %v1045_v13 = vrot.slane %v1043_v44, 4  ;;  %v1048_v14 = vrot.slane %v1046_v45, 5  ;;  %v1347_v62 = vshll.u32 %v10813_v7, 16  ;;  %v1052_v48 = vshll.u32 %v10810_v20, 16  ;;  %v11190_v20 = vld [vmem:[#allocation9 + $0x40] ss:$8 sps:$4 sm:$0xff]  }
  0xc3   : > { %11042 = vmatprep.subr.msk.bf16.mxu0 %vm653_vm0, %v1057_v52  ;;  %v1344_v17 = vor.u32 %v1343_v4, %v1340_v1  ;;  %v9910_v49 = vcombine.low %v12906_v27, %v12952_v56  ;;  %v9911_v16 = vcombine.low %v12964_v2, %v12976_v33  ;;  %v1259_v21 = vsel %vm653_vm0, %v1251_v28, 0  ;;  %v11210_v24 = vld [vmem:[#allocation9 + $0x14] ss:$8 sps:$4 sm:$0xff]   ;;  %v11216_v35 = vld [vmem:[#allocation9 + $0x4] ss:$8 sps:$4 sm:$0xff]  }
  0xc4   : > { %v1049_v47 = vor.u32 %v1048_v14, %v1045_v13  ;;  %v1349_v58 = vrot.slane %v1347_v62, 5  ;;  %v1054_v5 = vrot.slane %v1052_v48, 5  ;;  %v10811_v33 = vpack.c.bf16 %v13036_v55, %v12998_v8  ;;  %v11177_v8 = vld [vmem:[#allocation9 + $0x74] ss:$8 sps:$4 sm:$0xff]   ;;  %v11184_v55 = vld [vmem:[#allocation9 + $0x50] ss:$8 sps:$4 sm:$0xff]  }
  0xc5   : > { %v1345_v50 = vrot.slane %v1344_v17, 4  ;;  %v12581_v29 = vmov 0   ;;  %v11214_v38 = vld [vmem:[#allocation9] ss:$8 sps:$4 sm:$0xff]   ;;  %v11223_v42 = vld [vmem:[#allocation9 + $0x1f4] ss:$8 sps:$4 sm:$0xff]  }
  0xc6   : > { %v1050_v52 = vrot.slane %v1049_v47, 4  ;;  %1550 = vst [vmem:[#allocation2 + $0x18] sm:$0xf] %v12581_v29  ;;  %1551 = vst [vmem:[#allocation2 + $0x1c] sm:$0x1] %v12581_v29 }
  0xc7   : > { %v1350_v27 = vsel %vm12864_vm4, %v1345_v50, %v1349_v58  ;;  %1544 = vst [vmem:[#allocation2] sm:$0xf] %v12581_v29  ;;  %1545 = vst [vmem:[#allocation2 + $0x4] sm:$0x1] %v12581_v29  ;;  %v11211_v39 = vld [vmem:[#allocation9 + $0xa0] ss:$8 sps:$4 sm:$0xff]  }
  0xc8   : > { %10998 = vmatmul.mubr.msk.bf16.vlgmr.msra.gmra.mxu1 %vm640_vm3, %v9919_v37  ;;  %1546 = vst [vmem:[#allocation2 + $0x8] sm:$0xf] %v12581_v29  ;;  %1547 = vst [vmem:[#allocation2 + $0xc] sm:$0x1] %v12581_v29  ;;  %v11198_v37 = vld [vmem:[#allocation9 + $0x34] ss:$8 sps:$4 sm:$0xff]  }
  0xc9   : > { %10968 = vmatmul.mubr.msk.bf16.vlgmr.msra.gmra.mxu0 %vm640_vm3, %v13051_v31  ;;  %11001 = vmatprep.mubr.msk.bf16.mxu1 %vm640_vm3, %v9920_v59  ;;  %1548 = vst [vmem:[#allocation2 + $0x10] sm:$0xf] %v12581_v29  ;;  %1549 = vst [vmem:[#allocation2 + $0x14] sm:$0x1] %v12581_v29  ;;  %v11193_v59 = vld [vmem:[#allocation9 + $0xd0] ss:$8 sps:$4 sm:$0xff]  }
  0xca   : > { %10986 = vmatpush3.bf16.msra.mxu0 %v1076_v11  ;;  %10971 = vmatprep.mubr.msk.bf16.mxu0 %vm640_vm3, %v13059_v9  ;;  %1552 = vst [vmem:[#allocation2 + $0x20] sm:$0xf] %v12581_v29  ;;  %1553 = vst [vmem:[#allocation2 + $0x24] sm:$0x1] %v12581_v29  ;;  %v11208_v11 = vld [vmem:[#allocation9 + $0x10] ss:$8 sps:$4 sm:$0xff]  }
  0xcb   : > { %11044 = vmatprep.subr.msk.bf16.mxu0 %vm653_vm0, %v1251_v28  ;;  %11016 = vmatpush3.bf16.msra.mxu1 %v1359_v34  ;;  %1554 = vst [vmem:[#allocation2 + $0x28] sm:$0xf] %v12581_v29  ;;  %1555 = vst [vmem:[#allocation2 + $0x2c] sm:$0x1] %v12581_v29  ;;  %v11207_v28 = vld [vmem:[#allocation9 + $0xb4] ss:$8 sps:$4 sm:$0xff]  }
  0xcc   : > { %1556 = vst [vmem:[#allocation2 + $0x30] sm:$0xf] %v12581_v29  ;;  %1557 = vst [vmem:[#allocation2 + $0x34] sm:$0x1] %v12581_v29  ;;  %1992 = vmatprep.subr.bf16.mxu1 %v11183_v18  ;;  %v11205_v34 = vld [vmem:[#allocation9 + $0xb0] ss:$8 sps:$4 sm:$0xff]  }
  0xcd   : > { %1558 = vst [vmem:[#allocation2 + $0x38] sm:$0xf] %v12581_v29  ;;  %1559 = vst [vmem:[#allocation2 + $0x3c] sm:$0x1] %v12581_v29  ;;  %v11219_v44 = vld [vmem:[#allocation9 + $0x94] ss:$8 sps:$4 sm:$0xff]  }
  0xce   : > { %1560 = vst [vmem:[#allocation2 + $0x40] sm:$0xf] %v12581_v29  ;;  %1561 = vst [vmem:[#allocation2 + $0x44] sm:$0x1] %v12581_v29  ;;  %v11217_v45 = vld [vmem:[#allocation9 + $0x90] ss:$8 sps:$4 sm:$0xff]  }
  0xcf   : > { %1562 = vst [vmem:[#allocation2 + $0x48] sm:$0xf] %v12581_v29  ;;  %1563 = vst [vmem:[#allocation2 + $0x4c] sm:$0x1] %v12581_v29  ;;  %v11233_v1 = vld [vmem:[#allocation9 + $0x174] ss:$8 sps:$4 sm:$0xff]  }
  0xd0   : > { %11002 = vmatmul.mubr.msk.bf16.gmra.mxu1 %vm640_vm3, %v9921_v15  ;;  %3720 = vst [vmem:[#allocation3] sm:$0xff] %v12581_v29  ;;  %3721 = vst [vmem:[#allocation3 + $0x38] sm:$0x11] %v12581_v29  ;;  %v11224_v15 = vld [vmem:[#allocation9 + $0x80] ss:$8 sps:$4 sm:$0xff]  }
  0xd1   : > { %10972 = vmatmul.mubr.msk.bf16.gmra.mxu0 %vm640_vm3, %v9894_v46  ;;  %11017 = vmatprep.mubr.msk.bf16.mxu1 %vm640_vm3, %v12920_v32  ;;  %v1055_v32 = vsel %vm12864_vm4, %v1050_v52, %v1054_v5  ;;  %3723 = vst [vmem:[#allocation3 + $0x18] sm:$0x11] %v12581_v29  ;;  %3725 = vst [vmem:[#allocation3 + $0x68] sm:$0x11] %v12581_v29 }
  0xd2   : > { %10987 = vmatprep.mubr.msk.bf16.mxu0 %vm640_vm3, %v9909_v12  ;;  %v9933_v56 = vcombine.low %v1055_v32, %v1350_v27  ;;  %v9912_v2 = vcombine.low %v12985_v36, %v1055_v32  ;;  %v9938_v36 = vrot.slane %v13057_v3, 9  ;;  %3727 = vst [vmem:[#allocation3 + $0x80] sm:$0x11] %v12581_v29  ;;  %3729 = vst [vmem:[#allocation3 + $0x88] sm:$0x11] %v12581_v29 }
  0xd3   : > { %3731 = vst [vmem:[#allocation3 + $0x40] sm:$0x11] %v12581_v29  ;;  %3733 = vst [vmem:[#allocation3 + $0x10] sm:$0x11] %v12581_v29  ;;  %v11201_v3 = vld [vmem:[#allocation9 + $0xc4] ss:$8 sps:$4 sm:$0xff]  }
  0xd4   : > { %3735 = vst [vmem:[#allocation3 + $0x60] sm:$0x11] %v12581_v29  ;;  %3737 = vst [vmem:[#allocation3 + $0x48] sm:$0x11] %v12581_v29 }
  0xd5   : > { %3739 = vst [vmem:[#allocation3 + $0x90] sm:$0x11] %v12581_v29 }
  0xd8   : > { %11018 = vmatmul.mubr.msk.bf16.vlgmr.msra.gmra.mxu1 %vm640_vm3, %v12969_v23  ;;  %v1446_v23 = vsel %vm653_vm0, %v1439_v53, 0 }
  0xd9   : > { %10988 = vmatmul.mubr.msk.bf16.vlgmr.msra.gmra.mxu0 %vm640_vm3, %v9910_v49  ;;  %11021 = vmatprep.mubr.msk.bf16.mxu1 %vm640_vm3, %v12992_v43  ;;  %v1436_v43 = vrot.slane %v10813_v7, 5 }
  0xda   : > { %11006 = vmatpush3.bf16.msra.mxu0 %v1259_v21  ;;  %10991 = vmatprep.mubr.msk.bf16.mxu0 %vm640_vm3, %v9911_v16 }
  0xdb   : > { %11046 = vmatprep.subr.msk.bf16.mxu0 %vm653_vm0, %v1439_v53  ;;  %1993 = vmatpush1.bf16.msra.mxu1 %v11181_v22  ;;  %vm3885_vm0 = vsmask.f32 4352 }
  0xdc   : > { %1994 = vmatprep.subr.bf16.mxu1 %v11189_v26  ;;  %vm13866_vm2 = vmand %vm3884_vm15, %vm3885_vm0 }
  0xdd   : > { %vm13887_vm5 = vmor %vm13866_vm2, %vm13190_vm12 }
  0xe0   : > { %11022 = vmatmul.mubr.msk.bf16.gmra.mxu1 %vm640_vm3, %v9933_v56 }
  0xe1   : > { %10992 = vmatmul.mubr.msk.bf16.gmra.mxu0 %vm640_vm3, %v9912_v2  ;;  %2024 = vmatprep.mubr.bf16.mxu1 %v12581_v29 }
  0xe2   : > { %11007 = vmatprep.mubr.msk.bf16.mxu0 %vm640_vm3, %v13021_v0  ;;  %v11175_v0 = vld [vmem:[#allocation9 + $0x70] ss:$8 sps:$4 sm:$0xff]  }
  0xe9   : > { %11008 = vmatmul.mubr.msk.bf16.vlgmr.msra.gmra.mxu0 %vm640_vm3, %v12910_v30  ;;  %v1437_v30 = vsel %vm12958_vm7, %v9938_v36, %v1436_v43 }
  0xea   : > { %11026 = vmatpush3.bf16.msra.mxu0 %v1446_v23  ;;  %11011 = vmatprep.mubr.msk.bf16.mxu0 %vm640_vm3, %v12946_v51  ;;  %v9939_v51 = vcombine.low %v1154_v40, %v1437_v30  ;;  %v11213_v40 = vld [vmem:[#allocation9 + $0xa4] ss:$8 sps:$4 sm:$0xff]  }
  0xeb   : > { %2169 = vmatprep.subr.bf16.mxu0 %v11177_v8 }
  0xf1   : > { %11012 = vmatmul.mubr.msk.bf16.gmra.mxu0 %vm640_vm3, %v10811_v33 }
  0xf2   : > { %11027 = vmatprep.mubr.msk.bf16.mxu0 %vm640_vm3, %v13051_v31  ;;  %v11187_v31 = vld [vmem:[#allocation9 + $0xe0] ss:$8 sps:$4 sm:$0xff]  }
  0xf3   : > { %1995 = vmatpush1.bf16.msra.mxu1 %v11187_v31 }
  0xf4   : > { %1996 = vmatprep.subr.bf16.mxu1 %v11195_v57 }
  0xf7   : > { %1997 = vmatpush1.bf16.msra.mxu1 %v11193_v59 }
  0xf8   : > { %1998 = vmatprep.subr.bf16.mxu1 %v11201_v3 }
  0xf9   : > { %11028 = vmatmul.mubr.msk.bf16.vlgmr.msra.gmra.mxu0 %vm640_vm3, %v13059_v9  ;;  %v11202_v9 = vld [vmem:[#allocation9 + $0x20] ss:$8 sps:$4 sm:$0xff]  }
  0xfa   : > { %11031 = vmatprep.mubr.msk.bf16.mxu0 %vm640_vm3, %v9894_v46  ;;  %2170 = vmatpush1.bf16.msra.mxu0 %v11175_v0  ;;  %v11226_v46 = vld [vmem:[#allocation9 + $0x84] ss:$8 sps:$4 sm:$0xff]  }
  0xfb   : > { %2171 = vmatprep.subr.bf16.mxu0 %v11180_v54  ;;  %1999 = vmatpush1.bf16.msra.mxu1 %v11199_v19 }
  0xfc   : > { %2000 = vmatprep.subr.bf16.mxu1 %v11207_v28 }
  0xfe   : > { %2172 = vmatpush1.bf16.msra.mxu0 %v11178_v6 }
  0xff   : > { %2173 = vmatprep.subr.bf16.mxu0 %v11186_v10  ;;  %2001 = vmatpush1.bf16.msra.mxu1 %v11205_v34 }
 0x100   : > { %2002 = vmatprep.subr.bf16.mxu1 %v11213_v40 }
 0x101   : > { %11032 = vmatmul.mubr.msk.bf16.gmra.mxu0 %vm640_vm3, %v9939_v51  ;;  %vm13879_vm3 = vmor %vm13859_vm1, %vm13180_vm9 }
 0x102   : > { %2174 = vmatpush1.bf16.msra.mxu0 %v11184_v55  ;;  %2201 = vmatprep.mubr.bf16.mxu0 %v12581_v29 }
 0x103   : > { %2175 = vmatprep.subr.bf16.mxu0 %v11192_v25  ;;  %2003 = vmatpush1.bf16.msra.mxu1 %v11211_v39 }
 0x104   : > { %2004 = vmatprep.subr.bf16.mxu1 %v11219_v44 }
 0x106   : > { %2176 = vmatpush1.bf16.msra.mxu0 %v11190_v20 }
 0x107   : > { %2177 = vmatprep.subr.bf16.mxu0 %v11198_v37  ;;  %2005 = vmatpush1.bf16.msra.mxu1 %v11217_v45 }
 0x108   : > { %2006 = vmatprep.subr.bf16.mxu1 %v11226_v46 }
 0x10a   : > { %2178 = vmatpush1.bf16.msra.mxu0 %v11196_v61 }
 0x10b   : > { %2179 = vmatprep.subr.bf16.mxu0 %v11204_v63  ;;  %2007 = vmatpush1.bf16.msra.mxu1 %v11224_v15 }
 0x10c   : > { %2395 = vmatprep.subr.bf16.mxu1 %v11233_v1 }
 0x10e   : > { %2180 = vmatpush1.bf16.msra.mxu0 %v11202_v9 }
 0x10f   : > { %2181 = vmatprep.subr.bf16.mxu0 %v11210_v24 }
 0x112   : > { %2182 = vmatpush1.bf16.msra.mxu0 %v11208_v11 }
 0x113   : > { %2183 = vmatprep.subr.bf16.mxu0 %v11216_v35 }
 0x116   : > { %2184 = vmatpush1.bf16.msra.mxu0 %v11214_v38 }
 0x117   : > { %2591 = vmatprep.subr.bf16.mxu0 %v11223_v42 }
 0x16d   : > { %v10949_v4 = vpop.f32.mrf.mxu0 }
 0x16f   : > { %v691_v7 = vpop.f32.mrf.mxu0 }
 0x170   : > { %v13124_v12 = vpop.f32.mrf.mxu1 }
 0x171   : > { %v10950_v13 = vpop.f32.mrf.mxu0 }
 0x172   : > { %v13126_v14 = vpop.f32.mrf.mxu1 }
 0x173   : > { %v694_v62 = vpop.f32.mrf.mxu0 }
 0x174   : > { %v13128_v17 = vpop.f32.mrf.mxu1 }
 0x176   : > { %v13130_v47 = vpop.f32.mrf.mxu1 }
 0x178   : > { %v10979_v48 = vpop.f32.mrf.mxu1 }
 0x179   : > { %v10953_v49 = vpop.f32.mrf.mxu0 }
 0x17a   : > { %v1000_v50 = vpop.f32.mrf.mxu1 }
 0x17b   : > { %v707_v58 = vpop.f32.mrf.mxu0 }
 0x17c   : > { %v10980_v16 = vpop.f32.mrf.mxu1 }
 0x17d   : > { %v10954_v52 = vpop.f32.mrf.mxu0 }
 0x17e   : > { %v1003_v5 = vpop.f32.mrf.mxu1 }
 0x17f   : > { %v710_v53 = vpop.f32.mrf.mxu0 }
 0x180   : > { %v13132_v21 = vpop.f32.mrf.mxu1 }
 0x181   : > { %v10959_v27 = vpop.f32.mrf.mxu0 }
 0x182   : > { %v13134_v32 = vpop.f32.mrf.mxu1  ;;  %v784_v24 = vadd.f32 %v10959_v27, %v10949_v4  ;;  %v792_v4 = vadd.f32 %v13126_v14, %v707_v58 }
 0x183   : > { %v775_v56 = vpop.f32.mrf.mxu0 }
 0x184   : > { %v13136_v2 = vpop.f32.mrf.mxu1  ;;  %v776_v11 = vadd.f32 %v775_v56, %v691_v7 }
 0x185   : > { %v10960_v23 = vpop.f32.mrf.mxu0 }
 0x186   : > { %v13138_v33 = vpop.f32.mrf.mxu1  ;;  %v787_v38 = vadd.f32 %v10960_v23, %v10950_v13  ;;  %v803_v13 = vadd.f32 %v13128_v17, %v10954_v52 }
 0x187   : > { %v778_v36 = vpop.f32.mrf.mxu0 }
 0x188   : > { %v10999_v43 = vpop.f32.mrf.mxu1  ;;  %v779_v42 = vadd.f32 %v778_v36, %v694_v62  ;;  %v795_v62 = vadd.f32 %v13130_v47, %v710_v53 }
 0x189   : > { %v10969_v30 = vpop.f32.mrf.mxu0 }
 0x18a   : > { %v1211_v51 = vpop.f32.mrf.mxu1  ;;  %v937_v34 = vadd.f32 %v10969_v30, %v784_v24  ;;  %v13156_v30 = vld [vmem:[#allocation2] sm:$0xf] }
 0x18b   : > { %v904_v8 = vpop.f32.mrf.mxu0  ;;  %v1768_v47 = vshrl.u32 %v13156_v30, 16 }
 0x18c   : > { %v13140_v0 = vpop.f32.mrf.mxu1  ;;  %v935_v39 = vadd.f32 %v904_v8, %v776_v11  ;;  %v1033_v45 = vadd.f32 %v10979_v48, %v937_v34 }
 0x18d   : > { %v10970_v54 = vpop.f32.mrf.mxu0 }
 0x18e   : > { %v13142_v10 = vpop.f32.mrf.mxu1  ;;  %v938_v15 = vadd.f32 %v10970_v54, %v787_v38  ;;  %v1031_v41 = vadd.f32 %v1000_v50, %v935_v39 }
 0x18f   : > { %v907_v6 = vpop.f32.mrf.mxu0 }
 0x190   : > { %v13144_v22 = vpop.f32.mrf.mxu1  ;;  %v936_v1 = vadd.f32 %v907_v6, %v779_v42  ;;  %v1034_v7 = vadd.f32 %v10980_v16, %v938_v15 }
 0x191   : > { %v10973_v18 = vpop.f32.mrf.mxu0 }
 0x192   : > { %v13146_v26 = vpop.f32.mrf.mxu1  ;;  %v1032_v48 = vadd.f32 %v1003_v5, %v936_v1 }
 0x193   : > { %v920_v55 = vpop.f32.mrf.mxu0  ;;  %15286 = vst [vmem:[#allocation27_spill] sm:$0xff] %v13146_v26 }
 0x194   : > { %v13148_v37 = vpop.f32.mrf.mxu1  ;;  %v939_v8 = vadd.f32 %v920_v55, %v792_v4 }
 0x195   : > { %v10974_v29 = vpop.f32.mrf.mxu0  ;;  %15287 = vst [vmem:[#allocation28_spill] sm:$0xff] %v13148_v37  ;;  %v800_v37 = vadd.f32 %v13124_v12, %v10953_v49 }
 0x196   : > { %v13150_v61 = vpop.f32.mrf.mxu1  ;;  %v942_v6 = vadd.f32 %v10974_v29, %v803_v13  ;;  %v1035_v52 = vadd.f32 %v13134_v32, %v939_v8 }
 0x197   : > { %v923_v25 = vpop.f32.mrf.mxu0  ;;  %15288 = vst [vmem:[#allocation29_spill] sm:$0xff] %v13150_v61  ;;  %v941_v23 = vadd.f32 %v10973_v18, %v800_v37 }
 0x198   : > { %v11019_v9 = vpop.f32.mrf.mxu1  ;;  %v940_v12 = vadd.f32 %v923_v25, %v795_v62  ;;  %v1038_v18 = vadd.f32 %v13136_v2, %v942_v6 }
 0x199   : > { %v10989_v20 = vpop.f32.mrf.mxu0  ;;  %v1037_v16 = vadd.f32 %v13132_v21, %v941_v23  ;;  %v15292_v23 = vmov 0 }
 0x19a   : > { %v1395_v35 = vpop.f32.mrf.mxu1  ;;  %v1145_v61 = vadd.f32 %v10989_v20, %v1033_v45  ;;  %v1036_v55 = vadd.f32 %v13138_v33, %v940_v12  ;;  %v15293_v23 = vsel %vm13180_vm9, 4294967295, %v15292_v23 }
 0x19b   : > { %v1112_v31 = vpop.f32.mrf.mxu0 }
 0x19c   : > { %v11020_v46 = vpop.f32.mrf.mxu1  ;;  %v1143_v27 = vadd.f32 %v1112_v31, %v1031_v41  ;;  %v1244_v50 = vadd.f32 %v10999_v43, %v1145_v61  ;;  %v1771_v43 = vshll.u32 %v13156_v30, 16 }
 0x19d   : > { %v10990_v57 = vpop.f32.mrf.mxu0 }
 0x19e   : > { %v1398_v56 = vpop.f32.mrf.mxu1  ;;  %v1146_v54 = vadd.f32 %v10990_v57, %v1034_v7  ;;  %v1242_v14 = vadd.f32 %v1211_v51, %v1143_v27  ;;  %v15291_v39 = vld [vmem:[#allocation29_spill] sm:$0xff] }
 0x19f   : > { %v1115_v59 = vpop.f32.mrf.mxu0 }
 0x1a0   : > { %v1144_v49 = vadd.f32 %v1115_v59, %v1032_v48  ;;  %v11023_v41 = vpop.f32.mrf.mxu1  ;;  %v1245_v5 = vadd.f32 %v13140_v0, %v1146_v54  ;;  %v13166_v59 = vld [vmem:[#allocation7] ss:$0 sm:$0xff] }
 0x1a1   : > { %v10993_v63 = vpop.f32.mrf.mxu0 }
 0x1a2   : > { %v1149_v29 = vadd.f32 %v10993_v63, %v1037_v16  ;;  %v1243_v51 = vadd.f32 %v13142_v10, %v1144_v49  ;;  %v1411_v57 = vpop.f32.mrf.mxu1  ;;  %v13169_v63 = vrot.slane %v1768_v47, 4  ;;  %v13171_v10 = vrot.slane %v1771_v43, 5  ;;  %v1695_v16 = vld [vmem:[#allocation2 + $0x18] sm:$0xf] }
 0x1a3   : > { %v1128_v3 = vpop.f32.mrf.mxu0 }
 0x1a4   : > { %v1147_v31 = vadd.f32 %v1128_v3, %v1035_v52  ;;  %v1248_v2 = vadd.f32 %v13144_v22, %v1149_v29  ;;  %v15289_v3 = vld [vmem:[#allocation27_spill] sm:$0xff]  ;;  %v1774_v54 = vor.u32 %v13171_v10, %v13169_v63 }
 0x1a5   : > { %v10994_v19 = vpop.f32.mrf.mxu0  ;;  %15294 = vst [vmem:[#allocation27_spill] sm:$0xff] %v15293_v23 }
 0x1a6   : > { %v1150_v32 = vadd.f32 %v10994_v19, %v1038_v18 }
 0x1a7   : > { %v1131_v28 = vpop.f32.mrf.mxu0 }
 0x1a8   : > { %v1148_v61 = vadd.f32 %v1131_v28, %v1036_v55  ;;  %v15290_v28 = vld [vmem:[#allocation28_spill] sm:$0xff]  ;;  %v15295_v55 = vmov 0 }
 0x1a9   : > { %v11009_v40 = vpop.f32.mrf.mxu0  ;;  %v15296_v55 = vsel %vm13190_vm12, 4294967295, %v15295_v55 }
 0x1aa   : > { %v1328_v58 = vadd.f32 %v11009_v40, %v1244_v50  ;;  %v11024_v40 = vpop.f32.mrf.mxu1  ;;  %15297 = vst [vmem:[#allocation28_spill] sm:$0xff] %v15296_v55 }
 0x1ab   : > { %v1295_v44 = vpop.f32.mrf.mxu0 }
 0x1ac   : > { %v1326_v53 = vadd.f32 %v1295_v44, %v1242_v14  ;;  %v1428_v21 = vadd.f32 %v11019_v9, %v1328_v58  ;;  %v1246_v9 = vadd.f32 %v15289_v3, %v1147_v31 }
 0x1ad   : > { %v11010_v60 = vpop.f32.mrf.mxu0 }
 0x1ae   : > { %v1329_v37 = vadd.f32 %v11010_v60, %v1245_v5  ;;  %v1426_v11 = vadd.f32 %v1395_v35, %v1326_v53  ;;  %v1247_v35 = vadd.f32 %v15291_v39, %v1148_v61 }
 0x1af   : > { %v1298_v26 = vpop.f32.mrf.mxu0 }
 0x1b0   : > { %v1327_v0 = vadd.f32 %v1298_v26, %v1243_v51  ;;  %v1429_v60 = vadd.f32 %v11020_v46, %v1329_v37  ;;  %v1249_v26 = vadd.f32 %v15290_v28, %v1150_v32  ;;  %v1414_v46 = vpop.f32.mrf.mxu1  ;;  %v1680_v51 = vld [vmem:[#allocation2 + $0x8] sm:$0xf] }
 0x1b1   : > { %v11013_v36 = vpop.f32.mrf.mxu0 }
 0x1b2   : > { %v1332_v42 = vadd.f32 %v11013_v36, %v1248_v2  ;;  %v1427_v44 = vadd.f32 %v1398_v56, %v1327_v0 }
 0x1b3   : > { %v1311_v20 = vpop.f32.mrf.mxu0 }
 0x1b4   : > { %v1330_v22 = vadd.f32 %v1311_v20, %v1246_v9  ;;  %v1432_v8 = vadd.f32 %v11023_v41, %v1332_v42 }
 0x1b5   : > { %v11014_v17 = vpop.f32.mrf.mxu0 }
 0x1b6   : > { %v1333_v7 = vadd.f32 %v11014_v17, %v1249_v26  ;;  %v1430_v6 = vadd.f32 %v1411_v57, %v1330_v22  ;;  %v1698_v17 = vld [vmem:[#allocation2 + $0x1c] sm:$0x1] }
 0x1b7   : > { %v1314_v25 = vpop.f32.mrf.mxu0 }
 0x1b8   : > { %v1331_v27 = vadd.f32 %v1314_v25, %v1247_v35  ;;  %v1433_v14 = vadd.f32 %v11024_v40, %v1333_v7  ;;  %v1686_v25 = vld [vmem:[#allocation2 + $0xc] sm:$0x1] }
 0x1b9   : > { %v11029_v24 = vpop.f32.mrf.mxu0 }
 0x1ba   : > { %v1515_v34 = vadd.f32 %v11029_v24, %v1428_v21  ;;  %v1431_v58 = vadd.f32 %v1414_v46, %v1331_v27 }
 0x1bb   : > { %v1482_v33 = vpop.f32.mrf.mxu0 }
 0x1bc   : > { %v1530_v38 = vadd.f32 %v13166_v59, %v1515_v34  ;;  %v1513_v19 = vadd.f32 %v1482_v33, %v1426_v11 }
 0x1bd   : > { %v11030_v45 = vpop.f32.mrf.mxu0 }
 0x1be   : > { %v1538_v15 = vmax.f32 %v1530_v38, 0.0  ;;  %v1528_v1 = vadd.f32 %v13166_v59, %v1513_v19  ;;  %v1516_v4 = vadd.f32 %v11030_v45, %v1429_v60  ;;  %v1701_v38 = vld [vmem:[#allocation2 + $0x20] sm:$0xf]  ;;  %v1704_v19 = vld [vmem:[#allocation2 + $0x24] sm:$0x1] }
 0x1bf   : > { %v1485_v13 = vpop.f32.mrf.mxu0 }
 0x1c0   : > { %v10816_v62 = vpack.c.bf16 %v1538_v15, %v1538_v15  ;;  %v1536_v48 = vmax.f32 %v1528_v1, 0.0  ;;  %v1531_v56 = vadd.f32 %v13166_v59, %v1516_v4  ;;  %v1514_v36 = vadd.f32 %v1485_v13, %v1427_v44  ;;  %v13200_v44 = vld [vmem:[#allocation2 + $0x4] sm:$0x1]  ;;  %v1689_v15 = vld [vmem:[#allocation2 + $0x10] sm:$0xf] }
 0x1c1   : > { %v11033_v50 = vpop.f32.mrf.mxu0  ;;  %v1692_v1 = vld [vmem:[#allocation2 + $0x14] sm:$0x1] }
 0x1c2   : > { %v1613_v12 = vshrl.u32 %v10816_v62, 16  ;;  %v10814_v49 = vpack.c.bf16 %v1536_v48, %v1536_v48  ;;  %v1539_v20 = vmax.f32 %v1531_v56, 0.0  ;;  %v1529_v47 = vadd.f32 %v13166_v59, %v1514_v36 }
 0x1c3   : > { %v1519_v52 = vadd.f32 %v11033_v50, %v1432_v8  ;;  %v1498_v5 = vpop.f32.mrf.mxu0  ;;  %v1616_v41 = vshll.u32 %v10816_v62, 16  ;;  %v1777_v8 = vshll.u32 %v13200_v44, 16 }
 0x1c4   : > { %v1615_v53 = vrot.slane %v1613_v12, 7  ;;  %v1597_v43 = vshrl.u32 %v10814_v49, 16  ;;  %v10817_v18 = vpack.c.bf16 %v1539_v20, %v1539_v20  ;;  %v1600_v29 = vshll.u32 %v10814_v49, 16 }
 0x1c5   : > { %v1537_v31 = vmax.f32 %v1529_v47, 0.0  ;;  %v1534_v21 = vadd.f32 %v13166_v59, %v1519_v52  ;;  %v1517_v37 = vadd.f32 %v1498_v5, %v1430_v6  ;;  %v11034_v57 = vpop.f32.mrf.mxu0  ;;  %v1719_v52 = vld [vmem:[#allocation2 + $0x38] sm:$0xf]  ;;  %v1722_v5 = vld [vmem:[#allocation2 + $0x3c] sm:$0x1] }
 0x1c6   : > { %v1618_v32 = vor.u32 %v1616_v41, %v1615_v53  ;;  %v1619_v61 = vrot.slane %v1615_v53, 4  ;;  %v1599_v0 = vrot.slane %v1597_v43, 7  ;;  %v1621_v24 = vshrl.u32 %v10817_v18, 16 }
 0x1c7   : > { %v1624_v11 = vshll.u32 %v10817_v18, 16  ;;  %v10815_v34 = vpack.c.bf16 %v1537_v31, %v1537_v31  ;;  %v1542_v2 = vmax.f32 %v1534_v21, 0.0  ;;  %v1532_v33 = vadd.f32 %v13166_v59, %v1517_v37  ;;  %v1501_v42 = vpop.f32.mrf.mxu0  ;;  %v1710_v21 = vld [vmem:[#allocation2 + $0x2c] sm:$0x1] }
 0x1c8   : > { %v1696_v3 = vsel %vm13180_vm9, %v1618_v32, %v1695_v16  ;;  %v1699_v9 = vsel %vm13190_vm12, %v1619_v61, %v1698_v17  ;;  %v1602_v60 = vor.u32 %v1600_v29, %v1599_v0  ;;  %v1603_v40 = vrot.slane %v1599_v0, 4 }
 0x1c9   : > { %1697 = vst [vmem:[#allocation2 + $0x18] sm:$0xf] %v1696_v3  ;;  %1700 = vst [vmem:[#allocation2 + $0x1c] sm:$0x1] %v1699_v9  ;;  %v1623_v28 = vrot.slane %v1621_v24, 7  ;;  %v1605_v26 = vshrl.u32 %v10815_v34, 16  ;;  %v10820_v35 = vpack.c.bf16 %v1542_v2, %v1542_v2  ;;  %v1520_v7 = vadd.f32 %v11034_v57, %v1433_v14 }
 0x1ca   : > { %v1608_v39 = vshll.u32 %v10815_v34, 16  ;;  %v1681_v45 = vsel %vm13180_vm9, %v1602_v60, %v1680_v51  ;;  %v1687_v22 = vsel %vm13190_vm12, %v1603_v40, %v1686_v25  ;;  %v1540_v4 = vmax.f32 %v1532_v33, 0.0  ;;  %v1707_v51 = vld [vmem:[#allocation2 + $0x28] sm:$0xf]  ;;  %v11229_v33 = vld [vmem:[#allocation9 + $0x1e4] ss:$8 sps:$4 sm:$0xff]  }
 0x1cb   : > { %1682 = vst [vmem:[#allocation2 + $0x8] sm:$0xf] %v1681_v45  ;;  %1688 = vst [vmem:[#allocation2 + $0xc] sm:$0x1] %v1687_v22  ;;  %v1626_v27 = vor.u32 %v1624_v11, %v1623_v28  ;;  %v1627_v13 = vrot.slane %v1623_v28, 4  ;;  %v1607_v46 = vrot.slane %v1605_v26, 7  ;;  %v1535_v56 = vadd.f32 %v13166_v59, %v1520_v7 }
 0x1cc   : > { %v1645_v62 = vshrl.u32 %v10820_v35, 16  ;;  %v10818_v48 = vpack.c.bf16 %v1540_v4, %v1540_v4  ;;  %v1518_v36 = vadd.f32 %v1501_v42, %v1431_v58  ;;  %v1648_v14 = vshll.u32 %v10820_v35, 16  ;;  %v11221_v2 = vld [vmem:[#allocation9 + $0x1f0] ss:$8 sps:$4 sm:$0xff]   ;;  %v11227_v22 = vld [vmem:[#allocation9 + $0x1e0] ss:$8 sps:$4 sm:$0xff]  }
 0x1cd   : > { %v1702_v50 = vsel %vm13180_vm9, %v1626_v27, %v1701_v38  ;;  %v1705_v6 = vsel %vm13190_vm12, %v1627_v13, %v1704_v19  ;;  %v1610_v12 = vor.u32 %v1608_v39, %v1607_v46  ;;  %v1611_v49 = vrot.slane %v1607_v46, 4  ;;  %v1725_v38 = vld [vmem:[#allocation2 + $0x40] sm:$0xf]  ;;  %v1728_v19 = vld [vmem:[#allocation2 + $0x44] sm:$0x1] }
 0x1ce   : > { %1703 = vst [vmem:[#allocation2 + $0x20] sm:$0xf] %v1702_v50  ;;  %1706 = vst [vmem:[#allocation2 + $0x24] sm:$0x1] %v1705_v6  ;;  %v1647_v20 = vrot.slane %v1645_v62, 7  ;;  %v1629_v16 = vshrl.u32 %v10818_v48, 16  ;;  %v1533_v41 = vadd.f32 %v13166_v59, %v1518_v36 }
 0x1cf   : > { %v1543_v17 = vmax.f32 %v1535_v56, 0.0  ;;  %v1690_v47 = vsel %vm13180_vm9, %v1610_v12, %v1689_v15  ;;  %v1693_v58 = vsel %vm13190_vm12, %v1611_v49, %v1692_v1  ;;  %v1632_v53 = vshll.u32 %v10818_v48, 16  ;;  %v1713_v15 = vld [vmem:[#allocation2 + $0x30] sm:$0xf]  ;;  %v1716_v50 = vld [vmem:[#allocation2 + $0x34] sm:$0x1] }
 0x1d0   : > { %1691 = vst [vmem:[#allocation2 + $0x10] sm:$0xf] %v1690_v47  ;;  %1694 = vst [vmem:[#allocation2 + $0x14] sm:$0x1] %v1693_v58  ;;  %v1650_v43 = vor.u32 %v1648_v14, %v1647_v20  ;;  %v1651_v18 = vrot.slane %v1647_v20, 4  ;;  %v1631_v29 = vrot.slane %v1629_v16, 7 }
 0x1d1   : > { %v10821_v25 = vpack.c.bf16 %v1543_v17, %v1543_v17  ;;  %v13217_v31 = vld [vmem:[#allocation2 + $0x18] sm:$0xf]  ;;  %v1541_v37 = vmax.f32 %v1533_v41, 0.0  ;;  %v13222_v57 = vrot.slane %v1774_v54, 4  ;;  %v13224_v32 = vrot.slane %v1777_v8, 5  ;;  %v13244_v1 = vld [vmem:[#allocation3] sm:$0xff] }
 0x1d2   : > { %v1810_v59 = vshrl.u32 %v13217_v31, 16  ;;  %v1720_v61 = vsel %vm13180_vm9, %v1650_v43, %v1719_v52  ;;  %v1723_v0 = vsel %vm13190_vm12, %v1651_v18, %v1722_v5  ;;  %v1634_v24 = vor.u32 %v1632_v53, %v1631_v29  ;;  %v13231_v34 = vld [vmem:[#allocation2 + $0x8] sm:$0xf]  ;;  %v13235_v3 = vld [vmem:[#allocation2 + $0xc] sm:$0x1] }
 0x1d3   : > { %v1635_v11 = vrot.slane %v1631_v29, 4  ;;  %1721 = vst [vmem:[#allocation2 + $0x38] sm:$0xf] %v1720_v61  ;;  %1724 = vst [vmem:[#allocation2 + $0x3c] sm:$0x1] %v1723_v0  ;;  %v1653_v63 = vshrl.u32 %v10821_v25, 16  ;;  %v10819_v10 = vpack.c.bf16 %v1541_v37, %v1541_v37  ;;  %v9973_v54 = vcombine.low %v13156_v30, %v13231_v34 }
 0x1d4   : > { %v1813_v9 = vshll.u32 %v13217_v31, 16  ;;  %v1708_v60 = vsel %vm13180_vm9, %v1634_v24, %v1707_v51  ;;  %v1782_v28 = vshrl.u32 %v13231_v34, 16  ;;  %v1785_v26 = vshll.u32 %v13231_v34, 16  ;;  %v11236_v4 = vld [vmem:[#allocation9 + $0x1d4] ss:$8 sps:$4 sm:$0xff]  }
 0x1d5   : > { %v1711_v40 = vsel %vm13190_vm12, %v1635_v11, %v1710_v21  ;;  %1709 = vst [vmem:[#allocation2 + $0x28] sm:$0xf] %v1708_v60  ;;  %v1655_v39 = vrot.slane %v1653_v63, 7  ;;  %v1656_v35 = vshll.u32 %v10821_v25, 16  ;;  %v1637_v42 = vshrl.u32 %v10819_v10, 16  ;;  %2202 = vmatmul.mubr.bf16.vlgmr.msra.gmra.mxu0 %v9973_v54 }
 0x1d6   : > { %1712 = vst [vmem:[#allocation2 + $0x2c] sm:$0x1] %v1711_v40  ;;  %v1640_v45 = vshll.u32 %v10819_v10, 16  ;;  %2592 = vmatpush1.bf16.msra.mxu0 %v11221_v2  ;;  %2211 = vmatprep.mubr.bf16.mxu0 %v13244_v1  ;;  %v1784_v7 = vrot.slane %v1782_v28, 4  ;;  %v1787_v27 = vrot.slane %v1785_v26, 5  ;;  %v1791_v13 = vshll.u32 %v13235_v3, 16 }
 0x1d7   : > { %v1812_v46 = vrot.slane %v1810_v59, 4  ;;  %v1658_v62 = vor.u32 %v1656_v35, %v1655_v39  ;;  %v1659_v48 = vrot.slane %v1655_v39, 4  ;;  %v1639_v56 = vrot.slane %v1637_v42, 7  ;;  %2593 = vmatprep.subr.bf16.mxu0 %v11229_v33  ;;  %v13248_v36 = vld [vmem:[#allocation2 + $0x10] sm:$0xf] }
 0x1d8   : > { %v1815_v8 = vrot.slane %v1813_v9, 5  ;;  %v11234_v6 = vld [vmem:[#allocation9 + $0x1d0] ss:$8 sps:$4 sm:$0xff]   ;;  %v1780_v49 = vsel %vm12864_vm4, %v13222_v57, %v13224_v32  ;;  %v1788_v20 = vor.u32 %v1787_v27, %v1784_v7  ;;  %v1796_v14 = vshrl.u32 %v13248_v36, 16  ;;  %v13260_v5 = vld [vmem:[#allocation2 + $0x20] sm:$0xf] }
 0x1d9   : > { %v1799_v16 = vshll.u32 %v13248_v36, 16  ;;  %v1726_v17 = vsel %vm13180_vm9, %v1658_v62, %v1725_v38  ;;  %v1729_v47 = vsel %vm13190_vm12, %v1659_v48, %v1728_v19  ;;  %v1642_v58 = vor.u32 %v1640_v45, %v1639_v56  ;;  %v13262_v53 = vld [vmem:[#allocation2 + $0x14] sm:$0x1]  ;;  %v13264_v18 = vld [vmem:[#allocation2 + $0x1c] sm:$0x1] }
 0x1da   : > { %v1643_v52 = vrot.slane %v1639_v56, 4  ;;  %1727 = vst [vmem:[#allocation2 + $0x40] sm:$0xf] %v1726_v17  ;;  %1730 = vst [vmem:[#allocation2 + $0x44] sm:$0x1] %v1729_v47  ;;  %2594 = vmatpush1.bf16.msra.mxu0 %v11227_v22  ;;  %v1789_v41 = vrot.slane %v1788_v20, 4  ;;  %v13272_v37 = vcombine.low %v13248_v36, %v13217_v31  ;;  %v1816_v32 = vor.u32 %v1815_v8, %v1812_v46 }
 0x1db   : > { %v1793_v43 = vrot.slane %v1791_v13, 5  ;;  %v1798_v29 = vrot.slane %v1796_v14, 4  ;;  %v1801_v51 = vrot.slane %v1799_v16, 5  ;;  %v1714_v25 = vsel %vm13180_vm9, %v1642_v58, %v1713_v15  ;;  %2595 = vmatprep.subr.bf16.mxu0 %v11236_v4  ;;  %v11242_v57 = vld [vmem:[#allocation9 + $0x1c4] ss:$8 sps:$4 sm:$0xff]  }
 0x1dc   : > { %v1717_v21 = vsel %vm13190_vm12, %v1643_v52, %v1716_v50  ;;  %1715 = vst [vmem:[#allocation2 + $0x30] sm:$0xf] %v1714_v25  ;;  %v11231_v59 = vld [vmem:[#allocation9 + $0x170] ss:$8 sps:$4 sm:$0xff]   ;;  %v1805_v11 = vshll.u32 %v13262_v53, 16  ;;  %v1824_v2 = vshrl.u32 %v13260_v5, 16 }
 0x1dd   : > { %1718 = vst [vmem:[#allocation2 + $0x34] sm:$0x1] %v1717_v21  ;;  %v13276_v61 = vsel %vm12864_vm4, %v1789_v41, %v1793_v43  ;;  %v13278_v0 = vld [vmem:[#allocation2 + $0x28] sm:$0xf]  ;;  %v1802_v24 = vor.u32 %v1801_v51, %v1798_v29  ;;  %2212 = vmatmul.mubr.bf16.gmra.mxu0 %v13272_v37  ;;  %v11239_v10 = vld [vmem:[#allocation9 + $0x164] ss:$8 sps:$4 sm:$0xff]  }
 0x1de   : > { %v9953_v63 = vcombine.low %v1780_v49, %v13276_v61  ;;  %v1819_v54 = vshll.u32 %v13264_v18, 16  ;;  %v1827_v33 = vshll.u32 %v13260_v5, 16  ;;  %2596 = vmatpush1.bf16.msra.mxu0 %v11234_v6  ;;  %v11240_v9 = vld [vmem:[#allocation9 + $0x1c0] ss:$8 sps:$4 sm:$0xff]   ;;  %2221 = vmatprep.mubr.bf16.mxu0 %v13244_v1  ;;  %v1838_v40 = vshrl.u32 %v13278_v0, 16 }
 0x1df   : > { %v1803_v60 = vrot.slane %v1802_v24, 4  ;;  %2597 = vmatprep.subr.bf16.mxu0 %v11242_v57  ;;  %v11249_v38 = vld [vmem:[#allocation9 + $0x1b4] ss:$8 sps:$4 sm:$0xff]   ;;  %v1817_v19 = vrot.slane %v1816_v32, 4  ;;  %v1826_v28 = vrot.slane %v1824_v2, 4  ;;  %v1841_v39 = vshll.u32 %v13278_v0, 16 }
 0x1e0   : > { %2025 = vmatmul.mubr.bf16.vlgmr.msra.gmra.mxu1 %v9953_v63  ;;  %v1829_v26 = vrot.slane %v1827_v33, 5  ;;  %v11237_v35 = vld [vmem:[#allocation9 + $0x160] ss:$8 sps:$4 sm:$0xff]   ;;  %v1807_v42 = vrot.slane %v1805_v11, 5  ;;  %v13290_v45 = vld [vmem:[#allocation2 + $0x2c] sm:$0x1]  ;;  %v13296_v13 = vcombine.low %v13260_v5, %v13278_v0 }
 0x1e1   : > { %2396 = vmatpush1.bf16.msra.mxu1 %v11231_v59  ;;  %2034 = vmatprep.mubr.bf16.mxu1 %v13244_v1  ;;  %v1840_v22 = vrot.slane %v1838_v40, 4  ;;  %v11246_v15 = vld [vmem:[#allocation9 + $0x154] ss:$8 sps:$4 sm:$0xff]   ;;  %v1821_v4 = vrot.slane %v1819_v54, 5  ;;  %v13292_v7 = vld [vmem:[#allocation2 + $0x38] sm:$0xf] }
 0x1e2   : > { %2397 = vmatprep.subr.bf16.mxu1 %v11239_v10  ;;  %v1843_v27 = vrot.slane %v1841_v39, 5  ;;  %2598 = vmatpush1.bf16.msra.mxu0 %v11240_v9  ;;  %v11247_v46 = vld [vmem:[#allocation9 + $0x1b0] ss:$8 sps:$4 sm:$0xff]   ;;  %v13300_v62 = vsel %vm12864_vm4, %v1803_v60, %v1807_v42  ;;  %v11255_v48 = vld [vmem:[#allocation9 + $0x1a4] ss:$8 sps:$4 sm:$0xff]   ;;  %v1830_v6 = vor.u32 %v1829_v26, %v1826_v28  ;;  %v1847_v20 = vshll.u32 %v13290_v45, 16 }
 0x1e3   : > { %2599 = vmatprep.subr.bf16.mxu0 %v11249_v38  ;;  %v13304_v56 = vsel %vm12864_vm4, %v1817_v19, %v1821_v4  ;;  %v13306_v8 = vld [vmem:[#allocation2 + $0x30] sm:$0xf]  ;;  %v13308_v50 = vld [vmem:[#allocation2 + $0x24] sm:$0x1]  ;;  %v1866_v47 = vshrl.u32 %v13292_v7, 16  ;;  %v1869_v58 = vshll.u32 %v13292_v7, 16 }
 0x1e4   : > { %v1844_v49 = vor.u32 %v1843_v27, %v1840_v22  ;;  %v11244_v14 = vld [vmem:[#allocation9 + $0x150] ss:$8 sps:$4 sm:$0xff]   ;;  %v1852_v16 = vshrl.u32 %v13306_v8, 16  ;;  %v1855_v17 = vshll.u32 %v13306_v8, 16  ;;  %v13318_v52 = vcombine.low %v13300_v62, %v13304_v56  ;;  %v11252_v41 = vld [vmem:[#allocation9 + $0x144] ss:$8 sps:$4 sm:$0xff]  }
 0x1e5   : > { %2398 = vmatpush1.bf16.msra.mxu1 %v11237_v35  ;;  %2222 = vmatmul.mubr.bf16.gmra.mxu0 %v13296_v13  ;;  %v11253_v43 = vld [vmem:[#allocation9 + $0x1a0] ss:$8 sps:$4 sm:$0xff]   ;;  %v1833_v29 = vshll.u32 %v13308_v50, 16  ;;  %v11262_v57 = vld [vmem:[#allocation9 + $0x194] ss:$8 sps:$4 sm:$0xff]   ;;  %v1831_v59 = vrot.slane %v1830_v6, 4  ;;  %v13332_v40 = vcombine.low %v13306_v8, %v13292_v7 }
 0x1e6   : > { %2399 = vmatprep.subr.bf16.mxu1 %v11246_v15  ;;  %2600 = vmatpush1.bf16.msra.mxu0 %v11247_v46  ;;  %v1845_v51 = vrot.slane %v1844_v49, 4  ;;  %v1854_v25 = vrot.slane %v1852_v16, 4  ;;  %v1857_v21 = vrot.slane %v1855_v17, 5  ;;  %v11250_v32 = vld [vmem:[#allocation9 + $0x140] ss:$8 sps:$4 sm:$0xff]   ;;  %v1849_v24 = vrot.slane %v1847_v20, 5 }
 0x1e7   : > { %2231 = vmatprep.mubr.bf16.mxu0 %v13244_v1  ;;  %2601 = vmatprep.subr.bf16.mxu0 %v11255_v48  ;;  %v1868_v11 = vrot.slane %v1866_v47, 4  ;;  %v1871_v2 = vrot.slane %v1869_v58, 5  ;;  %v11259_v63 = vld [vmem:[#allocation9 + $0x134] ss:$8 sps:$4 sm:$0xff]   ;;  %v11260_v54 = vld [vmem:[#allocation9 + $0x190] ss:$8 sps:$4 sm:$0xff]   ;;  %v10021_v47 = vcombine.low %v13231_v34, %v13248_v36 }
 0x1e8   : > { %2035 = vmatmul.mubr.bf16.gmra.mxu1 %v13318_v52  ;;  %v13324_v10 = vld [vmem:[#allocation2 + $0x34] sm:$0x1]  ;;  %v1835_v33 = vrot.slane %v1833_v29, 5  ;;  %v13328_v9 = vsel %vm12864_vm4, %v1845_v51, %v1849_v24  ;;  %v1858_v60 = vor.u32 %v1857_v21, %v1854_v25  ;;  %v11268_v38 = vld [vmem:[#allocation9 + $0x184] ss:$8 sps:$4 sm:$0xff]   ;;  %v9993_v21 = vrot.slane %v13156_v30, 9 }
 0x1e9   : > { %2400 = vmatpush1.bf16.msra.mxu1 %v11244_v14  ;;  %2044 = vmatprep.mubr.bf16.mxu1 %v13244_v1  ;;  %v13334_v19 = vld [vmem:[#allocation2 + $0x3c] sm:$0x1]  ;;  %v11257_v28 = vld [vmem:[#allocation9 + $0x130] ss:$8 sps:$4 sm:$0xff]   ;;  %v1861_v39 = vshll.u32 %v13324_v10, 16  ;;  %v1872_v35 = vor.u32 %v1871_v2, %v1868_v11 }
 0x1ea   : > { %2401 = vmatprep.subr.bf16.mxu1 %v11252_v41  ;;  %2602 = vmatpush1.bf16.msra.mxu0 %v11253_v43  ;;  %v13338_v26 = vsel %vm12864_vm4, %v1831_v59, %v1835_v33  ;;  %v11265_v22 = vld [vmem:[#allocation9 + $0x124] ss:$8 sps:$4 sm:$0xff]   ;;  %v11266_v15 = vld [vmem:[#allocation9 + $0x180] ss:$8 sps:$4 sm:$0xff]   ;;  %v1859_v4 = vrot.slane %v1858_v60, 4  ;;  %v1875_v27 = vshll.u32 %v13334_v19, 16 }
 0x1eb   : > { %2603 = vmatprep.subr.bf16.mxu0 %v11262_v57  ;;  %v13344_v42 = vcombine.low %v13338_v26, %v13328_v9  ;;  %v11275_v46 = vld [vmem:[#allocation9 + $0x2f4] ss:$8 sps:$4 sm:$0xff]   ;;  %v11263_v48 = vld [vmem:[#allocation9 + $0x120] ss:$8 sps:$4 sm:$0xff]   ;;  %v1863_v6 = vrot.slane %v1861_v39, 5  ;;  %v1873_v49 = vrot.slane %v1872_v35, 4 }
 0x1ec   : > { %v11271_v20 = vld [vmem:[#allocation9 + $0x114] ss:$8 sps:$4 sm:$0xff]   ;;  %v11273_v14 = vld [vmem:[#allocation9 + $0x2f0] ss:$8 sps:$4 sm:$0xff]   ;;  %v1877_v17 = vrot.slane %v1875_v27, 5  ;;  %v2252_v57 = vrot.slane %v13200_v44, 5 }
 0x1ed   : > { %2402 = vmatpush1.bf16.msra.mxu1 %v11250_v32  ;;  %2232 = vmatmul.mubr.bf16.gmra.mxu0 %v13332_v40  ;;  %v13352_v16 = vsel %vm12864_vm4, %v1859_v4, %v1863_v6  ;;  %v11281_v58 = vld [vmem:[#allocation9 + $0x2e4] ss:$8 sps:$4 sm:$0xff]   ;;  %v11269_v41 = vld [vmem:[#allocation9 + $0x110] ss:$8 sps:$4 sm:$0xff]   ;;  %v11279_v25 = vld [vmem:[#allocation9 + $0x2e0] ss:$8 sps:$4 sm:$0xff]  }
 0x1ee   : > { %2403 = vmatprep.subr.bf16.mxu1 %v11259_v63  ;;  %2604 = vmatpush1.bf16.msra.mxu0 %v11260_v54  ;;  %v13358_v43 = vsel %vm12864_vm4, %v1873_v49, %v1877_v17  ;;  %v11278_v51 = vld [vmem:[#allocation9 + $0x104] ss:$8 sps:$4 sm:$0xff]   ;;  %v9994_v32 = vrot.slane %v13231_v34, 9  ;;  %v2256_v59 = vrot.slane %v13235_v3, 5  ;;  %v11288_v24 = vld [vmem:[#allocation9 + $0x2d4] ss:$8 sps:$4 sm:$0xff]   ;;  %v2253_v30 = vsel %vm12958_vm7, %v9993_v21, %v2252_v57 }
 0x1ef   : > { %2623 = vmatprep.mubr.bf16.mxu0 %v13244_v1  ;;  %2605 = vmatprep.subr.bf16.mxu0 %v11268_v38  ;;  %v13362_v29 = vcombine.low %v13352_v16, %v13358_v43  ;;  %v11276_v11 = vld [vmem:[#allocation9 + $0x100] ss:$8 sps:$4 sm:$0xff]   ;;  %v11285_v2 = vld [vmem:[#allocation9 + $0x274] ss:$8 sps:$4 sm:$0xff]   ;;  %v11286_v63 = vld [vmem:[#allocation9 + $0x2d0] ss:$8 sps:$4 sm:$0xff]   ;;  %v10022_v34 = vcombine.low %v13217_v31, %v13260_v5 }
 0x1f0   : > { %2045 = vmatmul.mubr.bf16.gmra.mxu1 %v13344_v42  ;;  %v13375_v44 = vsel %vm12958_vm7, %v9994_v32, %v2256_v59  ;;  %v11294_v3 = vld [vmem:[#allocation9 + $0x2c4] ss:$8 sps:$4 sm:$0xff]   ;;  %v11283_v33 = vld [vmem:[#allocation9 + $0x270] ss:$8 sps:$4 sm:$0xff]   ;;  %v9995_v39 = vrot.slane %v13248_v36, 9  ;;  %v2260_v35 = vrot.slane %v13262_v53, 5  ;;  %v10023_v53 = vcombine.low %v13278_v0, %v13306_v8 }
 0x1f1   : > { %2404 = vmatpush1.bf16.msra.mxu1 %v11257_v28  ;;  %2054 = vmatprep.mubr.bf16.mxu1 %v13244_v1  ;;  %v10001_v60 = vcombine.low %v2253_v30, %v13375_v44  ;;  %v11291_v38 = vld [vmem:[#allocation9 + $0x264] ss:$8 sps:$4 sm:$0xff]   ;;  %v11292_v28 = vld [vmem:[#allocation9 + $0x2c0] ss:$8 sps:$4 sm:$0xff]   ;;  %v9996_v4 = vrot.slane %v13217_v31, 9  ;;  %v2264_v27 = vrot.slane %v13264_v18, 5 }
 0x1f2   : > { %2405 = vmatprep.subr.bf16.mxu1 %v11265_v22  ;;  %2606 = vmatpush1.bf16.msra.mxu0 %v11266_v15  ;;  %v11301_v22 = vld [vmem:[#allocation9 + $0x2b4] ss:$8 sps:$4 sm:$0xff]   ;;  %v11289_v15 = vld [vmem:[#allocation9 + $0x260] ss:$8 sps:$4 sm:$0xff]   ;;  %v13388_v36 = vsel %vm12958_vm7, %v9995_v39, %v2260_v35  ;;  %v11307_v6 = vld [vmem:[#allocation9 + $0x2a4] ss:$8 sps:$4 sm:$0xff]  }
 0x1f3   : > { %3000 = vmatprep.subr.bf16.mxu0 %v11275_v46  ;;  %v11298_v46 = vld [vmem:[#allocation9 + $0x254] ss:$8 sps:$4 sm:$0xff]   ;;  %v11296_v49 = vld [vmem:[#allocation9 + $0x250] ss:$8 sps:$4 sm:$0xff]   ;;  %v13394_v31 = vsel %vm12958_vm7, %v9996_v4, %v2264_v27  ;;  %v9998_v17 = vrot.slane %v13278_v0, 9  ;;  %v2268_v21 = vrot.slane %v13308_v50, 5 }
 0x1f4   : > { %v13398_v18 = vcombine.low %v13388_v36, %v13394_v31  ;;  %v11311_v57 = vld [vmem:[#allocation9 + $0x234] ss:$8 sps:$4 sm:$0xff]   ;;  %v11312_v0 = vld [vmem:[#allocation9 + $0x290] ss:$8 sps:$4 sm:$0xff]   ;;  %v11320_v59 = vld [vmem:[#allocation9 + $0x284] ss:$8 sps:$4 sm:$0xff]  }
 0x1f5   : > { %2406 = vmatpush1.bf16.msra.mxu1 %v11263_v48  ;;  %2624 = vmatmul.mubr.bf16.vlgmr.msra.gmra.mxu0 %v10021_v47  ;;  %v11299_v48 = vld [vmem:[#allocation9 + $0x2b0] ss:$8 sps:$4 sm:$0xff]   ;;  %v2272_v47 = vrot.slane %v13290_v45, 5  ;;  %v2276_v30 = vrot.slane %v13324_v10, 5  ;;  %v10062_v10 = vcombine.low %v13375_v44, %v13388_v36  ;;  %v11332_v39 = vld [vmem:[#allocation9 + $0x3e4] ss:$8 sps:$4 sm:$0xff]  }
 0x1f6   : > { %2407 = vmatprep.subr.bf16.mxu1 %v11271_v20  ;;  %3001 = vmatpush1.bf16.msra.mxu0 %v11273_v14  ;;  %v11304_v20 = vld [vmem:[#allocation9 + $0x244] ss:$8 sps:$4 sm:$0xff]   ;;  %v11305_v14 = vld [vmem:[#allocation9 + $0x2a0] ss:$8 sps:$4 sm:$0xff]   ;;  %v11321_v35 = vld [vmem:[#allocation9 + $0x210] ss:$8 sps:$4 sm:$0xff]  }
 0x1f7   : > { %2633 = vmatprep.mubr.bf16.mxu0 %v13244_v1  ;;  %3002 = vmatprep.subr.bf16.mxu0 %v11281_v58  ;;  %v11314_v58 = vld [vmem:[#allocation9 + $0x294] ss:$8 sps:$4 sm:$0xff]   ;;  %v13411_v45 = vsel %vm12958_vm7, %v9998_v17, %v2272_v47  ;;  %v11327_v4 = vld [vmem:[#allocation9 + $0x200] ss:$8 sps:$4 sm:$0xff]   ;;  %v11344_v36 = vld [vmem:[#allocation9 + $0x3c4] ss:$8 sps:$4 sm:$0xff]  }
 0x1f8   : > { %2055 = vmatmul.mubr.bf16.gmra.mxu1 %v13362_v29  ;;  %v11338_v44 = vld [vmem:[#allocation9 + $0x3d4] ss:$8 sps:$4 sm:$0xff]   ;;  %v11339_v17 = vld [vmem:[#allocation9 + $0x360] ss:$8 sps:$4 sm:$0xff]   ;;  %v1748_v47 = vld [vmem:[#allocation2 + $0x44] sm:$0x1] }
 0x1f9   : > { %2408 = vmatpush1.bf16.msra.mxu1 %v11269_v41  ;;  %2427 = vmatprep.mubr.bf16.mxu1 %v13244_v1  ;;  %v11302_v41 = vld [vmem:[#allocation9 + $0x240] ss:$8 sps:$4 sm:$0xff]   ;;  %v11335_v27 = vld [vmem:[#allocation9 + $0x374] ss:$8 sps:$4 sm:$0xff]  }
 0x1fa   : > { %2409 = vmatprep.subr.bf16.mxu1 %v11278_v51  ;;  %3003 = vmatpush1.bf16.msra.mxu0 %v11279_v25  ;;  %v13405_v51 = vld [vmem:[#allocation2 + $0x40] sm:$0xf]  ;;  %v9997_v25 = vrot.slane %v13260_v5, 9  ;;  %v12200_v12 = vld [vmem:[#allocation12 + $0x1044] ss:$16 sps:$4 sm:$0xff]  }
 0x1fb   : > { %3004 = vmatprep.subr.bf16.mxu0 %v11288_v24  ;;  %v10024_v32 = vcombine.low %v13292_v7, %v13405_v51  ;;  %v11309_v24 = vld [vmem:[#allocation9 + $0x230] ss:$8 sps:$4 sm:$0xff]  }
 0x1fc   : > { %v2269_v5 = vsel %vm12958_vm7, %v9997_v25, %v2268_v21  ;;  %v11356_v25 = vld [vmem:[#allocation9 + $0x3a4] ss:$8 sps:$4 sm:$0xff]   ;;  %v11345_v21 = vld [vmem:[#allocation9 + $0x350] ss:$8 sps:$4 sm:$0xff]  }
 0x1fd   : > { %2410 = vmatpush1.bf16.msra.mxu1 %v11276_v11  ;;  %2634 = vmatmul.mubr.bf16.gmra.mxu0 %v10022_v34  ;;  %v13418_v50 = vcombine.low %v2269_v5, %v13411_v45  ;;  %v11317_v11 = vld [vmem:[#allocation9 + $0x224] ss:$8 sps:$4 sm:$0xff]   ;;  %v11326_v34 = vld [vmem:[#allocation9 + $0x3f4] ss:$8 sps:$4 sm:$0xff]  }
 0x1fe   : > { %2800 = vmatprep.subr.bf16.mxu1 %v11285_v2  ;;  %3005 = vmatpush1.bf16.msra.mxu0 %v11286_v63  ;;  %v11318_v2 = vld [vmem:[#allocation9 + $0x280] ss:$8 sps:$4 sm:$0xff]   ;;  %v9999_v63 = vrot.slane %v13306_v8, 9 }
 0x1ff   : > { %2643 = vmatprep.mubr.bf16.mxu0 %v13244_v1  ;;  %3006 = vmatprep.subr.bf16.mxu0 %v11294_v3  ;;  %v11315_v3 = vld [vmem:[#allocation9 + $0x220] ss:$8 sps:$4 sm:$0xff]  }
 0x200   : > { %2428 = vmatmul.mubr.bf16.vlgmr.msra.gmra.mxu1 %v10001_v60  ;;  %v2280_v60 = vrot.slane %v13334_v19, 5  ;;  %v2277_v8 = vsel %vm12958_vm7, %v9999_v63, %v2276_v30  ;;  %v11329_v19 = vld [vmem:[#allocation9 + $0x204] ss:$8 sps:$4 sm:$0xff]  }
 0x201   : > { %2801 = vmatpush1.bf16.msra.mxu1 %v11283_v33  ;;  %2437 = vmatprep.mubr.bf16.mxu1 %v13244_v1  ;;  %v10000_v33 = vrot.slane %v13292_v7, 9 }
 0x202   : > { %2802 = vmatprep.subr.bf16.mxu1 %v11291_v38  ;;  %3007 = vmatpush1.bf16.msra.mxu0 %v11292_v28  ;;  %v11323_v38 = vld [vmem:[#allocation9 + $0x214] ss:$8 sps:$4 sm:$0xff]   ;;  %v11324_v28 = vld [vmem:[#allocation9 + $0x3f0] ss:$8 sps:$4 sm:$0xff]  }
 0x203   : > { %3008 = vmatprep.subr.bf16.mxu0 %v11301_v22  ;;  %v13433_v22 = vsel %vm12958_vm7, %v10000_v33, %v2280_v60  ;;  %v11357_v33 = vld [vmem:[#allocation9 + $0x330] ss:$8 sps:$4 sm:$0xff]   ;;  %v2690_v60 = vshll.u32 %v1748_v47, 16 }
 0x204   : > { %v13436_v7 = vcombine.low %v2277_v8, %v13433_v22 }
 0x205   : > { %2803 = vmatpush1.bf16.msra.mxu1 %v11289_v15  ;;  %2644 = vmatmul.mubr.bf16.gmra.mxu0 %v10023_v53  ;;  %v11330_v15 = vld [vmem:[#allocation9 + $0x3e0] ss:$8 sps:$4 sm:$0xff]   ;;  %v11333_v53 = vld [vmem:[#allocation9 + $0x370] ss:$8 sps:$4 sm:$0xff]  }
 0x206   : > { %2804 = vmatprep.subr.bf16.mxu1 %v11298_v46  ;;  %3009 = vmatpush1.bf16.msra.mxu0 %v11299_v48  ;;  %v11336_v46 = vld [vmem:[#allocation9 + $0x3d0] ss:$8 sps:$4 sm:$0xff]   ;;  %v10063_v48 = vcombine.low %v13394_v31, %v2269_v5  ;;  %v11347_v31 = vld [vmem:[#allocation9 + $0x354] ss:$8 sps:$4 sm:$0xff]  }
 0x207   : > { %2653 = vmatprep.mubr.bf16.mxu0 %v13244_v1  ;;  %3010 = vmatprep.subr.bf16.mxu0 %v11307_v6  ;;  %v10041_v6 = vcombine.low %v13276_v61, %v13300_v62  ;;  %v2681_v61 = vshrl.u32 %v13405_v51, 16  ;;  %v2684_v62 = vshll.u32 %v13405_v51, 16 }
 0x208   : > { %2438 = vmatmul.mubr.bf16.gmra.mxu1 %v13398_v18 }
 0x209   : > { %2805 = vmatpush1.bf16.msra.mxu1 %v11296_v49  ;;  %2447 = vmatprep.mubr.bf16.mxu1 %v13244_v1  ;;  %v11341_v49 = vld [vmem:[#allocation9 + $0x364] ss:$8 sps:$4 sm:$0xff]   ;;  %v2683_v5 = vrot.slane %v2681_v61, 4 }
 0x20a   : > { %2806 = vmatprep.subr.bf16.mxu1 %v11304_v20  ;;  %3011 = vmatpush1.bf16.msra.mxu0 %v11305_v14  ;;  %v11342_v20 = vld [vmem:[#allocation9 + $0x3c0] ss:$8 sps:$4 sm:$0xff]   ;;  %v11350_v14 = vld [vmem:[#allocation9 + $0x3b4] ss:$8 sps:$4 sm:$0xff]  }
 0x20b   : > { %3012 = vmatprep.subr.bf16.mxu0 %v11314_v58  ;;  %v11348_v58 = vld [vmem:[#allocation9 + $0x3b0] ss:$8 sps:$4 sm:$0xff]  }
 0x20d   : > { %2807 = vmatpush1.bf16.msra.mxu1 %v11302_v41  ;;  %2654 = vmatmul.mubr.bf16.gmra.mxu0 %v10024_v32  ;;  %v10064_v41 = vcombine.low %v13411_v45, %v2277_v8  ;;  %v10042_v32 = vcombine.low %v13304_v56, %v13338_v26  ;;  %v11362_v45 = vld [vmem:[#allocation9 + $0x394] ss:$8 sps:$4 sm:$0xff]   ;;  %v11360_v26 = vld [vmem:[#allocation9 + $0x390] ss:$8 sps:$4 sm:$0xff]   ;;  %v11366_v8 = vld [vmem:[#allocation9 + $0x380] ss:$8 sps:$4 sm:$0xff]  }
 0x20e   : > { %2808 = vmatprep.subr.bf16.mxu1 %v11311_v57  ;;  %3013 = vmatpush1.bf16.msra.mxu0 %v11312_v0  ;;  %v10061_v57 = vrot.slane %v13405_v51, 9  ;;  %v2892_v0 = vrot.slane %v1748_v47, 5  ;;  %v11359_v56 = vld [vmem:[#allocation9 + $0x334] ss:$8 sps:$4 sm:$0xff]  }
 0x20f   : > { %3032 = vmatprep.mubr.bf16.mxu0 %v13244_v1  ;;  %3014 = vmatprep.subr.bf16.mxu0 %v11320_v59  ;;  %v11353_v59 = vld [vmem:[#allocation9 + $0x344] ss:$8 sps:$4 sm:$0xff]  }
 0x210   : > { %2448 = vmatmul.mubr.bf16.gmra.mxu1 %v13418_v50  ;;  %v13456_v63 = vsel %vm12958_vm7, %v10061_v57, %v2892_v0  ;;  %v11393_v57 = vld [vmem:[#allocation9 + $0x410] ss:$8 sps:$4 sm:$0xff]  }
 0x211   : > { %2809 = vmatpush1.bf16.msra.mxu1 %v11309_v24  ;;  %2457 = vmatprep.mubr.bf16.mxu1 %v13244_v1  ;;  %v11354_v24 = vld [vmem:[#allocation9 + $0x3a0] ss:$8 sps:$4 sm:$0xff]  }
 0x212   : > { %2810 = vmatprep.subr.bf16.mxu1 %v11317_v11  ;;  %3015 = vmatpush1.bf16.msra.mxu0 %v11318_v2  ;;  %v2686_v11 = vrot.slane %v2684_v62, 5  ;;  %v11351_v2 = vld [vmem:[#allocation9 + $0x340] ss:$8 sps:$4 sm:$0xff]   ;;  %v11389_v62 = vld [vmem:[#allocation9 + $0x434] ss:$8 sps:$4 sm:$0xff]  }
 0x213   : > { %3393 = vmatprep.subr.bf16.mxu0 %v11326_v34  ;;  %v10065_v34 = vcombine.low %v13433_v22, %v13456_v63  ;;  %v11371_v22 = vld [vmem:[#allocation9 + $0x314] ss:$8 sps:$4 sm:$0xff]  }
 0x214   : > { %v2687_v30 = vor.u32 %v2686_v11, %v2683_v5  ;;  %v11402_v11 = vld [vmem:[#allocation12 + $0x2e4] ss:$16 sps:$4 sm:$0xff]  }
 0x215   : > { %2811 = vmatpush1.bf16.msra.mxu1 %v11315_v3  ;;  %3033 = vmatmul.mubr.bf16.vlgmr.msra.gmra.mxu0 %v10062_v10  ;;  %v11368_v3 = vld [vmem:[#allocation9 + $0x384] ss:$8 sps:$4 sm:$0xff]  }
 0x216   : > { %2812 = vmatprep.subr.bf16.mxu1 %v11323_v38  ;;  %3394 = vmatpush1.bf16.msra.mxu0 %v11324_v28  ;;  %v10043_v38 = vcombine.low %v13328_v9, %v13352_v16  ;;  %v11365_v28 = vld [vmem:[#allocation9 + $0x324] ss:$8 sps:$4 sm:$0xff]   ;;  %v2688_v10 = vrot.slane %v2687_v30, 4  ;;  %v11369_v9 = vld [vmem:[#allocation9 + $0x310] ss:$8 sps:$4 sm:$0xff]  }
 0x217   : > { %3042 = vmatprep.mubr.bf16.mxu0 %v13244_v1  ;;  %3395 = vmatprep.subr.bf16.mxu0 %v11332_v39  ;;  %v11363_v39 = vld [vmem:[#allocation9 + $0x320] ss:$8 sps:$4 sm:$0xff]  }
 0x218   : > { %2458 = vmatmul.mubr.bf16.gmra.mxu1 %v13436_v7  ;;  %v11414_v30 = vld [vmem:[#allocation12 + $0x2a4] ss:$16 sps:$4 sm:$0xff]  }
 0x219   : > { %2813 = vmatpush1.bf16.msra.mxu1 %v11321_v35  ;;  %2832 = vmatprep.mubr.bf16.mxu1 %v13244_v1  ;;  %v2692_v35 = vrot.slane %v2690_v60, 5  ;;  %v11421_v60 = vld [vmem:[#allocation12 + $0x288] ss:$16 sps:$4 sm:$0xff]  }
 0x21a   : > { %2814 = vmatprep.subr.bf16.mxu1 %v11329_v19  ;;  %3396 = vmatpush1.bf16.msra.mxu0 %v11330_v15  ;;  %v11374_v15 = vld [vmem:[#allocation9 + $0x304] ss:$8 sps:$4 sm:$0xff]  }
 0x21b   : > { %3397 = vmatprep.subr.bf16.mxu0 %v11338_v44  ;;  %v2693_v19 = vsel %vm12864_vm4, %v2688_v10, %v2692_v35  ;;  %v13468_v44 = vld [vmem:[#allocation2 + $0x48] sm:$0xf]  ;;  %v11427_v10 = vld [vmem:[#allocation12 + $0x268] ss:$16 sps:$4 sm:$0xff]   ;;  %v11429_v35 = vld [vmem:[#allocation12 + $0x26c] ss:$16 sps:$4 sm:$0xff]  }
 0x21c   : > { %v10044_v16 = vcombine.low %v13358_v43, %v2693_v19  ;;  %v10082_v0 = vcombine.low %v13405_v51, %v13468_v44 }
 0x21d   : > { %2815 = vmatpush1.bf16.msra.mxu1 %v11327_v4  ;;  %3043 = vmatmul.mubr.bf16.gmra.mxu0 %v10063_v48  ;;  %v11372_v4 = vld [vmem:[#allocation9 + $0x300] ss:$8 sps:$4 sm:$0xff]   ;;  %v11377_v48 = vld [vmem:[#allocation9 + $0x474] ss:$8 sps:$4 sm:$0xff]  }
 0x21e   : > { %3190 = vmatprep.subr.bf16.mxu1 %v11335_v27  ;;  %3398 = vmatpush1.bf16.msra.mxu0 %v11336_v46  ;;  %v3280_v27 = vshrl.u32 %v13468_v44, 16  ;;  %v3283_v46 = vshll.u32 %v13468_v44, 16 }
 0x21f   : > { %3052 = vmatprep.mubr.bf16.mxu0 %v13244_v1  ;;  %3399 = vmatprep.subr.bf16.mxu0 %v11344_v36 }
 0x220   : > { %2833 = vmatmul.mubr.bf16.vlgmr.msra.gmra.mxu1 %v10041_v6  ;;  %v3282_v36 = vrot.slane %v3280_v27, 4  ;;  %v3285_v43 = vrot.slane %v3283_v46, 5  ;;  %v1750_v6 = vld [vmem:[#allocation2 + $0x4c] sm:$0x1]  ;;  %v11436_v27 = vld [vmem:[#allocation12 + $0x220] ss:$16 sps:$4 sm:$0xff]  }
 0x221   : > { %3191 = vmatpush1.bf16.msra.mxu1 %v11333_v53  ;;  %2842 = vmatprep.mubr.bf16.mxu1 %v13244_v1  ;;  %v11380_v53 = vld [vmem:[#allocation9 + $0x464] ss:$8 sps:$4 sm:$0xff]  }
 0x222   : > { %3192 = vmatprep.subr.bf16.mxu1 %v11341_v49  ;;  %3400 = vmatpush1.bf16.msra.mxu0 %v11342_v20  ;;  %v11378_v49 = vld [vmem:[#allocation9 + $0x460] ss:$8 sps:$4 sm:$0xff]   ;;  %v3286_v20 = vor.u32 %v3285_v43, %v3282_v36 }
 0x223   : > { %3401 = vmatprep.subr.bf16.mxu0 %v11350_v14  ;;  %v3289_v14 = vshll.u32 %v1750_v6, 16  ;;  %v11438_v46 = vld [vmem:[#allocation12 + $0x224] ss:$16 sps:$4 sm:$0xff]   ;;  %v11441_v36 = vld [vmem:[#allocation12 + $0x22c] ss:$16 sps:$4 sm:$0xff]  }
 0x224   : > { %v3287_v47 = vrot.slane %v3286_v20, 4 }
 0x225   : > { %3193 = vmatpush1.bf16.msra.mxu1 %v11339_v17  ;;  %3053 = vmatmul.mubr.bf16.gmra.mxu0 %v10064_v41  ;;  %v11383_v17 = vld [vmem:[#allocation9 + $0x454] ss:$8 sps:$4 sm:$0xff]  }
 0x226   : > { %3194 = vmatprep.subr.bf16.mxu1 %v11347_v31  ;;  %3402 = vmatpush1.bf16.msra.mxu0 %v11348_v58  ;;  %v11381_v31 = vld [vmem:[#allocation9 + $0x450] ss:$8 sps:$4 sm:$0xff]   ;;  %v3291_v58 = vrot.slane %v3289_v14, 5 }
 0x227   : > { %3062 = vmatprep.mubr.bf16.mxu0 %v13244_v1  ;;  %3403 = vmatprep.subr.bf16.mxu0 %v11356_v25  ;;  %v11387_v25 = vld [vmem:[#allocation9 + $0x430] ss:$8 sps:$4 sm:$0xff]  }
 0x228   : > { %2843 = vmatmul.mubr.bf16.gmra.mxu1 %v10042_v32  ;;  %v3292_v61 = vsel %vm12864_vm4, %v3287_v47, %v3291_v58  ;;  %v11399_v32 = vld [vmem:[#allocation9 + $0x404] ss:$8 sps:$4 sm:$0xff]  }
 0x229   : > { %3195 = vmatpush1.bf16.msra.mxu1 %v11345_v21  ;;  %2852 = vmatprep.mubr.bf16.mxu1 %v13244_v1  ;;  %v10099_v41 = vcombine.low %v2693_v19, %v3292_v61  ;;  %v11390_v21 = vld [vmem:[#allocation9 + $0x420] ss:$8 sps:$4 sm:$0xff]  }
 0x22a   : > { %3196 = vmatprep.subr.bf16.mxu1 %v11353_v59  ;;  %3404 = vmatpush1.bf16.msra.mxu0 %v11354_v24  ;;  %v11397_v59 = vld [vmem:[#allocation9 + $0x400] ss:$8 sps:$4 sm:$0xff]   ;;  %v3485_v24 = vrot.slane %v1750_v6, 5 }
 0x22b   : > { %3405 = vmatprep.subr.bf16.mxu0 %v11362_v45  ;;  %v11403_v45 = vld [vmem:[#allocation12 + $0x2e8] ss:$16 sps:$4 sm:$0xff]   ;;  %v11430_v19 = vld [vmem:[#allocation12 + $0x240] ss:$16 sps:$4 sm:$0xff]  }
 0x22c   : > { %v11442_v58 = vld [vmem:[#allocation12 + $0x200] ss:$16 sps:$4 sm:$0xff]  }
 0x22d   : > { %3197 = vmatpush1.bf16.msra.mxu1 %v11351_v2  ;;  %3063 = vmatmul.mubr.bf16.gmra.mxu0 %v10065_v34  ;;  %v11405_v2 = vld [vmem:[#allocation12 + $0x2ec] ss:$16 sps:$4 sm:$0xff]  }
 0x22e   : > { %3198 = vmatprep.subr.bf16.mxu1 %v11359_v56  ;;  %3406 = vmatpush1.bf16.msra.mxu0 %v11360_v26  ;;  %v11408_v56 = vld [vmem:[#allocation12 + $0x2c4] ss:$16 sps:$4 sm:$0xff]   ;;  %v11409_v26 = vld [vmem:[#allocation12 + $0x2c8] ss:$16 sps:$4 sm:$0xff]   ;;  %v11417_v34 = vld [vmem:[#allocation12 + $0x2ac] ss:$16 sps:$4 sm:$0xff]  }
 0x22f   : > { %3425 = vmatprep.mubr.bf16.mxu0 %v13244_v1  ;;  %3407 = vmatprep.subr.bf16.mxu0 %v11368_v3  ;;  %v11418_v3 = vld [vmem:[#allocation12 + $0x280] ss:$16 sps:$4 sm:$0xff]  }
 0x230   : > { %2853 = vmatmul.mubr.bf16.gmra.mxu1 %v10043_v38  ;;  %v11423_v38 = vld [vmem:[#allocation12 + $0x28c] ss:$16 sps:$4 sm:$0xff]  }
 0x231   : > { %3199 = vmatpush1.bf16.msra.mxu1 %v11357_v33  ;;  %2862 = vmatprep.mubr.bf16.mxu1 %v13244_v1  ;;  %v11420_v33 = vld [vmem:[#allocation12 + $0x284] ss:$16 sps:$4 sm:$0xff]  }
 0x232   : > { %3200 = vmatprep.subr.bf16.mxu1 %v11365_v28  ;;  %3408 = vmatpush1.bf16.msra.mxu0 %v11366_v8  ;;  %v11424_v28 = vld [vmem:[#allocation12 + $0x260] ss:$16 sps:$4 sm:$0xff]   ;;  %v11426_v8 = vld [vmem:[#allocation12 + $0x264] ss:$16 sps:$4 sm:$0xff]  }
 0x233   : > { %4546 = vmatprep.subr.bf16.mxu0 %v11402_v11 }
 0x235   : > { %3201 = vmatpush1.bf16.msra.mxu1 %v11363_v39  ;;  %3426 = vmatmul.mubr.bf16.vlgmr.msra.gmra.mxu0 %v13318_v52  ;;  %v11375_v52 = vld [vmem:[#allocation9 + $0x470] ss:$8 sps:$4 sm:$0xff]  }
 0x236   : > { %3202 = vmatprep.subr.bf16.mxu1 %v11371_v22  ;;  %3435 = vmatprep.mubr.bf16.mxu0 %v13244_v1 }
 0x238   : > { %2863 = vmatmul.mubr.bf16.gmra.mxu1 %v10044_v16  ;;  %v11433_v16 = vld [vmem:[#allocation12 + $0x248] ss:$16 sps:$4 sm:$0xff]  }
 0x239   : > { %3203 = vmatpush1.bf16.msra.mxu1 %v11369_v9  ;;  %3222 = vmatprep.mubr.bf16.mxu1 %v13244_v1  ;;  %v11432_v9 = vld [vmem:[#allocation12 + $0x244] ss:$16 sps:$4 sm:$0xff]  }
 0x23a   : > { %3204 = vmatprep.subr.bf16.mxu1 %v11374_v15 }
 0x23d   : > { %3205 = vmatpush1.bf16.msra.mxu1 %v11372_v4  ;;  %3436 = vmatmul.mubr.bf16.gmra.mxu0 %v13344_v42  ;;  %v11386_v42 = vld [vmem:[#allocation9 + $0x444] ss:$8 sps:$4 sm:$0xff]  }
 0x23e   : > { %3587 = vmatprep.subr.bf16.mxu1 %v11377_v48  ;;  %3445 = vmatprep.mubr.bf16.mxu0 %v13244_v1  ;;  %v11439_v48 = vld [vmem:[#allocation12 + $0x228] ss:$16 sps:$4 sm:$0xff]  }
 0x240   : > { %3223 = vmatmul.mubr.bf16.vlgmr.msra.gmra.mxu1 %v13272_v37  ;;  %v11384_v37 = vld [vmem:[#allocation9 + $0x440] ss:$8 sps:$4 sm:$0xff]  }
 0x241   : > { %3588 = vmatpush1.bf16.msra.mxu1 %v11375_v52  ;;  %3232 = vmatprep.mubr.bf16.mxu1 %v13244_v1 }
 0x242   : > { %3589 = vmatprep.subr.bf16.mxu1 %v11380_v53 }
 0x245   : > { %3590 = vmatpush1.bf16.msra.mxu1 %v11378_v49  ;;  %3446 = vmatmul.mubr.bf16.gmra.mxu0 %v13362_v29  ;;  %v11392_v29 = vld [vmem:[#allocation9 + $0x424] ss:$8 sps:$4 sm:$0xff]  }
 0x246   : > { %3591 = vmatprep.subr.bf16.mxu1 %v11383_v17  ;;  %3455 = vmatprep.mubr.bf16.mxu0 %v13244_v1 }
 0x248   : > { %3233 = vmatmul.mubr.bf16.gmra.mxu1 %v13296_v13  ;;  %v11395_v13 = vld [vmem:[#allocation9 + $0x414] ss:$8 sps:$4 sm:$0xff]  }
 0x249   : > { %3592 = vmatpush1.bf16.msra.mxu1 %v11381_v31  ;;  %3242 = vmatprep.mubr.bf16.mxu1 %v13244_v1 }
 0x24a   : > { %3593 = vmatprep.subr.bf16.mxu1 %v11386_v42  ;;  %v11444_v42 = vld [vmem:[#allocation12 + $0x204] ss:$16 sps:$4 sm:$0xff]  }
 0x24d   : > { %3594 = vmatpush1.bf16.msra.mxu1 %v11384_v37  ;;  %3456 = vmatmul.mubr.bf16.gmra.mxu0 %v10099_v41  ;;  %v11447_v41 = vld [vmem:[#allocation12 + $0x20c] ss:$16 sps:$4 sm:$0xff]  }
 0x24e   : > { %3595 = vmatprep.subr.bf16.mxu1 %v11389_v62  ;;  %v11445_v62 = vld [vmem:[#allocation12 + $0x208] ss:$16 sps:$4 sm:$0xff]  }
 0x250   : > { %3243 = vmatmul.mubr.bf16.gmra.mxu1 %v13332_v40  ;;  %v10116_v40 = vrot.slane %v13468_v44, 9  ;;  %v11435_v44 = vld [vmem:[#allocation12 + $0x24c] ss:$16 sps:$4 sm:$0xff]  }
 0x251   : > { %3596 = vmatpush1.bf16.msra.mxu1 %v11387_v25  ;;  %3252 = vmatprep.mubr.bf16.mxu1 %v13244_v1 }
 0x252   : > { %3597 = vmatprep.subr.bf16.mxu1 %v11392_v29  ;;  %v3486_v51 = vsel %vm12958_vm7, %v10116_v40, %v3485_v24 }
 0x253   : > { %v10117_v5 = vcombine.low %v13456_v63, %v3486_v51  ;;  %v11415_v63 = vld [vmem:[#allocation12 + $0x2a8] ss:$16 sps:$4 sm:$0xff]  }
 0x255   : > { %3598 = vmatpush1.bf16.msra.mxu1 %v11390_v21 }
 0x256   : > { %3599 = vmatprep.subr.bf16.mxu1 %v11395_v13 }
 0x258   : > { %3253 = vmatmul.mubr.bf16.gmra.mxu1 %v10082_v0 }
 0x259   : > { %3600 = vmatpush1.bf16.msra.mxu1 %v11393_v57  ;;  %3619 = vmatprep.mubr.bf16.mxu1 %v13244_v1 }
 0x25a   : > { %3601 = vmatprep.subr.bf16.mxu1 %v11399_v32 }
 0x25d   : > { %3602 = vmatpush1.bf16.msra.mxu1 %v11397_v59 }
 0x25e   : > { %4619 = vmatprep.subr.bf16.mxu1 %v11405_v2 }
 0x260   : > { %3620 = vmatmul.mubr.bf16.vlgmr.msra.gmra.mxu1 %v13398_v18  ;;  %v11400_v18 = vld [vmem:[#allocation12 + $0x2e0] ss:$16 sps:$4 sm:$0xff]  }
 0x261   : > { %3629 = vmatprep.mubr.bf16.mxu1 %v13244_v1  ;;  %4547 = vmatpush1.bf16.msra.mxu0 %v11400_v18 }
 0x262   : > { %4620 = vmatpush1.bf16.msra.mxu1 %v11403_v45  ;;  %4548 = vmatprep.subr.bf16.mxu0 %v11408_v56  ;;  %v11448_v56 = vld [vmem:[#allocation12 + $0x3e0] ss:$16 sps:$4 sm:$0xff]  }
 0x268   : > { %3630 = vmatmul.mubr.bf16.gmra.mxu1 %v13418_v50  ;;  %v11406_v50 = vld [vmem:[#allocation12 + $0x2c0] ss:$16 sps:$4 sm:$0xff]  }
 0x269   : > { %3639 = vmatprep.mubr.bf16.mxu1 %v13244_v1  ;;  %4549 = vmatpush1.bf16.msra.mxu0 %v11406_v50 }
 0x26a   : > { %4550 = vmatprep.subr.bf16.mxu0 %v11414_v30  ;;  %v11451_v30 = vld [vmem:[#allocation12 + $0x3e8] ss:$16 sps:$4 sm:$0xff]  }
 0x270   : > { %3640 = vmatmul.mubr.bf16.gmra.mxu1 %v13436_v7  ;;  %v11411_v7 = vld [vmem:[#allocation12 + $0x2cc] ss:$16 sps:$4 sm:$0xff]  }
 0x271   : > { %3649 = vmatprep.mubr.bf16.mxu1 %v13244_v1  ;;  %4621 = vmatprep.subr.bf16.mxu1 %v11411_v7  ;;  %v11412_v1 = vld [vmem:[#allocation12 + $0x2a0] ss:$16 sps:$4 sm:$0xff]  }
 0x272   : > { %4622 = vmatpush1.bf16.msra.mxu1 %v11409_v26  ;;  %4551 = vmatpush1.bf16.msra.mxu0 %v11412_v1  ;;  %v11450_v26 = vld [vmem:[#allocation12 + $0x3e4] ss:$16 sps:$4 sm:$0xff]  }
 0x273   : > { %4623 = vmatprep.subr.bf16.mxu1 %v11417_v34  ;;  %4552 = vmatprep.subr.bf16.mxu0 %v11420_v33 }
 0x276   : > { %4624 = vmatpush1.bf16.msra.mxu1 %v11415_v63  ;;  %4553 = vmatpush1.bf16.msra.mxu0 %v11418_v3  ;;  %v11453_v63 = vld [vmem:[#allocation12 + $0x3ec] ss:$16 sps:$4 sm:$0xff]  }
 0x277   : > { %4625 = vmatprep.subr.bf16.mxu1 %v11423_v38  ;;  %4554 = vmatprep.subr.bf16.mxu0 %v11426_v8  ;;  %v11456_v38 = vld [vmem:[#allocation12 + $0x3c4] ss:$16 sps:$4 sm:$0xff]   ;;  %v11459_v8 = vld [vmem:[#allocation12 + $0x3cc] ss:$16 sps:$4 sm:$0xff]  }
 0x278   : > { %3650 = vmatmul.mubr.bf16.gmra.mxu1 %v10117_v5 }
 0x27a   : > { %4626 = vmatpush1.bf16.msra.mxu1 %v11421_v60  ;;  %4555 = vmatpush1.bf16.msra.mxu0 %v11424_v28  ;;  %v11454_v60 = vld [vmem:[#allocation12 + $0x3c0] ss:$16 sps:$4 sm:$0xff]   ;;  %v11457_v28 = vld [vmem:[#allocation12 + $0x3c8] ss:$16 sps:$4 sm:$0xff]  }
 0x27b   : > { %4627 = vmatprep.subr.bf16.mxu1 %v11429_v35  ;;  %4556 = vmatprep.subr.bf16.mxu0 %v11432_v9 }
 0x27e   : > { %4628 = vmatpush1.bf16.msra.mxu1 %v11427_v10  ;;  %4557 = vmatpush1.bf16.msra.mxu0 %v11430_v19 }
 0x27f   : > { %4629 = vmatprep.subr.bf16.mxu1 %v11435_v44  ;;  %4558 = vmatprep.subr.bf16.mxu0 %v11438_v46  ;;  %v11463_v46 = vld [vmem:[#allocation12 + $0x3a8] ss:$16 sps:$4 sm:$0xff]  }
 0x282   : > { %4630 = vmatpush1.bf16.msra.mxu1 %v11433_v16  ;;  %4559 = vmatpush1.bf16.msra.mxu0 %v11436_v27  ;;  %v11460_v16 = vld [vmem:[#allocation12 + $0x3a0] ss:$16 sps:$4 sm:$0xff]  }
 0x283   : > { %4631 = vmatprep.subr.bf16.mxu1 %v11441_v36  ;;  %4560 = vmatprep.subr.bf16.mxu0 %v11444_v42  ;;  %v11471_v42 = vld [vmem:[#allocation12 + $0x38c] ss:$16 sps:$4 sm:$0xff]  }
 0x286   : > { %4632 = vmatpush1.bf16.msra.mxu1 %v11439_v48  ;;  %4561 = vmatpush1.bf16.msra.mxu0 %v11442_v58  ;;  %v11465_v48 = vld [vmem:[#allocation12 + $0x3ac] ss:$16 sps:$4 sm:$0xff]   ;;  %v11469_v58 = vld [vmem:[#allocation12 + $0x388] ss:$16 sps:$4 sm:$0xff]  }
 0x287   : > { %4633 = vmatprep.subr.bf16.mxu1 %v11447_v41  ;;  %4562 = vmatprep.subr.bf16.mxu0 %v11450_v26  ;;  %v11483_v26 = vld [vmem:[#allocation12 + $0x34c] ss:$16 sps:$4 sm:$0xff]  }
 0x28a   : > { %4634 = vmatpush1.bf16.msra.mxu1 %v11445_v62  ;;  %4563 = vmatpush2.bf16.msra.mxu0 %v11448_v56  ;;  %v11480_v56 = vld [vmem:[#allocation12 + $0x344] ss:$16 sps:$4 sm:$0xff]  }
 0x28b   : > { %4635 = vmatprep.subr.bf16.mxu1 %v11453_v63  ;;  %4564 = vmatprep.subr.bf16.mxu0 %v11456_v38 }
 0x28e   : > { %4636 = vmatpush2.bf16.msra.mxu1 %v11451_v30  ;;  %4565 = vmatpush2.bf16.msra.mxu0 %v11454_v60 }
 0x28f   : > { %4637 = vmatprep.subr.bf16.mxu1 %v11459_v8  ;;  %v11486_v8 = vld [vmem:[#allocation12 + $0x324] ss:$16 sps:$4 sm:$0xff]  }
 0x292   : > { %4638 = vmatpush2.bf16.msra.mxu1 %v11457_v28  ;;  %v11484_v28 = vld [vmem:[#allocation12 + $0x320] ss:$16 sps:$4 sm:$0xff]  }
 0x293   : > { %4639 = vmatprep.subr.bf16.mxu1 %v11465_v48  ;;  %v11492_v48 = vld [vmem:[#allocation12 + $0x304] ss:$16 sps:$4 sm:$0xff]  }
 0x295   : > { %v2203_v39 = vpop.f32.mrf.mxu0 }
 0x296   : > { %4640 = vmatpush2.bf16.msra.mxu1 %v11463_v46 }
 0x297   : > { %v2205_v22 = vpop.f32.mrf.mxu0  ;;  %4641 = vmatprep.subr.bf16.mxu1 %v11471_v42 }
 0x299   : > { %v2207_v15 = vpop.f32.mrf.mxu0 }
 0x29a   : > { %4642 = vmatpush2.bf16.msra.mxu1 %v11469_v58  ;;  %v11495_v58 = vld [vmem:[#allocation12 + $0x30c] ss:$16 sps:$4 sm:$0xff]  }
 0x29b   : > { %v13499_v4 = vpop.f32.mrf.mxu0 }
 0x29d   : > { %v2213_v52 = vpop.f32.mrf.mxu0 }
 0x29f   : > { %v2215_v53 = vpop.f32.mrf.mxu0 }
 0x2a0   : > { %v2026_v43 = vpop.f32.mrf.mxu1 }
 0x2a1   : > { %v13501_v6 = vadd.f32 %v2203_v39, %v2026_v43  ;;  %v2217_v20 = vpop.f32.mrf.mxu0 }
 0x2a2   : > { %v2028_v49 = vpop.f32.mrf.mxu1 }
 0x2a3   : > { %v13503_v14 = vadd.f32 %v2205_v22, %v2028_v49  ;;  %v13505_v31 = vpop.f32.mrf.mxu0  ;;  %v11468_v49 = vld [vmem:[#allocation12 + $0x384] ss:$16 sps:$4 sm:$0xff]  }
 0x2a4   : > { %v2030_v17 = vpop.f32.mrf.mxu1 }
 0x2a5   : > { %v13507_v47 = vadd.f32 %v2207_v15, %v2030_v17  ;;  %v2223_v61 = vpop.f32.mrf.mxu0  ;;  %v11462_v15 = vld [vmem:[#allocation12 + $0x3a4] ss:$16 sps:$4 sm:$0xff]  }
 0x2a6   : > { %v13509_v37 = vpop.f32.mrf.mxu1  ;;  %4566 = vmatprep.subr.bf16.mxu0 %v11462_v15  ;;  %v11489_v15 = vld [vmem:[#allocation12 + $0x32c] ss:$16 sps:$4 sm:$0xff]  }
 0x2a7   : > { %v2225_v29 = vpop.f32.mrf.mxu0  ;;  %4567 = vmatpush2.bf16.msra.mxu0 %v11460_v16  ;;  %v11487_v16 = vld [vmem:[#allocation12 + $0x328] ss:$16 sps:$4 sm:$0xff]  }
 0x2a8   : > { %v2036_v25 = vpop.f32.mrf.mxu1  ;;  %4568 = vmatprep.subr.bf16.mxu0 %v11468_v49 }
 0x2a9   : > { %v13511_v21 = vadd.f32 %v2213_v52, %v2036_v25  ;;  %v2227_v57 = vpop.f32.mrf.mxu0  ;;  %v11472_v25 = vld [vmem:[#allocation12 + $0x360] ss:$16 sps:$4 sm:$0xff]  }
 0x2aa   : > { %v2038_v13 = vpop.f32.mrf.mxu1 }
 0x2ab   : > { %v13513_v0 = vadd.f32 %v2215_v53, %v2038_v13  ;;  %v13515_v59 = vpop.f32.mrf.mxu0  ;;  %v11466_v53 = vld [vmem:[#allocation12 + $0x380] ss:$16 sps:$4 sm:$0xff]  }
 0x2ac   : > { %v2040_v32 = vpop.f32.mrf.mxu1  ;;  %4569 = vmatpush2.bf16.msra.mxu0 %v11466_v53 }
 0x2ad   : > { %v13517_v40 = vadd.f32 %v2217_v20, %v2040_v32  ;;  %v2233_v51 = vpop.f32.mrf.mxu0  ;;  %v11477_v32 = vld [vmem:[#allocation12 + $0x36c] ss:$16 sps:$4 sm:$0xff]  }
 0x2ae   : > { %v13519_v24 = vpop.f32.mrf.mxu1  ;;  %4643 = vmatprep.subr.bf16.mxu1 %v11477_v32 }
 0x2af   : > { %v2235_v18 = vpop.f32.mrf.mxu0 }
 0x2b0   : > { %v2046_v5 = vpop.f32.mrf.mxu1 }
 0x2b1   : > { %v13521_v11 = vadd.f32 %v2223_v61, %v2046_v5  ;;  %v2237_v2 = vpop.f32.mrf.mxu0 }
 0x2b2   : > { %v2048_v45 = vpop.f32.mrf.mxu1 }
 0x2b3   : > { %v13523_v50 = vadd.f32 %v2225_v29, %v2048_v45  ;;  %v13525_v1 = vpop.f32.mrf.mxu0  ;;  %v11474_v29 = vld [vmem:[#allocation12 + $0x364] ss:$16 sps:$4 sm:$0xff]  }
 0x2b4   : > { %v2050_v7 = vpop.f32.mrf.mxu1  ;;  %4570 = vmatprep.subr.bf16.mxu0 %v11474_v29  ;;  %v11501_v29 = vld [vmem:[#allocation12 + $0xec] ss:$16 sps:$4 sm:$0xff]  }
 0x2b5   : > { %v13527_v34 = vadd.f32 %v2227_v57, %v2050_v7  ;;  %v13531_v33 = vpop.f32.mrf.mxu0  ;;  %v11475_v57 = vld [vmem:[#allocation12 + $0x368] ss:$16 sps:$4 sm:$0xff]   ;;  %4571 = vmatpush2.bf16.msra.mxu0 %v11472_v25 }
 0x2b6   : > { %v13529_v3 = vpop.f32.mrf.mxu1  ;;  %4644 = vmatpush2.bf16.msra.mxu1 %v11475_v57  ;;  %4572 = vmatprep.subr.bf16.mxu0 %v11480_v56 }
 0x2b7   : > { %v13533_v39 = vpop.f32.mrf.mxu0  ;;  %4645 = vmatprep.subr.bf16.mxu1 %v11483_v26 }
 0x2b8   : > { %v2056_v10 = vpop.f32.mrf.mxu1 }
 0x2b9   : > { %v13535_v35 = vadd.f32 %v2233_v51, %v2056_v10  ;;  %v13537_v19 = vpop.f32.mrf.mxu0 }
 0x2ba   : > { %v2058_v22 = vpop.f32.mrf.mxu1 }
 0x2bb   : > { %v13539_v9 = vadd.f32 %v2235_v18, %v2058_v22  ;;  %v13541_v27 = vpop.f32.mrf.mxu0 }
 0x2bc   : > { %v2060_v44 = vpop.f32.mrf.mxu1 }
 0x2bd   : > { %v13543_v52 = vadd.f32 %v2237_v2, %v2060_v44  ;;  %v13547_v43 = vpop.f32.mrf.mxu0  ;;  %v11478_v2 = vld [vmem:[#allocation12 + $0x340] ss:$16 sps:$4 sm:$0xff]  }
 0x2be   : > { %v13545_v36 = vpop.f32.mrf.mxu1  ;;  %4573 = vmatpush2.bf16.msra.mxu0 %v11478_v2 }
 0x2bf   : > { %v13549_v17 = vpop.f32.mrf.mxu0  ;;  %4574 = vmatprep.subr.bf16.mxu0 %v11486_v8 }
 0x2c0   : > { %v2429_v20 = vpop.f32.mrf.mxu1 }
 0x2c1   : > { %v13552_v61 = vadd.f32 %v2429_v20, %v13501_v6  ;;  %v13554_v41 = vpop.f32.mrf.mxu0  ;;  %v11493_v20 = vld [vmem:[#allocation12 + $0x308] ss:$16 sps:$4 sm:$0xff]  }
 0x2c2   : > { %v2431_v62 = vpop.f32.mrf.mxu1  ;;  %4575 = vmatpush2.bf16.msra.mxu0 %v11484_v28 }
 0x2c3   : > { %v13557_v13 = vadd.f32 %v2431_v62, %v13503_v14  ;;  %v13559_v5 = vpop.f32.mrf.mxu0  ;;  %v11481_v14 = vld [vmem:[#allocation12 + $0x348] ss:$16 sps:$4 sm:$0xff]   ;;  %4576 = vmatprep.subr.bf16.mxu0 %v11492_v48 }
 0x2c4   : > { %v2433_v51 = vpop.f32.mrf.mxu1  ;;  %4646 = vmatpush2.bf16.msra.mxu1 %v11481_v14 }
 0x2c5   : > { %v13562_v6 = vadd.f32 %v2433_v51, %v13507_v47  ;;  %v13566_v45 = vpop.f32.mrf.mxu0  ;;  %4647 = vmatprep.subr.bf16.mxu1 %v11489_v15 }
 0x2c6   : > { %v13564_v18 = vpop.f32.mrf.mxu1 }
 0x2c7   : > { %v13568_v30 = vpop.f32.mrf.mxu0 }
 0x2c8   : > { %v2439_v7 = vpop.f32.mrf.mxu1  ;;  %4648 = vmatpush2.bf16.msra.mxu1 %v11487_v16 }
 0x2c9   : > { %v13571_v63 = vadd.f32 %v2439_v7, %v13511_v21  ;;  %v13573_v60 = vpop.f32.mrf.mxu0  ;;  %4649 = vmatprep.subr.bf16.mxu1 %v11495_v58 }
 0x2ca   : > { %v2441_v47 = vpop.f32.mrf.mxu1 }
 0x2cb   : > { %v13576_v38 = vadd.f32 %v2441_v47, %v13513_v0  ;;  %v13578_v22 = vpop.f32.mrf.mxu0  ;;  %v11490_v0 = vld [vmem:[#allocation12 + $0x300] ss:$16 sps:$4 sm:$0xff]  }
 0x2cc   : > { %v2443_v10 = vpop.f32.mrf.mxu1  ;;  %4577 = vmatpush2.bf16.msra.mxu0 %v11490_v0  ;;  %4650 = vmatpush2.bf16.msra.mxu1 %v11493_v20 }
 0x2cd   : > { %v13581_v44 = vadd.f32 %v2443_v10, %v13517_v40  ;;  %v13585_v46 = vpop.f32.mrf.mxu0  ;;  %v11498_v40 = vld [vmem:[#allocation12 + $0xe4] ss:$16 sps:$4 sm:$0xff]   ;;  %5125 = vmatprep.subr.bf16.mxu1 %v11501_v29 }
 0x2ce   : > { %v13583_v21 = vpop.f32.mrf.mxu1  ;;  %5052 = vmatprep.subr.bf16.mxu0 %v11498_v40 }
 0x2cf   : > { %v13587_v49 = vpop.f32.mrf.mxu0 }
 0x2d0   : > { %v2449_v53 = vpop.f32.mrf.mxu1 }
 0x2d1   : > { %v13590_v42 = vadd.f32 %v2449_v53, %v13521_v11  ;;  %v13592_v25 = vpop.f32.mrf.mxu0 }
 0x2d2   : > { %v2451_v62 = vpop.f32.mrf.mxu1  ;;  %15300 = vst [vmem:[#allocation29_spill] sm:$0xff] %v13592_v25 }
 0x2d3   : > { %v13595_v57 = vadd.f32 %v2451_v62, %v13523_v50  ;;  %v13597_v51 = vpop.f32.mrf.mxu0 }
 0x2d4   : > { %v2453_v32 = vpop.f32.mrf.mxu1  ;;  %15301 = vst [vmem:[#allocation25_spill] sm:$0xff] %v13597_v51 }
 0x2d5   : > { %v13600_v11 = vadd.f32 %v2453_v32, %v13527_v34  ;;  %v13604_v56 = vpop.f32.mrf.mxu0 }
 0x2d6   : > { %v13602_v2 = vpop.f32.mrf.mxu1 }
 0x2d7   : > { %v13606_v26 = vpop.f32.mrf.mxu0 }
 0x2d8   : > { %v2459_v14 = vpop.f32.mrf.mxu1  ;;  %15302 = vst [vmem:[#allocation30_spill] sm:$0xff] %v13606_v26 }
 0x2d9   : > { %v13609_v7 = vadd.f32 %v2459_v14, %v13535_v35  ;;  %v13611_v47 = vpop.f32.mrf.mxu0 }
 0x2da   : > { %v2461_v50 = vpop.f32.mrf.mxu1  ;;  %15303 = vst [vmem:[#allocation31_spill] sm:$0xff] %v13611_v47 }
 0x2db   : > { %v13614_v28 = vadd.f32 %v2461_v50, %v13539_v9  ;;  %v13616_v10 = vpop.f32.mrf.mxu0 }
 0x2dc   : > { %v2463_v8 = vpop.f32.mrf.mxu1  ;;  %15304 = vst [vmem:[#allocation32_spill] sm:$0xff] %v13616_v10 }
 0x2dd   : > { %v13619_v34 = vadd.f32 %v2463_v8, %v13543_v52  ;;  %v13623_v15 = vpop.f32.mrf.mxu0 }
 0x2de   : > { %v13621_v16 = vpop.f32.mrf.mxu1  ;;  %15306 = vst [vmem:[#allocation34_spill] sm:$0xff] %v13623_v15 }
 0x2df   : > { %15305 = vst [vmem:[#allocation33_spill] sm:$0xff] %v13619_v34  ;;  %v13627_v35 = vpop.f32.mrf.mxu0  ;;  %v13715_v34 = vld [vmem:[#allocation3 + $0x38] sm:$0x11] }
 0x2e0   : > { %v13625_v0 = vpop.f32.mrf.mxu1  ;;  %15307 = vst [vmem:[#allocation35_spill] sm:$0xff] %v13627_v35 }
 0x2e1   : > { %v13631_v53 = vpop.f32.mrf.mxu0 }
 0x2e2   : > { %v13629_v48 = vpop.f32.mrf.mxu1  ;;  %15308 = vst [vmem:[#allocation36_spill] sm:$0xff] %v13631_v53 }
 0x2e3   : > { %v13635_v20 = vpop.f32.mrf.mxu0 }
 0x2e4   : > { %v13633_v9 = vpop.f32.mrf.mxu1  ;;  %15309 = vst [vmem:[#allocation37_spill] sm:$0xff] %v13635_v20 }
 0x2e5   : > { %v13639_v52 = vpop.f32.mrf.mxu0 }
 0x2e6   : > { %v13637_v58 = vpop.f32.mrf.mxu1  ;;  %15310 = vst [vmem:[#allocation38_spill] sm:$0xff] %v13639_v52 }
 0x2e7   : > { %v13643_v62 = vpop.f32.mrf.mxu0 }
 0x2e8   : > { %v13641_v40 = vpop.f32.mrf.mxu1  ;;  %15311 = vst [vmem:[#allocation39_spill] sm:$0xff] %v13643_v62 }
 0x2e9   : > { %v13647_v32 = vpop.f32.mrf.mxu0 }
 0x2ea   : > { %v13645_v29 = vpop.f32.mrf.mxu1  ;;  %15312 = vst [vmem:[#allocation40_spill] sm:$0xff] %v13647_v32 }
 0x2eb   : > { %v13651_v50 = vpop.f32.mrf.mxu0 }
 0x2ec   : > { %v13649_v14 = vpop.f32.mrf.mxu1  ;;  %15313 = vst [vmem:[#allocation41_spill] sm:$0xff] %v13651_v50 }
 0x2ed   : > { %v13655_v54 = vpop.f32.mrf.mxu0 }
 0x2ee   : > { %v13653_v8 = vpop.f32.mrf.mxu1  ;;  %15314 = vst [vmem:[#allocation42_spill] sm:$0xff] %v13655_v54 }
 0x2ef   : > { %v13659_v23 = vpop.f32.mrf.mxu0 }
 0x2f0   : > { %v13657_v55 = vpop.f32.mrf.mxu1  ;;  %15315 = vst [vmem:[#allocation43_spill] sm:$0xff] %v13659_v23 }
 0x2f1   : > { %v13663_v20 = vpop.f32.mrf.mxu0 }
 0x2f2   : > { %v13661_v52 = vpop.f32.mrf.mxu1  ;;  %15317 = vst [vmem:[#allocation45_spill] sm:$0xff] %v13663_v20 }
 0x2f3   : > { %15316 = vst [vmem:[#allocation44_spill] sm:$0xff] %v13661_v52  ;;  %v13667_v53 = vpop.f32.mrf.mxu0  ;;  %v2210_v52 = vadd.f32 %v13499_v4, %v13509_v37  ;;  %v2230_v4 = vadd.f32 %v13515_v59, %v13529_v3 }
 0x2f4   : > { %v13665_v62 = vpop.f32.mrf.mxu1  ;;  %15319 = vst [vmem:[#allocation47_spill] sm:$0xff] %v13667_v53 }
 0x2f5   : > { %15318 = vst [vmem:[#allocation46_spill] sm:$0xff] %v13665_v62  ;;  %v13671_v35 = vpop.f32.mrf.mxu0  ;;  %v2479_v59 = vadd.f32 %v13602_v2, %v2230_v4  ;;  %v2670_v2 = vadd.f32 %v13554_v41, %v13581_v44  ;;  %v15349_v4 = vld [vmem:[#allocation31_spill] sm:$0xff] }
 0x2f6   : > { %v13669_v32 = vpop.f32.mrf.mxu1  ;;  %15321 = vst [vmem:[#allocation49_spill] sm:$0xff] %v13671_v35 }
 0x2f7   : > { %15320 = vst [vmem:[#allocation48_spill] sm:$0xff] %v13669_v32  ;;  %v13675_v15 = vpop.f32.mrf.mxu0  ;;  %v2675_v41 = vadd.f32 %v13578_v22, %v2479_v59  ;;  %v2879_v22 = vadd.f32 %v13649_v14, %v2670_v2  ;;  %v15353_v59 = vld [vmem:[#allocation34_spill] sm:$0xff]  ;;  %v15357_v2 = vld [vmem:[#allocation37_spill] sm:$0xff] }
 0x2f8   : > { %v13673_v50 = vpop.f32.mrf.mxu1  ;;  %15323 = vst [vmem:[#allocation51_spill] sm:$0xff] %v13675_v15 }
 0x2f9   : > { %15322 = vst [vmem:[#allocation50_spill] sm:$0xff] %v13673_v50  ;;  %v13679_v10 = vpop.f32.mrf.mxu0 }
 0x2fa   : > { %v13677_v54 = vpop.f32.mrf.mxu1  ;;  %15325 = vst [vmem:[#allocation53_spill] sm:$0xff] %v13679_v10 }
 0x2fb   : > { %15324 = vst [vmem:[#allocation52_spill] sm:$0xff] %v13677_v54  ;;  %v13683_v47 = vpop.f32.mrf.mxu0  ;;  %v3678_v54 = vlaneseq }
 0x2fc   : > { %v13681_v23 = vpop.f32.mrf.mxu1  ;;  %15327 = vst [vmem:[#allocation55_spill] sm:$0xff] %v13683_v47 }
 0x2fd   : > { %15326 = vst [vmem:[#allocation54_spill] sm:$0xff] %v13681_v23  ;;  %v13689_v53 = vpop.f32.mrf.mxu0  ;;  %v13701_v23 = vld [vmem:[#allocation3] sm:$0xff] }
 0x2fe   : > { %v13685_v20 = vpop.f32.mrf.mxu1  ;;  %15329 = vst [vmem:[#allocation57_spill] sm:$0xff] %v13689_v53  ;;  %15335 = vst [vmem:[#allocation63_spill] sm:$0xff] %v13701_v23  ;;  %v4018_v47 = vshrl.u32 %v13701_v23, 16 }
 0x2ff   : > { %15328 = vst [vmem:[#allocation56_spill] sm:$0xff] %v13685_v20  ;;  %v13695_v50 = vpop.f32.mrf.mxu0  ;;  %v4021_v20 = vshll.u32 %v13701_v23, 16 }
 0x300   : > { %v13687_v62 = vpop.f32.mrf.mxu1  ;;  %15332 = vst [vmem:[#allocation60_spill] sm:$0xff] %v13695_v50  ;;  %v4020_v50 = vrot.slane %v4018_v47, 4  ;;  %v3676_v47 = vld [vmem:[#allocation10] sm:$0x3] }
 0x301   : > { %v13705_v51 = vpop.f32.mrf.mxu0  ;;  %v4023_v25 = vrot.slane %v4021_v20, 5 }
 0x302   : > { %v13691_v32 = vpop.f32.mrf.mxu1  ;;  %15336 = vst [vmem:[#allocation64_spill] sm:$0xff] %v13705_v51 }
 0x303   : > { %15330 = vst [vmem:[#allocation58_spill] sm:$0xff] %v13691_v32  ;;  %v13709_v32 = vshrl.u32 %v3678_v54, 7  ;;  %v2220_v54 = vadd.f32 %v13505_v31, %v13519_v24  ;;  %v4024_v20 = vor.u32 %v4023_v25, %v4020_v50  ;;  %v2664_v31 = vadd.f32 %v13531_v33, %v13552_v61 }
 0x304   : > { %v13693_v35 = vpop.f32.mrf.mxu1  ;;  %v2665_v33 = vadd.f32 %v13533_v39, %v13557_v13  ;;  %v2666_v61 = vadd.f32 %v13537_v19, %v13562_v6  ;;  %v2672_v19 = vadd.f32 %v13566_v45, %v13590_v42 }
 0x305   : > { %15331 = vst [vmem:[#allocation59_spill] sm:$0xff] %v13693_v35  ;;  %15338 = vst [vmem:[#allocation66_spill] sm:$0xff] %v13709_v32  ;;  %v2475_v37 = vadd.f32 %v13583_v21, %v2220_v54  ;;  %v15341_v24 = vsub.s32 0, %v13709_v32  ;;  %v15342_v25 = vsub.s32 1, %v13709_v32  ;;  %v4025_v21 = vrot.slane %v4024_v20, 4  ;;  %v15348_v20 = vld [vmem:[#allocation25_spill] sm:$0xff] }
 0x306   : > { %v13697_v15 = vpop.f32.mrf.mxu1  ;;  %v2873_v54 = vadd.f32 %v13625_v0, %v2664_v31  ;;  %v2874_v39 = vadd.f32 %v13629_v48, %v2665_v33  ;;  %v2875_v13 = vadd.f32 %v13633_v9, %v2666_v61  ;;  %v15345_v9 = vld [vmem:[#allocation44_spill] sm:$0xff]  ;;  %v15355_v61 = vld [vmem:[#allocation35_spill] sm:$0xff] }
 0x307   : > { %15333 = vst [vmem:[#allocation61_spill] sm:$0xff] %v13697_v15  ;;  %v13713_v15 = vpop.f32.mrf.mxu0  ;;  %v13740_v51 = vrot.slane %v3676_v47, %v15341_v24  ;;  %v13744_v50 = vrot.slane %v3676_v47, %v15342_v25 }
 0x308   : > { %v13699_v10 = vpop.f32.mrf.mxu1  ;;  %15340 = vst [vmem:[#allocation68_spill] sm:$0xff] %v13713_v15  ;;  %v4027_v15 = vshll.u32 %v13715_v34, 16 }
 0x309   : > { %15334 = vst [vmem:[#allocation62_spill] sm:$0xff] %v13699_v10  ;;  %v13729_v26 = vpop.f32.mrf.mxu0 }
 0x30a   : > { %v13707_v53 = vpop.f32.mrf.mxu1 }
 0x30b   : > { %15337 = vst [vmem:[#allocation65_spill] sm:$0xff] %v13707_v53  ;;  %v13757_v24 = vpop.f32.mrf.mxu0 }
 0x30c   : > { %v13711_v35 = vpop.f32.mrf.mxu1 }
 0x30d   : > { %15339 = vst [vmem:[#allocation67_spill] sm:$0xff] %v13711_v35  ;;  %v2471_v35 = vadd.f32 %v13564_v18, %v2210_v52  ;;  %v2240_v18 = vadd.f32 %v13525_v1, %v13545_v36  ;;  %v4029_v52 = vrot.slane %v4027_v15, 5  ;;  %v2668_v1 = vadd.f32 %v13547_v43, %v13571_v63 }
 0x30e   : > { %v13717_v10 = vpop.f32.mrf.mxu1  ;;  %v2669_v36 = vadd.f32 %v13549_v17, %v13576_v38  ;;  %v2671_v15 = vadd.f32 %v13559_v5, %v2475_v37  ;;  %v2674_v43 = vadd.f32 %v13573_v60, %v13600_v11  ;;  %v3073_v60 = vadd.f32 %v13604_v56, %v2873_v54  ;;  %v13789_v38 = vpop.f32.mrf.mxu0  ;;  %v15344_v56 = vld [vmem:[#allocation63_spill] sm:$0xff]  ;;  %v15354_v54 = vld [vmem:[#allocation48_spill] sm:$0xff] }
 0x30f   : > { %v2667_v47 = vadd.f32 %v13541_v27, %v2471_v35  ;;  %v2673_v27 = vadd.f32 %v13568_v30, %v13595_v57  ;;  %v2483_v17 = vadd.f32 %v13621_v16, %v2240_v18  ;;  %v13782_v6 = vsel %vm12864_vm4, %v4025_v21, %v4029_v52 }
 0x310   : > { %v13725_v53 = vpop.f32.mrf.mxu1  ;;  %v2877_v63 = vadd.f32 %v13641_v40, %v2668_v1  ;;  %v2676_v30 = vadd.f32 %v13585_v46, %v13609_v7  ;;  %v2878_v44 = vadd.f32 %v13645_v29, %v2669_v36  ;;  %v2880_v42 = vadd.f32 %v13653_v8, %v2671_v15  ;;  %v15343_v46 = vld [vmem:[#allocation30_spill] sm:$0xff]  ;;  %v15346_v40 = vld [vmem:[#allocation33_spill] sm:$0xff]  ;;  %v13813_v52 = vpop.f32.mrf.mxu0  ;;  %v15356_v1 = vld [vmem:[#allocation36_spill] sm:$0xff] }
 0x311   : > { %v2876_v45 = vadd.f32 %v13637_v58, %v2667_v47  ;;  %v2677_v57 = vadd.f32 %v13587_v49, %v13614_v28  ;;  %v2881_v16 = vadd.f32 %v13657_v55, %v2672_v19  ;;  %v3263_v35 = vadd.f32 %v13687_v62, %v3073_v60  ;;  %v15347_v29 = vld [vmem:[#allocation29_spill] sm:$0xff]  ;;  %v15350_v28 = vld [vmem:[#allocation46_spill] sm:$0xff]  ;;  %v15352_v62 = vld [vmem:[#allocation32_spill] sm:$0xff] }
 0x312   : > { %v13734_v23 = vpop.f32.mrf.mxu1  ;;  %v3074_v7 = vadd.f32 %v15343_v46, %v2874_v39  ;;  %v15218_v48 = vrot.slane %v15344_v56, 9  ;;  %v2882_v58 = vadd.f32 %v15345_v9, %v2673_v27  ;;  %v2678_v14 = vadd.f32 %v15347_v29, %v15346_v40  ;;  %v15351_v55 = vld [vmem:[#allocation58_spill] sm:$0xff] }
 0x313   : > { %v2679_v8 = vadd.f32 %v15348_v20, %v2483_v17  ;;  %v3075_v37 = vadd.f32 %v15349_v4, %v2875_v13  ;;  %v2883_v31 = vadd.f32 %v15350_v28, %v2674_v43  ;;  %v3076_v18 = vadd.f32 %v15352_v62, %v2876_v45  ;;  %v15358_v19 = vld [vmem:[#allocation50_spill] sm:$0xff]  ;;  %v15359_v43 = vld [vmem:[#allocation59_spill] sm:$0xff]  ;;  %v15361_v45 = vld [vmem:[#allocation49_spill] sm:$0xff]  ;;  %v3457_v4 = vpop.f32.mrf.mxu0 }
 0x314   : > { %v13749_v3 = vpop.f32.mrf.mxu1  ;;  %v3264_v25 = vadd.f32 %v15351_v55, %v3074_v7  ;;  %v3077_v21 = vadd.f32 %v15353_v59, %v2877_v63  ;;  %v2884_v33 = vadd.f32 %v15354_v54, %v2675_v41  ;;  %v3078_v47 = vadd.f32 %v15355_v61, %v2878_v44  ;;  %v15360_v13 = vld [vmem:[#allocation38_spill] sm:$0xff]  ;;  %v15362_v63 = vld [vmem:[#allocation52_spill] sm:$0xff] }
 0x315   : > { %v3079_v36 = vadd.f32 %v15356_v1, %v2879_v22  ;;  %v3080_v15 = vadd.f32 %v15357_v2, %v2880_v42  ;;  %v2885_v27 = vadd.f32 %v15358_v19, %v2676_v30  ;;  %v3265_v17 = vadd.f32 %v15359_v43, %v3075_v37  ;;  %v15363_v41 = vld [vmem:[#allocation54_spill] sm:$0xff]  ;;  %v15364_v44 = vld [vmem:[#allocation56_spill] sm:$0xff]  ;;  %v15365_v22 = vld [vmem:[#allocation39_spill] sm:$0xff] }
 0x316   : > { %v13766_v0 = vpop.f32.mrf.mxu1  ;;  %v3081_v60 = vadd.f32 %v15360_v13, %v2881_v16  ;;  %v3466_v46 = vadd.f32 %v15361_v45, %v3263_v35  ;;  %v2886_v7 = vadd.f32 %v15362_v63, %v2677_v57  ;;  %v2887_v9 = vadd.f32 %v15363_v41, %v2678_v14  ;;  %v15366_v30 = vld [vmem:[#allocation61_spill] sm:$0xff]  ;;  %v15367_v37 = vld [vmem:[#allocation40_spill] sm:$0xff]  ;;  %v15368_v35 = vld [vmem:[#allocation51_spill] sm:$0xff] }
 0x317   : > { %v2888_v40 = vadd.f32 %v15364_v44, %v2679_v8  ;;  %v3082_v29 = vadd.f32 %v15365_v22, %v2882_v58  ;;  %v3266_v20 = vadd.f32 %v15366_v30, %v3076_v18  ;;  %v3083_v16 = vadd.f32 %v15367_v37, %v2883_v31  ;;  %v15369_v62 = vld [vmem:[#allocation62_spill] sm:$0xff]  ;;  %v15370_v57 = vld [vmem:[#allocation65_spill] sm:$0xff]  ;;  %v15371_v14 = vld [vmem:[#allocation67_spill] sm:$0xff] }
 0x318   : > { %v13778_v5 = vpop.f32.mrf.mxu1  ;;  %v3467_v55 = vadd.f32 %v15368_v35, %v3264_v25  ;;  %v3267_v59 = vadd.f32 %v15369_v62, %v3077_v21  ;;  %v3268_v54 = vadd.f32 %v15370_v57, %v3078_v47  ;;  %v3269_v61 = vadd.f32 %v15371_v14, %v3079_v36  ;;  %v15372_v8 = vld [vmem:[#allocation41_spill] sm:$0xff]  ;;  %v15373_v2 = vld [vmem:[#allocation42_spill] sm:$0xff]  ;;  %v15377_v41 = vld [vmem:[#allocation47_spill] sm:$0xff] }
 0x319   : > { %v3084_v1 = vadd.f32 %v15372_v8, %v2884_v33  ;;  %v3085_v19 = vadd.f32 %v15373_v2, %v2885_v27  ;;  %v15374_v13 = vld [vmem:[#allocation53_spill] sm:$0xff]  ;;  %v3270_v31 = vadd.f32 %v13717_v10, %v3080_v15  ;;  %v3088_v47 = vadd.f32 %v15377_v41, %v2888_v40  ;;  %v3459_v33 = vpop.f32.mrf.mxu0  ;;  %v15380_v15 = vld [vmem:[#allocation60_spill] sm:$0xff] }
 0x31a   : > { %v13796_v11 = vpop.f32.mrf.mxu1  ;;  %v3468_v45 = vadd.f32 %v15374_v13, %v3265_v17  ;;  %v15376_v63 = vld [vmem:[#allocation45_spill] sm:$0xff]  ;;  %v3271_v36 = vadd.f32 %v13725_v53, %v3081_v60  ;;  %v3272_v37 = vadd.f32 %v13734_v23, %v3082_v29  ;;  %v15381_v35 = vld [vmem:[#allocation64_spill] sm:$0xff]  ;;  %v3273_v60 = vadd.f32 %v13749_v3, %v3083_v16 }
 0x31b   : > { %v3087_v21 = vadd.f32 %v15376_v63, %v2887_v9  ;;  %v3472_v9 = vadd.f32 %v15381_v35, %v3269_v61  ;;  %v3274_v57 = vadd.f32 %v13766_v0, %v3084_v1  ;;  %v15382_v23 = vld [vmem:[#allocation68_spill] sm:$0xff]  ;;  %v3461_v8 = vpop.f32.mrf.mxu0  ;;  %v15411_v32 = vrot.slane %v15344_v56, 9 }
 0x31c   : > { %v13807_v49 = vpop.f32.mrf.mxu1  ;;  %v3473_v29 = vadd.f32 %v15382_v23, %v3270_v31  ;;  %v3474_v61 = vadd.f32 %v13729_v26, %v3271_v36  ;;  %v3476_v13 = vadd.f32 %v13789_v38, %v3273_v60 }
 0x31e   : > { %v3260_v39 = vpop.f32.mrf.mxu1 }
 0x320   : > { %v3621_v42 = vpop.f32.mrf.mxu1 }
 0x321   : > { %v3660_v28 = vadd.f32 %v3621_v42, %v3466_v46  ;;  %v15375_v46 = vld [vmem:[#allocation43_spill] sm:$0xff] }
 0x322   : > { %v3623_v58 = vpop.f32.mrf.mxu1  ;;  %v3086_v25 = vadd.f32 %v15375_v46, %v2886_v7  ;;  %v15378_v42 = vld [vmem:[#allocation55_spill] sm:$0xff]  ;;  %v3471_v7 = vadd.f32 %v15380_v15, %v3268_v54 }
 0x323   : > { %v3688_v43 = vadd.f32 %v13740_v51, %v3660_v28  ;;  %v3661_v18 = vadd.f32 %v3623_v58, %v3467_v55  ;;  %v3469_v30 = vadd.f32 %v15378_v42, %v3266_v20  ;;  %v15379_v28 = vld [vmem:[#allocation57_spill] sm:$0xff]  ;;  %v3275_v20 = vadd.f32 %v13778_v5, %v3085_v19 }
 0x324   : > { %v3625_v44 = vpop.f32.mrf.mxu1  ;;  %v3470_v10 = vadd.f32 %v15379_v28, %v3267_v59  ;;  %v3276_v2 = vadd.f32 %v13796_v11, %v3086_v25  ;;  %v3475_v5 = vadd.f32 %v13757_v24, %v3272_v37  ;;  %v3463_v24 = vpop.f32.mrf.mxu0 }
 0x325   : > { %v3689_v22 = vadd.f32 %v13744_v50, %v3661_v18  ;;  %v3662_v27 = vadd.f32 %v3625_v44, %v3468_v45  ;;  %v3704_v55 = vmax.f32 %v3688_v43, 0.0  ;;  %v3277_v43 = vadd.f32 %v13807_v49, %v3087_v21 }
 0x326   : > { %v3627_v17 = vpop.f32.mrf.mxu1  ;;  %v3278_v18 = vadd.f32 %v3260_v39, %v3088_v47  ;;  %v3477_v45 = vadd.f32 %v13813_v52, %v3274_v57  ;;  %v13873_v31 = vadd.f32 %v3457_v4, %v3275_v20  ;;  %v3888_v52 = vld [vmem:[#allocation3 + $0x18] sm:$0x11] }
 0x327   : > { %v3705_v40 = vmax.f32 %v3689_v22, 0.0  ;;  %v3690_v62 = vadd.f32 %v13740_v51, %v3662_v27  ;;  %v3663_v53 = vadd.f32 %v3627_v17, %v3469_v30  ;;  %v13892_v22 = vadd.f32 %v3459_v33, %v3276_v2 }
 0x328   : > { %v3631_v14 = vpop.f32.mrf.mxu1  ;;  %v13894_v27 = vadd.f32 %v3461_v8, %v3277_v43  ;;  %v13896_v42 = vadd.f32 %v3463_v24, %v3278_v18 }
 0x329   : > { %v10822_v59 = vpack.c.bf16 %v3705_v40, %v3704_v55  ;;  %v3691_v54 = vadd.f32 %v13744_v50, %v3663_v53  ;;  %v3664_v58 = vadd.f32 %v3631_v14, %v3470_v10  ;;  %v3706_v26 = vmax.f32 %v3690_v62, 0.0  ;;  %v3894_v53 = vld [vmem:[#allocation3 + $0x68] sm:$0x11] }
 0x32a   : > { %v3633_v0 = vpop.f32.mrf.mxu1 }
 0x32b   : > { %v3797_v16 = vshrl.u32 %v10822_v59, 16  ;;  %v3707_v11 = vmax.f32 %v3691_v54, 0.0  ;;  %v3692_v49 = vadd.f32 %v13740_v51, %v3664_v58  ;;  %v3665_v39 = vadd.f32 %v3633_v0, %v3471_v7 }
 0x32c   : > { %v3635_v19 = vpop.f32.mrf.mxu1  ;;  %v3800_v25 = vshll.u32 %v10822_v59, 16 }
 0x32d   : > { %v3799_v46 = vrot.slane %v3797_v16, 7  ;;  %v10823_v41 = vpack.c.bf16 %v3707_v11, %v3706_v26  ;;  %v3666_v47 = vadd.f32 %v3635_v19, %v3472_v9  ;;  %v3693_v4 = vadd.f32 %v13744_v50, %v3665_v39  ;;  %v3900_v19 = vld [vmem:[#allocation3 + $0x80] sm:$0x11] }
 0x32e   : > { %v3637_v36 = vpop.f32.mrf.mxu1  ;;  %v3708_v28 = vmax.f32 %v3692_v49, 0.0 }
 0x32f   : > { %v3802_v30 = vor.u32 %v3800_v25, %v3799_v46  ;;  %v3803_v37 = vrot.slane %v3799_v46, 4  ;;  %v3805_v17 = vshrl.u32 %v10823_v41, 16  ;;  %v3808_v10 = vshll.u32 %v10823_v41, 16 }
 0x330   : > { %v3709_v15 = vmax.f32 %v3693_v4, 0.0  ;;  %v3694_v7 = vadd.f32 %v13740_v51, %v3666_v47  ;;  %v3667_v35 = vadd.f32 %v3637_v36, %v3473_v29  ;;  %v3641_v9 = vpop.f32.mrf.mxu1 }
 0x331   : > { %v13902_v55 = vsel %vm13879_vm3, %v3802_v30, %v15344_v56  ;;  %v3889_v33 = vsel %vm13887_vm5, %v3803_v37, %v3888_v52  ;;  %v3807_v40 = vrot.slane %v3805_v17, 7  ;;  %v3668_v62 = vadd.f32 %v3641_v9, %v3474_v61 }
 0x332   : > { %3890 = vst [vmem:[#allocation3 + $0x18] sm:$0x11] %v3889_v33  ;;  %v10824_v60 = vpack.c.bf16 %v3709_v15, %v3708_v28  ;;  %v3710_v57 = vmax.f32 %v3694_v7, 0.0  ;;  %v3695_v20 = vadd.f32 %v13744_v50, %v3667_v35  ;;  %v3643_v14 = vpop.f32.mrf.mxu1  ;;  %v4032_v23 = vshrl.u32 %v13902_v55, 16  ;;  %v3906_v7 = vld [vmem:[#allocation3 + $0x88] sm:$0x11] }
 0x333   : > { %v3810_v29 = vor.u32 %v3808_v10, %v3807_v40  ;;  %v3811_v8 = vrot.slane %v3807_v40, 4  ;;  %v3696_v59 = vadd.f32 %v13740_v51, %v3668_v62  ;;  %v3669_v54 = vadd.f32 %v3643_v14, %v3475_v5 }
 0x334   : > { %v3813_v58 = vshrl.u32 %v10824_v60, 16  ;;  %v3816_v2 = vshll.u32 %v10824_v60, 16  ;;  %v3711_v43 = vmax.f32 %v3695_v20, 0.0  ;;  %v3645_v18 = vpop.f32.mrf.mxu1  ;;  %v4034_v3 = vrot.slane %v4032_v23, 4 }
 0x335   : > { %v13912_v61 = vsel %vm13879_vm3, %v3810_v29, %v15344_v56  ;;  %v3895_v0 = vsel %vm13887_vm5, %v3811_v8, %v3894_v53  ;;  %v3712_v16 = vmax.f32 %v3696_v59, 0.0  ;;  %v3697_v1 = vadd.f32 %v13744_v50, %v3669_v54  ;;  %v3912_v54 = vld [vmem:[#allocation3 + $0x40] sm:$0x11] }
 0x336   : > { %3896 = vst [vmem:[#allocation3 + $0x68] sm:$0x11] %v3895_v0  ;;  %v3815_v26 = vrot.slane %v3813_v58, 7  ;;  %v10825_v11 = vpack.c.bf16 %v3711_v43, %v3710_v57  ;;  %v3670_v5 = vadd.f32 %v3645_v18, %v3476_v13  ;;  %v3647_v49 = vpop.f32.mrf.mxu1  ;;  %v4035_v39 = vshll.u32 %v13902_v55, 16 }
 0x337   : > { %v3713_v24 = vmax.f32 %v3697_v1, 0.0  ;;  %v3671_v46 = vadd.f32 %v3647_v49, %v3477_v45  ;;  %v4046_v25 = vshrl.u32 %v13912_v61, 16  ;;  %v4049_v63 = vshll.u32 %v13912_v61, 16 }
 0x338   : > { %v3818_v41 = vor.u32 %v3816_v2, %v3815_v26  ;;  %v3819_v47 = vrot.slane %v3815_v26, 4  ;;  %v3821_v44 = vshrl.u32 %v10825_v11, 16  ;;  %v3824_v52 = vshll.u32 %v10825_v11, 16  ;;  %v3651_v4 = vpop.f32.mrf.mxu1 }
 0x339   : > { %v10826_v36 = vpack.c.bf16 %v3713_v24, %v3712_v16  ;;  %v3698_v30 = vadd.f32 %v13740_v51, %v3670_v5  ;;  %v3699_v13 = vadd.f32 %v13744_v50, %v3671_v46  ;;  %v3672_v37 = vadd.f32 %v3651_v4, %v13873_v31  ;;  %v3918_v46 = vld [vmem:[#allocation3 + $0x10] sm:$0x11] }
 0x33a   : > { %v13926_v45 = vsel %vm13879_vm3, %v3818_v41, %v15344_v56  ;;  %v3901_v17 = vsel %vm13887_vm5, %v3819_v47, %v3900_v19  ;;  %v3823_v28 = vrot.slane %v3821_v44, 7  ;;  %v3653_v10 = vpop.f32.mrf.mxu1  ;;  %v4037_v15 = vrot.slane %v4035_v39, 5 }
 0x33b   : > { %3902 = vst [vmem:[#allocation3 + $0x80] sm:$0x11] %v3901_v17  ;;  %v3829_v35 = vshrl.u32 %v10826_v36, 16  ;;  %v3832_v9 = vshll.u32 %v10826_v36, 16  ;;  %v3714_v33 = vmax.f32 %v3698_v30, 0.0  ;;  %v3715_v40 = vmax.f32 %v3699_v13, 0.0 }
 0x33c   : > { %v3826_v62 = vor.u32 %v3824_v52, %v3823_v28  ;;  %v3827_v53 = vrot.slane %v3823_v28, 4  ;;  %v3700_v31 = vadd.f32 %v13740_v51, %v3672_v37  ;;  %v3673_v60 = vadd.f32 %v3653_v10, %v13892_v22  ;;  %v3655_v57 = vpop.f32.mrf.mxu1  ;;  %v13941_v22 = vld [vmem:[#allocation3 + $0x18] sm:$0x11] }
 0x33d   : > { %v3831_v20 = vrot.slane %v3829_v35, 7  ;;  %v10827_v14 = vpack.c.bf16 %v3715_v40, %v3714_v33  ;;  %v3674_v23 = vadd.f32 %v3655_v57, %v13894_v27  ;;  %v4038_v29 = vor.u32 %v4037_v15, %v4034_v3  ;;  %v13953_v24 = vld [vmem:[#allocation3 + $0x68] sm:$0x11]  ;;  %v3924_v15 = vld [vmem:[#allocation3 + $0x60] sm:$0x11] }
 0x33e   : > { %v13936_v8 = vsel %vm13879_vm3, %v3826_v62, %v15344_v56  ;;  %v3907_v59 = vsel %vm13887_vm5, %v3827_v53, %v3906_v7  ;;  %v3716_v58 = vmax.f32 %v3700_v31, 0.0  ;;  %v3701_v2 = vadd.f32 %v13744_v50, %v3673_v60  ;;  %v3657_v43 = vpop.f32.mrf.mxu1  ;;  %v11504_v62 = vld [vmem:[#allocation12 + $0xc4] ss:$16 sps:$4 sm:$0xff]   ;;  %v11507_v31 = vld [vmem:[#allocation12 + $0xcc] ss:$16 sps:$4 sm:$0xff]  }
 0x33f   : > { %3908 = vst [vmem:[#allocation3 + $0x88] sm:$0x11] %v3907_v59  ;;  %v3834_v18 = vor.u32 %v3832_v9, %v3831_v20  ;;  %v3835_v0 = vrot.slane %v3831_v20, 4  ;;  %v3837_v27 = vshrl.u32 %v10827_v14, 16  ;;  %v3840_v3 = vshll.u32 %v10827_v14, 16 }
 0x340   : > { %v3717_v16 = vmax.f32 %v3701_v2, 0.0  ;;  %v3702_v1 = vadd.f32 %v13740_v51, %v3674_v23  ;;  %v3675_v26 = vadd.f32 %v3657_v43, %v13896_v42  ;;  %v4039_v11 = vrot.slane %v4038_v29, 4  ;;  %v3930_v2 = vld [vmem:[#allocation3 + $0x48] sm:$0x11] }
 0x341   : > { %v13948_v5 = vsel %vm13879_vm3, %v3834_v18, %v15344_v56  ;;  %v3913_v49 = vsel %vm13887_vm5, %v3835_v0, %v3912_v54  ;;  %v3839_v39 = vrot.slane %v3837_v27, 7  ;;  %v4041_v19 = vshll.u32 %v13941_v22, 16 }
 0x342   : > { %3914 = vst [vmem:[#allocation3 + $0x40] sm:$0x11] %v3913_v49  ;;  %v10828_v41 = vpack.c.bf16 %v3717_v16, %v3716_v58  ;;  %v3718_v51 = vmax.f32 %v3702_v1, 0.0  ;;  %v3703_v42 = vadd.f32 %v13744_v50, %v3675_v26  ;;  %v4048_v47 = vrot.slane %v4046_v25, 4  ;;  %v11496_v25 = vld [vmem:[#allocation12 + $0xe0] ss:$16 sps:$4 sm:$0xff]  }
 0x343   : > { %v3842_v44 = vor.u32 %v3840_v3, %v3839_v39  ;;  %v3843_v52 = vrot.slane %v3839_v39, 4  ;;  %v4043_v4 = vrot.slane %v4041_v19, 5  ;;  %v4051_v36 = vrot.slane %v4049_v63, 5  ;;  %v11499_v63 = vld [vmem:[#allocation12 + $0xe8] ss:$16 sps:$4 sm:$0xff]  }
 0x344   : > { %v3845_v30 = vshrl.u32 %v10828_v41, 16  ;;  %v3848_v13 = vshll.u32 %v10828_v41, 16  ;;  %v3719_v37 = vmax.f32 %v3703_v42, 0.0  ;;  %v4055_v17 = vshll.u32 %v13953_v24, 16  ;;  %v13972_v53 = vld [vmem:[#allocation3 + $0x80] sm:$0x11] }
 0x345   : > { %v13960_v28 = vsel %vm13879_vm3, %v3842_v44, %v15344_v56  ;;  %v3919_v10 = vsel %vm13887_vm5, %v3843_v52, %v3918_v46  ;;  %v13966_v50 = vsel %vm12864_vm4, %v4039_v11, %v4043_v4  ;;  %v4052_v7 = vor.u32 %v4051_v36, %v4048_v47  ;;  %v11502_v58 = vld [vmem:[#allocation12 + $0xc0] ss:$16 sps:$4 sm:$0xff]   ;;  %v11505_v26 = vld [vmem:[#allocation12 + $0xc8] ss:$16 sps:$4 sm:$0xff]   ;;  %v11510_v49 = vld [vmem:[#allocation12 + $0xa4] ss:$16 sps:$4 sm:$0xff]  }
 0x346   : > { %3920 = vst [vmem:[#allocation3 + $0x10] sm:$0x11] %v3919_v10  ;;  %v3847_v35 = vrot.slane %v3845_v30, 7  ;;  %v10829_v9 = vpack.c.bf16 %v3719_v37, %v3718_v51  ;;  %v10142_v33 = vcombine.low %v13782_v6, %v13966_v50  ;;  %v10143_v40 = vcombine.high %v13782_v6, %v13966_v50  ;;  %v13981_v27 = vld [vmem:[#allocation3 + $0x88] sm:$0x11] }
 0x347   : > { %v4053_v60 = vrot.slane %v4052_v7, 4  ;;  %v4057_v57 = vrot.slane %v4055_v17, 5  ;;  %v4060_v20 = vshrl.u32 %v13926_v45, 16  ;;  %v4063_v14 = vshll.u32 %v13926_v45, 16  ;;  %v11513_v46 = vld [vmem:[#allocation12 + $0xac] ss:$16 sps:$4 sm:$0xff]  }
 0x348   : > { %v3850_v23 = vor.u32 %v3848_v13, %v3847_v35  ;;  %v3851_v29 = vrot.slane %v3847_v35, 4  ;;  %v3853_v59 = vshrl.u32 %v10829_v9, 16  ;;  %v3856_v54 = vshll.u32 %v10829_v9, 16  ;;  %4578 = vmatprep.mubr.bf16.mxu0 %v10143_v40  ;;  %4651 = vmatprep.mubr.bf16.mxu1 %v10143_v40  ;;  %v11508_v35 = vld [vmem:[#allocation12 + $0xa0] ss:$16 sps:$4 sm:$0xff]  }
 0x349   : > { %4579 = vmatmul.mubr.bf16.vlgmr.msra.gmra.mxu0 %v10142_v33  ;;  %4652 = vmatmul.mubr.bf16.vlgmr.msra.gmra.mxu1 %v10142_v33  ;;  %v13978_v6 = vsel %vm12864_vm4, %v4053_v60, %v4057_v57  ;;  %v4062_v43 = vrot.slane %v4060_v20, 4  ;;  %v4065_v18 = vrot.slane %v4063_v14, 5  ;;  %v4069_v0 = vshll.u32 %v13972_v53, 16  ;;  %v13997_v44 = vld [vmem:[#allocation3 + $0x40] sm:$0x11] }
 0x34a   : > { %v13986_v3 = vsel %vm13879_vm3, %v3850_v23, %v15344_v56  ;;  %v3925_v16 = vsel %vm13887_vm5, %v3851_v29, %v3924_v15  ;;  %v3855_v1 = vrot.slane %v3853_v59, 7  ;;  %5053 = vmatpush1.bf16.msra.mxu0 %v11496_v25  ;;  %5126 = vmatpush1.bf16.msra.mxu1 %v11499_v63  ;;  %v13992_v11 = vcombine.low %v13966_v50, %v13978_v6  ;;  %v11511_v40 = vld [vmem:[#allocation12 + $0xa8] ss:$16 sps:$4 sm:$0xff]   ;;  %v11519_v57 = vld [vmem:[#allocation12 + $0x8c] ss:$16 sps:$4 sm:$0xff]  }
 0x34b   : > { %3923 = vst [vmem:[#allocation3 + $0x98] sm:$0xff] %v13986_v3  ;;  %3926 = vst [vmem:[#allocation3 + $0x60] sm:$0x11] %v3925_v16  ;;  %5054 = vmatprep.subr.bf16.mxu0 %v11504_v62  ;;  %5127 = vmatprep.subr.bf16.mxu1 %v11507_v31  ;;  %v4066_v39 = vor.u32 %v4065_v18, %v4062_v43  ;;  %v4071_v19 = vrot.slane %v4069_v0, 5  ;;  %v4074_v41 = vshrl.u32 %v13936_v8, 16  ;;  %v4077_v51 = vshll.u32 %v13936_v8, 16 }
 0x34c   : > { %v3858_v42 = vor.u32 %v3856_v54, %v3855_v1  ;;  %v3859_v47 = vrot.slane %v3855_v1, 4  ;;  %v4083_v52 = vshll.u32 %v13981_v27, 16  ;;  %v4088_v4 = vshrl.u32 %v13948_v5, 16  ;;  %v11516_v62 = vld [vmem:[#allocation12 + $0x84] ss:$16 sps:$4 sm:$0xff]  }
 0x34d   : > { %v4067_v36 = vrot.slane %v4066_v39, 4  ;;  %v4076_v30 = vrot.slane %v4074_v41, 4  ;;  %v4079_v13 = vrot.slane %v4077_v51, 5  ;;  %v4091_v37 = vshll.u32 %v13948_v5, 16  ;;  %v14007_v25 = vld [vmem:[#allocation3 + $0x10] sm:$0x11] }
 0x34e   : > { %v3928_v17 = vsel %vm13879_vm3, %v3858_v42, %v15344_v56  ;;  %v3931_v10 = vsel %vm13887_vm5, %v3859_v47, %v3930_v2  ;;  %5055 = vmatpush1.bf16.msra.mxu0 %v11502_v58  ;;  %5128 = vmatpush1.bf16.msra.mxu1 %v11505_v26  ;;  %v4090_v15 = vrot.slane %v4088_v4, 4  ;;  %v5208_v63 = vrot.slane %v13715_v34, 5  ;;  %v11514_v18 = vld [vmem:[#allocation12 + $0x80] ss:$16 sps:$4 sm:$0xff]   ;;  %v11517_v39 = vld [vmem:[#allocation12 + $0x88] ss:$16 sps:$4 sm:$0xff]  }
 0x34f   : > { %3929 = vst [vmem:[#allocation3 + $0x20] sm:$0xff] %v3928_v17  ;;  %3932 = vst [vmem:[#allocation3 + $0x48] sm:$0x11] %v3931_v10  ;;  %v14012_v7 = vsel %vm12864_vm4, %v4067_v36, %v4071_v19  ;;  %5056 = vmatprep.subr.bf16.mxu0 %v11510_v49  ;;  %5129 = vmatprep.subr.bf16.mxu1 %v11513_v46  ;;  %v4080_v21 = vor.u32 %v4079_v13, %v4076_v30  ;;  %v4093_v9 = vrot.slane %v4091_v37, 5  ;;  %v11522_v30 = vld [vmem:[#allocation12 + $0x64] ss:$16 sps:$4 sm:$0xff]  }
 0x350   : > { %v4097_v38 = vshll.u32 %v13997_v44, 16  ;;  %v14017_v33 = vcombine.high %v13978_v6, %v14012_v7  ;;  %v14021_v34 = vcombine.low %v13978_v6, %v14012_v7  ;;  %v4102_v31 = vshrl.u32 %v13960_v28, 16  ;;  %v11525_v13 = vld [vmem:[#allocation12 + $0x6c] ss:$16 sps:$4 sm:$0xff]   ;;  %v11556_v26 = vld [vmem:[#allocation12 + $0x1a0] ss:$16 sps:$4 sm:$0xff]  }
 0x351   : > { %v4105_v60 = vshll.u32 %v13960_v28, 16  ;;  %v4085_v20 = vrot.slane %v4083_v52, 5  ;;  %v4094_v14 = vor.u32 %v4093_v9, %v4090_v15  ;;  %v4111_v29 = vshll.u32 %v14007_v25, 16  ;;  %v11520_v15 = vld [vmem:[#allocation12 + $0x60] ss:$16 sps:$4 sm:$0xff]  }
 0x352   : > { %15393 = vst [vmem:[#allocation30_spill] sm:$0xff] %v14017_v33  ;;  %15394 = vst [vmem:[#allocation63_spill] sm:$0xff] %v14021_v34  ;;  %v4099_v23 = vrot.slane %v4097_v38, 5  ;;  %4588 = vmatprep.mubr.bf16.mxu0 %v14017_v33  ;;  %4661 = vmatprep.mubr.bf16.mxu1 %v14017_v33  ;;  %v14028_v59 = vld [vmem:[#allocation3 + $0x60] sm:$0x11]  ;;  %v4104_v54 = vrot.slane %v4102_v31, 4  ;;  %v5209_v49 = vsel %vm12958_vm7, %v15218_v48, %v5208_v63 }
 0x353   : > { %v4107_v58 = vrot.slane %v4105_v60, 5  ;;  %v4116_v2 = vshrl.u32 %v13986_v3, 16  ;;  %v4119_v43 = vshll.u32 %v13986_v3, 16  ;;  %4589 = vmatmul.mubr.bf16.gmra.mxu0 %v14021_v34  ;;  %4662 = vmatmul.mubr.bf16.gmra.mxu1 %v14021_v34  ;;  %v4081_v0 = vrot.slane %v4080_v21, 4  ;;  %v11523_v38 = vld [vmem:[#allocation12 + $0x68] ss:$16 sps:$4 sm:$0xff]  }
 0x354   : > { %v4095_v16 = vrot.slane %v4094_v14, 4  ;;  %v4125_v1 = vshll.u32 %v14028_v59, 16  ;;  %5057 = vmatpush1.bf16.msra.mxu0 %v11508_v35  ;;  %5130 = vmatpush1.bf16.msra.mxu1 %v11511_v40  ;;  %v4113_v46 = vrot.slane %v4111_v29, 5  ;;  %v14049_v4 = vcombine.high %v13912_v61, %v13926_v45  ;;  %v11528_v40 = vld [vmem:[#allocation12 + $0x44] ss:$16 sps:$4 sm:$0xff]  }
 0x355   : > { %v4108_v19 = vor.u32 %v4107_v58, %v4104_v54  ;;  %v4118_v41 = vrot.slane %v4116_v2, 4  ;;  %v4121_v51 = vrot.slane %v4119_v43, 5  ;;  %5058 = vmatprep.subr.bf16.mxu0 %v11516_v62  ;;  %5131 = vmatprep.subr.bf16.mxu1 %v11519_v57  ;;  %v14041_v42 = vsel %vm12864_vm4, %v4081_v0, %v4085_v20  ;;  %v11531_v20 = vld [vmem:[#allocation12 + $0x4c] ss:$16 sps:$4 sm:$0xff]  }
 0x356   : > { %v14045_v47 = vsel %vm12864_vm4, %v4095_v16, %v4099_v23  ;;  %v4127_v52 = vrot.slane %v4125_v1, 5  ;;  %v14061_v63 = vcombine.low %v13912_v61, %v13926_v45  ;;  %v14065_v35 = vcombine.high %v13936_v8, %v13948_v5  ;;  %v11529_v16 = vld [vmem:[#allocation12 + $0x48] ss:$16 sps:$4 sm:$0xff]   ;;  %v11885_v34 = vld [vmem:[#allocation12 + $0xaec] ss:$16 sps:$4 sm:$0xff]  }
 0x357   : > { %v14053_v36 = vcombine.high %v14041_v42, %v14045_v47  ;;  %v14057_v37 = vcombine.low %v14041_v42, %v14045_v47  ;;  %v4109_v17 = vrot.slane %v4108_v19, 4  ;;  %v4122_v10 = vor.u32 %v4121_v51, %v4118_v41  ;;  %v11534_v41 = vld [vmem:[#allocation12 + $0x24] ss:$16 sps:$4 sm:$0xff]   ;;  %v11537_v51 = vld [vmem:[#allocation12 + $0x2c] ss:$16 sps:$4 sm:$0xff]  }
 0x358   : > { %15398 = vst [vmem:[#allocation29_spill] sm:$0xff] %v14061_v63  ;;  %15399 = vst [vmem:[#allocation25_spill] sm:$0xff] %v14065_v35  ;;  %v14069_v21 = vcombine.low %v13936_v8, %v13948_v5  ;;  %v14073_v9 = vcombine.high %v13960_v28, %v13986_v3  ;;  %5059 = vmatpush1.bf16.msra.mxu0 %v11514_v18  ;;  %5132 = vmatpush1.bf16.msra.mxu1 %v11517_v39  ;;  %v10287_v57 = vrot.slane %v13902_v55, 9 }
 0x359   : > { %15396 = vst [vmem:[#allocation44_spill] sm:$0xff] %v14053_v36  ;;  %15397 = vst [vmem:[#allocation33_spill] sm:$0xff] %v14057_v37  ;;  %v14077_v62 = vsel %vm12864_vm4, %v4109_v17, %v4113_v46  ;;  %v4123_v31 = vrot.slane %v4122_v10, 4  ;;  %v14081_v60 = vcombine.low %v13960_v28, %v13986_v3  ;;  %4598 = vmatprep.mubr.bf16.mxu0 %v14053_v36  ;;  %4671 = vmatprep.mubr.bf16.mxu1 %v14053_v36  ;;  %v11882_v36 = vld [vmem:[#allocation12 + $0xae4] ss:$16 sps:$4 sm:$0xff]  }
 0x35a   : > { %15400 = vst [vmem:[#allocation31_spill] sm:$0xff] %v14069_v21  ;;  %15401 = vst [vmem:[#allocation46_spill] sm:$0xff] %v14073_v9  ;;  %v5212_v14 = vrot.slane %v13941_v22, 5  ;;  %v10288_v23 = vrot.slane %v13912_v61, 9  ;;  %v5216_v29 = vrot.slane %v13953_v24, 5  ;;  %v10289_v54 = vrot.slane %v13926_v45, 9  ;;  %5060 = vmatprep.subr.bf16.mxu0 %v11522_v30  ;;  %5133 = vmatprep.subr.bf16.mxu1 %v11525_v13 }
 0x35b   : > { %15402 = vst [vmem:[#allocation58_spill] sm:$0xff] %v14081_v60  ;;  %v14092_v58 = vsel %vm12864_vm4, %v4123_v31, %v4127_v52  ;;  %v5220_v2 = vrot.slane %v13972_v53, 5  ;;  %v10290_v43 = vrot.slane %v13936_v8, 9  ;;  %v5224_v18 = vrot.slane %v13981_v27, 5  ;;  %4599 = vmatmul.mubr.bf16.gmra.mxu0 %v14057_v37  ;;  %4672 = vmatmul.mubr.bf16.gmra.mxu1 %v14057_v37  ;;  %v11526_v27 = vld [vmem:[#allocation12 + $0x40] ss:$16 sps:$4 sm:$0xff]  }
 0x35c   : > { %v14101_v22 = vcombine.high %v14077_v62, %v14092_v58  ;;  %v14105_v24 = vcombine.low %v14077_v62, %v14092_v58  ;;  %v14109_v0 = vsel %vm12958_vm7, %v10287_v57, %v5212_v14  ;;  %v10291_v53 = vrot.slane %v13948_v5, 9  ;;  %5061 = vmatpush1.bf16.msra.mxu0 %v11520_v15  ;;  %5134 = vmatpush1.bf16.msra.mxu1 %v11523_v38  ;;  %v11535_v14 = vld [vmem:[#allocation12 + $0x28] ss:$16 sps:$4 sm:$0xff]   ;;  %v11879_v37 = vld [vmem:[#allocation12 + $0x90c] ss:$16 sps:$4 sm:$0xff]  }
 0x35d   : > { %v14113_v1 = vcombine.low %v5209_v49, %v14109_v0  ;;  %v14116_v39 = vcombine.high %v5209_v49, %v14109_v0  ;;  %v5217_v19 = vsel %vm12958_vm7, %v10288_v23, %v5216_v29  ;;  %v5228_v46 = vrot.slane %v13997_v44, 5  ;;  %5062 = vmatprep.subr.bf16.mxu0 %v11528_v40  ;;  %5135 = vmatprep.subr.bf16.mxu1 %v11531_v20  ;;  %v11532_v20 = vld [vmem:[#allocation12 + $0x20] ss:$16 sps:$4 sm:$0xff]  }
 0x35e   : > { %15403 = vst [vmem:[#allocation32_spill] sm:$0xff] %v14101_v22  ;;  %15404 = vst [vmem:[#allocation34_spill] sm:$0xff] %v14105_v24  ;;  %v5221_v52 = vsel %vm12958_vm7, %v10289_v54, %v5220_v2  ;;  %v14124_v30 = vcombine.low %v14109_v0, %v5217_v19  ;;  %v5225_v13 = vsel %vm12958_vm7, %v10290_v43, %v5224_v18  ;;  %v10292_v49 = vrot.slane %v13960_v28, 9  ;;  %v3952_v54 = vld [vmem:[#allocation3 + $0x90] sm:$0x11] }
 0x35f   : > { %4608 = vmatprep.mubr.bf16.mxu0 %v14101_v22  ;;  %4681 = vmatprep.mubr.bf16.mxu1 %v14101_v22  ;;  %v14131_v44 = vcombine.high %v5217_v19, %v5221_v52  ;;  %v14133_v17 = vcombine.low %v5217_v19, %v5221_v52  ;;  %v5229_v10 = vsel %vm12958_vm7, %v10291_v53, %v5228_v46  ;;  %v5232_v15 = vrot.slane %v14007_v25, 5  ;;  %v11540_v43 = vld [vmem:[#allocation12 + $0x4] ss:$16 sps:$4 sm:$0xff]   ;;  %v11543_v18 = vld [vmem:[#allocation12 + $0xc] ss:$16 sps:$4 sm:$0xff]  }
 0x360   : > { %v14138_v38 = vcombine.high %v5225_v13, %v5229_v10  ;;  %v14140_v40 = vcombine.low %v5225_v13, %v5229_v10  ;;  %v10293_v31 = vrot.slane %v13986_v3, 9  ;;  %v5236_v57 = vrot.slane %v14028_v59, 5  ;;  %5063 = vmatpush1.bf16.msra.mxu0 %v11526_v27  ;;  %5136 = vmatpush1.bf16.msra.mxu1 %v11529_v16  ;;  %v11876_v22 = vld [vmem:[#allocation12 + $0x904] ss:$16 sps:$4 sm:$0xff]  }
 0x361   : > { %15405 = vst [vmem:[#allocation48_spill] sm:$0xff] %v14131_v44  ;;  %15406 = vst [vmem:[#allocation35_spill] sm:$0xff] %v14133_v17  ;;  %v5233_v23 = vsel %vm12958_vm7, %v10292_v49, %v5232_v15  ;;  %v14148_v29 = vcombine.high %v13902_v55, %v13912_v61  ;;  %v14152_v25 = vcombine.low %v13902_v55, %v13912_v61  ;;  %5064 = vmatprep.subr.bf16.mxu0 %v11534_v41  ;;  %v11541_v49 = vld [vmem:[#allocation12 + $0x8] ss:$16 sps:$4 sm:$0xff]  }
 0x362   : > { %15407 = vst [vmem:[#allocation36_spill] sm:$0xff] %v14138_v38  ;;  %15408 = vst [vmem:[#allocation37_spill] sm:$0xff] %v14140_v40  ;;  %5137 = vmatprep.subr.bf16.mxu1 %v11537_v51  ;;  %v5237_v3 = vsel %vm12958_vm7, %v10293_v31, %v5236_v57  ;;  %v14158_v59 = vcombine.high %v13926_v45, %v13936_v8  ;;  %v14162_v2 = vcombine.low %v13926_v45, %v13936_v8  ;;  %v14180_v8 = vld [vmem:[#allocation3 + $0x20] sm:$0xff]  ;;  %v11538_v51 = vld [vmem:[#allocation12] ss:$16 sps:$4 sm:$0xff]  }
 0x363   : > { %v14164_v53 = vcombine.high %v5233_v23, %v5237_v3  ;;  %v14166_v61 = vcombine.low %v5233_v23, %v5237_v3  ;;  %v14170_v27 = vcombine.high %v13948_v5, %v13960_v28  ;;  %v14174_v16 = vcombine.low %v13948_v5, %v13960_v28  ;;  %4609 = vmatmul.mubr.bf16.gmra.mxu0 %v14105_v24  ;;  %v3950_v31 = vld [vmem:[#allocation3 + $0x48] sm:$0x11] }
 0x364   : > { %4682 = vmatmul.mubr.bf16.gmra.mxu1 %v14105_v24  ;;  %v10215_v45 = vcombine.high %v15344_v56, %v13902_v55  ;;  %v14184_v46 = vcombine.high %v13966_v50, %v13978_v6  ;;  %v8752_v41 = vrot.slane %v3952_v54, 5  ;;  %5065 = vmatpush1.bf16.msra.mxu0 %v11532_v20  ;;  %v14188_v5 = vcombine.high %v14012_v7, %v14041_v42  ;;  %v11546_v50 = vld [vmem:[#allocation12 + $0x1e4] ss:$16 sps:$4 sm:$0xff]   ;;  %v11549_v6 = vld [vmem:[#allocation12 + $0x1ec] ss:$16 sps:$4 sm:$0xff]  }
 0x365   : > { %15409 = vst [vmem:[#allocation50_spill] sm:$0xff] %v14164_v53  ;;  %15410 = vst [vmem:[#allocation59_spill] sm:$0xff] %v14166_v61  ;;  %5138 = vmatpush1.bf16.msra.mxu1 %v11535_v14  ;;  %v14192_v28 = vcombine.low %v14012_v7, %v14041_v42  ;;  %v14196_v15 = vcombine.high %v14045_v47, %v14077_v62  ;;  %v14200_v57 = vcombine.low %v14045_v47, %v14077_v62  ;;  %v11544_v62 = vld [vmem:[#allocation12 + $0x1e0] ss:$16 sps:$4 sm:$0xff]   ;;  %v11873_v24 = vld [vmem:[#allocation12 + $0x92c] ss:$16 sps:$4 sm:$0xff]  }
 0x366   : > { %5084 = vmatprep.mubr.bf16.mxu0 %v10215_v45  ;;  %5157 = vmatprep.mubr.bf16.mxu1 %v10215_v45  ;;  %v14203_v20 = vcombine.high %v14109_v0, %v5217_v19  ;;  %v14205_v7 = vcombine.high %v5221_v52, %v5225_v13  ;;  %v14207_v42 = vcombine.low %v5221_v52, %v5225_v13  ;;  %v10510_v54 = vrot.slane %v14180_v8, 9  ;;  %v11547_v0 = vld [vmem:[#allocation12 + $0x1e8] ss:$16 sps:$4 sm:$0xff]   ;;  %v11552_v19 = vld [vmem:[#allocation12 + $0x1c4] ss:$16 sps:$4 sm:$0xff]  }
 0x367   : > { %5066 = vmatprep.subr.bf16.mxu0 %v11540_v43  ;;  %5139 = vmatprep.subr.bf16.mxu1 %v11543_v18  ;;  %v14209_v14 = vcombine.high %v5229_v10, %v5233_v23  ;;  %v14212_v45 = vcombine.low %v5229_v10, %v5233_v23  ;;  %v7013_v48 = vrot.slane %v3950_v31, 5  ;;  %v8753_v47 = vsel %vm12958_vm7, %v15411_v32, %v8752_v41  ;;  %v11555_v52 = vld [vmem:[#allocation12 + $0x1cc] ss:$16 sps:$4 sm:$0xff]   ;;  %v11550_v32 = vld [vmem:[#allocation12 + $0x1c0] ss:$16 sps:$4 sm:$0xff]  }
 0x368   : > { %5067 = vmatpush1.bf16.msra.mxu0 %v11538_v51  ;;  %v11553_v18 = vld [vmem:[#allocation12 + $0x1c8] ss:$16 sps:$4 sm:$0xff]   ;;  %v11558_v41 = vld [vmem:[#allocation12 + $0x1a4] ss:$16 sps:$4 sm:$0xff]   ;;  %v11561_v51 = vld [vmem:[#allocation12 + $0x1ac] ss:$16 sps:$4 sm:$0xff]  }
 0x369   : > { %5140 = vmatpush1.bf16.msra.mxu1 %v11541_v49  ;;  %5068 = vmatprep.subr.bf16.mxu0 %v11546_v50  ;;  %v7014_v13 = vsel %vm12958_vm7, %v10510_v54, %v7013_v48  ;;  %v11559_v48 = vld [vmem:[#allocation12 + $0x1a8] ss:$16 sps:$4 sm:$0xff]   ;;  %v11567_v49 = vld [vmem:[#allocation12 + $0x18c] ss:$16 sps:$4 sm:$0xff]   ;;  %v11562_v31 = vld [vmem:[#allocation12 + $0x180] ss:$16 sps:$4 sm:$0xff]  }
 0x36a   : > { %5141 = vmatprep.subr.bf16.mxu1 %v11549_v6  ;;  %v14220_v43 = vcombine.high %v5237_v3, %v7014_v13  ;;  %v14222_v10 = vcombine.low %v5237_v3, %v7014_v13  ;;  %v14224_v23 = vcombine.low %v7014_v13, %v8753_v47  ;;  %v14226_v56 = vcombine.high %v7014_v13, %v8753_v47  ;;  %v11564_v3 = vld [vmem:[#allocation12 + $0x184] ss:$16 sps:$4 sm:$0xff]   ;;  %v11565_v50 = vld [vmem:[#allocation12 + $0x188] ss:$16 sps:$4 sm:$0xff]   ;;  %v11573_v54 = vld [vmem:[#allocation12 + $0x16c] ss:$16 sps:$4 sm:$0xff]  }
 0x36b   : > { %v11570_v6 = vld [vmem:[#allocation12 + $0x164] ss:$16 sps:$4 sm:$0xff]   ;;  %v11568_v47 = vld [vmem:[#allocation12 + $0x160] ss:$16 sps:$4 sm:$0xff]   ;;  %v11577_v13 = vld [vmem:[#allocation12 + $0x148] ss:$16 sps:$4 sm:$0xff]  }
 0x36c   : > { %15412 = vst [vmem:[#allocation38_spill] sm:$0xff] %v14224_v23  ;;  %15413 = vst [vmem:[#allocation49_spill] sm:$0xff] %v14226_v56  ;;  %5069 = vmatpush2.bf16.msra.mxu0 %v11544_v62  ;;  %v11571_v62 = vld [vmem:[#allocation12 + $0x168] ss:$16 sps:$4 sm:$0xff]   ;;  %v11849_v23 = vld [vmem:[#allocation12 + $0x9ac] ss:$16 sps:$4 sm:$0xff]  }
 0x36d   : > { %5142 = vmatpush2.bf16.msra.mxu1 %v11547_v0  ;;  %5070 = vmatprep.subr.bf16.mxu0 %v11552_v19  ;;  %v11576_v0 = vld [vmem:[#allocation12 + $0x144] ss:$16 sps:$4 sm:$0xff]   ;;  %v11579_v19 = vld [vmem:[#allocation12 + $0x14c] ss:$16 sps:$4 sm:$0xff]  }
 0x36e   : > { %5143 = vmatprep.subr.bf16.mxu1 %v11555_v52  ;;  %v11574_v52 = vld [vmem:[#allocation12 + $0x140] ss:$16 sps:$4 sm:$0xff]   ;;  %v11852_v56 = vld [vmem:[#allocation12 + $0x984] ss:$16 sps:$4 sm:$0xff]  }
 0x370   : > { %5071 = vmatpush2.bf16.msra.mxu0 %v11550_v32  ;;  %v11582_v32 = vld [vmem:[#allocation12 + $0x124] ss:$16 sps:$4 sm:$0xff]  }
 0x371   : > { %5144 = vmatpush2.bf16.msra.mxu1 %v11553_v18  ;;  %5072 = vmatprep.subr.bf16.mxu0 %v11558_v41  ;;  %v11585_v18 = vld [vmem:[#allocation12 + $0x12c] ss:$16 sps:$4 sm:$0xff]   ;;  %v11580_v41 = vld [vmem:[#allocation12 + $0x120] ss:$16 sps:$4 sm:$0xff]  }
 0x372   : > { %5145 = vmatprep.subr.bf16.mxu1 %v11561_v51  ;;  %v11583_v51 = vld [vmem:[#allocation12 + $0x128] ss:$16 sps:$4 sm:$0xff]  }
 0x374   : > { %5073 = vmatpush2.bf16.msra.mxu0 %v11556_v26  ;;  %v11588_v26 = vld [vmem:[#allocation12 + $0x104] ss:$16 sps:$4 sm:$0xff]  }
 0x375   : > { %5146 = vmatpush2.bf16.msra.mxu1 %v11559_v48  ;;  %5074 = vmatprep.subr.bf16.mxu0 %v11564_v3  ;;  %v11591_v48 = vld [vmem:[#allocation12 + $0x10c] ss:$16 sps:$4 sm:$0xff]   ;;  %v11586_v3 = vld [vmem:[#allocation12 + $0x100] ss:$16 sps:$4 sm:$0xff]  }
 0x376   : > { %5147 = vmatprep.subr.bf16.mxu1 %v11567_v49  ;;  %v11589_v49 = vld [vmem:[#allocation12 + $0x108] ss:$16 sps:$4 sm:$0xff]  }
 0x378   : > { %5075 = vmatpush2.bf16.msra.mxu0 %v11562_v31  ;;  %v11594_v31 = vld [vmem:[#allocation12 + $0x4e4] ss:$16 sps:$4 sm:$0xff]  }
 0x379   : > { %5148 = vmatpush2.bf16.msra.mxu1 %v11565_v50  ;;  %5076 = vmatprep.subr.bf16.mxu0 %v11570_v6  ;;  %v11597_v50 = vld [vmem:[#allocation12 + $0x4ec] ss:$16 sps:$4 sm:$0xff]  }
 0x37a   : > { %5149 = vmatprep.subr.bf16.mxu1 %v11573_v54  ;;  %v12270_v6 = vld [vmem:[#allocation3] sm:$0xff] }
 0x37b   : > { %v10214_v54 = vcombine.low %v12270_v6, %v13902_v55  ;;  %v11609_v55 = vld [vmem:[#allocation12 + $0x4ac] ss:$16 sps:$4 sm:$0xff]   ;;  %v11619_v6 = vld [vmem:[#allocation12 + $0x468] ss:$16 sps:$4 sm:$0xff]  }
 0x37c   : > { %5077 = vmatpush2.bf16.msra.mxu0 %v11568_v47  ;;  %v11592_v47 = vld [vmem:[#allocation12 + $0x4e0] ss:$16 sps:$4 sm:$0xff]  }
 0x37d   : > { %5150 = vmatpush2.bf16.msra.mxu1 %v11571_v62  ;;  %5078 = vmatprep.subr.bf16.mxu0 %v11576_v0  ;;  %v11595_v62 = vld [vmem:[#allocation12 + $0x4e8] ss:$16 sps:$4 sm:$0xff]   ;;  %v11600_v0 = vld [vmem:[#allocation12 + $0x4c4] ss:$16 sps:$4 sm:$0xff]  }
 0x37e   : > { %5151 = vmatprep.subr.bf16.mxu1 %v11579_v19  ;;  %v11603_v19 = vld [vmem:[#allocation12 + $0x4cc] ss:$16 sps:$4 sm:$0xff]  }
 0x380   : > { %5079 = vmatpush2.bf16.msra.mxu0 %v11574_v52  ;;  %v11598_v52 = vld [vmem:[#allocation12 + $0x4c0] ss:$16 sps:$4 sm:$0xff]  }
 0x381   : > { %5152 = vmatpush2.bf16.msra.mxu1 %v11577_v13  ;;  %5080 = vmatprep.subr.bf16.mxu0 %v11582_v32  ;;  %v11601_v13 = vld [vmem:[#allocation12 + $0x4c8] ss:$16 sps:$4 sm:$0xff]   ;;  %v11606_v32 = vld [vmem:[#allocation12 + $0x4a4] ss:$16 sps:$4 sm:$0xff]  }
 0x382   : > { %5153 = vmatprep.subr.bf16.mxu1 %v11585_v18  ;;  %v11604_v18 = vld [vmem:[#allocation12 + $0x4a0] ss:$16 sps:$4 sm:$0xff]  }
 0x384   : > { %5081 = vmatpush2.bf16.msra.mxu0 %v11580_v41  ;;  %v11607_v41 = vld [vmem:[#allocation12 + $0x4a8] ss:$16 sps:$4 sm:$0xff]  }
 0x385   : > { %5154 = vmatpush2.bf16.msra.mxu1 %v11583_v51  ;;  %5082 = vmatprep.subr.bf16.mxu0 %v11588_v26  ;;  %v11612_v51 = vld [vmem:[#allocation12 + $0x484] ss:$16 sps:$4 sm:$0xff]   ;;  %v11615_v26 = vld [vmem:[#allocation12 + $0x48c] ss:$16 sps:$4 sm:$0xff]  }
 0x386   : > { %5155 = vmatprep.subr.bf16.mxu1 %v11591_v48  ;;  %v11610_v48 = vld [vmem:[#allocation12 + $0x480] ss:$16 sps:$4 sm:$0xff]  }
 0x388   : > { %5083 = vmatpush2.bf16.msra.mxu0 %v11586_v3  ;;  %v11613_v3 = vld [vmem:[#allocation12 + $0x488] ss:$16 sps:$4 sm:$0xff]  }
 0x389   : > { %5156 = vmatpush2.bf16.msra.mxu1 %v11589_v49  ;;  %5655 = vmatprep.subr.bf16.mxu0 %v11594_v31  ;;  %v11618_v49 = vld [vmem:[#allocation12 + $0x464] ss:$16 sps:$4 sm:$0xff]   ;;  %v11621_v31 = vld [vmem:[#allocation12 + $0x46c] ss:$16 sps:$4 sm:$0xff]  }
 0x38a   : > { %5728 = vmatprep.subr.bf16.mxu1 %v11597_v50  ;;  %v11616_v50 = vld [vmem:[#allocation12 + $0x460] ss:$16 sps:$4 sm:$0xff]  }
 0x38b   : > { %5085 = vmatmul.mubr.bf16.vlgmr.msra.gmra.mxu0 %v10214_v54 }
 0x38c   : > { %5158 = vmatmul.mubr.bf16.vlgmr.msra.gmra.mxu1 %v10214_v54  ;;  %5094 = vmatprep.mubr.bf16.mxu0 %v14049_v4  ;;  %v11624_v54 = vld [vmem:[#allocation12 + $0x444] ss:$16 sps:$4 sm:$0xff]  }
 0x38d   : > { %5167 = vmatprep.mubr.bf16.mxu1 %v14049_v4  ;;  %5656 = vmatpush1.bf16.msra.mxu0 %v11592_v47  ;;  %v11627_v47 = vld [vmem:[#allocation12 + $0x44c] ss:$16 sps:$4 sm:$0xff]  }
 0x38e   : > { %5729 = vmatpush1.bf16.msra.mxu1 %v11595_v62  ;;  %5657 = vmatprep.subr.bf16.mxu0 %v11600_v0  ;;  %v11622_v62 = vld [vmem:[#allocation12 + $0x440] ss:$16 sps:$4 sm:$0xff]   ;;  %v11625_v0 = vld [vmem:[#allocation12 + $0x448] ss:$16 sps:$4 sm:$0xff]  }
 0x38f   : > { %5730 = vmatprep.subr.bf16.mxu1 %v11603_v19  ;;  %v11630_v19 = vld [vmem:[#allocation12 + $0x424] ss:$16 sps:$4 sm:$0xff]  }
 0x391   : > { %5658 = vmatpush1.bf16.msra.mxu0 %v11598_v52  ;;  %v11633_v52 = vld [vmem:[#allocation12 + $0x42c] ss:$16 sps:$4 sm:$0xff]  }
 0x392   : > { %5731 = vmatpush1.bf16.msra.mxu1 %v11601_v13  ;;  %5659 = vmatprep.subr.bf16.mxu0 %v11606_v32  ;;  %v11628_v13 = vld [vmem:[#allocation12 + $0x420] ss:$16 sps:$4 sm:$0xff]   ;;  %v11631_v32 = vld [vmem:[#allocation12 + $0x428] ss:$16 sps:$4 sm:$0xff]  }
 0x393   : > { %5732 = vmatprep.subr.bf16.mxu1 %v11609_v55  ;;  %5095 = vmatmul.mubr.bf16.gmra.mxu0 %v14061_v63  ;;  %v11636_v55 = vld [vmem:[#allocation12 + $0x404] ss:$16 sps:$4 sm:$0xff]  }
 0x394   : > { %5168 = vmatmul.mubr.bf16.gmra.mxu1 %v14061_v63  ;;  %5104 = vmatprep.mubr.bf16.mxu0 %v14065_v35 }
 0x395   : > { %5177 = vmatprep.mubr.bf16.mxu1 %v14065_v35  ;;  %5660 = vmatpush1.bf16.msra.mxu0 %v11604_v18  ;;  %v11639_v18 = vld [vmem:[#allocation12 + $0x40c] ss:$16 sps:$4 sm:$0xff]  }
 0x396   : > { %5733 = vmatpush1.bf16.msra.mxu1 %v11607_v41  ;;  %5661 = vmatprep.subr.bf16.mxu0 %v11612_v51  ;;  %v11634_v41 = vld [vmem:[#allocation12 + $0x400] ss:$16 sps:$4 sm:$0xff]   ;;  %v11637_v51 = vld [vmem:[#allocation12 + $0x408] ss:$16 sps:$4 sm:$0xff]  }
 0x397   : > { %5734 = vmatprep.subr.bf16.mxu1 %v11615_v26  ;;  %v11642_v26 = vld [vmem:[#allocation12 + $0x5e4] ss:$16 sps:$4 sm:$0xff]  }
 0x399   : > { %5662 = vmatpush1.bf16.msra.mxu0 %v11610_v48  ;;  %v11645_v48 = vld [vmem:[#allocation12 + $0x5ec] ss:$16 sps:$4 sm:$0xff]  }
 0x39a   : > { %5735 = vmatpush1.bf16.msra.mxu1 %v11613_v3  ;;  %5663 = vmatprep.subr.bf16.mxu0 %v11618_v49  ;;  %v11640_v3 = vld [vmem:[#allocation12 + $0x5e0] ss:$16 sps:$4 sm:$0xff]   ;;  %v11643_v49 = vld [vmem:[#allocation12 + $0x5e8] ss:$16 sps:$4 sm:$0xff]  }
 0x39b   : > { %5736 = vmatprep.subr.bf16.mxu1 %v11621_v31  ;;  %5105 = vmatmul.mubr.bf16.gmra.mxu0 %v14069_v21  ;;  %v11648_v31 = vld [vmem:[#allocation12 + $0x5c4] ss:$16 sps:$4 sm:$0xff]  }
 0x39c   : > { %5178 = vmatmul.mubr.bf16.gmra.mxu1 %v14069_v21  ;;  %5114 = vmatprep.mubr.bf16.mxu0 %v14073_v9 }
 0x39d   : > { %5187 = vmatprep.mubr.bf16.mxu1 %v14073_v9  ;;  %5664 = vmatpush1.bf16.msra.mxu0 %v11616_v50  ;;  %v11651_v50 = vld [vmem:[#allocation12 + $0x5cc] ss:$16 sps:$4 sm:$0xff]  }
 0x39e   : > { %5737 = vmatpush1.bf16.msra.mxu1 %v11619_v6  ;;  %5665 = vmatprep.subr.bf16.mxu0 %v11624_v54  ;;  %v11646_v6 = vld [vmem:[#allocation12 + $0x5c0] ss:$16 sps:$4 sm:$0xff]   ;;  %v11654_v54 = vld [vmem:[#allocation12 + $0x5a4] ss:$16 sps:$4 sm:$0xff]  }
 0x39f   : > { %5738 = vmatprep.subr.bf16.mxu1 %v11627_v47  ;;  %v11657_v47 = vld [vmem:[#allocation12 + $0x5ac] ss:$16 sps:$4 sm:$0xff]  }
 0x3a1   : > { %5666 = vmatpush1.bf16.msra.mxu0 %v11622_v62  ;;  %v11652_v62 = vld [vmem:[#allocation12 + $0x5a0] ss:$16 sps:$4 sm:$0xff]  }
 0x3a2   : > { %5739 = vmatpush1.bf16.msra.mxu1 %v11625_v0  ;;  %5667 = vmatprep.subr.bf16.mxu0 %v11630_v19  ;;  %v11655_v0 = vld [vmem:[#allocation12 + $0x5a8] ss:$16 sps:$4 sm:$0xff]   ;;  %v11660_v19 = vld [vmem:[#allocation12 + $0x584] ss:$16 sps:$4 sm:$0xff]  }
 0x3a3   : > { %5740 = vmatprep.subr.bf16.mxu1 %v11633_v52  ;;  %5115 = vmatmul.mubr.bf16.gmra.mxu0 %v14081_v60  ;;  %v11663_v52 = vld [vmem:[#allocation12 + $0x58c] ss:$16 sps:$4 sm:$0xff]  }
 0x3a4   : > { %5188 = vmatmul.mubr.bf16.gmra.mxu1 %v14081_v60  ;;  %5687 = vmatprep.mubr.bf16.mxu0 %v14116_v39 }
 0x3a5   : > { %5760 = vmatprep.mubr.bf16.mxu1 %v14116_v39  ;;  %5668 = vmatpush1.bf16.msra.mxu0 %v11628_v13  ;;  %v11649_v39 = vld [vmem:[#allocation12 + $0x5c8] ss:$16 sps:$4 sm:$0xff]   ;;  %v11658_v13 = vld [vmem:[#allocation12 + $0x580] ss:$16 sps:$4 sm:$0xff]  }
 0x3a6   : > { %5741 = vmatpush1.bf16.msra.mxu1 %v11631_v32  ;;  %5669 = vmatprep.subr.bf16.mxu0 %v11636_v55  ;;  %v11661_v32 = vld [vmem:[#allocation12 + $0x588] ss:$16 sps:$4 sm:$0xff]   ;;  %v11666_v55 = vld [vmem:[#allocation12 + $0x564] ss:$16 sps:$4 sm:$0xff]  }
 0x3a7   : > { %5742 = vmatprep.subr.bf16.mxu1 %v11639_v18  ;;  %v11669_v18 = vld [vmem:[#allocation12 + $0x56c] ss:$16 sps:$4 sm:$0xff]  }
 0x3a9   : > { %5670 = vmatpush1.bf16.msra.mxu0 %v11634_v41  ;;  %v11664_v41 = vld [vmem:[#allocation12 + $0x560] ss:$16 sps:$4 sm:$0xff]  }
 0x3aa   : > { %5743 = vmatpush1.bf16.msra.mxu1 %v11637_v51  ;;  %5671 = vmatprep.subr.bf16.mxu0 %v11642_v26  ;;  %v11667_v51 = vld [vmem:[#allocation12 + $0x568] ss:$16 sps:$4 sm:$0xff]   ;;  %v11672_v26 = vld [vmem:[#allocation12 + $0x544] ss:$16 sps:$4 sm:$0xff]  }
 0x3ab   : > { %5744 = vmatprep.subr.bf16.mxu1 %v11645_v48  ;;  %v11675_v48 = vld [vmem:[#allocation12 + $0x54c] ss:$16 sps:$4 sm:$0xff]  }
 0x3ad   : > { %5672 = vmatpush2.bf16.msra.mxu0 %v11640_v3  ;;  %v11670_v3 = vld [vmem:[#allocation12 + $0x540] ss:$16 sps:$4 sm:$0xff]  }
 0x3ae   : > { %5745 = vmatpush2.bf16.msra.mxu1 %v11643_v49  ;;  %5673 = vmatprep.subr.bf16.mxu0 %v11648_v31  ;;  %v11673_v49 = vld [vmem:[#allocation12 + $0x548] ss:$16 sps:$4 sm:$0xff]   ;;  %v11678_v31 = vld [vmem:[#allocation12 + $0x524] ss:$16 sps:$4 sm:$0xff]  }
 0x3af   : > { %5746 = vmatprep.subr.bf16.mxu1 %v11651_v50  ;;  %v11681_v50 = vld [vmem:[#allocation12 + $0x52c] ss:$16 sps:$4 sm:$0xff]  }
 0x3b1   : > { %5674 = vmatpush2.bf16.msra.mxu0 %v11646_v6  ;;  %v11676_v6 = vld [vmem:[#allocation12 + $0x520] ss:$16 sps:$4 sm:$0xff]  }
 0x3b2   : > { %5747 = vmatpush2.bf16.msra.mxu1 %v11649_v39  ;;  %5675 = vmatprep.subr.bf16.mxu0 %v11654_v54  ;;  %v11679_v39 = vld [vmem:[#allocation12 + $0x528] ss:$16 sps:$4 sm:$0xff]   ;;  %v11684_v54 = vld [vmem:[#allocation12 + $0x504] ss:$16 sps:$4 sm:$0xff]  }
 0x3b3   : > { %5748 = vmatprep.subr.bf16.mxu1 %v11657_v47  ;;  %v11687_v47 = vld [vmem:[#allocation12 + $0x50c] ss:$16 sps:$4 sm:$0xff]  }
 0x3b5   : > { %5676 = vmatpush2.bf16.msra.mxu0 %v11652_v62  ;;  %v11682_v62 = vld [vmem:[#allocation12 + $0x500] ss:$16 sps:$4 sm:$0xff]  }
 0x3b6   : > { %5749 = vmatpush2.bf16.msra.mxu1 %v11655_v0  ;;  %5677 = vmatprep.subr.bf16.mxu0 %v11660_v19  ;;  %v11685_v0 = vld [vmem:[#allocation12 + $0x508] ss:$16 sps:$4 sm:$0xff]   ;;  %v11690_v19 = vld [vmem:[#allocation12 + $0x6e4] ss:$16 sps:$4 sm:$0xff]  }
 0x3b7   : > { %5750 = vmatprep.subr.bf16.mxu1 %v11663_v52  ;;  %v11693_v52 = vld [vmem:[#allocation12 + $0x6ec] ss:$16 sps:$4 sm:$0xff]  }
 0x3b9   : > { %5678 = vmatpush2.bf16.msra.mxu0 %v11658_v13  ;;  %v11688_v13 = vld [vmem:[#allocation12 + $0x6e0] ss:$16 sps:$4 sm:$0xff]  }
 0x3ba   : > { %5751 = vmatpush2.bf16.msra.mxu1 %v11661_v32  ;;  %5679 = vmatprep.subr.bf16.mxu0 %v11666_v55  ;;  %v11691_v32 = vld [vmem:[#allocation12 + $0x6e8] ss:$16 sps:$4 sm:$0xff]   ;;  %v11696_v55 = vld [vmem:[#allocation12 + $0x6c4] ss:$16 sps:$4 sm:$0xff]  }
 0x3bb   : > { %5752 = vmatprep.subr.bf16.mxu1 %v11669_v18  ;;  %v11699_v18 = vld [vmem:[#allocation12 + $0x6cc] ss:$16 sps:$4 sm:$0xff]  }
 0x3bd   : > { %5680 = vmatpush2.bf16.msra.mxu0 %v11664_v41  ;;  %v11694_v41 = vld [vmem:[#allocation12 + $0x6c0] ss:$16 sps:$4 sm:$0xff]  }
 0x3be   : > { %5753 = vmatpush2.bf16.msra.mxu1 %v11667_v51  ;;  %5681 = vmatprep.subr.bf16.mxu0 %v11672_v26  ;;  %v11697_v51 = vld [vmem:[#allocation12 + $0x6c8] ss:$16 sps:$4 sm:$0xff]   ;;  %v11702_v26 = vld [vmem:[#allocation12 + $0x6a4] ss:$16 sps:$4 sm:$0xff]  }
 0x3bf   : > { %5754 = vmatprep.subr.bf16.mxu1 %v11675_v48  ;;  %v11705_v48 = vld [vmem:[#allocation12 + $0x6ac] ss:$16 sps:$4 sm:$0xff]  }
 0x3c1   : > { %5682 = vmatpush2.bf16.msra.mxu0 %v11670_v3  ;;  %v11700_v3 = vld [vmem:[#allocation12 + $0x6a0] ss:$16 sps:$4 sm:$0xff]  }
 0x3c2   : > { %5755 = vmatpush2.bf16.msra.mxu1 %v11673_v49  ;;  %5683 = vmatprep.subr.bf16.mxu0 %v11678_v31  ;;  %v11703_v49 = vld [vmem:[#allocation12 + $0x6a8] ss:$16 sps:$4 sm:$0xff]   ;;  %v11708_v31 = vld [vmem:[#allocation12 + $0x684] ss:$16 sps:$4 sm:$0xff]  }
 0x3c3   : > { %5756 = vmatprep.subr.bf16.mxu1 %v11681_v50  ;;  %v11706_v50 = vld [vmem:[#allocation12 + $0x680] ss:$16 sps:$4 sm:$0xff]  }
 0x3c5   : > { %5684 = vmatpush2.bf16.msra.mxu0 %v11676_v6  ;;  %v11709_v6 = vld [vmem:[#allocation12 + $0x688] ss:$16 sps:$4 sm:$0xff]  }
 0x3c6   : > { %5757 = vmatpush2.bf16.msra.mxu1 %v11679_v39  ;;  %5685 = vmatprep.subr.bf16.mxu0 %v11684_v54  ;;  %v11714_v39 = vld [vmem:[#allocation12 + $0x664] ss:$16 sps:$4 sm:$0xff]   ;;  %v11717_v54 = vld [vmem:[#allocation12 + $0x66c] ss:$16 sps:$4 sm:$0xff]  }
 0x3c7   : > { %5758 = vmatprep.subr.bf16.mxu1 %v11687_v47  ;;  %v11712_v47 = vld [vmem:[#allocation12 + $0x660] ss:$16 sps:$4 sm:$0xff]  }
 0x3c9   : > { %5686 = vmatpush2.bf16.msra.mxu0 %v11682_v62  ;;  %v11715_v62 = vld [vmem:[#allocation12 + $0x668] ss:$16 sps:$4 sm:$0xff]  }
 0x3ca   : > { %5759 = vmatpush2.bf16.msra.mxu1 %v11685_v0  ;;  %6237 = vmatprep.subr.bf16.mxu0 %v11690_v19  ;;  %v11720_v0 = vld [vmem:[#allocation12 + $0x644] ss:$16 sps:$4 sm:$0xff]   ;;  %v11723_v19 = vld [vmem:[#allocation12 + $0x64c] ss:$16 sps:$4 sm:$0xff]  }
 0x3cb   : > { %6310 = vmatprep.subr.bf16.mxu1 %v11693_v52  ;;  %v11718_v52 = vld [vmem:[#allocation12 + $0x640] ss:$16 sps:$4 sm:$0xff]  }
 0x3cc   : > { %5688 = vmatmul.mubr.bf16.vlgmr.msra.gmra.mxu0 %v14113_v1 }
 0x3cd   : > { %5761 = vmatmul.mubr.bf16.vlgmr.msra.gmra.mxu1 %v14113_v1  ;;  %5697 = vmatprep.mubr.bf16.mxu0 %v14131_v44  ;;  %v11711_v1 = vld [vmem:[#allocation12 + $0x68c] ss:$16 sps:$4 sm:$0xff]  }
 0x3ce   : > { %5770 = vmatprep.mubr.bf16.mxu1 %v14131_v44  ;;  %6238 = vmatpush1.bf16.msra.mxu0 %v11688_v13  ;;  %v11721_v13 = vld [vmem:[#allocation12 + $0x648] ss:$16 sps:$4 sm:$0xff]   ;;  %v11870_v44 = vld [vmem:[#allocation12 + $0x924] ss:$16 sps:$4 sm:$0xff]  }
 0x3cf   : > { %6311 = vmatpush1.bf16.msra.mxu1 %v11691_v32  ;;  %6239 = vmatprep.subr.bf16.mxu0 %v11696_v55  ;;  %v11726_v32 = vld [vmem:[#allocation12 + $0x624] ss:$16 sps:$4 sm:$0xff]   ;;  %v11729_v55 = vld [vmem:[#allocation12 + $0x62c] ss:$16 sps:$4 sm:$0xff]  }
 0x3d0   : > { %6312 = vmatprep.subr.bf16.mxu1 %v11699_v18  ;;  %v11724_v18 = vld [vmem:[#allocation12 + $0x620] ss:$16 sps:$4 sm:$0xff]  }
 0x3d2   : > { %6240 = vmatpush1.bf16.msra.mxu0 %v11694_v41  ;;  %v11727_v41 = vld [vmem:[#allocation12 + $0x628] ss:$16 sps:$4 sm:$0xff]  }
 0x3d3   : > { %6313 = vmatpush1.bf16.msra.mxu1 %v11697_v51  ;;  %6241 = vmatprep.subr.bf16.mxu0 %v11702_v26  ;;  %v11732_v51 = vld [vmem:[#allocation12 + $0x604] ss:$16 sps:$4 sm:$0xff]   ;;  %v11735_v26 = vld [vmem:[#allocation12 + $0x60c] ss:$16 sps:$4 sm:$0xff]  }
 0x3d4   : > { %6314 = vmatprep.subr.bf16.mxu1 %v11705_v48  ;;  %5698 = vmatmul.mubr.bf16.gmra.mxu0 %v14133_v17  ;;  %v11730_v48 = vld [vmem:[#allocation12 + $0x600] ss:$16 sps:$4 sm:$0xff]  }
 0x3d5   : > { %5771 = vmatmul.mubr.bf16.gmra.mxu1 %v14133_v17  ;;  %5707 = vmatprep.mubr.bf16.mxu0 %v14138_v38  ;;  %v11867_v17 = vld [vmem:[#allocation12 + $0x94c] ss:$16 sps:$4 sm:$0xff]  }
 0x3d6   : > { %5780 = vmatprep.mubr.bf16.mxu1 %v14138_v38  ;;  %6242 = vmatpush1.bf16.msra.mxu0 %v11700_v3  ;;  %v11733_v3 = vld [vmem:[#allocation12 + $0x608] ss:$16 sps:$4 sm:$0xff]   ;;  %v11864_v38 = vld [vmem:[#allocation12 + $0x944] ss:$16 sps:$4 sm:$0xff]  }
 0x3d7   : > { %6315 = vmatpush1.bf16.msra.mxu1 %v11703_v49  ;;  %6243 = vmatprep.subr.bf16.mxu0 %v11708_v31  ;;  %v11738_v49 = vld [vmem:[#allocation12 + $0x7e4] ss:$16 sps:$4 sm:$0xff]   ;;  %v11741_v31 = vld [vmem:[#allocation12 + $0x7ec] ss:$16 sps:$4 sm:$0xff]  }
 0x3d8   : > { %6316 = vmatprep.subr.bf16.mxu1 %v11711_v1  ;;  %v11736_v1 = vld [vmem:[#allocation12 + $0x7e0] ss:$16 sps:$4 sm:$0xff]  }
 0x3da   : > { %6244 = vmatpush1.bf16.msra.mxu0 %v11706_v50  ;;  %v11739_v50 = vld [vmem:[#allocation12 + $0x7e8] ss:$16 sps:$4 sm:$0xff]  }
 0x3db   : > { %6317 = vmatpush1.bf16.msra.mxu1 %v11709_v6  ;;  %6245 = vmatprep.subr.bf16.mxu0 %v11714_v39  ;;  %v11744_v6 = vld [vmem:[#allocation12 + $0x7c4] ss:$16 sps:$4 sm:$0xff]   ;;  %v11747_v39 = vld [vmem:[#allocation12 + $0x7cc] ss:$16 sps:$4 sm:$0xff]  }
 0x3dc   : > { %6318 = vmatprep.subr.bf16.mxu1 %v11717_v54  ;;  %5708 = vmatmul.mubr.bf16.gmra.mxu0 %v14140_v40  ;;  %v11742_v54 = vld [vmem:[#allocation12 + $0x7c0] ss:$16 sps:$4 sm:$0xff]  }
 0x3dd   : > { %5781 = vmatmul.mubr.bf16.gmra.mxu1 %v14140_v40  ;;  %5717 = vmatprep.mubr.bf16.mxu0 %v14164_v53  ;;  %v11861_v40 = vld [vmem:[#allocation12 + $0x96c] ss:$16 sps:$4 sm:$0xff]  }
 0x3de   : > { %5790 = vmatprep.mubr.bf16.mxu1 %v14164_v53  ;;  %6246 = vmatpush1.bf16.msra.mxu0 %v11712_v47  ;;  %v11750_v47 = vld [vmem:[#allocation12 + $0x7a4] ss:$16 sps:$4 sm:$0xff]  }
 0x3df   : > { %6319 = vmatpush1.bf16.msra.mxu1 %v11715_v62  ;;  %6247 = vmatprep.subr.bf16.mxu0 %v11720_v0  ;;  %v11753_v62 = vld [vmem:[#allocation12 + $0x7ac] ss:$16 sps:$4 sm:$0xff]   ;;  %v11748_v0 = vld [vmem:[#allocation12 + $0x7a0] ss:$16 sps:$4 sm:$0xff]   ;;  %v11858_v53 = vld [vmem:[#allocation12 + $0x964] ss:$16 sps:$4 sm:$0xff]  }
 0x3e0   : > { %6320 = vmatprep.subr.bf16.mxu1 %v11723_v19  ;;  %v11751_v19 = vld [vmem:[#allocation12 + $0x7a8] ss:$16 sps:$4 sm:$0xff]  }
 0x3e2   : > { %6248 = vmatpush1.bf16.msra.mxu0 %v11718_v52  ;;  %v11756_v52 = vld [vmem:[#allocation12 + $0x784] ss:$16 sps:$4 sm:$0xff]  }
 0x3e3   : > { %6321 = vmatpush1.bf16.msra.mxu1 %v11721_v13  ;;  %6249 = vmatprep.subr.bf16.mxu0 %v11726_v32  ;;  %v11759_v13 = vld [vmem:[#allocation12 + $0x78c] ss:$16 sps:$4 sm:$0xff]   ;;  %v11754_v32 = vld [vmem:[#allocation12 + $0x780] ss:$16 sps:$4 sm:$0xff]  }
 0x3e4   : > { %6322 = vmatprep.subr.bf16.mxu1 %v11729_v55  ;;  %5718 = vmatmul.mubr.bf16.gmra.mxu0 %v14166_v61  ;;  %v11757_v55 = vld [vmem:[#allocation12 + $0x788] ss:$16 sps:$4 sm:$0xff]  }
 0x3e5   : > { %5791 = vmatmul.mubr.bf16.gmra.mxu1 %v14166_v61  ;;  %6269 = vmatprep.mubr.bf16.mxu0 %v14148_v29  ;;  %v11855_v61 = vld [vmem:[#allocation12 + $0x98c] ss:$16 sps:$4 sm:$0xff]  }
 0x3e6   : > { %6342 = vmatprep.mubr.bf16.mxu1 %v14148_v29  ;;  %6250 = vmatpush1.bf16.msra.mxu0 %v11724_v18  ;;  %v11745_v29 = vld [vmem:[#allocation12 + $0x7c8] ss:$16 sps:$4 sm:$0xff]   ;;  %v11762_v18 = vld [vmem:[#allocation12 + $0x764] ss:$16 sps:$4 sm:$0xff]  }
 0x3e7   : > { %6323 = vmatpush1.bf16.msra.mxu1 %v11727_v41  ;;  %6251 = vmatprep.subr.bf16.mxu0 %v11732_v51  ;;  %v11765_v41 = vld [vmem:[#allocation12 + $0x76c] ss:$16 sps:$4 sm:$0xff]   ;;  %v11760_v51 = vld [vmem:[#allocation12 + $0x760] ss:$16 sps:$4 sm:$0xff]  }
 0x3e8   : > { %6324 = vmatprep.subr.bf16.mxu1 %v11735_v26  ;;  %v11763_v26 = vld [vmem:[#allocation12 + $0x768] ss:$16 sps:$4 sm:$0xff]  }
 0x3ea   : > { %6252 = vmatpush1.bf16.msra.mxu0 %v11730_v48  ;;  %v11768_v48 = vld [vmem:[#allocation12 + $0x744] ss:$16 sps:$4 sm:$0xff]  }
 0x3eb   : > { %6325 = vmatpush1.bf16.msra.mxu1 %v11733_v3  ;;  %6253 = vmatprep.subr.bf16.mxu0 %v11738_v49  ;;  %v11771_v3 = vld [vmem:[#allocation12 + $0x74c] ss:$16 sps:$4 sm:$0xff]   ;;  %v11766_v49 = vld [vmem:[#allocation12 + $0x740] ss:$16 sps:$4 sm:$0xff]  }
 0x3ec   : > { %6326 = vmatprep.subr.bf16.mxu1 %v11741_v31  ;;  %v11769_v31 = vld [vmem:[#allocation12 + $0x748] ss:$16 sps:$4 sm:$0xff]  }
 0x3ee   : > { %6254 = vmatpush2.bf16.msra.mxu0 %v11736_v1  ;;  %v11774_v1 = vld [vmem:[#allocation12 + $0x724] ss:$16 sps:$4 sm:$0xff]  }
 0x3ef   : > { %6327 = vmatpush2.bf16.msra.mxu1 %v11739_v50  ;;  %6255 = vmatprep.subr.bf16.mxu0 %v11744_v6  ;;  %v11777_v50 = vld [vmem:[#allocation12 + $0x72c] ss:$16 sps:$4 sm:$0xff]   ;;  %v11772_v6 = vld [vmem:[#allocation12 + $0x720] ss:$16 sps:$4 sm:$0xff]  }
 0x3f0   : > { %6328 = vmatprep.subr.bf16.mxu1 %v11747_v39  ;;  %v11775_v39 = vld [vmem:[#allocation12 + $0x728] ss:$16 sps:$4 sm:$0xff]  }
 0x3f2   : > { %6256 = vmatpush2.bf16.msra.mxu0 %v11742_v54  ;;  %v11780_v54 = vld [vmem:[#allocation12 + $0x704] ss:$16 sps:$4 sm:$0xff]  }
 0x3f3   : > { %6329 = vmatpush2.bf16.msra.mxu1 %v11745_v29  ;;  %6257 = vmatprep.subr.bf16.mxu0 %v11750_v47  ;;  %v11783_v29 = vld [vmem:[#allocation12 + $0x70c] ss:$16 sps:$4 sm:$0xff]   ;;  %v11778_v47 = vld [vmem:[#allocation12 + $0x700] ss:$16 sps:$4 sm:$0xff]  }
 0x3f4   : > { %6330 = vmatprep.subr.bf16.mxu1 %v11753_v62  ;;  %v11781_v62 = vld [vmem:[#allocation12 + $0x708] ss:$16 sps:$4 sm:$0xff]  }
 0x3f6   : > { %6258 = vmatpush2.bf16.msra.mxu0 %v11748_v0  ;;  %v11786_v0 = vld [vmem:[#allocation12 + $0x8e4] ss:$16 sps:$4 sm:$0xff]  }
 0x3f7   : > { %6331 = vmatpush2.bf16.msra.mxu1 %v11751_v19  ;;  %6259 = vmatprep.subr.bf16.mxu0 %v11756_v52  ;;  %v11789_v19 = vld [vmem:[#allocation12 + $0x8ec] ss:$16 sps:$4 sm:$0xff]   ;;  %v11784_v52 = vld [vmem:[#allocation12 + $0x8e0] ss:$16 sps:$4 sm:$0xff]  }
 0x3f8   : > { %6332 = vmatprep.subr.bf16.mxu1 %v11759_v13  ;;  %v11787_v13 = vld [vmem:[#allocation12 + $0x8e8] ss:$16 sps:$4 sm:$0xff]  }
 0x3fa   : > { %6260 = vmatpush2.bf16.msra.mxu0 %v11754_v32  ;;  %v11792_v32 = vld [vmem:[#allocation12 + $0x8c4] ss:$16 sps:$4 sm:$0xff]  }
 0x3fb   : > { %6333 = vmatpush2.bf16.msra.mxu1 %v11757_v55  ;;  %6261 = vmatprep.subr.bf16.mxu0 %v11762_v18  ;;  %v11795_v55 = vld [vmem:[#allocation12 + $0x8cc] ss:$16 sps:$4 sm:$0xff]  }
 0x3fc   : > { %6334 = vmatprep.subr.bf16.mxu1 %v11765_v41 }
 0x3fe   : > { %6262 = vmatpush2.bf16.msra.mxu0 %v11760_v51  ;;  %v11790_v51 = vld [vmem:[#allocation12 + $0x8c0] ss:$16 sps:$4 sm:$0xff]  }
 0x3ff   : > { %6335 = vmatpush2.bf16.msra.mxu1 %v11763_v26  ;;  %6263 = vmatprep.subr.bf16.mxu0 %v11768_v48  ;;  %v11793_v26 = vld [vmem:[#allocation12 + $0x8c8] ss:$16 sps:$4 sm:$0xff]   ;;  %v11798_v48 = vld [vmem:[#allocation12 + $0x8a4] ss:$16 sps:$4 sm:$0xff]  }
 0x400   : > { %6336 = vmatprep.subr.bf16.mxu1 %v11771_v3  ;;  %v11801_v3 = vld [vmem:[#allocation12 + $0x8ac] ss:$16 sps:$4 sm:$0xff]  }
 0x402   : > { %6264 = vmatpush2.bf16.msra.mxu0 %v11766_v49 }
 0x403   : > { %6337 = vmatpush2.bf16.msra.mxu1 %v11769_v31  ;;  %6265 = vmatprep.subr.bf16.mxu0 %v11774_v1  ;;  %v11799_v1 = vld [vmem:[#allocation12 + $0x8a8] ss:$16 sps:$4 sm:$0xff]  }
 0x404   : > { %6338 = vmatprep.subr.bf16.mxu1 %v11777_v50  ;;  %v11804_v50 = vld [vmem:[#allocation12 + $0x884] ss:$16 sps:$4 sm:$0xff]  }
 0x406   : > { %6266 = vmatpush2.bf16.msra.mxu0 %v11772_v6 }
 0x407   : > { %6339 = vmatpush2.bf16.msra.mxu1 %v11775_v39  ;;  %6267 = vmatprep.subr.bf16.mxu0 %v11780_v54  ;;  %v11802_v54 = vld [vmem:[#allocation12 + $0x880] ss:$16 sps:$4 sm:$0xff]  }
 0x408   : > { %6340 = vmatprep.subr.bf16.mxu1 %v11783_v29  ;;  %v11805_v29 = vld [vmem:[#allocation12 + $0x888] ss:$16 sps:$4 sm:$0xff]  }
 0x409   : > { %v14261_v18 = vpop.f32.mrf.mxu0  ;;  %v14263_v41 = vpop.f32.mrf.mxu1 }
 0x40a   : > { %6268 = vmatpush2.bf16.msra.mxu0 %v11778_v47  ;;  %v11810_v47 = vld [vmem:[#allocation12 + $0x864] ss:$16 sps:$4 sm:$0xff]  }
 0x40b   : > { %6341 = vmatpush2.bf16.msra.mxu1 %v11781_v62  ;;  %6832 = vmatprep.subr.bf16.mxu0 %v11786_v0  ;;  %v14267_v49 = vpop.f32.mrf.mxu0  ;;  %v14269_v31 = vpop.f32.mrf.mxu1  ;;  %v11813_v62 = vld [vmem:[#allocation12 + $0x86c] ss:$16 sps:$4 sm:$0xff]  }
 0x40c   : > { %6905 = vmatprep.subr.bf16.mxu1 %v11789_v19 }
 0x40d   : > { %6270 = vmatmul.mubr.bf16.vlgmr.msra.gmra.mxu0 %v14152_v25  ;;  %v14271_v6 = vpop.f32.mrf.mxu0  ;;  %v14273_v39 = vpop.f32.mrf.mxu1 }
 0x40e   : > { %6343 = vmatmul.mubr.bf16.vlgmr.msra.gmra.mxu1 %v14152_v25  ;;  %6279 = vmatprep.mubr.bf16.mxu0 %v14158_v59  ;;  %v11796_v25 = vld [vmem:[#allocation12 + $0x8a0] ss:$16 sps:$4 sm:$0xff]  }
 0x40f   : > { %6352 = vmatprep.mubr.bf16.mxu1 %v14158_v59  ;;  %6833 = vmatpush1.bf16.msra.mxu0 %v11784_v52  ;;  %v11807_v59 = vld [vmem:[#allocation12 + $0x88c] ss:$16 sps:$4 sm:$0xff]   ;;  %v14279_v0 = vpop.f32.mrf.mxu0  ;;  %v14281_v19 = vpop.f32.mrf.mxu1  ;;  %v11808_v52 = vld [vmem:[#allocation12 + $0x860] ss:$16 sps:$4 sm:$0xff]  }
 0x410   : > { %6906 = vmatpush1.bf16.msra.mxu1 %v11787_v13  ;;  %6834 = vmatprep.subr.bf16.mxu0 %v11792_v32  ;;  %15414 = vst [vmem:[#allocation52_spill] sm:$0xff] %v14281_v19  ;;  %v12271_v13 = vld [vmem:[#allocation3 + $0x98] sm:$0xff] }
 0x411   : > { %6907 = vmatprep.subr.bf16.mxu1 %v11795_v55  ;;  %v11816_v32 = vld [vmem:[#allocation12 + $0x844] ss:$16 sps:$4 sm:$0xff]   ;;  %v11819_v55 = vld [vmem:[#allocation12 + $0x84c] ss:$16 sps:$4 sm:$0xff]  }
 0x412   : > { %v11900_v19 = vld [vmem:[#allocation12 + $0xa84] ss:$16 sps:$4 sm:$0xff]  }
 0x413   : > { %6835 = vmatpush1.bf16.msra.mxu0 %v11790_v51  ;;  %v14284_v51 = vpop.f32.mrf.mxu0 }
 0x414   : > { %6908 = vmatpush1.bf16.msra.mxu1 %v11793_v26  ;;  %6836 = vmatprep.subr.bf16.mxu0 %v11798_v48  ;;  %v14286_v26 = vpop.f32.mrf.mxu1  ;;  %v11814_v48 = vld [vmem:[#allocation12 + $0x840] ss:$16 sps:$4 sm:$0xff]  }
 0x415   : > { %6909 = vmatprep.subr.bf16.mxu1 %v11801_v3  ;;  %6280 = vmatmul.mubr.bf16.gmra.mxu0 %v14162_v2  ;;  %v11817_v3 = vld [vmem:[#allocation12 + $0x848] ss:$16 sps:$4 sm:$0xff]  }
 0x416   : > { %6353 = vmatmul.mubr.bf16.gmra.mxu1 %v14162_v2  ;;  %6289 = vmatprep.mubr.bf16.mxu0 %v14170_v27  ;;  %v11811_v2 = vld [vmem:[#allocation12 + $0x868] ss:$16 sps:$4 sm:$0xff]  }
 0x417   : > { %6362 = vmatprep.mubr.bf16.mxu1 %v14170_v27  ;;  %6837 = vmatpush1.bf16.msra.mxu0 %v11796_v25  ;;  %v10373_v27 = vcombine.high %v12271_v13, %v14180_v8  ;;  %v11822_v25 = vld [vmem:[#allocation12 + $0x824] ss:$16 sps:$4 sm:$0xff]  }
 0x418   : > { %6910 = vmatpush1.bf16.msra.mxu1 %v11799_v1  ;;  %6838 = vmatprep.subr.bf16.mxu0 %v11804_v50  ;;  %v11825_v1 = vld [vmem:[#allocation12 + $0x82c] ss:$16 sps:$4 sm:$0xff]   ;;  %v14290_v50 = vpop.f32.mrf.mxu0 }
 0x419   : > { %6911 = vmatprep.subr.bf16.mxu1 %v11807_v59  ;;  %v14292_v59 = vpop.f32.mrf.mxu1 }
 0x41b   : > { %6839 = vmatpush1.bf16.msra.mxu0 %v11802_v54  ;;  %v10372_v54 = vcombine.low %v12271_v13, %v14180_v8  ;;  %v11829_v8 = vld [vmem:[#allocation12 + $0x808] ss:$16 sps:$4 sm:$0xff]   ;;  %v11834_v13 = vld [vmem:[#allocation12 + $0x9e4] ss:$16 sps:$4 sm:$0xff]  }
 0x41c   : > { %6912 = vmatpush1.bf16.msra.mxu1 %v11805_v29  ;;  %6840 = vmatprep.subr.bf16.mxu0 %v11810_v47  ;;  %v11820_v29 = vld [vmem:[#allocation12 + $0x820] ss:$16 sps:$4 sm:$0xff]   ;;  %v11828_v47 = vld [vmem:[#allocation12 + $0x804] ss:$16 sps:$4 sm:$0xff]  }
 0x41d   : > { %6913 = vmatprep.subr.bf16.mxu1 %v11813_v62  ;;  %6290 = vmatmul.mubr.bf16.gmra.mxu0 %v14174_v16  ;;  %v11831_v62 = vld [vmem:[#allocation12 + $0x80c] ss:$16 sps:$4 sm:$0xff]  }
 0x41e   : > { %6363 = vmatmul.mubr.bf16.gmra.mxu1 %v14174_v16  ;;  %6299 = vmatprep.mubr.bf16.mxu0 %v10373_v27  ;;  %v11823_v16 = vld [vmem:[#allocation12 + $0x828] ss:$16 sps:$4 sm:$0xff]  }
 0x41f   : > { %6372 = vmatprep.mubr.bf16.mxu1 %v10373_v27  ;;  %6841 = vmatpush1.bf16.msra.mxu0 %v11808_v52  ;;  %v14295_v52 = vpop.f32.mrf.mxu0  ;;  %v11826_v27 = vld [vmem:[#allocation12 + $0x800] ss:$16 sps:$4 sm:$0xff]  }
 0x420   : > { %6914 = vmatpush1.bf16.msra.mxu1 %v11811_v2  ;;  %6842 = vmatprep.subr.bf16.mxu0 %v11816_v32  ;;  %v14297_v2 = vpop.f32.mrf.mxu1  ;;  %v11837_v32 = vld [vmem:[#allocation12 + $0x9ec] ss:$16 sps:$4 sm:$0xff]  }
 0x421   : > { %6915 = vmatprep.subr.bf16.mxu1 %v11819_v55  ;;  %v14301_v55 = vpop.f32.mrf.mxu0 }
 0x422   : > { %15415 = vst [vmem:[#allocation54_spill] sm:$0xff] %v14301_v55 }
 0x423   : > { %6843 = vmatpush1.bf16.msra.mxu0 %v11814_v48  ;;  %v14303_v48 = vpop.f32.mrf.mxu1 }
 0x424   : > { %6916 = vmatpush1.bf16.msra.mxu1 %v11817_v3  ;;  %6844 = vmatprep.subr.bf16.mxu0 %v11822_v25  ;;  %15416 = vst [vmem:[#allocation56_spill] sm:$0xff] %v14303_v48  ;;  %v11832_v3 = vld [vmem:[#allocation12 + $0x9e0] ss:$16 sps:$4 sm:$0xff]   ;;  %v11835_v25 = vld [vmem:[#allocation12 + $0x9e8] ss:$16 sps:$4 sm:$0xff]  }
 0x425   : > { %6917 = vmatprep.subr.bf16.mxu1 %v11825_v1  ;;  %6300 = vmatmul.mubr.bf16.gmra.mxu0 %v10372_v54  ;;  %v11840_v1 = vld [vmem:[#allocation12 + $0x9c4] ss:$16 sps:$4 sm:$0xff]  }
 0x426   : > { %6373 = vmatmul.mubr.bf16.gmra.mxu1 %v10372_v54  ;;  %6864 = vmatprep.mubr.bf16.mxu0 %v14184_v46  ;;  %v14305_v54 = vpop.f32.mrf.mxu0 }
 0x427   : > { %6937 = vmatprep.mubr.bf16.mxu1 %v14184_v46  ;;  %6845 = vmatpush1.bf16.msra.mxu0 %v11820_v29  ;;  %v11843_v46 = vld [vmem:[#allocation12 + $0x9cc] ss:$16 sps:$4 sm:$0xff]   ;;  %v14307_v29 = vpop.f32.mrf.mxu1 }
 0x428   : > { %6918 = vmatpush1.bf16.msra.mxu1 %v11823_v16  ;;  %6846 = vmatprep.subr.bf16.mxu0 %v11828_v47  ;;  %v11838_v16 = vld [vmem:[#allocation12 + $0x9c0] ss:$16 sps:$4 sm:$0xff]   ;;  %v11841_v47 = vld [vmem:[#allocation12 + $0x9c8] ss:$16 sps:$4 sm:$0xff]  }
 0x429   : > { %6919 = vmatprep.subr.bf16.mxu1 %v11831_v62  ;;  %v11846_v62 = vld [vmem:[#allocation12 + $0x9a4] ss:$16 sps:$4 sm:$0xff]  }
 0x42b   : > { %6847 = vmatpush1.bf16.msra.mxu0 %v11826_v27  ;;  %v14309_v27 = vpop.f32.mrf.mxu0 }
 0x42c   : > { %6920 = vmatpush1.bf16.msra.mxu1 %v11829_v8  ;;  %6848 = vmatprep.subr.bf16.mxu0 %v11834_v13  ;;  %v14311_v8 = vpop.f32.mrf.mxu1  ;;  %v11844_v13 = vld [vmem:[#allocation12 + $0x9a0] ss:$16 sps:$4 sm:$0xff]  }
 0x42d   : > { %6921 = vmatprep.subr.bf16.mxu1 %v11837_v32  ;;  %v11847_v32 = vld [vmem:[#allocation12 + $0x9a8] ss:$16 sps:$4 sm:$0xff]  }
 0x42f   : > { %6849 = vmatpush2.bf16.msra.mxu0 %v11832_v3  ;;  %v14313_v3 = vpop.f32.mrf.mxu0 }
 0x430   : > { %6922 = vmatpush2.bf16.msra.mxu1 %v11835_v25  ;;  %6850 = vmatprep.subr.bf16.mxu0 %v11840_v1  ;;  %v14315_v25 = vpop.f32.mrf.mxu1  ;;  %v11850_v1 = vld [vmem:[#allocation12 + $0x980] ss:$16 sps:$4 sm:$0xff]  }
 0x431   : > { %6923 = vmatprep.subr.bf16.mxu1 %v11843_v46  ;;  %v11853_v46 = vld [vmem:[#allocation12 + $0x988] ss:$16 sps:$4 sm:$0xff]  }
 0x433   : > { %6851 = vmatpush2.bf16.msra.mxu0 %v11838_v16  ;;  %v14317_v16 = vpop.f32.mrf.mxu0 }
 0x434   : > { %6924 = vmatpush2.bf16.msra.mxu1 %v11841_v47  ;;  %6852 = vmatprep.subr.bf16.mxu0 %v11846_v62  ;;  %15417 = vst [vmem:[#allocation39_spill] sm:$0xff] %v14317_v16  ;;  %v14319_v47 = vpop.f32.mrf.mxu1  ;;  %v11859_v62 = vld [vmem:[#allocation12 + $0x968] ss:$16 sps:$4 sm:$0xff]  }
 0x435   : > { %6925 = vmatprep.subr.bf16.mxu1 %v11849_v23  ;;  %15418 = vst [vmem:[#allocation61_spill] sm:$0xff] %v14319_v47  ;;  %v11856_v23 = vld [vmem:[#allocation12 + $0x960] ss:$16 sps:$4 sm:$0xff]   ;;  %v11891_v47 = vld [vmem:[#allocation12 + $0xacc] ss:$16 sps:$4 sm:$0xff]  }
 0x436   : > { %v11889_v16 = vld [vmem:[#allocation12 + $0xac8] ss:$16 sps:$4 sm:$0xff]  }
 0x437   : > { %6853 = vmatpush2.bf16.msra.mxu0 %v11844_v13  ;;  %v14321_v13 = vpop.f32.mrf.mxu0 }
 0x438   : > { %6926 = vmatpush2.bf16.msra.mxu1 %v11847_v32  ;;  %6854 = vmatprep.subr.bf16.mxu0 %v11852_v56  ;;  %v14323_v32 = vpop.f32.mrf.mxu1  ;;  %v11865_v56 = vld [vmem:[#allocation12 + $0x948] ss:$16 sps:$4 sm:$0xff]  }
 0x439   : > { %6927 = vmatprep.subr.bf16.mxu1 %v11855_v61  ;;  %v11862_v61 = vld [vmem:[#allocation12 + $0x940] ss:$16 sps:$4 sm:$0xff]  }
 0x43b   : > { %6855 = vmatpush2.bf16.msra.mxu0 %v11850_v1  ;;  %v14325_v1 = vpop.f32.mrf.mxu0 }
 0x43c   : > { %6928 = vmatpush2.bf16.msra.mxu1 %v11853_v46  ;;  %6856 = vmatprep.subr.bf16.mxu0 %v11858_v53  ;;  %v14327_v46 = vpop.f32.mrf.mxu1  ;;  %v11871_v53 = vld [vmem:[#allocation12 + $0x928] ss:$16 sps:$4 sm:$0xff]  }
 0x43d   : > { %6929 = vmatprep.subr.bf16.mxu1 %v11861_v40  ;;  %v11868_v40 = vld [vmem:[#allocation12 + $0x920] ss:$16 sps:$4 sm:$0xff]  }
 0x43f   : > { %6857 = vmatpush2.bf16.msra.mxu0 %v11856_v23  ;;  %v14329_v23 = vpop.f32.mrf.mxu0 }
 0x440   : > { %6930 = vmatpush2.bf16.msra.mxu1 %v11859_v62  ;;  %6858 = vmatprep.subr.bf16.mxu0 %v11864_v38  ;;  %v14331_v62 = vpop.f32.mrf.mxu1  ;;  %v11877_v38 = vld [vmem:[#allocation12 + $0x908] ss:$16 sps:$4 sm:$0xff]  }
 0x441   : > { %6931 = vmatprep.subr.bf16.mxu1 %v11867_v17  ;;  %v11874_v17 = vld [vmem:[#allocation12 + $0x900] ss:$16 sps:$4 sm:$0xff]  }
 0x443   : > { %6859 = vmatpush2.bf16.msra.mxu0 %v11862_v61  ;;  %v14333_v61 = vpop.f32.mrf.mxu0 }
 0x444   : > { %6932 = vmatpush2.bf16.msra.mxu1 %v11865_v56  ;;  %6860 = vmatprep.subr.bf16.mxu0 %v11870_v44  ;;  %15419 = vst [vmem:[#allocation40_spill] sm:$0xff] %v14333_v61  ;;  %v14335_v56 = vpop.f32.mrf.mxu1  ;;  %v14337_v44 = vld [vmem:[#allocation3 + $0x20] sm:$0xff] }
 0x445   : > { %6933 = vmatprep.subr.bf16.mxu1 %v11873_v24  ;;  %15420 = vst [vmem:[#allocation51_spill] sm:$0xff] %v14335_v56  ;;  %15421 = vst [vmem:[#allocation62_spill] sm:$0xff] %v14337_v44  ;;  %v6416_v24 = vshrl.u32 %v14337_v44, 16  ;;  %v6419_v33 = vshll.u32 %v14337_v44, 16  ;;  %v11888_v56 = vld [vmem:[#allocation12 + $0xac4] ss:$16 sps:$4 sm:$0xff]  }
 0x447   : > { %6861 = vmatpush2.bf16.msra.mxu0 %v11868_v40 }
 0x448   : > { %6934 = vmatpush2.bf16.msra.mxu1 %v11871_v53  ;;  %6862 = vmatprep.subr.bf16.mxu0 %v11876_v22  ;;  %v11880_v22 = vld [vmem:[#allocation12 + $0xae0] ss:$16 sps:$4 sm:$0xff]  }
 0x449   : > { %6935 = vmatprep.subr.bf16.mxu1 %v11879_v37  ;;  %v11883_v37 = vld [vmem:[#allocation12 + $0xae8] ss:$16 sps:$4 sm:$0xff]  }
 0x44b   : > { %6863 = vmatpush2.bf16.msra.mxu0 %v11874_v17  ;;  %v14341_v40 = vpop.f32.mrf.mxu0  ;;  %v6418_v17 = vrot.slane %v6416_v24, 4 }
 0x44c   : > { %6936 = vmatpush2.bf16.msra.mxu1 %v11877_v38  ;;  %v14343_v53 = vpop.f32.mrf.mxu1  ;;  %7418 = vmatprep.subr.bf16.mxu0 %v11882_v36  ;;  %v6421_v38 = vrot.slane %v6419_v33, 5  ;;  %v11897_v33 = vld [vmem:[#allocation12 + $0xaac] ss:$16 sps:$4 sm:$0xff]  }
 0x44d   : > { %7491 = vmatprep.subr.bf16.mxu1 %v11885_v34  ;;  %v14345_v60 = vpop.f32.mrf.mxu0  ;;  %v11886_v34 = vld [vmem:[#allocation12 + $0xac0] ss:$16 sps:$4 sm:$0xff]  }
 0x44e   : > { %v14347_v61 = vpop.f32.mrf.mxu1  ;;  %6865 = vmatmul.mubr.bf16.vlgmr.msra.gmra.mxu0 %v13992_v11  ;;  %v6422_v24 = vor.u32 %v6421_v38, %v6418_v17  ;;  %v11903_v17 = vld [vmem:[#allocation12 + $0xa8c] ss:$16 sps:$4 sm:$0xff]  }
 0x44f   : > { %6938 = vmatmul.mubr.bf16.vlgmr.msra.gmra.mxu1 %v13992_v11  ;;  %6874 = vmatprep.mubr.bf16.mxu0 %v14188_v5  ;;  %v14353_v44 = vpop.f32.mrf.mxu0  ;;  %v11894_v11 = vld [vmem:[#allocation12 + $0xaa4] ss:$16 sps:$4 sm:$0xff]  }
 0x450   : > { %6947 = vmatprep.mubr.bf16.mxu1 %v14188_v5  ;;  %v14355_v36 = vpop.f32.mrf.mxu1  ;;  %7419 = vmatpush1.bf16.msra.mxu0 %v11880_v22 }
 0x451   : > { %7492 = vmatpush1.bf16.msra.mxu1 %v11883_v37  ;;  %7420 = vmatprep.subr.bf16.mxu0 %v11888_v56  ;;  %v14357_v9 = vpop.f32.mrf.mxu0  ;;  %v11892_v37 = vld [vmem:[#allocation12 + $0xaa0] ss:$16 sps:$4 sm:$0xff]   ;;  %v11895_v56 = vld [vmem:[#allocation12 + $0xaa8] ss:$16 sps:$4 sm:$0xff]  }
 0x452   : > { %7493 = vmatprep.subr.bf16.mxu1 %v11891_v47  ;;  %v14359_v21 = vpop.f32.mrf.mxu1  ;;  %v12273_v47 = vld [vmem:[#allocation3 + $0x48] sm:$0x11] }
 0x453   : > { %15422 = vst [vmem:[#allocation65_spill] sm:$0xff] %v14359_v21  ;;  %v5096_v48 = vpop.f32.mrf.mxu0  ;;  %v6425_v35 = vshll.u32 %v12273_v47, 16 }
 0x454   : > { %v5169_v55 = vpop.f32.mrf.mxu1  ;;  %7421 = vmatpush1.bf16.msra.mxu0 %v11886_v34  ;;  %v14362_v5 = vadd.f32 %v5096_v48, %v14284_v51 }
 0x455   : > { %7494 = vmatpush1.bf16.msra.mxu1 %v11889_v16  ;;  %v14365_v22 = vadd.f32 %v5169_v55, %v14286_v26  ;;  %7422 = vmatprep.subr.bf16.mxu0 %v11894_v11  ;;  %v5098_v63 = vpop.f32.mrf.mxu0  ;;  %v6423_v55 = vrot.slane %v6422_v24, 4  ;;  %v6427_v34 = vrot.slane %v6425_v35, 5  ;;  %v11909_v11 = vld [vmem:[#allocation12 + $0xa6c] ss:$16 sps:$4 sm:$0xff]  }
 0x456   : > { %7495 = vmatprep.subr.bf16.mxu1 %v11897_v33  ;;  %v5171_v21 = vpop.f32.mrf.mxu1  ;;  %6875 = vmatmul.mubr.bf16.gmra.mxu0 %v14192_v28  ;;  %v14370_v51 = vadd.f32 %v5098_v63, %v14290_v50  ;;  %v11898_v63 = vld [vmem:[#allocation12 + $0xa80] ss:$16 sps:$4 sm:$0xff]   ;;  %v11901_v50 = vld [vmem:[#allocation12 + $0xa88] ss:$16 sps:$4 sm:$0xff]  }
 0x457   : > { %6948 = vmatmul.mubr.bf16.gmra.mxu1 %v14192_v28  ;;  %v14373_v26 = vadd.f32 %v5171_v21, %v14292_v59  ;;  %6884 = vmatprep.mubr.bf16.mxu0 %v14196_v15  ;;  %v5100_v48 = vpop.f32.mrf.mxu0  ;;  %v14389_v33 = vsel %vm12864_vm4, %v6423_v55, %v6427_v34  ;;  %v11912_v55 = vld [vmem:[#allocation12 + $0xa44] ss:$16 sps:$4 sm:$0xff]  }
 0x458   : > { %6957 = vmatprep.mubr.bf16.mxu1 %v14196_v15  ;;  %v5173_v16 = vpop.f32.mrf.mxu1  ;;  %7423 = vmatpush1.bf16.msra.mxu0 %v11892_v37  ;;  %v14378_v38 = vadd.f32 %v5100_v48, %v14295_v52  ;;  %v11906_v15 = vld [vmem:[#allocation12 + $0xa64] ss:$16 sps:$4 sm:$0xff]   ;;  %v11907_v37 = vld [vmem:[#allocation12 + $0xa68] ss:$16 sps:$4 sm:$0xff]   ;;  %v11915_v48 = vld [vmem:[#allocation12 + $0xa4c] ss:$16 sps:$4 sm:$0xff]  }
 0x459   : > { %7496 = vmatpush1.bf16.msra.mxu1 %v11895_v56  ;;  %v14381_v28 = vadd.f32 %v5173_v16, %v14297_v2  ;;  %7424 = vmatprep.subr.bf16.mxu0 %v11900_v19  ;;  %v14383_v21 = vpop.f32.mrf.mxu0  ;;  %v11904_v19 = vld [vmem:[#allocation12 + $0xa60] ss:$16 sps:$4 sm:$0xff]   ;;  %v10445_v56 = vcombine.high %v14092_v58, %v14389_v33 }
 0x45a   : > { %7497 = vmatprep.subr.bf16.mxu1 %v11903_v17  ;;  %v14385_v59 = vpop.f32.mrf.mxu1 }
 0x45b   : > { %v5106_v52 = vpop.f32.mrf.mxu0 }
 0x45c   : > { %v5179_v24 = vpop.f32.mrf.mxu1  ;;  %7425 = vmatpush1.bf16.msra.mxu0 %v11898_v63  ;;  %v14392_v2 = vadd.f32 %v5106_v52, %v14305_v54  ;;  %v11921_v52 = vld [vmem:[#allocation12 + $0xa2c] ss:$16 sps:$4 sm:$0xff]  }
 0x45d   : > { %7498 = vmatpush1.bf16.msra.mxu1 %v11901_v50  ;;  %v14395_v35 = vadd.f32 %v5179_v24, %v14307_v29  ;;  %7426 = vmatprep.subr.bf16.mxu0 %v11906_v15  ;;  %v5108_v47 = vpop.f32.mrf.mxu0  ;;  %v11910_v15 = vld [vmem:[#allocation12 + $0xa40] ss:$16 sps:$4 sm:$0xff]  }
 0x45e   : > { %7499 = vmatprep.subr.bf16.mxu1 %v11909_v11  ;;  %v5181_v17 = vpop.f32.mrf.mxu1  ;;  %6885 = vmatmul.mubr.bf16.gmra.mxu0 %v14200_v57  ;;  %v14402_v54 = vadd.f32 %v5108_v47, %v14309_v27  ;;  %v11918_v11 = vld [vmem:[#allocation12 + $0xa24] ss:$16 sps:$4 sm:$0xff]   ;;  %v11919_v47 = vld [vmem:[#allocation12 + $0xa28] ss:$16 sps:$4 sm:$0xff]  }
 0x45f   : > { %6958 = vmatmul.mubr.bf16.gmra.mxu1 %v14200_v57  ;;  %v14405_v29 = vadd.f32 %v5181_v17, %v14311_v8  ;;  %6894 = vmatprep.mubr.bf16.mxu0 %v10445_v56  ;;  %v5110_v16 = vpop.f32.mrf.mxu0  ;;  %v11913_v57 = vld [vmem:[#allocation12 + $0xa48] ss:$16 sps:$4 sm:$0xff]  }
 0x460   : > { %6967 = vmatprep.mubr.bf16.mxu1 %v10445_v56  ;;  %v5183_v63 = vpop.f32.mrf.mxu1  ;;  %7427 = vmatpush1.bf16.msra.mxu0 %v11904_v19  ;;  %v14408_v50 = vadd.f32 %v5110_v16, %v14313_v3  ;;  %v10444_v19 = vcombine.low %v14092_v58, %v14389_v33  ;;  %v11927_v16 = vld [vmem:[#allocation12 + $0xa0c] ss:$16 sps:$4 sm:$0xff]  }
 0x461   : > { %7500 = vmatpush1.bf16.msra.mxu1 %v11907_v37  ;;  %v14411_v34 = vadd.f32 %v5183_v63, %v14315_v25  ;;  %7428 = vmatprep.subr.bf16.mxu0 %v11912_v55  ;;  %v14413_v27 = vpop.f32.mrf.mxu0  ;;  %v11916_v37 = vld [vmem:[#allocation12 + $0xa20] ss:$16 sps:$4 sm:$0xff]  }
 0x462   : > { %7501 = vmatprep.subr.bf16.mxu1 %v11915_v48  ;;  %v14415_v8 = vpop.f32.mrf.mxu1  ;;  %v11924_v48 = vld [vmem:[#allocation12 + $0xa04] ss:$16 sps:$4 sm:$0xff]  }
 0x463   : > { %v5116_v24 = vpop.f32.mrf.mxu0 }
 0x464   : > { %v5189_v56 = vpop.f32.mrf.mxu1  ;;  %7429 = vmatpush1.bf16.msra.mxu0 %v11910_v15  ;;  %v14418_v3 = vadd.f32 %v5116_v24, %v14321_v13  ;;  %v11928_v24 = vld [vmem:[#allocation12 + $0xbe0] ss:$16 sps:$4 sm:$0xff]  }
 0x465   : > { %7502 = vmatpush1.bf16.msra.mxu1 %v11913_v57  ;;  %v14421_v25 = vadd.f32 %v5189_v56, %v14323_v32  ;;  %7430 = vmatprep.subr.bf16.mxu0 %v11918_v11  ;;  %v5118_v17 = vpop.f32.mrf.mxu0  ;;  %v11922_v11 = vld [vmem:[#allocation12 + $0xa00] ss:$16 sps:$4 sm:$0xff]   ;;  %v11936_v56 = vld [vmem:[#allocation12 + $0xbc4] ss:$16 sps:$4 sm:$0xff]  }
 0x466   : > { %7503 = vmatprep.subr.bf16.mxu1 %v11921_v52  ;;  %v5191_v55 = vpop.f32.mrf.mxu1  ;;  %6895 = vmatmul.mubr.bf16.gmra.mxu0 %v10444_v19  ;;  %v14426_v63 = vadd.f32 %v5118_v17, %v14325_v1  ;;  %v11925_v1 = vld [vmem:[#allocation12 + $0xa08] ss:$16 sps:$4 sm:$0xff]   ;;  %v11933_v52 = vld [vmem:[#allocation12 + $0xbec] ss:$16 sps:$4 sm:$0xff]   ;;  %v11940_v17 = vld [vmem:[#allocation12 + $0xba0] ss:$16 sps:$4 sm:$0xff]  }
 0x467   : > { %6968 = vmatmul.mubr.bf16.gmra.mxu1 %v10444_v19  ;;  %v14429_v13 = vadd.f32 %v5191_v55, %v14327_v46  ;;  %7450 = vmatprep.mubr.bf16.mxu0 %v14203_v20  ;;  %v5120_v58 = vpop.f32.mrf.mxu0  ;;  %v11930_v46 = vld [vmem:[#allocation12 + $0xbe4] ss:$16 sps:$4 sm:$0xff]   ;;  %v11939_v19 = vld [vmem:[#allocation12 + $0xbcc] ss:$16 sps:$4 sm:$0xff]   ;;  %v11943_v55 = vld [vmem:[#allocation12 + $0xba8] ss:$16 sps:$4 sm:$0xff]  }
 0x468   : > { %7523 = vmatprep.mubr.bf16.mxu1 %v14203_v20  ;;  %v5193_v32 = vpop.f32.mrf.mxu1  ;;  %7431 = vmatpush1.bf16.msra.mxu0 %v11916_v37  ;;  %v14434_v15 = vadd.f32 %v5120_v58, %v14329_v23  ;;  %v11931_v20 = vld [vmem:[#allocation12 + $0xbe8] ss:$16 sps:$4 sm:$0xff]   ;;  %v11934_v23 = vld [vmem:[#allocation12 + $0xbc0] ss:$16 sps:$4 sm:$0xff]  }
 0x469   : > { %7504 = vmatpush1.bf16.msra.mxu1 %v11919_v47  ;;  %v14437_v57 = vadd.f32 %v5193_v32, %v14331_v62  ;;  %7432 = vmatprep.subr.bf16.mxu0 %v11924_v48  ;;  %v11937_v37 = vld [vmem:[#allocation12 + $0xbc8] ss:$16 sps:$4 sm:$0xff]   ;;  %v11942_v62 = vld [vmem:[#allocation12 + $0xba4] ss:$16 sps:$4 sm:$0xff]   ;;  %v11945_v47 = vld [vmem:[#allocation12 + $0xbac] ss:$16 sps:$4 sm:$0xff]  }
 0x46a   : > { %7505 = vmatprep.subr.bf16.mxu1 %v11927_v16  ;;  %v11948_v48 = vld [vmem:[#allocation12 + $0xb84] ss:$16 sps:$4 sm:$0xff]   ;;  %v11951_v16 = vld [vmem:[#allocation12 + $0xb8c] ss:$16 sps:$4 sm:$0xff]   ;;  %v11946_v58 = vld [vmem:[#allocation12 + $0xb80] ss:$16 sps:$4 sm:$0xff]  }
 0x46b   : > { %v11949_v32 = vld [vmem:[#allocation12 + $0xb88] ss:$16 sps:$4 sm:$0xff]  }
 0x46c   : > { %7433 = vmatpush1.bf16.msra.mxu0 %v11922_v11  ;;  %v11954_v11 = vld [vmem:[#allocation12 + $0xb64] ss:$16 sps:$4 sm:$0xff]  }
 0x46d   : > { %7506 = vmatpush1.bf16.msra.mxu1 %v11925_v1  ;;  %7434 = vmatprep.subr.bf16.mxu0 %v11930_v46  ;;  %v11957_v1 = vld [vmem:[#allocation12 + $0xb6c] ss:$16 sps:$4 sm:$0xff]   ;;  %v11952_v46 = vld [vmem:[#allocation12 + $0xb60] ss:$16 sps:$4 sm:$0xff]  }
 0x46e   : > { %7507 = vmatprep.subr.bf16.mxu1 %v11933_v52  ;;  %v11955_v52 = vld [vmem:[#allocation12 + $0xb68] ss:$16 sps:$4 sm:$0xff]  }
 0x470   : > { %7435 = vmatpush2.bf16.msra.mxu0 %v11928_v24  ;;  %v11960_v24 = vld [vmem:[#allocation12 + $0xb44] ss:$16 sps:$4 sm:$0xff]  }
 0x471   : > { %7508 = vmatpush2.bf16.msra.mxu1 %v11931_v20  ;;  %7436 = vmatprep.subr.bf16.mxu0 %v11936_v56  ;;  %v11963_v20 = vld [vmem:[#allocation12 + $0xb4c] ss:$16 sps:$4 sm:$0xff]   ;;  %v11958_v56 = vld [vmem:[#allocation12 + $0xb40] ss:$16 sps:$4 sm:$0xff]  }
 0x472   : > { %7509 = vmatprep.subr.bf16.mxu1 %v11939_v19  ;;  %v11961_v19 = vld [vmem:[#allocation12 + $0xb48] ss:$16 sps:$4 sm:$0xff]  }
 0x474   : > { %7437 = vmatpush2.bf16.msra.mxu0 %v11934_v23  ;;  %v11966_v23 = vld [vmem:[#allocation12 + $0xb24] ss:$16 sps:$4 sm:$0xff]  }
 0x475   : > { %7510 = vmatpush2.bf16.msra.mxu1 %v11937_v37  ;;  %7438 = vmatprep.subr.bf16.mxu0 %v11942_v62  ;;  %v11969_v37 = vld [vmem:[#allocation12 + $0xb2c] ss:$16 sps:$4 sm:$0xff]   ;;  %v11964_v62 = vld [vmem:[#allocation12 + $0xb20] ss:$16 sps:$4 sm:$0xff]  }
 0x476   : > { %7511 = vmatprep.subr.bf16.mxu1 %v11945_v47  ;;  %v11967_v47 = vld [vmem:[#allocation12 + $0xb28] ss:$16 sps:$4 sm:$0xff]  }
 0x478   : > { %7439 = vmatpush2.bf16.msra.mxu0 %v11940_v17  ;;  %v11972_v17 = vld [vmem:[#allocation12 + $0xb04] ss:$16 sps:$4 sm:$0xff]  }
 0x479   : > { %7512 = vmatpush2.bf16.msra.mxu1 %v11943_v55  ;;  %7440 = vmatprep.subr.bf16.mxu0 %v11948_v48  ;;  %v11975_v55 = vld [vmem:[#allocation12 + $0xb0c] ss:$16 sps:$4 sm:$0xff]   ;;  %v11970_v48 = vld [vmem:[#allocation12 + $0xb00] ss:$16 sps:$4 sm:$0xff]  }
 0x47a   : > { %7513 = vmatprep.subr.bf16.mxu1 %v11951_v16  ;;  %v11973_v16 = vld [vmem:[#allocation12 + $0xb08] ss:$16 sps:$4 sm:$0xff]  }
 0x47c   : > { %7441 = vmatpush2.bf16.msra.mxu0 %v11946_v58  ;;  %v11978_v58 = vld [vmem:[#allocation12 + $0xce4] ss:$16 sps:$4 sm:$0xff]  }
 0x47d   : > { %7514 = vmatpush2.bf16.msra.mxu1 %v11949_v32  ;;  %7442 = vmatprep.subr.bf16.mxu0 %v11954_v11  ;;  %v11981_v32 = vld [vmem:[#allocation12 + $0xcec] ss:$16 sps:$4 sm:$0xff]   ;;  %v14439_v11 = vpop.f32.mrf.mxu0 }
 0x47e   : > { %7515 = vmatprep.subr.bf16.mxu1 %v11957_v1  ;;  %v14441_v1 = vpop.f32.mrf.mxu1 }
 0x480   : > { %7443 = vmatpush2.bf16.msra.mxu0 %v11952_v46  ;;  %v5087_v46 = vadd.f32 %v14341_v40, %v14261_v18  ;;  %v11984_v18 = vld [vmem:[#allocation12 + $0xcc4] ss:$16 sps:$4 sm:$0xff]   ;;  %v11987_v40 = vld [vmem:[#allocation12 + $0xccc] ss:$16 sps:$4 sm:$0xff]  }
 0x481   : > { %7516 = vmatpush2.bf16.msra.mxu1 %v11955_v52  ;;  %7444 = vmatprep.subr.bf16.mxu0 %v11960_v24  ;;  %v5160_v52 = vadd.f32 %v14343_v53, %v14263_v41  ;;  %v5091_v41 = vadd.f32 %v14353_v44, %v14271_v6  ;;  %v5164_v53 = vadd.f32 %v14355_v36, %v14273_v39  ;;  %v11982_v6 = vld [vmem:[#allocation12 + $0xcc0] ss:$16 sps:$4 sm:$0xff]   ;;  %v11985_v44 = vld [vmem:[#allocation12 + $0xcc8] ss:$16 sps:$4 sm:$0xff]  }
 0x482   : > { %7517 = vmatprep.subr.bf16.mxu1 %v11963_v20 }
 0x484   : > { %7445 = vmatpush2.bf16.msra.mxu0 %v11958_v56 }
 0x485   : > { %7518 = vmatpush2.bf16.msra.mxu1 %v11961_v19  ;;  %7446 = vmatprep.subr.bf16.mxu0 %v11966_v23  ;;  %v11976_v23 = vld [vmem:[#allocation12 + $0xce0] ss:$16 sps:$4 sm:$0xff]  }
 0x486   : > { %7519 = vmatprep.subr.bf16.mxu1 %v11969_v37  ;;  %v11979_v37 = vld [vmem:[#allocation12 + $0xce8] ss:$16 sps:$4 sm:$0xff]  }
 0x488   : > { %7447 = vmatpush2.bf16.msra.mxu0 %v11964_v62 }
 0x489   : > { %7520 = vmatpush2.bf16.msra.mxu1 %v11967_v47  ;;  %7448 = vmatprep.subr.bf16.mxu0 %v11972_v17 }
 0x48a   : > { %7521 = vmatprep.subr.bf16.mxu1 %v11975_v55 }
 0x48c   : > { %7449 = vmatpush2.bf16.msra.mxu0 %v11970_v48  ;;  %v5689_v24 = vpop.f32.mrf.mxu0 }
 0x48d   : > { %7522 = vmatpush2.bf16.msra.mxu1 %v11973_v16  ;;  %v5762_v20 = vpop.f32.mrf.mxu1  ;;  %v14447_v56 = vadd.f32 %v5689_v24, %v5087_v46  ;;  %7988 = vmatprep.subr.bf16.mxu0 %v11978_v58  ;;  %v11993_v58 = vld [vmem:[#allocation12 + $0xcac] ss:$16 sps:$4 sm:$0xff]   ;;  %v11988_v24 = vld [vmem:[#allocation12 + $0xca0] ss:$16 sps:$4 sm:$0xff]  }
 0x48e   : > { %v14449_v19 = vadd.f32 %v5762_v20, %v5160_v52  ;;  %8061 = vmatprep.subr.bf16.mxu1 %v11981_v32  ;;  %v14451_v62 = vpop.f32.mrf.mxu0  ;;  %v11991_v20 = vld [vmem:[#allocation12 + $0xca8] ss:$16 sps:$4 sm:$0xff]  }
 0x48f   : > { %v14453_v47 = vpop.f32.mrf.mxu1  ;;  %7451 = vmatmul.mubr.bf16.vlgmr.msra.gmra.mxu0 %v14124_v30 }
 0x490   : > { %7524 = vmatmul.mubr.bf16.vlgmr.msra.gmra.mxu1 %v14124_v30  ;;  %7460 = vmatprep.mubr.bf16.mxu0 %v14205_v7  ;;  %v5693_v17 = vpop.f32.mrf.mxu0  ;;  %v11990_v30 = vld [vmem:[#allocation12 + $0xca4] ss:$16 sps:$4 sm:$0xff]  }
 0x491   : > { %7533 = vmatprep.mubr.bf16.mxu1 %v14205_v7  ;;  %v5766_v55 = vpop.f32.mrf.mxu1  ;;  %7989 = vmatpush1.bf16.msra.mxu0 %v11976_v23  ;;  %v14463_v48 = vadd.f32 %v5693_v17, %v5091_v41 }
 0x492   : > { %8062 = vmatpush1.bf16.msra.mxu1 %v11979_v37  ;;  %v14465_v16 = vadd.f32 %v5766_v55, %v5164_v53  ;;  %7990 = vmatprep.subr.bf16.mxu0 %v11984_v18  ;;  %v14467_v39 = vpop.f32.mrf.mxu0  ;;  %v11996_v18 = vld [vmem:[#allocation12 + $0xc84] ss:$16 sps:$4 sm:$0xff]  }
 0x493   : > { %8063 = vmatprep.subr.bf16.mxu1 %v11987_v40  ;;  %v14469_v36 = vpop.f32.mrf.mxu1  ;;  %v11999_v40 = vld [vmem:[#allocation12 + $0xc8c] ss:$16 sps:$4 sm:$0xff]  }
 0x494   : > { %v5699_v32 = vpop.f32.mrf.mxu0 }
 0x495   : > { %v5772_v7 = vpop.f32.mrf.mxu1  ;;  %7991 = vmatpush1.bf16.msra.mxu0 %v11982_v6  ;;  %v14472_v46 = vadd.f32 %v5699_v32, %v14362_v5  ;;  %v12000_v32 = vld [vmem:[#allocation12 + $0xc60] ss:$16 sps:$4 sm:$0xff]  }
 0x496   : > { %8064 = vmatpush1.bf16.msra.mxu1 %v11985_v44  ;;  %v14475_v52 = vadd.f32 %v5772_v7, %v14365_v22  ;;  %7992 = vmatprep.subr.bf16.mxu0 %v11990_v30  ;;  %v5701_v23 = vpop.f32.mrf.mxu0  ;;  %v12002_v44 = vld [vmem:[#allocation12 + $0xc64] ss:$16 sps:$4 sm:$0xff]   ;;  %v12003_v7 = vld [vmem:[#allocation12 + $0xc68] ss:$16 sps:$4 sm:$0xff]  }
 0x497   : > { %8065 = vmatprep.subr.bf16.mxu1 %v11993_v58  ;;  %v5774_v37 = vpop.f32.mrf.mxu1  ;;  %7461 = vmatmul.mubr.bf16.gmra.mxu0 %v14207_v42  ;;  %v14480_v41 = vadd.f32 %v5701_v23, %v14370_v51  ;;  %v11997_v51 = vld [vmem:[#allocation12 + $0xc88] ss:$16 sps:$4 sm:$0xff]   ;;  %v12008_v23 = vld [vmem:[#allocation12 + $0xc44] ss:$16 sps:$4 sm:$0xff]  }
 0x498   : > { %7534 = vmatmul.mubr.bf16.gmra.mxu1 %v14207_v42  ;;  %v14483_v5 = vadd.f32 %v5774_v37, %v14373_v26  ;;  %7470 = vmatprep.mubr.bf16.mxu0 %v14209_v14  ;;  %v5703_v22 = vpop.f32.mrf.mxu0  ;;  %v11994_v42 = vld [vmem:[#allocation12 + $0xc80] ss:$16 sps:$4 sm:$0xff]   ;;  %v12011_v37 = vld [vmem:[#allocation12 + $0xc4c] ss:$16 sps:$4 sm:$0xff]  }
 0x499   : > { %7543 = vmatprep.mubr.bf16.mxu1 %v14209_v14  ;;  %v5776_v53 = vpop.f32.mrf.mxu1  ;;  %7993 = vmatpush1.bf16.msra.mxu0 %v11988_v24  ;;  %v14488_v17 = vadd.f32 %v5703_v22, %v14378_v38  ;;  %v12005_v14 = vld [vmem:[#allocation12 + $0xc6c] ss:$16 sps:$4 sm:$0xff]  }
 0x49a   : > { %8066 = vmatpush1.bf16.msra.mxu1 %v11991_v20  ;;  %v14491_v55 = vadd.f32 %v5776_v53, %v14381_v28  ;;  %7994 = vmatprep.subr.bf16.mxu0 %v11996_v18  ;;  %v14493_v26 = vpop.f32.mrf.mxu0 }
 0x49b   : > { %8067 = vmatprep.subr.bf16.mxu1 %v11999_v40  ;;  %v14495_v6 = vpop.f32.mrf.mxu1 }
 0x49c   : > { %v5709_v30 = vpop.f32.mrf.mxu0 }
 0x49d   : > { %v5782_v58 = vpop.f32.mrf.mxu1  ;;  %7995 = vmatpush1.bf16.msra.mxu0 %v11994_v42  ;;  %v14498_v38 = vadd.f32 %v5709_v30, %v14392_v2  ;;  %v12012_v30 = vld [vmem:[#allocation12 + $0xc20] ss:$16 sps:$4 sm:$0xff]  }
 0x49e   : > { %8068 = vmatpush1.bf16.msra.mxu1 %v11997_v51  ;;  %v14501_v28 = vadd.f32 %v5782_v58, %v14395_v35  ;;  %7996 = vmatprep.subr.bf16.mxu0 %v12002_v44  ;;  %v5711_v24 = vpop.f32.mrf.mxu0  ;;  %v12014_v51 = vld [vmem:[#allocation12 + $0xc24] ss:$16 sps:$4 sm:$0xff]   ;;  %v12015_v58 = vld [vmem:[#allocation12 + $0xc28] ss:$16 sps:$4 sm:$0xff]  }
 0x49f   : > { %8069 = vmatprep.subr.bf16.mxu1 %v12005_v14  ;;  %v5784_v20 = vpop.f32.mrf.mxu1  ;;  %7471 = vmatmul.mubr.bf16.gmra.mxu0 %v14212_v45  ;;  %v14506_v18 = vadd.f32 %v5711_v24, %v14402_v54  ;;  %v12009_v54 = vld [vmem:[#allocation12 + $0xc48] ss:$16 sps:$4 sm:$0xff]   ;;  %v12020_v24 = vld [vmem:[#allocation12 + $0xc04] ss:$16 sps:$4 sm:$0xff]  }
 0x4a0   : > { %7544 = vmatmul.mubr.bf16.gmra.mxu1 %v14212_v45  ;;  %v14509_v2 = vadd.f32 %v5784_v20, %v14405_v29  ;;  %7480 = vmatprep.mubr.bf16.mxu0 %v14220_v43  ;;  %v5713_v35 = vpop.f32.mrf.mxu0  ;;  %v12006_v45 = vld [vmem:[#allocation12 + $0xc40] ss:$16 sps:$4 sm:$0xff]   ;;  %v12023_v20 = vld [vmem:[#allocation12 + $0xc0c] ss:$16 sps:$4 sm:$0xff]  }
 0x4a1   : > { %7553 = vmatprep.mubr.bf16.mxu1 %v14220_v43  ;;  %v5786_v40 = vpop.f32.mrf.mxu1  ;;  %7997 = vmatpush1.bf16.msra.mxu0 %v12000_v32  ;;  %v14514_v22 = vadd.f32 %v5713_v35, %v14408_v50  ;;  %v12017_v43 = vld [vmem:[#allocation12 + $0xc2c] ss:$16 sps:$4 sm:$0xff]  }
 0x4a2   : > { %8070 = vmatpush1.bf16.msra.mxu1 %v12003_v7  ;;  %v14517_v53 = vadd.f32 %v5786_v40, %v14411_v34  ;;  %7998 = vmatprep.subr.bf16.mxu0 %v12008_v23  ;;  %v14519_v29 = vpop.f32.mrf.mxu0 }
 0x4a3   : > { %8071 = vmatprep.subr.bf16.mxu1 %v12011_v37  ;;  %v14521_v42 = vpop.f32.mrf.mxu1 }
 0x4a4   : > { %v5719_v44 = vpop.f32.mrf.mxu0 }
 0x4a5   : > { %v5792_v14 = vpop.f32.mrf.mxu1  ;;  %7999 = vmatpush1.bf16.msra.mxu0 %v12006_v45  ;;  %v14524_v50 = vadd.f32 %v5719_v44, %v14418_v3  ;;  %v12029_v45 = vld [vmem:[#allocation12 + $0xdec] ss:$16 sps:$4 sm:$0xff]   ;;  %v12033_v44 = vld [vmem:[#allocation12 + $0xdc8] ss:$16 sps:$4 sm:$0xff]  }
 0x4a6   : > { %8072 = vmatpush1.bf16.msra.mxu1 %v12009_v54  ;;  %v14527_v34 = vadd.f32 %v5792_v14, %v14421_v25  ;;  %8000 = vmatprep.subr.bf16.mxu0 %v12014_v51  ;;  %v5721_v32 = vpop.f32.mrf.mxu0  ;;  %v12024_v54 = vld [vmem:[#allocation12 + $0xde0] ss:$16 sps:$4 sm:$0xff]   ;;  %v12032_v51 = vld [vmem:[#allocation12 + $0xdc4] ss:$16 sps:$4 sm:$0xff]   ;;  %v12041_v14 = vld [vmem:[#allocation12 + $0xdac] ss:$16 sps:$4 sm:$0xff]  }
 0x4a7   : > { %8073 = vmatprep.subr.bf16.mxu1 %v12017_v43  ;;  %v5794_v7 = vpop.f32.mrf.mxu1  ;;  %7481 = vmatmul.mubr.bf16.gmra.mxu0 %v14222_v10  ;;  %v14532_v23 = vadd.f32 %v5721_v32, %v14426_v63  ;;  %v12021_v63 = vld [vmem:[#allocation12 + $0xc08] ss:$16 sps:$4 sm:$0xff]   ;;  %v12035_v43 = vld [vmem:[#allocation12 + $0xdcc] ss:$16 sps:$4 sm:$0xff]   ;;  %v12044_v32 = vld [vmem:[#allocation12 + $0xd84] ss:$16 sps:$4 sm:$0xff]  }
 0x4a8   : > { %7554 = vmatmul.mubr.bf16.gmra.mxu1 %v14222_v10  ;;  %v14535_v3 = vadd.f32 %v5794_v7, %v14429_v13  ;;  %8020 = vmatprep.mubr.bf16.mxu0 %v14049_v4  ;;  %v5723_v25 = vpop.f32.mrf.mxu0  ;;  %v12018_v10 = vld [vmem:[#allocation12 + $0xc00] ss:$16 sps:$4 sm:$0xff]   ;;  %v12026_v13 = vld [vmem:[#allocation12 + $0xde4] ss:$16 sps:$4 sm:$0xff]   ;;  %v12047_v7 = vld [vmem:[#allocation12 + $0xd8c] ss:$16 sps:$4 sm:$0xff]  }
 0x4a9   : > { %8093 = vmatprep.mubr.bf16.mxu1 %v14049_v4  ;;  %v5796_v37 = vpop.f32.mrf.mxu1  ;;  %8001 = vmatpush1.bf16.msra.mxu0 %v12012_v30  ;;  %v14540_v35 = vadd.f32 %v5723_v25, %v14434_v15  ;;  %v12027_v4 = vld [vmem:[#allocation12 + $0xde8] ss:$16 sps:$4 sm:$0xff]   ;;  %v12030_v15 = vld [vmem:[#allocation12 + $0xdc0] ss:$16 sps:$4 sm:$0xff]   ;;  %v12050_v25 = vld [vmem:[#allocation12 + $0xd64] ss:$16 sps:$4 sm:$0xff]  }
 0x4aa   : > { %8074 = vmatpush1.bf16.msra.mxu1 %v12015_v58  ;;  %v14543_v40 = vadd.f32 %v5796_v37, %v14437_v57  ;;  %8002 = vmatprep.subr.bf16.mxu0 %v12020_v24  ;;  %v12038_v57 = vld [vmem:[#allocation12 + $0xda4] ss:$16 sps:$4 sm:$0xff]   ;;  %v12036_v30 = vld [vmem:[#allocation12 + $0xda0] ss:$16 sps:$4 sm:$0xff]   ;;  %v12039_v58 = vld [vmem:[#allocation12 + $0xda8] ss:$16 sps:$4 sm:$0xff]  }
 0x4ab   : > { %8075 = vmatprep.subr.bf16.mxu1 %v12023_v20  ;;  %v12042_v24 = vld [vmem:[#allocation12 + $0xd80] ss:$16 sps:$4 sm:$0xff]   ;;  %v12045_v20 = vld [vmem:[#allocation12 + $0xd88] ss:$16 sps:$4 sm:$0xff]   ;;  %v12053_v37 = vld [vmem:[#allocation12 + $0xd6c] ss:$16 sps:$4 sm:$0xff]  }
 0x4ad   : > { %8003 = vmatpush1.bf16.msra.mxu0 %v12018_v10  ;;  %v12048_v10 = vld [vmem:[#allocation12 + $0xd60] ss:$16 sps:$4 sm:$0xff]  }
 0x4ae   : > { %8076 = vmatpush1.bf16.msra.mxu1 %v12021_v63  ;;  %8004 = vmatprep.subr.bf16.mxu0 %v12026_v13  ;;  %v12051_v63 = vld [vmem:[#allocation12 + $0xd68] ss:$16 sps:$4 sm:$0xff]   ;;  %v12056_v13 = vld [vmem:[#allocation12 + $0xd44] ss:$16 sps:$4 sm:$0xff]  }
 0x4af   : > { %8077 = vmatprep.subr.bf16.mxu1 %v12029_v45  ;;  %v12059_v45 = vld [vmem:[#allocation12 + $0xd4c] ss:$16 sps:$4 sm:$0xff]  }
 0x4b1   : > { %8005 = vmatpush2.bf16.msra.mxu0 %v12024_v54  ;;  %v12054_v54 = vld [vmem:[#allocation12 + $0xd40] ss:$16 sps:$4 sm:$0xff]  }
 0x4b2   : > { %8078 = vmatpush2.bf16.msra.mxu1 %v12027_v4  ;;  %8006 = vmatprep.subr.bf16.mxu0 %v12032_v51  ;;  %v12057_v4 = vld [vmem:[#allocation12 + $0xd48] ss:$16 sps:$4 sm:$0xff]   ;;  %v12062_v51 = vld [vmem:[#allocation12 + $0xd24] ss:$16 sps:$4 sm:$0xff]  }
 0x4b3   : > { %8079 = vmatprep.subr.bf16.mxu1 %v12035_v43  ;;  %v12065_v43 = vld [vmem:[#allocation12 + $0xd2c] ss:$16 sps:$4 sm:$0xff]  }
 0x4b5   : > { %8007 = vmatpush2.bf16.msra.mxu0 %v12030_v15  ;;  %v12060_v15 = vld [vmem:[#allocation12 + $0xd20] ss:$16 sps:$4 sm:$0xff]  }
 0x4b6   : > { %8080 = vmatpush2.bf16.msra.mxu1 %v12033_v44  ;;  %8008 = vmatprep.subr.bf16.mxu0 %v12038_v57  ;;  %v12063_v44 = vld [vmem:[#allocation12 + $0xd28] ss:$16 sps:$4 sm:$0xff]   ;;  %v12068_v57 = vld [vmem:[#allocation12 + $0xd04] ss:$16 sps:$4 sm:$0xff]  }
 0x4b7   : > { %8081 = vmatprep.subr.bf16.mxu1 %v12041_v14  ;;  %v12071_v14 = vld [vmem:[#allocation12 + $0xd0c] ss:$16 sps:$4 sm:$0xff]  }
 0x4b9   : > { %8009 = vmatpush2.bf16.msra.mxu0 %v12036_v30  ;;  %v12066_v30 = vld [vmem:[#allocation12 + $0xd00] ss:$16 sps:$4 sm:$0xff]  }
 0x4ba   : > { %8082 = vmatpush2.bf16.msra.mxu1 %v12039_v58  ;;  %8010 = vmatprep.subr.bf16.mxu0 %v12044_v32  ;;  %v12069_v58 = vld [vmem:[#allocation12 + $0xd08] ss:$16 sps:$4 sm:$0xff]   ;;  %v12074_v32 = vld [vmem:[#allocation12 + $0xee4] ss:$16 sps:$4 sm:$0xff]  }
 0x4bb   : > { %8083 = vmatprep.subr.bf16.mxu1 %v12047_v7  ;;  %v12077_v7 = vld [vmem:[#allocation12 + $0xeec] ss:$16 sps:$4 sm:$0xff]  }
 0x4bd   : > { %8011 = vmatpush2.bf16.msra.mxu0 %v12042_v24  ;;  %v5089_v24 = vadd.f32 %v14345_v60, %v14267_v49  ;;  %v12072_v49 = vld [vmem:[#allocation12 + $0xee0] ss:$16 sps:$4 sm:$0xff]  }
 0x4be   : > { %8084 = vmatpush2.bf16.msra.mxu1 %v12045_v20  ;;  %8012 = vmatprep.subr.bf16.mxu0 %v12050_v25  ;;  %v14547_v20 = vpop.f32.mrf.mxu0  ;;  %v14549_v25 = vpop.f32.mrf.mxu1 }
 0x4bf   : > { %8085 = vmatprep.subr.bf16.mxu1 %v12053_v37  ;;  %v5162_v37 = vadd.f32 %v14347_v61, %v14269_v31  ;;  %v5093_v31 = vadd.f32 %v14357_v9, %v14279_v0 }
 0x4c1   : > { %8013 = vmatpush2.bf16.msra.mxu0 %v12048_v10  ;;  %v5802_v10 = vadd.f32 %v14451_v62, %v5089_v24  ;;  %v12078_v24 = vld [vmem:[#allocation12 + $0xec0] ss:$16 sps:$4 sm:$0xff]  }
 0x4c2   : > { %8086 = vmatpush2.bf16.msra.mxu1 %v12051_v63  ;;  %8014 = vmatprep.subr.bf16.mxu0 %v12056_v13 }
 0x4c3   : > { %8087 = vmatprep.subr.bf16.mxu1 %v12059_v45  ;;  %v5804_v45 = vadd.f32 %v14453_v47, %v5162_v37  ;;  %v12081_v37 = vld [vmem:[#allocation12 + $0xec8] ss:$16 sps:$4 sm:$0xff]  }
 0x4c5   : > { %8015 = vmatpush2.bf16.msra.mxu0 %v12054_v54 }
 0x4c6   : > { %8088 = vmatpush2.bf16.msra.mxu1 %v12057_v4  ;;  %8016 = vmatprep.subr.bf16.mxu0 %v12062_v51  ;;  %v12075_v4 = vld [vmem:[#allocation12 + $0xee8] ss:$16 sps:$4 sm:$0xff]   ;;  %v12080_v51 = vld [vmem:[#allocation12 + $0xec4] ss:$16 sps:$4 sm:$0xff]  }
 0x4c7   : > { %8089 = vmatprep.subr.bf16.mxu1 %v12065_v43  ;;  %v12083_v43 = vld [vmem:[#allocation12 + $0xecc] ss:$16 sps:$4 sm:$0xff]  }
 0x4c9   : > { %8017 = vmatpush2.bf16.msra.mxu0 %v12060_v15  ;;  %v15423_v15 = vld [vmem:[#allocation52_spill] sm:$0xff] }
 0x4ca   : > { %8090 = vmatpush2.bf16.msra.mxu1 %v12063_v44  ;;  %8018 = vmatprep.subr.bf16.mxu0 %v12068_v57  ;;  %v15424_v44 = vld [vmem:[#allocation65_spill] sm:$0xff] }
 0x4cb   : > { %8091 = vmatprep.subr.bf16.mxu1 %v12071_v14  ;;  %v5166_v47 = vadd.f32 %v15424_v44, %v15423_v15  ;;  %v15425_v57 = vld [vmem:[#allocation29_spill] sm:$0xff]  ;;  %v5806_v14 = vadd.f32 %v14467_v39, %v5093_v31  ;;  %v12092_v44 = vld [vmem:[#allocation12 + $0xe84] ss:$16 sps:$4 sm:$0xff]  }
 0x4cd   : > { %8019 = vmatpush2.bf16.msra.mxu0 %v12066_v30  ;;  %v6271_v63 = vpop.f32.mrf.mxu0  ;;  %v15426_v30 = vld [vmem:[#allocation25_spill] sm:$0xff] }
 0x4ce   : > { %8092 = vmatpush2.bf16.msra.mxu1 %v12069_v58  ;;  %v6344_v13 = vpop.f32.mrf.mxu1  ;;  %v14556_v54 = vadd.f32 %v6271_v63, %v14447_v56  ;;  %8571 = vmatprep.subr.bf16.mxu0 %v12074_v32  ;;  %v5808_v58 = vadd.f32 %v14469_v36, %v5166_v47  ;;  %v12086_v63 = vld [vmem:[#allocation12 + $0xea4] ss:$16 sps:$4 sm:$0xff]   ;;  %v12095_v47 = vld [vmem:[#allocation12 + $0xe8c] ss:$16 sps:$4 sm:$0xff]  }
 0x4cf   : > { %v14559_v60 = vadd.f32 %v6344_v13, %v14449_v19  ;;  %8644 = vmatprep.subr.bf16.mxu1 %v12077_v7  ;;  %v6273_v61 = vpop.f32.mrf.mxu0  ;;  %v12089_v13 = vld [vmem:[#allocation12 + $0xeac] ss:$16 sps:$4 sm:$0xff]  }
 0x4d0   : > { %v6346_v62 = vpop.f32.mrf.mxu1  ;;  %8021 = vmatmul.mubr.bf16.vlgmr.msra.gmra.mxu0 %v15425_v57  ;;  %v14567_v56 = vadd.f32 %v6273_v61, %v5802_v10  ;;  %v12087_v61 = vld [vmem:[#allocation12 + $0xea8] ss:$16 sps:$4 sm:$0xff]  }
 0x4d1   : > { %8094 = vmatmul.mubr.bf16.vlgmr.msra.gmra.mxu1 %v15425_v57  ;;  %v14569_v19 = vadd.f32 %v6346_v62, %v5804_v45  ;;  %8030 = vmatprep.mubr.bf16.mxu0 %v15426_v30  ;;  %v6275_v9 = vpop.f32.mrf.mxu0  ;;  %v15427_v62 = vld [vmem:[#allocation54_spill] sm:$0xff]  ;;  %v15428_v57 = vld [vmem:[#allocation56_spill] sm:$0xff] }
 0x4d2   : > { %8103 = vmatprep.mubr.bf16.mxu1 %v15426_v30  ;;  %v6348_v0 = vpop.f32.mrf.mxu1  ;;  %8572 = vmatpush1.bf16.msra.mxu0 %v12072_v49  ;;  %v14576_v32 = vadd.f32 %v6275_v9, %v14463_v48  ;;  %v15429_v30 = vld [vmem:[#allocation31_spill] sm:$0xff]  ;;  %v15430_v9 = vld [vmem:[#allocation46_spill] sm:$0xff] }
 0x4d3   : > { %8645 = vmatpush1.bf16.msra.mxu1 %v12075_v4  ;;  %v14579_v7 = vadd.f32 %v6348_v0, %v14465_v16  ;;  %8573 = vmatprep.subr.bf16.mxu0 %v12080_v51  ;;  %v6277_v39 = vpop.f32.mrf.mxu0  ;;  %v12084_v4 = vld [vmem:[#allocation12 + $0xea0] ss:$16 sps:$4 sm:$0xff]   ;;  %v5103_v51 = vadd.f32 %v14383_v21, %v15427_v62  ;;  %v15431_v62 = vld [vmem:[#allocation39_spill] sm:$0xff] }
 0x4d4   : > { %8646 = vmatprep.subr.bf16.mxu1 %v12083_v43  ;;  %v6350_v10 = vpop.f32.mrf.mxu1  ;;  %v14581_v45 = vadd.f32 %v6277_v39, %v5806_v14  ;;  %v5176_v14 = vadd.f32 %v14385_v59, %v15428_v57 }
 0x4d5   : > { %v14583_v31 = vadd.f32 %v6350_v10, %v5808_v58  ;;  %v6281_v36 = vpop.f32.mrf.mxu0  ;;  %v5814_v21 = vadd.f32 %v14493_v26, %v5103_v51  ;;  %v12098_v10 = vld [vmem:[#allocation12 + $0xe64] ss:$16 sps:$4 sm:$0xff]   ;;  %v5113_v51 = vadd.f32 %v14413_v27, %v15431_v62  ;;  %v12108_v62 = vld [vmem:[#allocation12 + $0xe20] ss:$16 sps:$4 sm:$0xff]  }
 0x4d6   : > { %v6354_v49 = vpop.f32.mrf.mxu1  ;;  %8574 = vmatpush1.bf16.msra.mxu0 %v12078_v24  ;;  %v14586_v48 = vadd.f32 %v6281_v36, %v14472_v46  ;;  %v5816_v59 = vadd.f32 %v14495_v6, %v5176_v14  ;;  %v12104_v14 = vld [vmem:[#allocation12 + $0xe44] ss:$16 sps:$4 sm:$0xff]  }
 0x4d7   : > { %8647 = vmatpush1.bf16.msra.mxu1 %v12081_v37  ;;  %v14589_v16 = vadd.f32 %v6354_v49, %v14475_v52  ;;  %8575 = vmatprep.subr.bf16.mxu0 %v12086_v63  ;;  %v6283_v43 = vpop.f32.mrf.mxu0  ;;  %v12093_v37 = vld [vmem:[#allocation12 + $0xe88] ss:$16 sps:$4 sm:$0xff]   ;;  %v12101_v63 = vld [vmem:[#allocation12 + $0xe6c] ss:$16 sps:$4 sm:$0xff]  }
 0x4d8   : > { %8648 = vmatprep.subr.bf16.mxu1 %v12089_v13  ;;  %v6356_v15 = vpop.f32.mrf.mxu1  ;;  %8031 = vmatmul.mubr.bf16.gmra.mxu0 %v15429_v30  ;;  %v14598_v46 = vadd.f32 %v6283_v43, %v14480_v41  ;;  %v14625_v43 = vld [vmem:[#allocation3] sm:$0xff] }
 0x4d9   : > { %8104 = vmatmul.mubr.bf16.gmra.mxu1 %v15429_v30  ;;  %v14601_v52 = vadd.f32 %v6356_v15, %v14483_v5  ;;  %8040 = vmatprep.mubr.bf16.mxu0 %v15430_v9  ;;  %v6285_v0 = vpop.f32.mrf.mxu0  ;;  %v12090_v5 = vld [vmem:[#allocation12 + $0xe80] ss:$16 sps:$4 sm:$0xff]   ;;  %v15433_v30 = vld [vmem:[#allocation61_spill] sm:$0xff] }
 0x4da   : > { %8113 = vmatprep.mubr.bf16.mxu1 %v15430_v9  ;;  %v6358_v58 = vpop.f32.mrf.mxu1  ;;  %8576 = vmatpush1.bf16.msra.mxu0 %v12084_v4  ;;  %v14608_v24 = vadd.f32 %v6285_v0, %v14488_v17  ;;  %v12096_v4 = vld [vmem:[#allocation12 + $0xe60] ss:$16 sps:$4 sm:$0xff]   ;;  %v5822_v0 = vadd.f32 %v14519_v29, %v5113_v51  ;;  %v12111_v51 = vld [vmem:[#allocation12 + $0xe28] ss:$16 sps:$4 sm:$0xff]  }
 0x4db   : > { %8649 = vmatpush1.bf16.msra.mxu1 %v12087_v61  ;;  %v14611_v41 = vadd.f32 %v6358_v58, %v14491_v55  ;;  %8577 = vmatprep.subr.bf16.mxu0 %v12092_v44  ;;  %v6287_v26 = vpop.f32.mrf.mxu0  ;;  %v12099_v61 = vld [vmem:[#allocation12 + $0xe68] ss:$16 sps:$4 sm:$0xff]   ;;  %v15432_v15 = vld [vmem:[#allocation62_spill] sm:$0xff] }
 0x4dc   : > { %8650 = vmatprep.subr.bf16.mxu1 %v12095_v47  ;;  %v6360_v39 = vpop.f32.mrf.mxu1  ;;  %v14613_v13 = vadd.f32 %v6287_v26, %v5814_v21  ;;  %v10584_v44 = vcombine.high %v15432_v15, %v14625_v43  ;;  %v15434_v21 = vld [vmem:[#allocation58_spill] sm:$0xff]  ;;  %v12105_v26 = vld [vmem:[#allocation12 + $0xe48] ss:$16 sps:$4 sm:$0xff]   ;;  %v15435_v15 = vld [vmem:[#allocation40_spill] sm:$0xff] }
 0x4dd   : > { %v14615_v36 = vadd.f32 %v6360_v39, %v5816_v59  ;;  %v6291_v6 = vpop.f32.mrf.mxu0  ;;  %v12110_v39 = vld [vmem:[#allocation12 + $0xe24] ss:$16 sps:$4 sm:$0xff]  }
 0x4de   : > { %v6364_v49 = vpop.f32.mrf.mxu1  ;;  %8578 = vmatpush1.bf16.msra.mxu0 %v12090_v5  ;;  %v14618_v17 = vadd.f32 %v6291_v6, %v14498_v38  ;;  %v12107_v38 = vld [vmem:[#allocation12 + $0xe4c] ss:$16 sps:$4 sm:$0xff]  }
 0x4df   : > { %8651 = vmatpush1.bf16.msra.mxu1 %v12093_v37  ;;  %v14621_v55 = vadd.f32 %v6364_v49, %v14501_v28  ;;  %8579 = vmatprep.subr.bf16.mxu0 %v12098_v10  ;;  %v6293_v47 = vpop.f32.mrf.mxu0  ;;  %v5186_v28 = vadd.f32 %v14415_v8, %v15433_v30  ;;  %v12113_v10 = vld [vmem:[#allocation12 + $0xe2c] ss:$16 sps:$4 sm:$0xff]  }
 0x4e0   : > { %8652 = vmatprep.subr.bf16.mxu1 %v12101_v63  ;;  %v6366_v57 = vpop.f32.mrf.mxu1  ;;  %8041 = vmatmul.mubr.bf16.gmra.mxu0 %v15434_v21  ;;  %v14634_v27 = vadd.f32 %v6293_v47, %v14506_v18  ;;  %v12102_v18 = vld [vmem:[#allocation12 + $0xe40] ss:$16 sps:$4 sm:$0xff]   ;;  %v15436_v30 = vld [vmem:[#allocation51_spill] sm:$0xff] }
 0x4e1   : > { %8114 = vmatmul.mubr.bf16.gmra.mxu1 %v15434_v21  ;;  %v14637_v9 = vadd.f32 %v6366_v57, %v14509_v2  ;;  %8050 = vmatprep.mubr.bf16.mxu0 %v10584_v44  ;;  %v6295_v58 = vpop.f32.mrf.mxu0  ;;  %v5824_v5 = vadd.f32 %v14521_v42, %v5186_v28 }
 0x4e2   : > { %8123 = vmatprep.mubr.bf16.mxu1 %v10584_v44  ;;  %v6368_v59 = vpop.f32.mrf.mxu1  ;;  %8580 = vmatpush1.bf16.msra.mxu0 %v12096_v4  ;;  %v14642_v8 = vadd.f32 %v6295_v58, %v14514_v22  ;;  %v12275_v4 = vld [vmem:[#allocation3 + $0x20] sm:$0xff]  ;;  %v5123_v44 = vadd.f32 %v14439_v11, %v15435_v15  ;;  %v15437_v11 = vld [vmem:[#allocation30_spill] sm:$0xff] }
 0x4e3   : > { %8653 = vmatpush1.bf16.msra.mxu1 %v12099_v61  ;;  %v14645_v37 = vadd.f32 %v6368_v59, %v14517_v53  ;;  %8581 = vmatprep.subr.bf16.mxu0 %v12104_v14  ;;  %v6297_v2 = vpop.f32.mrf.mxu0  ;;  %v10583_v61 = vcombine.low %v12275_v4, %v14625_v43  ;;  %v12116_v14 = vld [vmem:[#allocation12 + $0xe04] ss:$16 sps:$4 sm:$0xff]  }
 0x4e4   : > { %8654 = vmatprep.subr.bf16.mxu1 %v12107_v38  ;;  %v6370_v29 = vpop.f32.mrf.mxu1  ;;  %v14647_v63 = vadd.f32 %v6297_v2, %v5822_v0  ;;  %v12119_v38 = vld [vmem:[#allocation12 + $0xe0c] ss:$16 sps:$4 sm:$0xff]   ;;  %v5830_v21 = vadd.f32 %v14547_v20, %v5123_v44  ;;  %v12134_v4 = vld [vmem:[#allocation12 + $0xfa4] ss:$16 sps:$4 sm:$0xff]  }
 0x4e5   : > { %v14649_v6 = vadd.f32 %v6370_v29, %v5824_v5  ;;  %v6301_v42 = vpop.f32.mrf.mxu0  ;;  %v12117_v5 = vld [vmem:[#allocation12 + $0xe08] ss:$16 sps:$4 sm:$0xff]   ;;  %v12125_v2 = vld [vmem:[#allocation12 + $0xfec] ss:$16 sps:$4 sm:$0xff]   ;;  %v12140_v15 = vld [vmem:[#allocation12 + $0xf84] ss:$16 sps:$4 sm:$0xff]  }
 0x4e6   : > { %v6374_v49 = vpop.f32.mrf.mxu1  ;;  %8582 = vmatpush1.bf16.msra.mxu0 %v12102_v18  ;;  %v14652_v22 = vadd.f32 %v6301_v42, %v14524_v50  ;;  %v5196_v50 = vadd.f32 %v14441_v1, %v15436_v30  ;;  %v12126_v42 = vld [vmem:[#allocation12 + $0xfc0] ss:$16 sps:$4 sm:$0xff]   ;;  %v12143_v44 = vld [vmem:[#allocation12 + $0xf8c] ss:$16 sps:$4 sm:$0xff]  }
 0x4e7   : > { %8655 = vmatpush1.bf16.msra.mxu1 %v12105_v26  ;;  %v14655_v53 = vadd.f32 %v6374_v49, %v14527_v34  ;;  %8583 = vmatprep.subr.bf16.mxu0 %v12110_v39  ;;  %v6303_v47 = vpop.f32.mrf.mxu0  ;;  %v12122_v26 = vld [vmem:[#allocation12 + $0xfe4] ss:$16 sps:$4 sm:$0xff]   ;;  %v12129_v49 = vld [vmem:[#allocation12 + $0xfc8] ss:$16 sps:$4 sm:$0xff]   ;;  %v12144_v30 = vld [vmem:[#allocation12 + $0xf60] ss:$16 sps:$4 sm:$0xff]  }
 0x4e8   : > { %8656 = vmatprep.subr.bf16.mxu1 %v12113_v10  ;;  %v6376_v57 = vpop.f32.mrf.mxu1  ;;  %8051 = vmatmul.mubr.bf16.gmra.mxu0 %v10583_v61  ;;  %v14663_v34 = vadd.f32 %v6303_v47, %v14532_v23  ;;  %v5832_v59 = vadd.f32 %v14549_v25, %v5196_v50  ;;  %v12120_v25 = vld [vmem:[#allocation12 + $0xfe0] ss:$16 sps:$4 sm:$0xff]   ;;  %v12131_v10 = vld [vmem:[#allocation12 + $0xfcc] ss:$16 sps:$4 sm:$0xff]   ;;  %v12147_v50 = vld [vmem:[#allocation12 + $0xf68] ss:$16 sps:$4 sm:$0xff]  }
 0x4e9   : > { %8124 = vmatmul.mubr.bf16.gmra.mxu1 %v10583_v61  ;;  %v14666_v28 = vadd.f32 %v6376_v57, %v14535_v3  ;;  %8603 = vmatprep.mubr.bf16.mxu0 %v15437_v11  ;;  %v6305_v0 = vpop.f32.mrf.mxu0  ;;  %v12114_v3 = vld [vmem:[#allocation12 + $0xe00] ss:$16 sps:$4 sm:$0xff]   ;;  %v12137_v61 = vld [vmem:[#allocation12 + $0xfac] ss:$16 sps:$4 sm:$0xff]   ;;  %v12141_v57 = vld [vmem:[#allocation12 + $0xf88] ss:$16 sps:$4 sm:$0xff]  }
 0x4ea   : > { %8676 = vmatprep.mubr.bf16.mxu1 %v15437_v11  ;;  %v6378_v58 = vpop.f32.mrf.mxu1  ;;  %8584 = vmatpush1.bf16.msra.mxu0 %v12108_v62  ;;  %v14673_v1 = vadd.f32 %v6305_v0, %v14540_v35  ;;  %v12123_v35 = vld [vmem:[#allocation12 + $0xfe8] ss:$16 sps:$4 sm:$0xff]   ;;  %v12132_v62 = vld [vmem:[#allocation12 + $0xfa0] ss:$16 sps:$4 sm:$0xff]   ;;  %v12155_v11 = vld [vmem:[#allocation12 + $0xf4c] ss:$16 sps:$4 sm:$0xff]  }
 0x4eb   : > { %8657 = vmatpush1.bf16.msra.mxu1 %v12111_v51  ;;  %v14676_v23 = vadd.f32 %v6378_v58, %v14543_v40  ;;  %8585 = vmatprep.subr.bf16.mxu0 %v12116_v14  ;;  %v6307_v20 = vpop.f32.mrf.mxu0  ;;  %v12128_v40 = vld [vmem:[#allocation12 + $0xfc4] ss:$16 sps:$4 sm:$0xff]   ;;  %v12135_v51 = vld [vmem:[#allocation12 + $0xfa8] ss:$16 sps:$4 sm:$0xff]   ;;  %v12138_v47 = vld [vmem:[#allocation12 + $0xf80] ss:$16 sps:$4 sm:$0xff]  }
 0x4ec   : > { %8658 = vmatprep.subr.bf16.mxu1 %v12119_v38  ;;  %v6380_v18 = vpop.f32.mrf.mxu1  ;;  %v14678_v29 = vadd.f32 %v6307_v20, %v5830_v21  ;;  %v12146_v14 = vld [vmem:[#allocation12 + $0xf64] ss:$16 sps:$4 sm:$0xff]   ;;  %v12149_v38 = vld [vmem:[#allocation12 + $0xf6c] ss:$16 sps:$4 sm:$0xff]   ;;  %v12150_v0 = vld [vmem:[#allocation12 + $0xf40] ss:$16 sps:$4 sm:$0xff]  }
 0x4ed   : > { %v14680_v39 = vadd.f32 %v6380_v18, %v5832_v59  ;;  %v12152_v21 = vld [vmem:[#allocation12 + $0xf44] ss:$16 sps:$4 sm:$0xff]   ;;  %v12153_v58 = vld [vmem:[#allocation12 + $0xf48] ss:$16 sps:$4 sm:$0xff]  }
 0x4ee   : > { %8586 = vmatpush1.bf16.msra.mxu0 %v12114_v3  ;;  %v12158_v59 = vld [vmem:[#allocation12 + $0xf24] ss:$16 sps:$4 sm:$0xff]   ;;  %v12161_v3 = vld [vmem:[#allocation12 + $0xf2c] ss:$16 sps:$4 sm:$0xff]   ;;  %v12159_v20 = vld [vmem:[#allocation12 + $0xf28] ss:$16 sps:$4 sm:$0xff]  }
 0x4ef   : > { %8659 = vmatpush1.bf16.msra.mxu1 %v12117_v5  ;;  %8587 = vmatprep.subr.bf16.mxu0 %v12122_v26  ;;  %v12156_v5 = vld [vmem:[#allocation12 + $0xf20] ss:$16 sps:$4 sm:$0xff]   ;;  %v12164_v18 = vld [vmem:[#allocation12 + $0xf04] ss:$16 sps:$4 sm:$0xff]   ;;  %v12167_v26 = vld [vmem:[#allocation12 + $0xf0c] ss:$16 sps:$4 sm:$0xff]  }
 0x4f0   : > { %8660 = vmatprep.subr.bf16.mxu1 %v12125_v2  ;;  %v12162_v2 = vld [vmem:[#allocation12 + $0xf00] ss:$16 sps:$4 sm:$0xff]  }
 0x4f2   : > { %8588 = vmatpush2.bf16.msra.mxu0 %v12120_v25  ;;  %v12165_v25 = vld [vmem:[#allocation12 + $0xf08] ss:$16 sps:$4 sm:$0xff]  }
 0x4f3   : > { %8661 = vmatpush2.bf16.msra.mxu1 %v12123_v35  ;;  %8589 = vmatprep.subr.bf16.mxu0 %v12128_v40  ;;  %v12170_v35 = vld [vmem:[#allocation12 + $0x10e4] ss:$16 sps:$4 sm:$0xff]   ;;  %v12173_v40 = vld [vmem:[#allocation12 + $0x10ec] ss:$16 sps:$4 sm:$0xff]  }
 0x4f4   : > { %8662 = vmatprep.subr.bf16.mxu1 %v12131_v10  ;;  %v8167_v10 = vshrl.u32 %v14625_v43, 16 }
 0x4f6   : > { %8590 = vmatpush2.bf16.msra.mxu0 %v12126_v42  ;;  %v8170_v42 = vshll.u32 %v14625_v43, 16 }
 0x4f7   : > { %8663 = vmatpush2.bf16.msra.mxu1 %v12129_v49  ;;  %8591 = vmatprep.subr.bf16.mxu0 %v12134_v4 }
 0x4f8   : > { %8664 = vmatprep.subr.bf16.mxu1 %v12137_v61 }
 0x4fa   : > { %8592 = vmatpush2.bf16.msra.mxu0 %v12132_v62 }
 0x4fb   : > { %8665 = vmatpush2.bf16.msra.mxu1 %v12135_v51  ;;  %8593 = vmatprep.subr.bf16.mxu0 %v12140_v15  ;;  %v12168_v51 = vld [vmem:[#allocation12 + $0x10e0] ss:$16 sps:$4 sm:$0xff]   ;;  %v12171_v15 = vld [vmem:[#allocation12 + $0x10e8] ss:$16 sps:$4 sm:$0xff]  }
 0x4fc   : > { %8666 = vmatprep.subr.bf16.mxu1 %v12143_v44 }
 0x4fe   : > { %8594 = vmatpush2.bf16.msra.mxu0 %v12138_v47 }
 0x4ff   : > { %8667 = vmatpush2.bf16.msra.mxu1 %v12141_v57  ;;  %8595 = vmatprep.subr.bf16.mxu0 %v12146_v14  ;;  %v12176_v57 = vld [vmem:[#allocation12 + $0x10c4] ss:$16 sps:$4 sm:$0xff]   ;;  %v12179_v14 = vld [vmem:[#allocation12 + $0x10cc] ss:$16 sps:$4 sm:$0xff]  }
 0x500   : > { %8668 = vmatprep.subr.bf16.mxu1 %v12149_v38  ;;  %v15438_v38 = vld [vmem:[#allocation63_spill] sm:$0xff] }
 0x502   : > { %8596 = vmatpush2.bf16.msra.mxu0 %v12144_v30  ;;  %v8172_v30 = vrot.slane %v8170_v42, 5  ;;  %v12180_v42 = vld [vmem:[#allocation12 + $0x10a0] ss:$16 sps:$4 sm:$0xff]  }
 0x503   : > { %8669 = vmatpush2.bf16.msra.mxu1 %v12147_v50  ;;  %8597 = vmatprep.subr.bf16.mxu0 %v12152_v21  ;;  %v15439_v50 = vld [vmem:[#allocation44_spill] sm:$0xff] }
 0x504   : > { %8670 = vmatprep.subr.bf16.mxu1 %v12155_v11 }
 0x506   : > { %8598 = vmatpush2.bf16.msra.mxu0 %v12150_v0 }
 0x507   : > { %8671 = vmatpush2.bf16.msra.mxu1 %v12153_v58  ;;  %8599 = vmatprep.subr.bf16.mxu0 %v12158_v59  ;;  %v12177_v59 = vld [vmem:[#allocation12 + $0x10c8] ss:$16 sps:$4 sm:$0xff]  }
 0x508   : > { %8672 = vmatprep.subr.bf16.mxu1 %v12161_v3 }
 0x50a   : > { %8600 = vmatpush2.bf16.msra.mxu0 %v12156_v5  ;;  %v12182_v5 = vld [vmem:[#allocation12 + $0x10a4] ss:$16 sps:$4 sm:$0xff]  }
 0x50b   : > { %8673 = vmatpush2.bf16.msra.mxu1 %v12159_v20  ;;  %8601 = vmatprep.subr.bf16.mxu0 %v12164_v18  ;;  %v12185_v20 = vld [vmem:[#allocation12 + $0x10ac] ss:$16 sps:$4 sm:$0xff]  }
 0x50c   : > { %8674 = vmatprep.subr.bf16.mxu1 %v12167_v26 }
 0x50e   : > { %8602 = vmatpush2.bf16.msra.mxu0 %v12162_v2  ;;  %v6866_v49 = vpop.f32.mrf.mxu0 }
 0x50f   : > { %8675 = vmatpush2.bf16.msra.mxu1 %v12165_v25  ;;  %v6939_v4 = vpop.f32.mrf.mxu1  ;;  %v14685_v61 = vadd.f32 %v6866_v49, %v14556_v54  ;;  %9145 = vmatprep.subr.bf16.mxu0 %v12170_v35  ;;  %v12183_v49 = vld [vmem:[#allocation12 + $0x10a8] ss:$16 sps:$4 sm:$0xff]  }
 0x510   : > { %v14688_v62 = vadd.f32 %v6939_v4, %v14559_v60  ;;  %9218 = vmatprep.subr.bf16.mxu1 %v12173_v40  ;;  %v6868_v44 = vpop.f32.mrf.mxu0  ;;  %v8169_v60 = vrot.slane %v8167_v10, 4  ;;  %v12188_v4 = vld [vmem:[#allocation12 + $0x1084] ss:$16 sps:$4 sm:$0xff]  }
 0x511   : > { %v6941_v47 = vpop.f32.mrf.mxu1  ;;  %8604 = vmatmul.mubr.bf16.vlgmr.msra.gmra.mxu0 %v15438_v38  ;;  %v14693_v43 = vadd.f32 %v6868_v44, %v14567_v56  ;;  %v12174_v56 = vld [vmem:[#allocation12 + $0x10c0] ss:$16 sps:$4 sm:$0xff]  }
 0x512   : > { %8677 = vmatmul.mubr.bf16.vlgmr.msra.gmra.mxu1 %v15438_v38  ;;  %v14696_v54 = vadd.f32 %v6941_v47, %v14569_v19  ;;  %8613 = vmatprep.mubr.bf16.mxu0 %v15439_v50  ;;  %v6870_v21 = vpop.f32.mrf.mxu0  ;;  %v8173_v2 = vor.u32 %v8172_v30, %v8169_v60 }
 0x513   : > { %8686 = vmatprep.mubr.bf16.mxu1 %v15439_v50  ;;  %v6943_v11 = vpop.f32.mrf.mxu1  ;;  %9146 = vmatpush1.bf16.msra.mxu0 %v12168_v51  ;;  %v14701_v0 = vadd.f32 %v6870_v21, %v14576_v32  ;;  %v12276_v32 = vld [vmem:[#allocation3 + $0x90] sm:$0x11] }
 0x514   : > { %9219 = vmatpush1.bf16.msra.mxu1 %v12171_v15  ;;  %v14704_v58 = vadd.f32 %v6943_v11, %v14579_v7  ;;  %9147 = vmatprep.subr.bf16.mxu0 %v12176_v57  ;;  %v6872_v19 = vpop.f32.mrf.mxu0  ;;  %v8176_v25 = vshll.u32 %v12276_v32, 16  ;;  %v12191_v51 = vld [vmem:[#allocation12 + $0x108c] ss:$16 sps:$4 sm:$0xff]   ;;  %v15441_v57 = vld [vmem:[#allocation32_spill] sm:$0xff]  ;;  %v12189_v50 = vld [vmem:[#allocation12 + $0x1088] ss:$16 sps:$4 sm:$0xff]  }
 0x515   : > { %9220 = vmatprep.subr.bf16.mxu1 %v12179_v14  ;;  %v6945_v3 = vpop.f32.mrf.mxu1  ;;  %v14707_v18 = vadd.f32 %v6872_v19, %v14581_v45  ;;  %v15440_v15 = vld [vmem:[#allocation33_spill] sm:$0xff]  ;;  %v12194_v11 = vld [vmem:[#allocation12 + $0x1064] ss:$16 sps:$4 sm:$0xff]  }
 0x516   : > { %v14710_v26 = vadd.f32 %v6945_v3, %v14583_v31  ;;  %v6876_v35 = vpop.f32.mrf.mxu0  ;;  %v8178_v47 = vrot.slane %v8176_v25, 5  ;;  %v12195_v32 = vld [vmem:[#allocation12 + $0x1068] ss:$16 sps:$4 sm:$0xff]  }
 0x517   : > { %v6949_v7 = vpop.f32.mrf.mxu1  ;;  %9148 = vmatpush1.bf16.msra.mxu0 %v12174_v56  ;;  %v14713_v40 = vadd.f32 %v6876_v35, %v14586_v48  ;;  %v12197_v56 = vld [vmem:[#allocation12 + $0x106c] ss:$16 sps:$4 sm:$0xff]  }
 0x518   : > { %9221 = vmatpush1.bf16.msra.mxu1 %v12177_v59  ;;  %v14716_v10 = vadd.f32 %v6949_v7, %v14589_v16  ;;  %9149 = vmatprep.subr.bf16.mxu0 %v12182_v5  ;;  %v6878_v45 = vpop.f32.mrf.mxu0  ;;  %v8174_v16 = vrot.slane %v8173_v2, 4  ;;  %v12192_v2 = vld [vmem:[#allocation12 + $0x1060] ss:$16 sps:$4 sm:$0xff]   ;;  %v12203_v35 = vld [vmem:[#allocation12 + $0x104c] ss:$16 sps:$4 sm:$0xff]  }
 0x519   : > { %9222 = vmatprep.subr.bf16.mxu1 %v12185_v20  ;;  %v6951_v31 = vpop.f32.mrf.mxu1  ;;  %8614 = vmatmul.mubr.bf16.gmra.mxu0 %v15440_v15  ;;  %v14721_v44 = vadd.f32 %v6878_v45, %v14598_v46  ;;  %v12186_v46 = vld [vmem:[#allocation12 + $0x1080] ss:$16 sps:$4 sm:$0xff]  }
 0x51a   : > { %8687 = vmatmul.mubr.bf16.gmra.mxu1 %v15440_v15  ;;  %v14724_v48 = vadd.f32 %v6951_v31, %v14601_v52  ;;  %8623 = vmatprep.mubr.bf16.mxu0 %v15441_v57  ;;  %v6880_v14 = vpop.f32.mrf.mxu0  ;;  %v15442_v7 = vld [vmem:[#allocation34_spill] sm:$0xff] }
 0x51b   : > { %8696 = vmatprep.mubr.bf16.mxu1 %v15441_v57  ;;  %v6953_v38 = vpop.f32.mrf.mxu1  ;;  %9150 = vmatpush1.bf16.msra.mxu0 %v12180_v42  ;;  %v14729_v60 = vadd.f32 %v6880_v14, %v14608_v24  ;;  %v8179_v24 = vsel %vm12864_vm4, %v8174_v16, %v8178_v47  ;;  %v12209_v16 = vld [vmem:[#allocation12 + $0x102c] ss:$16 sps:$4 sm:$0xff]  }
 0x51c   : > { %9223 = vmatpush1.bf16.msra.mxu1 %v12183_v49  ;;  %v14732_v30 = vadd.f32 %v6953_v38, %v14611_v41  ;;  %9151 = vmatprep.subr.bf16.mxu0 %v12188_v4  ;;  %v6882_v52 = vpop.f32.mrf.mxu0  ;;  %v12198_v4 = vld [vmem:[#allocation12 + $0x1040] ss:$16 sps:$4 sm:$0xff]   ;;  %v10649_v38 = vcombine.low %v14389_v33, %v8179_v24 }
 0x51d   : > { %9224 = vmatprep.subr.bf16.mxu1 %v12191_v51  ;;  %v6955_v21 = vpop.f32.mrf.mxu1  ;;  %v14735_v59 = vadd.f32 %v6882_v52, %v14613_v13  ;;  %v10650_v13 = vcombine.high %v14389_v33, %v8179_v24  ;;  %v12201_v51 = vld [vmem:[#allocation12 + $0x1048] ss:$16 sps:$4 sm:$0xff]  }
 0x51e   : > { %v14738_v19 = vadd.f32 %v6955_v21, %v14615_v36  ;;  %v6886_v3 = vpop.f32.mrf.mxu0  ;;  %v12207_v52 = vld [vmem:[#allocation12 + $0x1028] ss:$16 sps:$4 sm:$0xff]  }
 0x51f   : > { %v6959_v41 = vpop.f32.mrf.mxu1  ;;  %9152 = vmatpush1.bf16.msra.mxu0 %v12186_v46  ;;  %v14743_v5 = vadd.f32 %v6886_v3, %v14618_v17 }
 0x520   : > { %9225 = vmatpush1.bf16.msra.mxu1 %v12189_v50  ;;  %v14746_v20 = vadd.f32 %v6959_v41, %v14621_v55  ;;  %9153 = vmatprep.subr.bf16.mxu0 %v12194_v11  ;;  %v6888_v36 = vpop.f32.mrf.mxu0  ;;  %v12204_v50 = vld [vmem:[#allocation12 + $0x1020] ss:$16 sps:$4 sm:$0xff]   ;;  %v12215_v11 = vld [vmem:[#allocation12 + $0x100c] ss:$16 sps:$4 sm:$0xff]  }
 0x521   : > { %9226 = vmatprep.subr.bf16.mxu1 %v12197_v56  ;;  %v6961_v25 = vpop.f32.mrf.mxu1  ;;  %8624 = vmatmul.mubr.bf16.gmra.mxu0 %v15442_v7  ;;  %v14752_v17 = vadd.f32 %v6888_v36, %v14634_v27  ;;  %v12221_v36 = vld [vmem:[#allocation12 + $0x11ec] ss:$16 sps:$4 sm:$0xff]  }
 0x522   : > { %8697 = vmatmul.mubr.bf16.gmra.mxu1 %v15442_v7  ;;  %v14755_v55 = vadd.f32 %v6961_v25, %v14637_v9  ;;  %8633 = vmatprep.mubr.bf16.mxu0 %v10650_v13  ;;  %v6890_v42 = vpop.f32.mrf.mxu0  ;;  %v12206_v9 = vld [vmem:[#allocation12 + $0x1024] ss:$16 sps:$4 sm:$0xff]   ;;  %v12227_v7 = vld [vmem:[#allocation12 + $0x11cc] ss:$16 sps:$4 sm:$0xff]  }
 0x523   : > { %8706 = vmatprep.mubr.bf16.mxu1 %v10650_v13  ;;  %v6963_v49 = vpop.f32.mrf.mxu1  ;;  %9154 = vmatpush1.bf16.msra.mxu0 %v12192_v2  ;;  %v14758_v45 = vadd.f32 %v6890_v42, %v14642_v8  ;;  %v12210_v2 = vld [vmem:[#allocation12 + $0x1000] ss:$16 sps:$4 sm:$0xff]   ;;  %v12218_v13 = vld [vmem:[#allocation12 + $0x11e4] ss:$16 sps:$4 sm:$0xff]  }
 0x524   : > { %9227 = vmatpush1.bf16.msra.mxu1 %v12195_v32  ;;  %v14761_v31 = vadd.f32 %v6963_v49, %v14645_v37  ;;  %9155 = vmatprep.subr.bf16.mxu0 %v12200_v12  ;;  %v6892_v27 = vpop.f32.mrf.mxu0  ;;  %v12222_v42 = vld [vmem:[#allocation12 + $0x11c0] ss:$16 sps:$4 sm:$0xff]   ;;  %v12225_v49 = vld [vmem:[#allocation12 + $0x11c8] ss:$16 sps:$4 sm:$0xff]  }
 0x525   : > { %9228 = vmatprep.subr.bf16.mxu1 %v12203_v35  ;;  %v6965_v15 = vpop.f32.mrf.mxu1  ;;  %v14764_v47 = vadd.f32 %v6892_v27, %v14647_v63  ;;  %v12219_v35 = vld [vmem:[#allocation12 + $0x11e8] ss:$16 sps:$4 sm:$0xff]   ;;  %v12236_v27 = vld [vmem:[#allocation12 + $0x1184] ss:$16 sps:$4 sm:$0xff]  }
 0x526   : > { %v14767_v57 = vadd.f32 %v6965_v15, %v14649_v6  ;;  %v6896_v14 = vpop.f32.mrf.mxu0  ;;  %v12212_v6 = vld [vmem:[#allocation12 + $0x1004] ss:$16 sps:$4 sm:$0xff]   ;;  %v12239_v15 = vld [vmem:[#allocation12 + $0x118c] ss:$16 sps:$4 sm:$0xff]  }
 0x527   : > { %v6969_v8 = vpop.f32.mrf.mxu1  ;;  %9156 = vmatpush1.bf16.msra.mxu0 %v12198_v4  ;;  %v14771_v37 = vadd.f32 %v6896_v14, %v14652_v22  ;;  %v15443_v22 = vld [vmem:[#allocation48_spill] sm:$0xff] }
 0x528   : > { %9229 = vmatpush1.bf16.msra.mxu1 %v12201_v51  ;;  %v14774_v46 = vadd.f32 %v6969_v8, %v14655_v53  ;;  %9157 = vmatprep.subr.bf16.mxu0 %v12206_v9  ;;  %v6898_v63 = vpop.f32.mrf.mxu0  ;;  %v12230_v4 = vld [vmem:[#allocation12 + $0x11a4] ss:$16 sps:$4 sm:$0xff]   ;;  %v12231_v51 = vld [vmem:[#allocation12 + $0x11a8] ss:$16 sps:$4 sm:$0xff]   ;;  %v12234_v9 = vld [vmem:[#allocation12 + $0x1180] ss:$16 sps:$4 sm:$0xff]  }
 0x529   : > { %9230 = vmatprep.subr.bf16.mxu1 %v12209_v16  ;;  %v6971_v21 = vpop.f32.mrf.mxu1  ;;  %8634 = vmatmul.mubr.bf16.gmra.mxu0 %v10649_v38  ;;  %v14777_v33 = vadd.f32 %v6898_v63, %v14663_v34  ;;  %v12213_v34 = vld [vmem:[#allocation12 + $0x1008] ss:$16 sps:$4 sm:$0xff]   ;;  %v12242_v14 = vld [vmem:[#allocation12 + $0x1164] ss:$16 sps:$4 sm:$0xff]   ;;  %v12245_v8 = vld [vmem:[#allocation12 + $0x116c] ss:$16 sps:$4 sm:$0xff]  }
 0x52a   : > { %8707 = vmatmul.mubr.bf16.gmra.mxu1 %v10649_v38  ;;  %v14780_v56 = vadd.f32 %v6971_v21, %v14666_v28  ;;  %9177 = vmatprep.mubr.bf16.mxu0 %v15443_v22  ;;  %v6900_v53 = vpop.f32.mrf.mxu0  ;;  %v12237_v16 = vld [vmem:[#allocation12 + $0x1188] ss:$16 sps:$4 sm:$0xff]   ;;  %v12240_v38 = vld [vmem:[#allocation12 + $0x1160] ss:$16 sps:$4 sm:$0xff]   ;;  %v12251_v63 = vld [vmem:[#allocation12 + $0x114c] ss:$16 sps:$4 sm:$0xff]  }
 0x52b   : > { %9250 = vmatprep.mubr.bf16.mxu1 %v15443_v22  ;;  %v6973_v24 = vpop.f32.mrf.mxu1  ;;  %9158 = vmatpush1.bf16.msra.mxu0 %v12204_v50  ;;  %v14785_v3 = vadd.f32 %v6900_v53, %v14673_v1  ;;  %v12216_v1 = vld [vmem:[#allocation12 + $0x11e0] ss:$16 sps:$4 sm:$0xff]   ;;  %v12243_v50 = vld [vmem:[#allocation12 + $0x1168] ss:$16 sps:$4 sm:$0xff]   ;;  %v12257_v22 = vld [vmem:[#allocation12 + $0x112c] ss:$16 sps:$4 sm:$0xff]  }
 0x52c   : > { %9231 = vmatpush1.bf16.msra.mxu1 %v12207_v52  ;;  %v14788_v41 = vadd.f32 %v6973_v24, %v14676_v23  ;;  %9159 = vmatprep.subr.bf16.mxu0 %v12212_v6  ;;  %v6902_v28 = vpop.f32.mrf.mxu0  ;;  %v12224_v23 = vld [vmem:[#allocation12 + $0x11c4] ss:$16 sps:$4 sm:$0xff]   ;;  %v12246_v21 = vld [vmem:[#allocation12 + $0x1140] ss:$16 sps:$4 sm:$0xff]   ;;  %v12249_v6 = vld [vmem:[#allocation12 + $0x1148] ss:$16 sps:$4 sm:$0xff]  }
 0x52d   : > { %9232 = vmatprep.subr.bf16.mxu1 %v12215_v11  ;;  %v6975_v32 = vpop.f32.mrf.mxu1  ;;  %v14791_v25 = vadd.f32 %v6902_v28, %v14678_v29  ;;  %v12233_v29 = vld [vmem:[#allocation12 + $0x11ac] ss:$16 sps:$4 sm:$0xff]   ;;  %v12248_v52 = vld [vmem:[#allocation12 + $0x1144] ss:$16 sps:$4 sm:$0xff]   ;;  %v12252_v53 = vld [vmem:[#allocation12 + $0x1120] ss:$16 sps:$4 sm:$0xff]  }
 0x52e   : > { %v14794_v12 = vadd.f32 %v6975_v32, %v14680_v39  ;;  %v12228_v39 = vld [vmem:[#allocation12 + $0x11a0] ss:$16 sps:$4 sm:$0xff]   ;;  %v12254_v11 = vld [vmem:[#allocation12 + $0x1124] ss:$16 sps:$4 sm:$0xff]   ;;  %v12255_v24 = vld [vmem:[#allocation12 + $0x1128] ss:$16 sps:$4 sm:$0xff]  }
 0x52f   : > { %9160 = vmatpush1.bf16.msra.mxu0 %v12210_v2  ;;  %v12260_v2 = vld [vmem:[#allocation12 + $0x1104] ss:$16 sps:$4 sm:$0xff]   ;;  %v12258_v28 = vld [vmem:[#allocation12 + $0x1100] ss:$16 sps:$4 sm:$0xff]   ;;  %v12261_v32 = vld [vmem:[#allocation12 + $0x1108] ss:$16 sps:$4 sm:$0xff]  }
 0x530   : > { %9233 = vmatpush1.bf16.msra.mxu1 %v12213_v34  ;;  %9161 = vmatprep.subr.bf16.mxu0 %v12218_v13  ;;  %v12263_v34 = vld [vmem:[#allocation12 + $0x110c] ss:$16 sps:$4 sm:$0xff]  }
 0x531   : > { %9234 = vmatprep.subr.bf16.mxu1 %v12221_v36 }
 0x533   : > { %9162 = vmatpush2.bf16.msra.mxu0 %v12216_v1 }
 0x534   : > { %9235 = vmatpush2.bf16.msra.mxu1 %v12219_v35  ;;  %9163 = vmatprep.subr.bf16.mxu0 %v12224_v23 }
 0x535   : > { %9236 = vmatprep.subr.bf16.mxu1 %v12227_v7 }
 0x537   : > { %9164 = vmatpush2.bf16.msra.mxu0 %v12222_v42  ;;  %v15444_v42 = vld [vmem:[#allocation35_spill] sm:$0xff] }
 0x538   : > { %9237 = vmatpush2.bf16.msra.mxu1 %v12225_v49  ;;  %9165 = vmatprep.subr.bf16.mxu0 %v12230_v4 }
 0x539   : > { %9238 = vmatprep.subr.bf16.mxu1 %v12233_v29  ;;  %v15445_v29 = vld [vmem:[#allocation36_spill] sm:$0xff] }
 0x53b   : > { %9166 = vmatpush2.bf16.msra.mxu0 %v12228_v39 }
 0x53c   : > { %9239 = vmatpush2.bf16.msra.mxu1 %v12231_v51  ;;  %9167 = vmatprep.subr.bf16.mxu0 %v12236_v27 }
 0x53d   : > { %9240 = vmatprep.subr.bf16.mxu1 %v12239_v15 }
 0x53f   : > { %9168 = vmatpush2.bf16.msra.mxu0 %v12234_v9 }
 0x540   : > { %9241 = vmatpush2.bf16.msra.mxu1 %v12237_v16  ;;  %9169 = vmatprep.subr.bf16.mxu0 %v12242_v14 }
 0x541   : > { %9242 = vmatprep.subr.bf16.mxu1 %v12245_v8 }
 0x543   : > { %9170 = vmatpush2.bf16.msra.mxu0 %v12240_v38 }
 0x544   : > { %9243 = vmatpush2.bf16.msra.mxu1 %v12243_v50  ;;  %9171 = vmatprep.subr.bf16.mxu0 %v12248_v52  ;;  %v15447_v50 = vld [vmem:[#allocation50_spill] sm:$0xff] }
 0x545   : > { %9244 = vmatprep.subr.bf16.mxu1 %v12251_v63 }
 0x547   : > { %9172 = vmatpush2.bf16.msra.mxu0 %v12246_v21 }
 0x548   : > { %9245 = vmatpush2.bf16.msra.mxu1 %v12249_v6  ;;  %9173 = vmatprep.subr.bf16.mxu0 %v12254_v11 }
 0x549   : > { %9246 = vmatprep.subr.bf16.mxu1 %v12257_v22 }
 0x54b   : > { %9174 = vmatpush2.bf16.msra.mxu0 %v12252_v53 }
 0x54c   : > { %9247 = vmatpush2.bf16.msra.mxu1 %v12255_v24  ;;  %9175 = vmatprep.subr.bf16.mxu0 %v12260_v2 }
 0x54d   : > { %9248 = vmatprep.subr.bf16.mxu1 %v12263_v34  ;;  %v15449_v34 = vld [vmem:[#allocation49_spill] sm:$0xff] }
 0x54f   : > { %9176 = vmatpush2.bf16.msra.mxu0 %v12258_v28  ;;  %v7452_v13 = vpop.f32.mrf.mxu0 }
 0x550   : > { %9249 = vmatpush2.bf16.msra.mxu1 %v12261_v32  ;;  %v7525_v36 = vpop.f32.mrf.mxu1  ;;  %v14797_v1 = vadd.f32 %v7452_v13, %v14685_v61 }
 0x551   : > { %v14800_v35 = vadd.f32 %v7525_v36, %v14688_v62  ;;  %v7454_v23 = vpop.f32.mrf.mxu0 }
 0x552   : > { %v7527_v7 = vpop.f32.mrf.mxu1  ;;  %9178 = vmatmul.mubr.bf16.vlgmr.msra.gmra.mxu0 %v15444_v42  ;;  %v14805_v49 = vadd.f32 %v7454_v23, %v14693_v43 }
 0x553   : > { %9251 = vmatmul.mubr.bf16.vlgmr.msra.gmra.mxu1 %v15444_v42  ;;  %v14808_v4 = vadd.f32 %v7527_v7, %v14696_v54  ;;  %9187 = vmatprep.mubr.bf16.mxu0 %v15445_v29  ;;  %v7456_v61 = vpop.f32.mrf.mxu0 }
 0x554   : > { %9260 = vmatprep.mubr.bf16.mxu1 %v15445_v29  ;;  %v7529_v39 = vpop.f32.mrf.mxu1  ;;  %v14813_v62 = vadd.f32 %v7456_v61, %v14701_v0 }
 0x555   : > { %v14816_v51 = vadd.f32 %v7529_v39, %v14704_v58  ;;  %v7458_v27 = vpop.f32.mrf.mxu0  ;;  %v15446_v58 = vld [vmem:[#allocation37_spill] sm:$0xff] }
 0x556   : > { %v7531_v15 = vpop.f32.mrf.mxu1  ;;  %v14819_v43 = vadd.f32 %v7458_v27, %v14707_v18 }
 0x557   : > { %v14822_v54 = vadd.f32 %v7531_v15, %v14710_v26  ;;  %v7462_v9 = vpop.f32.mrf.mxu0 }
 0x558   : > { %v7535_v16 = vpop.f32.mrf.mxu1  ;;  %v14825_v14 = vadd.f32 %v7462_v9, %v14713_v40 }
 0x559   : > { %v14828_v8 = vadd.f32 %v7535_v16, %v14716_v10  ;;  %v7464_v0 = vpop.f32.mrf.mxu0 }
 0x55a   : > { %v7537_v38 = vpop.f32.mrf.mxu1  ;;  %9188 = vmatmul.mubr.bf16.gmra.mxu0 %v15446_v58  ;;  %v14833_v18 = vadd.f32 %v7464_v0, %v14721_v44 }
 0x55b   : > { %9261 = vmatmul.mubr.bf16.gmra.mxu1 %v15446_v58  ;;  %v14836_v26 = vadd.f32 %v7537_v38, %v14724_v48  ;;  %9197 = vmatprep.mubr.bf16.mxu0 %v15447_v50  ;;  %v7466_v40 = vpop.f32.mrf.mxu0 }
 0x55c   : > { %9270 = vmatprep.mubr.bf16.mxu1 %v15447_v50  ;;  %v7539_v52 = vpop.f32.mrf.mxu1  ;;  %v14841_v10 = vadd.f32 %v7466_v40, %v14729_v60 }
 0x55d   : > { %v14844_v63 = vadd.f32 %v7539_v52, %v14732_v30  ;;  %v7468_v21 = vpop.f32.mrf.mxu0  ;;  %v15448_v30 = vld [vmem:[#allocation59_spill] sm:$0xff] }
 0x55e   : > { %v7541_v6 = vpop.f32.mrf.mxu1  ;;  %v14847_v44 = vadd.f32 %v7468_v21, %v14735_v59 }
 0x55f   : > { %v14850_v48 = vadd.f32 %v7541_v6, %v14738_v19  ;;  %v7472_v11 = vpop.f32.mrf.mxu0 }
 0x560   : > { %v7545_v22 = vpop.f32.mrf.mxu1  ;;  %v14853_v53 = vadd.f32 %v7472_v11, %v14743_v5 }
 0x561   : > { %v14856_v24 = vadd.f32 %v7545_v22, %v14746_v20  ;;  %v7474_v60 = vpop.f32.mrf.mxu0 }
 0x562   : > { %v7547_v2 = vpop.f32.mrf.mxu1  ;;  %9198 = vmatmul.mubr.bf16.gmra.mxu0 %v15448_v30  ;;  %v14861_v59 = vadd.f32 %v7474_v60, %v14752_v17 }
 0x563   : > { %9271 = vmatmul.mubr.bf16.gmra.mxu1 %v15448_v30  ;;  %v14864_v19 = vadd.f32 %v7547_v2, %v14755_v55  ;;  %9207 = vmatprep.mubr.bf16.mxu0 %v15449_v34  ;;  %v7476_v5 = vpop.f32.mrf.mxu0 }
 0x564   : > { %9280 = vmatprep.mubr.bf16.mxu1 %v15449_v34  ;;  %v7549_v28 = vpop.f32.mrf.mxu1  ;;  %v14869_v20 = vadd.f32 %v7476_v5, %v14758_v45 }
 0x565   : > { %v14872_v32 = vadd.f32 %v7549_v28, %v14761_v31  ;;  %v7478_v13 = vpop.f32.mrf.mxu0  ;;  %v15450_v31 = vld [vmem:[#allocation38_spill] sm:$0xff] }
 0x566   : > { %v7551_v36 = vpop.f32.mrf.mxu1  ;;  %v14875_v17 = vadd.f32 %v7478_v13, %v14764_v47 }
 0x567   : > { %v14878_v55 = vadd.f32 %v7551_v36, %v14767_v57  ;;  %v7482_v23 = vpop.f32.mrf.mxu0 }
 0x568   : > { %v7555_v7 = vpop.f32.mrf.mxu1  ;;  %v14881_v42 = vadd.f32 %v7482_v23, %v14771_v37 }
 0x569   : > { %v14884_v29 = vadd.f32 %v7555_v7, %v14774_v46  ;;  %v7484_v45 = vpop.f32.mrf.mxu0 }
 0x56a   : > { %v7557_v61 = vpop.f32.mrf.mxu1  ;;  %9208 = vmatmul.mubr.bf16.gmra.mxu0 %v15450_v31  ;;  %v14889_v47 = vadd.f32 %v7484_v45, %v14777_v33 }
 0x56b   : > { %9281 = vmatmul.mubr.bf16.gmra.mxu1 %v15450_v31  ;;  %v14892_v57 = vadd.f32 %v7557_v61, %v14780_v56  ;;  %v7486_v39 = vpop.f32.mrf.mxu0 }
 0x56c   : > { %v7559_v27 = vpop.f32.mrf.mxu1  ;;  %v14895_v37 = vadd.f32 %v7486_v39, %v14785_v3 }
 0x56d   : > { %v14898_v46 = vadd.f32 %v7559_v27, %v14788_v41  ;;  %v7488_v15 = vpop.f32.mrf.mxu0 }
 0x56e   : > { %v7561_v9 = vpop.f32.mrf.mxu1  ;;  %v14901_v16 = vadd.f32 %v7488_v15, %v14791_v25 }
 0x56f   : > { %v14904_v0 = vadd.f32 %v7561_v9, %v14794_v12 }
 0x590   : > { %v8022_v33 = vpop.f32.mrf.mxu0 }
 0x591   : > { %v8095_v38 = vpop.f32.mrf.mxu1  ;;  %v14907_v56 = vadd.f32 %v8022_v33, %v14797_v1  ;;  %v9528_v33 = vld [vmem:[#allocation15 + $0x1f8] sm:$0xff] }
 0x592   : > { %v14910_v58 = vadd.f32 %v8095_v38, %v14800_v35  ;;  %v8024_v3 = vpop.f32.mrf.mxu0  ;;  %v9495_v38 = vld [vmem:[#allocation15 + $0xf0] sm:$0xff]  ;;  %10910 = vmatprep.subr.mxu1 %v9528_v33  ;;  %v9505_v33 = vld [vmem:[#allocation15 + $0x140] sm:$0xff] }
 0x593   : > { %v8097_v50 = vpop.f32.mrf.mxu1  ;;  %v14913_v41 = vadd.f32 %v8024_v3, %v14805_v49  ;;  %v9527_v3 = vld [vmem:[#allocation15 + $0x1f0] sm:$0xff] }
 0x594   : > { %v14916_v40 = vadd.f32 %v8097_v50, %v14808_v4  ;;  %v8026_v25 = vpop.f32.mrf.mxu0  ;;  %v9494_v50 = vld [vmem:[#allocation15 + $0xe8] sm:$0xff] }
 0x595   : > { %v8099_v52 = vpop.f32.mrf.mxu1  ;;  %v14919_v12 = vadd.f32 %v8026_v25, %v14813_v62  ;;  %v9526_v25 = vld [vmem:[#allocation15 + $0x1e8] sm:$0xff] }
 0x596   : > { %v14922_v21 = vadd.f32 %v8099_v52, %v14816_v51  ;;  %v8028_v1 = vpop.f32.mrf.mxu0  ;;  %v9493_v52 = vld [vmem:[#allocation15 + $0xe0] sm:$0xff] }
 0x597   : > { %v8101_v6 = vpop.f32.mrf.mxu1  ;;  %v14925_v35 = vadd.f32 %v8028_v1, %v14819_v43  ;;  %v9510_v1 = vld [vmem:[#allocation15 + $0x168] sm:$0xff] }
 0x598   : > { %v14928_v11 = vadd.f32 %v8101_v6, %v14822_v54  ;;  %v8032_v49 = vpop.f32.mrf.mxu0  ;;  %v9477_v6 = vld [vmem:[#allocation15 + $0x60] sm:$0xff] }
 0x599   : > { %v8105_v22 = vpop.f32.mrf.mxu1  ;;  %v14931_v4 = vadd.f32 %v8032_v49, %v14825_v14  ;;  %v9525_v49 = vld [vmem:[#allocation15 + $0x1e0] sm:$0xff] }
 0x59a   : > { %v14934_v60 = vadd.f32 %v8105_v22, %v14828_v8  ;;  %v8034_v62 = vpop.f32.mrf.mxu0  ;;  %v9492_v22 = vld [vmem:[#allocation15 + $0xd8] sm:$0xff] }
 0x59b   : > { %v8107_v2 = vpop.f32.mrf.mxu1  ;;  %v14937_v51 = vadd.f32 %v8034_v62, %v14833_v18  ;;  %v9509_v62 = vld [vmem:[#allocation15 + $0x160] sm:$0xff] }
 0x59c   : > { %15451 = vst [vmem:[#allocation67_spill] sm:$0xff] %v14934_v60  ;;  %v14940_v30 = vadd.f32 %v8107_v2, %v14836_v26  ;;  %v8036_v43 = vpop.f32.mrf.mxu0  ;;  %v9476_v2 = vld [vmem:[#allocation15 + $0x58] sm:$0xff] }
 0x59d   : > { %15452 = vst [vmem:[#allocation41_spill] sm:$0xff] %v14937_v51  ;;  %v8109_v34 = vpop.f32.mrf.mxu1  ;;  %v14943_v54 = vadd.f32 %v8036_v43, %v14841_v10  ;;  %v9524_v43 = vld [vmem:[#allocation15 + $0x1d8] sm:$0xff] }
 0x59e   : > { %15453 = vst [vmem:[#allocation42_spill] sm:$0xff] %v14940_v30  ;;  %v14946_v5 = vadd.f32 %v8109_v34, %v14844_v63  ;;  %v8038_v14 = vpop.f32.mrf.mxu0  ;;  %v9491_v34 = vld [vmem:[#allocation15 + $0xd0] sm:$0xff] }
 0x59f   : > { %15454 = vst [vmem:[#allocation53_spill] sm:$0xff] %v14943_v54  ;;  %v8111_v28 = vpop.f32.mrf.mxu1  ;;  %v14949_v8 = vadd.f32 %v8038_v14, %v14847_v44  ;;  %v9508_v14 = vld [vmem:[#allocation15 + $0x158] sm:$0xff] }
 0x5a0   : > { %15455 = vst [vmem:[#allocation43_spill] sm:$0xff] %v14946_v5  ;;  %v14952_v13 = vadd.f32 %v8111_v28, %v14850_v48  ;;  %v8042_v18 = vpop.f32.mrf.mxu0  ;;  %v9475_v28 = vld [vmem:[#allocation15 + $0x50] sm:$0xff] }
 0x5a1   : > { %15456 = vst [vmem:[#allocation45_spill] sm:$0xff] %v14949_v8  ;;  %v8115_v36 = vpop.f32.mrf.mxu1  ;;  %v14955_v26 = vadd.f32 %v8042_v18, %v14853_v53  ;;  %v9523_v18 = vld [vmem:[#allocation15 + $0x1d0] sm:$0xff] }
 0x5a2   : > { %15457 = vst [vmem:[#allocation47_spill] sm:$0xff] %v14952_v13  ;;  %v14958_v23 = vadd.f32 %v8115_v36, %v14856_v24  ;;  %v8044_v10 = vpop.f32.mrf.mxu0  ;;  %v9490_v36 = vld [vmem:[#allocation15 + $0xc8] sm:$0xff] }
 0x5a3   : > { %15458 = vst [vmem:[#allocation55_spill] sm:$0xff] %v14955_v26  ;;  %v8117_v7 = vpop.f32.mrf.mxu1  ;;  %v14961_v63 = vadd.f32 %v8044_v10, %v14861_v59  ;;  %v9507_v10 = vld [vmem:[#allocation15 + $0x150] sm:$0xff] }
 0x5a4   : > { %15459 = vst [vmem:[#allocation57_spill] sm:$0xff] %v14958_v23  ;;  %v14964_v45 = vadd.f32 %v8117_v7, %v14864_v19  ;;  %v8046_v44 = vpop.f32.mrf.mxu0  ;;  %v9474_v7 = vld [vmem:[#allocation15 + $0x48] sm:$0xff] }
 0x5a5   : > { %15460 = vst [vmem:[#allocation60_spill] sm:$0xff] %v14961_v63  ;;  %v8119_v61 = vpop.f32.mrf.mxu1  ;;  %v14967_v48 = vadd.f32 %v8046_v44, %v14869_v20  ;;  %v9496_v20 = vld [vmem:[#allocation15 + $0xf8] sm:$0xff]  ;;  %v9522_v44 = vld [vmem:[#allocation15 + $0x1c8] sm:$0xff] }
 0x5a6   : > { %15461 = vst [vmem:[#allocation64_spill] sm:$0xff] %v14964_v45  ;;  %v14970_v31 = vadd.f32 %v8119_v61, %v14872_v32  ;;  %v8048_v53 = vpop.f32.mrf.mxu0  ;;  %10875 = vmatprep.subr.mxu0 %v9496_v20  ;;  %v9480_v32 = vld [vmem:[#allocation15 + $0x78] sm:$0xff]  ;;  %v9489_v61 = vld [vmem:[#allocation15 + $0xc0] sm:$0xff] }
 0x5a7   : > { %15462 = vst [vmem:[#allocation68_spill] sm:$0xff] %v14967_v48  ;;  %v8121_v39 = vpop.f32.mrf.mxu1  ;;  %v14973_v24 = vadd.f32 %v8048_v53, %v14875_v17  ;;  %10876 = vmatpush3.msra.mxu0 %v9480_v32  ;;  %v9512_v17 = vld [vmem:[#allocation15 + $0x178] sm:$0xff]  ;;  %v9506_v53 = vld [vmem:[#allocation15 + $0x148] sm:$0xff]  ;;  %v9521_v20 = vld [vmem:[#allocation15 + $0x1c0] sm:$0xff] }
 0x5a8   : > { %15463 = vst [vmem:[#allocation27_spill] sm:$0xff] %v14970_v31  ;;  %v14976_v27 = vadd.f32 %v8121_v39, %v14878_v55  ;;  %v8052_v59 = vpop.f32.mrf.mxu0  ;;  %10877 = vmatprep.subr.mxu0 %v9495_v38  ;;  %10911 = vmatpush3.msra.mxu1 %v9512_v17  ;;  %v9479_v55 = vld [vmem:[#allocation15 + $0x70] sm:$0xff]  ;;  %v9488_v32 = vld [vmem:[#allocation15 + $0xb8] sm:$0xff] }
 0x5a9   : > { %15464 = vst [vmem:[#allocation28_spill] sm:$0xff] %v14973_v24  ;;  %v8125_v15 = vpop.f32.mrf.mxu1  ;;  %v14979_v19 = vadd.f32 %v8052_v59, %v14881_v42  ;;  %10878 = vmatpush3.msra.mxu0 %v9479_v55  ;;  %10912 = vmatprep.subr.mxu1 %v9527_v3  ;;  %v9511_v42 = vld [vmem:[#allocation15 + $0x170] sm:$0xff]  ;;  %v9472_v38 = vld [vmem:[#allocation15 + $0x38] sm:$0xff] }
 0x5aa   : > { %15465 = vst [vmem:[#allocation26_spill] sm:$0xff] %v14976_v27  ;;  %v14982_v9 = vadd.f32 %v8125_v15, %v14884_v29  ;;  %10879 = vmatprep.subr.mxu0 %v9494_v50  ;;  %10913 = vmatpush3.msra.mxu1 %v9511_v42  ;;  %v9478_v29 = vld [vmem:[#allocation15 + $0x68] sm:$0xff]  ;;  %v14984_v39 = vpop.f32.mrf.mxu0  ;;  %v9473_v15 = vld [vmem:[#allocation15 + $0x40] sm:$0xff]  ;;  %v9520_v17 = vld [vmem:[#allocation15 + $0x1b8] sm:$0xff] }
 0x5ab   : > { %15466 = vst [vmem:[#allocation52_spill] sm:$0xff] %v14979_v19  ;;  %10880 = vmatpush3.msra.mxu0 %v9478_v29  ;;  %10914 = vmatprep.subr.mxu1 %v9526_v25  ;;  %v14986_v59 = vpop.f32.mrf.mxu1  ;;  %v9487_v55 = vld [vmem:[#allocation15 + $0xb0] sm:$0xff]  ;;  %v9504_v3 = vld [vmem:[#allocation15 + $0x138] sm:$0xff]  ;;  %v8159_v5 = vadd.f32 %v14984_v39, %v14889_v47 }
 0x5ac   : > { %15467 = vst [vmem:[#allocation65_spill] sm:$0xff] %v14982_v9  ;;  %10881 = vmatprep.subr.mxu0 %v9493_v52  ;;  %10915 = vmatpush3.msra.mxu1 %v9510_v1  ;;  %v14988_v50 = vpop.f32.mrf.mxu0  ;;  %v9471_v29 = vld [vmem:[#allocation15 + $0x30] sm:$0xff]  ;;  %v9486_v52 = vld [vmem:[#allocation15 + $0xa8] sm:$0xff]  ;;  %v9323_v27 = vld [vmem:[#allocation13] sm:$0xf]  ;;  %v8161_v54 = vadd.f32 %v14986_v59, %v14892_v57 }
 0x5ad   : > { %10882 = vmatpush3.msra.mxu0 %v9477_v6  ;;  %10916 = vmatprep.subr.mxu1 %v9525_v49  ;;  %v14990_v42 = vpop.f32.mrf.mxu1  ;;  %v9519_v25 = vld [vmem:[#allocation15 + $0x1b0] sm:$0xff]  ;;  %v9470_v6 = vld [vmem:[#allocation15 + $0x28] sm:$0xff]  ;;  %v8162_v60 = vadd.f32 %v14988_v50, %v14895_v37 }
 0x5ae   : > { %10883 = vmatprep.subr.mxu0 %v9492_v22  ;;  %10917 = vmatpush3.msra.mxu1 %v9509_v62  ;;  %v9503_v1 = vld [vmem:[#allocation15 + $0x130] sm:$0xff]  ;;  %v9518_v49 = vld [vmem:[#allocation15 + $0x1a8] sm:$0xff]  ;;  %v9485_v22 = vld [vmem:[#allocation15 + $0xa0] sm:$0xff] }
 0x5af   : > { %10884 = vmatpush3.msra.mxu0 %v9476_v2  ;;  %10918 = vmatprep.subr.mxu1 %v9524_v43  ;;  %v9502_v62 = vld [vmem:[#allocation15 + $0x128] sm:$0xff]  ;;  %v14992_v2 = vpop.f32.mrf.mxu0  ;;  %v14994_v43 = vpop.f32.mrf.mxu1  ;;  %v15471_v59 = vld [vmem:[#allocation67_spill] sm:$0xff] }
 0x5b0   : > { %10885 = vmatprep.subr.mxu0 %v9491_v34  ;;  %10919 = vmatpush3.msra.mxu1 %v9508_v14  ;;  %v9469_v34 = vld [vmem:[#allocation15 + $0x20] sm:$0xff]  ;;  %v15468_v24 = vld [vmem:[#allocation66_spill] sm:$0xff] }
 0x5b1   : > { %10886 = vmatpush3.msra.mxu0 %v9475_v28  ;;  %10920 = vmatprep.subr.mxu1 %v9523_v18  ;;  %v9517_v14 = vld [vmem:[#allocation15 + $0x1a0] sm:$0xff]  ;;  %v9484_v28 = vld [vmem:[#allocation15 + $0x98] sm:$0xff]  ;;  %v9335_v31 = vsub.s32 2, %v15468_v24  ;;  %v9339_v48 = vsub.s32 3, %v15468_v24  ;;  %v15469_v23 = vsub.s32 0, %v15468_v24  ;;  %v15470_v13 = vsub.s32 1, %v15468_v24 }
 0x5b2   : > { %10887 = vmatprep.subr.mxu0 %v9490_v36  ;;  %10921 = vmatpush3.msra.mxu1 %v9507_v10  ;;  %v9501_v18 = vld [vmem:[#allocation15 + $0x120] sm:$0xff]  ;;  %v8165_v24 = vadd.f32 %v14994_v43, %v14904_v0 }
 0x5b3   : > { %10888 = vmatpush3.msra.mxu0 %v9474_v7  ;;  %10922 = vmatprep.subr.mxu1 %v9522_v44  ;;  %v9468_v7 = vld [vmem:[#allocation15 + $0x18] sm:$0xff]  ;;  %v15008_v26 = vrot.slane %v9323_v27, %v15469_v23  ;;  %v15012_v8 = vrot.slane %v9323_v27, %v15470_v13  ;;  %v15018_v30 = vrot.slane %v9323_v27, %v9335_v31  ;;  %v15472_v50 = vld [vmem:[#allocation41_spill] sm:$0xff] }
 0x5b4   : > { %10889 = vmatprep.subr.mxu0 %v9489_v61  ;;  %10923 = vmatpush3.msra.mxu1 %v9506_v53  ;;  %v9516_v44 = vld [vmem:[#allocation15 + $0x198] sm:$0xff]  ;;  %v9483_v61 = vld [vmem:[#allocation15 + $0x90] sm:$0xff]  ;;  %v15020_v51 = vrot.slane %v9323_v27, %v9339_v48  ;;  %v8164_v23 = vadd.f32 %v14990_v42, %v14898_v46  ;;  %v8163_v13 = vadd.f32 %v14992_v2, %v14901_v16 }
 0x5b5   : > { %10890 = vmatpush3.msra.mxu0 %v9473_v15  ;;  %10924 = vmatprep.subr.mxu1 %v9521_v20  ;;  %v9500_v53 = vld [vmem:[#allocation15 + $0x118] sm:$0xff]  ;;  %v9467_v15 = vld [vmem:[#allocation15 + $0x10] sm:$0xff] }
 0x5b6   : > { %10891 = vmatprep.subr.mxu0 %v9488_v32  ;;  %10925 = vmatpush3.msra.mxu1 %v9505_v33  ;;  %v9515_v20 = vld [vmem:[#allocation15 + $0x190] sm:$0xff]  ;;  %v9482_v32 = vld [vmem:[#allocation15 + $0x88] sm:$0xff] }
 0x5b7   : > { %10892 = vmatpush3.msra.mxu0 %v9472_v38  ;;  %10926 = vmatprep.subr.mxu1 %v9520_v17  ;;  %v9499_v33 = vld [vmem:[#allocation15 + $0x110] sm:$0xff] }
 0x5b8   : > { %10893 = vmatprep.subr.mxu0 %v9487_v55  ;;  %10927 = vmatpush3.msra.mxu1 %v9504_v3  ;;  %v9466_v55 = vld [vmem:[#allocation15 + $0x8] sm:$0xff] }
 0x5b9   : > { %10894 = vmatpush3.msra.mxu0 %v9471_v29  ;;  %10928 = vmatprep.subr.mxu1 %v9519_v25  ;;  %v9514_v3 = vld [vmem:[#allocation15 + $0x188] sm:$0xff]  ;;  %v9481_v29 = vld [vmem:[#allocation15 + $0x80] sm:$0xff] }
 0x5ba   : > { %10895 = vmatprep.subr.mxu0 %v9486_v52  ;;  %10929 = vmatpush3.msra.mxu1 %v9503_v1  ;;  %v9498_v25 = vld [vmem:[#allocation15 + $0x108] sm:$0xff]  ;;  %v9465_v52 = vld [vmem:[#allocation15] sm:$0xff] }
 0x5bb   : > { %10896 = vmatpush3.msra.mxu0 %v9470_v6  ;;  %10930 = vmatprep.subr.mxu1 %v9518_v49  ;;  %v9513_v1 = vld [vmem:[#allocation15 + $0x180] sm:$0xff] }
 0x5bc   : > { %10897 = vmatprep.subr.mxu0 %v9485_v22  ;;  %10931 = vmatpush3.msra.mxu1 %v9502_v62  ;;  %v9497_v6 = vld [vmem:[#allocation15 + $0x100] sm:$0xff] }
 0x5bd   : > { %10898 = vmatpush3.msra.mxu0 %v9469_v34  ;;  %10932 = vmatprep.subr.mxu1 %v9517_v14 }
 0x5be   : > { %10899 = vmatprep.subr.mxu0 %v9484_v28  ;;  %10933 = vmatpush3.msra.mxu1 %v9501_v18 }
 0x5bf   : > { %10900 = vmatpush3.msra.mxu0 %v9468_v7  ;;  %10934 = vmatprep.subr.mxu1 %v9516_v44 }
 0x5c0   : > { %10901 = vmatprep.subr.mxu0 %v9483_v61  ;;  %10935 = vmatpush3.msra.mxu1 %v9500_v53 }
 0x5c1   : > { %10902 = vmatpush3.msra.mxu0 %v9467_v15  ;;  %10936 = vmatprep.subr.mxu1 %v9515_v20 }
 0x5c2   : > { %10903 = vmatprep.subr.mxu0 %v9482_v32  ;;  %10937 = vmatpush3.msra.mxu1 %v9499_v33 }
 0x5c3   : > { %10904 = vmatpush3.msra.mxu0 %v9466_v55  ;;  %10938 = vmatprep.subr.mxu1 %v9514_v3 }
 0x5c4   : > { %10905 = vmatprep.subr.mxu0 %v9481_v29  ;;  %10939 = vmatpush3.msra.mxu1 %v9498_v25 }
 0x5c5   : > { %10906 = vmatpush3.msra.mxu0 %v9465_v52  ;;  %10940 = vmatprep.subr.mxu1 %v9513_v1 }
 0x5c6   : > { %10941 = vmatpush3.msra.mxu1 %v9497_v6 }
 0x5d1   : > { %v14996_v36 = vpop.f32.mrf.mxu0 }
 0x5d2   : > { %v14998_v10 = vpop.f32.mrf.mxu1  ;;  %v8717_v47 = vadd.f32 %v14996_v36, %v14907_v56  ;;  %v15477_v36 = vld [vmem:[#allocation47_spill] sm:$0xff] }
 0x5d3   : > { %v15000_v38 = vpop.f32.mrf.mxu0  ;;  %v8719_v57 = vadd.f32 %v14998_v10, %v14910_v58 }
 0x5d4   : > { %v15002_v17 = vpop.f32.mrf.mxu1  ;;  %v8718_v48 = vadd.f32 %v15000_v38, %v14913_v41  ;;  %v15473_v41 = vld [vmem:[#allocation42_spill] sm:$0xff] }
 0x5d5   : > { %v8609_v49 = vpop.f32.mrf.mxu0  ;;  %v8720_v37 = vadd.f32 %v15002_v17, %v14916_v40  ;;  %v15474_v40 = vld [vmem:[#allocation53_spill] sm:$0xff]  ;;  %v15478_v17 = vld [vmem:[#allocation55_spill] sm:$0xff] }
 0x5d6   : > { %v8682_v22 = vpop.f32.mrf.mxu1  ;;  %v8721_v46 = vadd.f32 %v8609_v49, %v14919_v12 }
 0x5d7   : > { %v8611_v62 = vpop.f32.mrf.mxu0  ;;  %v8723_v31 = vadd.f32 %v8682_v22, %v14922_v21  ;;  %v15475_v21 = vld [vmem:[#allocation43_spill] sm:$0xff]  ;;  %v15479_v22 = vld [vmem:[#allocation57_spill] sm:$0xff] }
 0x5d8   : > { %v8684_v34 = vpop.f32.mrf.mxu1  ;;  %v8722_v16 = vadd.f32 %v8611_v62, %v14925_v35  ;;  %v15476_v35 = vld [vmem:[#allocation45_spill] sm:$0xff] }
 0x5d9   : > { %v8615_v14 = vpop.f32.mrf.mxu0  ;;  %v8724_v0 = vadd.f32 %v8684_v34, %v14928_v11 }
 0x5da   : > { %v8688_v28 = vpop.f32.mrf.mxu1  ;;  %v8725_v56 = vadd.f32 %v8615_v14, %v14931_v4 }
 0x5db   : > { %v8617_v18 = vpop.f32.mrf.mxu0  ;;  %v8727_v58 = vadd.f32 %v8688_v28, %v15471_v59  ;;  %v15480_v28 = vld [vmem:[#allocation60_spill] sm:$0xff] }
 0x5dc   : > { %v8690_v7 = vpop.f32.mrf.mxu1  ;;  %v15045_v42 = vadd.f32 %v8617_v18, %v15472_v50 }
 0x5dd   : > { %v8619_v44 = vpop.f32.mrf.mxu0  ;;  %v15048_v2 = vadd.f32 %v8690_v7, %v15473_v41  ;;  %v15481_v7 = vld [vmem:[#allocation64_spill] sm:$0xff] }
 0x5de   : > { %v8692_v61 = vpop.f32.mrf.mxu1  ;;  %v15051_v12 = vadd.f32 %v8619_v44, %v15474_v40  ;;  %v15484_v41 = vld [vmem:[#allocation28_spill] sm:$0xff] }
 0x5df   : > { %v8621_v53 = vpop.f32.mrf.mxu0  ;;  %v15054_v43 = vadd.f32 %v8692_v61, %v15475_v21  ;;  %v15482_v61 = vld [vmem:[#allocation68_spill] sm:$0xff] }
 0x5e0   : > { %v8694_v15 = vpop.f32.mrf.mxu1  ;;  %v15057_v11 = vadd.f32 %v8621_v53, %v15476_v35  ;;  %v15486_v21 = vld [vmem:[#allocation52_spill] sm:$0xff] }
 0x5e1   : > { %v8625_v20 = vpop.f32.mrf.mxu0  ;;  %v15060_v10 = vadd.f32 %v8694_v15, %v15477_v36  ;;  %v15483_v15 = vld [vmem:[#allocation27_spill] sm:$0xff] }
 0x5e2   : > { %v8698_v32 = vpop.f32.mrf.mxu1  ;;  %v15063_v49 = vadd.f32 %v8625_v20, %v15478_v17 }
 0x5e3   : > { %v8627_v33 = vpop.f32.mrf.mxu0  ;;  %v15066_v62 = vadd.f32 %v8698_v32, %v15479_v22  ;;  %v15485_v32 = vld [vmem:[#allocation26_spill] sm:$0xff] }
 0x5e4   : > { %v8700_v55 = vpop.f32.mrf.mxu1  ;;  %v15069_v18 = vadd.f32 %v8627_v33, %v15480_v28 }
 0x5e5   : > { %v8629_v3 = vpop.f32.mrf.mxu0  ;;  %v15072_v44 = vadd.f32 %v8700_v55, %v15481_v7  ;;  %v15487_v55 = vld [vmem:[#allocation65_spill] sm:$0xff] }
 0x5e6   : > { %v8702_v29 = vpop.f32.mrf.mxu1  ;;  %v15075_v53 = vadd.f32 %v8629_v3, %v15482_v61 }
 0x5e7   : > { %v8631_v25 = vpop.f32.mrf.mxu0  ;;  %v15078_v59 = vadd.f32 %v8702_v29, %v15483_v15 }
 0x5e8   : > { %v8704_v52 = vpop.f32.mrf.mxu1  ;;  %v15081_v40 = vadd.f32 %v8631_v25, %v15484_v41 }
 0x5e9   : > { %v8635_v1 = vpop.f32.mrf.mxu0 }
 0x5ea   : > { %v8708_v6 = vpop.f32.mrf.mxu1  ;;  %v15087_v35 = vadd.f32 %v8635_v1, %v15486_v21 }
 0x5eb   : > { %v8637_v9 = vpop.f32.mrf.mxu0  ;;  %v15090_v36 = vadd.f32 %v8708_v6, %v15487_v55 }
 0x5ec   : > { %v8710_v19 = vpop.f32.mrf.mxu1  ;;  %v15094_v17 = vadd.f32 %v8637_v9, %v8159_v5 }
 0x5ed   : > { %v8639_v45 = vpop.f32.mrf.mxu0  ;;  %v15096_v25 = vadd.f32 %v8710_v19, %v8161_v54 }
 0x5ee   : > { %v8712_v63 = vpop.f32.mrf.mxu1 }
 0x5ef   : > { %v8641_v27 = vpop.f32.mrf.mxu0 }
 0x5f0   : > { %v8714_v39 = vpop.f32.mrf.mxu1  ;;  %v15104_v7 = vadd.f32 %v8641_v27, %v8163_v13 }
 0x612   : > { %v9179_v4 = vpop.f32.mrf.mxu0 }
 0x613   : > { %v9252_v38 = vpop.f32.mrf.mxu1  ;;  %v9291_v34 = vadd.f32 %v9179_v4, %v8717_v47  ;;  %v15084_v47 = vadd.f32 %v8704_v52, %v15485_v32  ;;  %v15098_v52 = vadd.f32 %v8639_v45, %v8162_v60 }
 0x614   : > { %v9293_v14 = vadd.f32 %v9252_v38, %v8719_v57  ;;  %v9181_v50 = vpop.f32.mrf.mxu0 }
 0x615   : > { %v9254_v20 = vpop.f32.mrf.mxu1  ;;  %v9292_v57 = vadd.f32 %v9181_v50, %v8718_v48  ;;  %v9345_v3 = vadd.f32 %v15008_v26, %v9291_v34  ;;  %v15100_v48 = vadd.f32 %v8712_v63, %v8164_v23 }
 0x616   : > { %v9294_v33 = vadd.f32 %v9254_v20, %v8720_v37  ;;  %v9347_v29 = vadd.f32 %v15018_v30, %v9293_v14  ;;  %v9183_v4 = vpop.f32.mrf.mxu0  ;;  %v15106_v14 = vadd.f32 %v8714_v39, %v8165_v24 }
 0x617   : > { %v9256_v38 = vpop.f32.mrf.mxu1  ;;  %v9346_v1 = vadd.f32 %v15012_v8, %v9292_v57  ;;  %v9295_v6 = vadd.f32 %v9183_v4, %v8721_v46  ;;  %v9377_v54 = vmax.f32 %v9345_v3, 0.0 }
 0x618   : > { %v9348_v37 = vadd.f32 %v15020_v51, %v9294_v33  ;;  %v9297_v22 = vadd.f32 %v9256_v38, %v8723_v31  ;;  %v9185_v28 = vpop.f32.mrf.mxu0  ;;  %v9379_v19 = vmax.f32 %v9347_v29, 0.0 }
 0x619   : > { %v9258_v34 = vpop.f32.mrf.mxu1  ;;  %v9296_v5 = vadd.f32 %v9185_v28, %v8722_v16  ;;  %v9349_v60 = vadd.f32 %v15008_v26, %v9295_v6  ;;  %v9378_v13 = vmax.f32 %v9346_v1, 0.0 }
 0x61a   : > { %v9298_v9 = vadd.f32 %v9258_v34, %v8724_v0  ;;  %v9351_v63 = vadd.f32 %v15018_v30, %v9297_v22  ;;  %v9189_v45 = vpop.f32.mrf.mxu0  ;;  %v9380_v27 = vmax.f32 %v9348_v37, 0.0 }
 0x61b   : > { %v9262_v23 = vpop.f32.mrf.mxu1  ;;  %v9350_v61 = vadd.f32 %v15012_v8, %v9296_v5  ;;  %v9299_v31 = vadd.f32 %v9189_v45, %v8725_v56  ;;  %v9381_v24 = vmax.f32 %v9349_v60, 0.0 }
 0x61c   : > { %v9352_v46 = vadd.f32 %v15020_v51, %v9298_v9  ;;  %v9301_v15 = vadd.f32 %v9262_v23, %v8727_v58  ;;  %v9383_v39 = vmax.f32 %v9351_v63, 0.0  ;;  %v9191_v16 = vpop.f32.mrf.mxu0 }
 0x61d   : > { %v9264_v0 = vpop.f32.mrf.mxu1  ;;  %v9382_v50 = vmax.f32 %v9350_v61, 0.0  ;;  %v9353_v41 = vadd.f32 %v15008_v26, %v9299_v31  ;;  %v9409_v57 = vadd.f32 %v9381_v24, %v9377_v54  ;;  %v9300_v21 = vadd.f32 %v9191_v16, %v15045_v42 }
 0x61e   : > { %v9384_v20 = vmax.f32 %v9352_v46, 0.0  ;;  %v9355_v32 = vadd.f32 %v15018_v30, %v9301_v15  ;;  %v9435_v33 = vadd.f32 %v9383_v39, %v9379_v19  ;;  %v9302_v55 = vadd.f32 %v9264_v0, %v15048_v2  ;;  %v9193_v56 = vpop.f32.mrf.mxu0 }
 0x61f   : > { %v9266_v58 = vpop.f32.mrf.mxu1  ;;  %v9422_v3 = vadd.f32 %v9382_v50, %v9378_v13  ;;  %v9385_v4 = vmax.f32 %v9353_v41, 0.0  ;;  %v9354_v1 = vadd.f32 %v15012_v8, %v9300_v21  ;;  %v9303_v6 = vadd.f32 %v9193_v56, %v15051_v12 }
 0x620   : > { %v9448_v29 = vadd.f32 %v9384_v20, %v9380_v27  ;;  %v9387_v38 = vmax.f32 %v9355_v32, 0.0  ;;  %v9356_v37 = vadd.f32 %v15020_v51, %v9302_v55  ;;  %v9305_v22 = vadd.f32 %v9266_v58, %v15054_v43  ;;  %v9195_v28 = vpop.f32.mrf.mxu0 }
 0x621   : > { %v9268_v34 = vpop.f32.mrf.mxu1  ;;  %v9410_v5 = vadd.f32 %v9409_v57, %v9385_v4  ;;  %v9304_v2 = vadd.f32 %v9195_v28, %v15057_v11  ;;  %v9386_v54 = vmax.f32 %v9354_v1, 0.0  ;;  %v9357_v60 = vadd.f32 %v15008_v26, %v9303_v6 }
 0x622   : > { %v9436_v42 = vadd.f32 %v9435_v33, %v9387_v38  ;;  %v9306_v9 = vadd.f32 %v9268_v34, %v15060_v10  ;;  %v9388_v19 = vmax.f32 %v9356_v37, 0.0  ;;  %v9359_v63 = vadd.f32 %v15018_v30, %v9305_v22  ;;  %v9199_v45 = vpop.f32.mrf.mxu0 }
 0x623   : > { %v9272_v23 = vpop.f32.mrf.mxu1  ;;  %v9358_v12 = vadd.f32 %v15012_v8, %v9304_v2  ;;  %v9307_v61 = vadd.f32 %v9199_v45, %v15063_v49  ;;  %v9423_v31 = vadd.f32 %v9422_v3, %v9386_v54  ;;  %v9389_v15 = vmax.f32 %v9357_v60, 0.0 }
 0x624   : > { %v9360_v43 = vadd.f32 %v15020_v51, %v9306_v9  ;;  %v9309_v46 = vadd.f32 %v9272_v23, %v15066_v62  ;;  %v9449_v11 = vadd.f32 %v9448_v29, %v9388_v19  ;;  %v9391_v10 = vmax.f32 %v9359_v63, 0.0  ;;  %v9201_v13 = vpop.f32.mrf.mxu0 }
 0x625   : > { %v9274_v27 = vpop.f32.mrf.mxu1  ;;  %v9390_v24 = vmax.f32 %v9358_v12, 0.0  ;;  %v9361_v16 = vadd.f32 %v15008_v26, %v9307_v61  ;;  %v9411_v50 = vadd.f32 %v9410_v5, %v9389_v15  ;;  %v9308_v41 = vadd.f32 %v9201_v13, %v15069_v18 }
 0x626   : > { %v9392_v39 = vmax.f32 %v9360_v43, 0.0  ;;  %v9363_v0 = vadd.f32 %v15018_v30, %v9309_v46  ;;  %v9437_v20 = vadd.f32 %v9436_v42, %v9391_v10  ;;  %v9310_v49 = vadd.f32 %v9274_v27, %v15072_v44  ;;  %v9203_v32 = vpop.f32.mrf.mxu0 }
 0x627   : > { %v9276_v62 = vpop.f32.mrf.mxu1  ;;  %v9424_v57 = vadd.f32 %v9423_v31, %v9390_v24  ;;  %v9393_v21 = vmax.f32 %v9361_v16, 0.0  ;;  %v9362_v56 = vadd.f32 %v15012_v8, %v9308_v41  ;;  %v9311_v3 = vadd.f32 %v9203_v32, %v15075_v53 }
 0x628   : > { %v9450_v33 = vadd.f32 %v9449_v11, %v9392_v39  ;;  %v9395_v55 = vmax.f32 %v9363_v0, 0.0  ;;  %v9364_v58 = vadd.f32 %v15020_v51, %v9310_v49  ;;  %v9313_v29 = vadd.f32 %v9276_v62, %v15078_v59  ;;  %v9205_v4 = vpop.f32.mrf.mxu0 }
 0x629   : > { %v9278_v38 = vpop.f32.mrf.mxu1  ;;  %v9412_v1 = vadd.f32 %v9411_v50, %v9393_v21  ;;  %v9312_v44 = vadd.f32 %v9205_v4, %v15081_v40  ;;  %v9394_v6 = vmax.f32 %v9362_v56, 0.0  ;;  %v9365_v28 = vadd.f32 %v15008_v26, %v9311_v3 }
 0x62a   : > { %v9438_v18 = vadd.f32 %v9437_v20, %v9395_v55  ;;  %v9314_v37 = vadd.f32 %v9278_v38, %v15084_v47  ;;  %v9396_v22 = vmax.f32 %v9364_v58, 0.0  ;;  %v9367_v34 = vadd.f32 %v15018_v30, %v9313_v29  ;;  %v9209_v5 = vpop.f32.mrf.mxu0 }
 0x62b   : > { %v9282_v42 = vpop.f32.mrf.mxu1  ;;  %v9366_v53 = vadd.f32 %v15012_v8, %v9312_v44  ;;  %v9315_v2 = vadd.f32 %v9209_v5, %v15087_v35  ;;  %v9425_v54 = vadd.f32 %v9424_v57, %v9394_v6  ;;  %v9397_v19 = vmax.f32 %v9365_v28, 0.0 }
 0x62c   : > { %v9368_v59 = vadd.f32 %v15020_v51, %v9314_v37  ;;  %v9317_v9 = vadd.f32 %v9282_v42, %v15090_v36  ;;  %v9451_v40 = vadd.f32 %v9450_v33, %v9396_v22  ;;  %v9399_v47 = vmax.f32 %v9367_v34, 0.0  ;;  %v9211_v60 = vpop.f32.mrf.mxu0 }
 0x62d   : > { %v9284_v63 = vpop.f32.mrf.mxu1  ;;  %v9398_v45 = vmax.f32 %v9366_v53, 0.0  ;;  %v9369_v12 = vadd.f32 %v15008_v26, %v9315_v2  ;;  %v9413_v61 = vadd.f32 %v9412_v1, %v9397_v19  ;;  %v9316_v31 = vadd.f32 %v9211_v60, %v15094_v17 }
 0x62e   : > { %v9400_v23 = vmax.f32 %v9368_v59, 0.0  ;;  %v9371_v43 = vadd.f32 %v15018_v30, %v9317_v9  ;;  %v9439_v46 = vadd.f32 %v9438_v18, %v9399_v47  ;;  %v9318_v35 = vadd.f32 %v9284_v63, %v15096_v25  ;;  %v9213_v11 = vpop.f32.mrf.mxu0 }
 0x62f   : > { %v9286_v36 = vpop.f32.mrf.mxu1  ;;  %v9426_v15 = vadd.f32 %v9425_v54, %v9398_v45  ;;  %v9401_v13 = vmax.f32 %v9369_v12, 0.0  ;;  %v9370_v24 = vadd.f32 %v15012_v8, %v9316_v31  ;;  %v9319_v16 = vadd.f32 %v9213_v11, %v15098_v52  ;;  %v9529_v31 = vld [vmem:[#allocation16] sm:$0x1] }
 0x630   : > { %v9452_v10 = vadd.f32 %v9451_v40, %v9400_v23  ;;  %v9403_v27 = vmax.f32 %v9371_v43, 0.0  ;;  %v9372_v39 = vadd.f32 %v15020_v51, %v9318_v35  ;;  %v9321_v0 = vadd.f32 %v9286_v36, %v15100_v48  ;;  %v9215_v50 = vpop.f32.mrf.mxu0 }
 0x631   : > { %v9288_v20 = vpop.f32.mrf.mxu1  ;;  %v9414_v41 = vadd.f32 %v9413_v61, %v9401_v13  ;;  %v9320_v25 = vadd.f32 %v9215_v50, %v15104_v7  ;;  %v9402_v32 = vmax.f32 %v9370_v24, 0.0  ;;  %v9373_v57 = vadd.f32 %v15008_v26, %v9319_v16 }
 0x632   : > { %v9440_v17 = vadd.f32 %v9439_v46, %v9403_v27  ;;  %v9322_v49 = vadd.f32 %v9288_v20, %v15106_v14  ;;  %v9404_v62 = vmax.f32 %v9372_v39, 0.0  ;;  %v9375_v33 = vadd.f32 %v15018_v30, %v9321_v0 }
 0x633   : > { %v9374_v21 = vadd.f32 %v15012_v8, %v9320_v25  ;;  %v9427_v55 = vadd.f32 %v9426_v15, %v9402_v32  ;;  %v9405_v56 = vmax.f32 %v9373_v57, 0.0 }
 0x634   : > { %v9376_v52 = vadd.f32 %v15020_v51, %v9322_v49  ;;  %v9453_v48 = vadd.f32 %v9452_v10, %v9404_v62  ;;  %v9407_v58 = vmax.f32 %v9375_v33, 0.0 }
 0x635   : > { %v9406_v3 = vmax.f32 %v9374_v21, 0.0  ;;  %v9415_v4 = vadd.f32 %v9414_v41, %v9405_v56 }
 0x636   : > { %v9408_v29 = vmax.f32 %v9376_v52, 0.0  ;;  %v9441_v7 = vadd.f32 %v9440_v17, %v9407_v58 }
 0x637   : > { %v9428_v38 = vadd.f32 %v9427_v55, %v9406_v3  ;;  %v9416_v1 = vrot.slane %v9415_v4, 4 }
 0x638   : > { %v9454_v14 = vadd.f32 %v9453_v48, %v9408_v29  ;;  %v9442_v18 = vrot.slane %v9441_v7, 4 }
 0x639   : > { %v9429_v44 = vrot.slane %v9428_v38, 4  ;;  %v9417_v37 = vadd.f32 %v9416_v1, %v9415_v4 }
 0x63a   : > { %v9455_v26 = vrot.slane %v9454_v14, 4  ;;  %v9443_v30 = vadd.f32 %v9442_v18, %v9441_v7 }
 0x63b   : > { %v9430_v6 = vadd.f32 %v9429_v44, %v9428_v38  ;;  %v9418_v22 = vrot.slane %v9417_v37, 2 }
 0x63c   : > { %v9456_v8 = vadd.f32 %v9455_v26, %v9454_v14  ;;  %v9444_v51 = vrot.slane %v9443_v30, 2 }
 0x63d   : > { %v9431_v28 = vrot.slane %v9430_v6, 2  ;;  %v9419_v5 = vadd.f32 %v9418_v22, %v9417_v37 }
 0x63e   : > { %v9457_v34 = vrot.slane %v9456_v8, 2  ;;  %v9445_v42 = vadd.f32 %v9444_v51, %v9443_v30 }
 0x63f   : > { %v9432_v53 = vadd.f32 %v9431_v28, %v9430_v6  ;;  %v9420_v2 = vrot.slane %v9419_v5, 1 }
 0x640   : > { %v9458_v59 = vadd.f32 %v9457_v34, %v9456_v8  ;;  %v9446_v9 = vrot.slane %v9445_v42, 1 }
 0x641   : > { %v9433_v54 = vrot.slane %v9432_v53, 1  ;;  %v9421_v19 = vadd.f32 %v9420_v2, %v9419_v5 }
 0x642   : > { %v9459_v40 = vrot.slane %v9458_v59, 1  ;;  %v9447_v47 = vadd.f32 %v9446_v9, %v9445_v42 }
 0x643   : > { %v9434_v60 = vadd.f32 %v9433_v54, %v9432_v53  ;;  %v9461_v12 = vmul.f32 0.015625, %v9421_v19 }
 0x644   : > { %v9460_v63 = vadd.f32 %v9459_v40, %v9458_v59  ;;  %v9463_v43 = vmul.f32 0.015625, %v9447_v47 }
 0x645   : > { %v9462_v45 = vmul.f32 0.015625, %v9434_v60 }
 0x646   : > { %v9464_v23 = vmul.f32 0.015625, %v9460_v63 }
 0x647   : > { %9594 = vmatprep.mubr.f32.mxu0 %v9462_v45 }
 0x648   : > { %9664 = vmatprep.mubr.f32.mxu1 %v9464_v23  ;;  %9595 = vmatmul.mubr.f32.vlgmr.msra.gmra.mxu0 %v9461_v12 }
 0x649   : > { %9665 = vmatmul.mubr.f32.vlgmr.msra.gmra.mxu1 %v9463_v43 }
 0x708   : > { %v10907_v61 = vpop.f32.mrf.mxu0 }
 0x709   : > { %v10942_v46 = vpop.f32.mrf.mxu1 }
 0x70a   : > { %v10908_v35 = vpop.f32.mrf.mxu0 }
 0x70b   : > { %v10943_v11 = vpop.f32.mrf.mxu1  ;;  %v10909_v36 = vadd.f32 %v10908_v35, %v10907_v61 }
 0x70c   : > { %v10944_v10 = vadd.f32 %v10943_v11, %v10942_v46 }
 0x70d   : > { %v9597_v15 = vadd.f32 %v10909_v36, %v9529_v31 }
 0x70f   : > { %v9667_v13 = vadd.f32 %v10944_v10, %v9597_v15 }
 0x711   : > { %v9671_v27 = vsel %vm1683_vm10, %v9667_v13, -inf }
 0x712   : > { %9672 = vmax.xlane.f32.xlu0 %v9671_v27 }
 0x79b   : > { %v9673_v24 = vpop.xlane.xlu0 %9672 }
 0x79c   : > { %v9674_v39 = vsub.f32 %v9667_v13, %v9673_v24 }
 0x79e   : > { %v9675_v16 = vmul.f32 1.442695, %v9674_v39 }
 0x7a0   : > { %12264 = vpow2.f32 %v9675_v16 }
 0x7ad   : > { %v12265_v0 = vpop.eup %12264 }
 0x7ae   : > { %v9677_v50 = vsel %vm1683_vm10, %v12265_v0, 0.0 }
 0x7af   : > { %9678 = vadd.xlane.f32.xlu0 %v9677_v50 }
 0x838   : > { %v9679_v20 = vpop.xlane.xlu0 %9678 }
 0x839   : > { %12266 = vrcp.f32 %v9679_v20 }
 0x846   : > { %v12267_v41 = vpop.eup %12266 }
 0x847   : > { %v9681_v17 = vmul.f32 %v12267_v41, %v12265_v0 }
 0x849   : > { %9682 = vst [vmem:[%s433_s23] sm:$0x1] %v9681_v17 }
 0x84a   : > { %12498 = shalt.err (!%p12495_p0)
}
 0x84b   : > { %s12499_s26 = scalar_lea.hbm %s9694_s22, 16  ;;  %s12503_s14 = scalar_lea.hbm %s15203_s9, 32 }
 0x84c   : > { %p12500_p12 = scmp.ne.s32.totalorder %s9694_s22, %s12499_s26  ;;  %p12504_p3 = scmp.lt.s32.totalorder %s9694_s22, %s15203_s9 }
 0x84d   : > { %p12505_p9 = scmp.lt.s32.totalorder %s12503_s14, %s12499_s26 }
 0x84e   : > { %p12501_p1 = pnand %p12500_p12, %p15488_p5 }
 0x84f   : > { %p12506_p4 = por %p12505_p9, %p12504_p3 }
 0x850   : > { %p12502_p2 = pneg %p12501_p1 }
 0x852   : > { %p12507_p7 = pnand %p12506_p4, %p12502_p2 }
 0x854   : > { %12510 = shalt.err (!%p12507_p7)
}
 0x855   : > { %11080 = dma.vmem_to_hbm [thread:$0]  (%p15488_p5), %s9697_s16, 16, %s9694_s22, %s9684_s1  }
 0x856 PF: > { %p11127_p6 = scmp.ge.s32.totalorder %s12565_s12, 2  ;;  %s9708_s25 = sand.u32 1, %s12553_s30  }
 0x857   : > { %p15489_p10 = scmp.ne.s32.totalorder %s15261_s20, 0  ;;  %s9709_s24 = scalar_lea.sflag [#allocation6], %s9708_s25 }
 0x859   : > { %p11108_p13 = pnand %p11127_p6, %p15489_p10 }
 0x85b   : > { %p11109_p8 = pneg %p11108_p13 }
 0x85d   : > { %12548 = dma.done.wait (%p11109_p8), %s9709_s24, 16  }
 0x85e   : > { %12550 = vsyncadd (%p11109_p8), %s9709_s24, 4294967280  ;;  %p24_p11 = scmp.ge.s32.totalorder %s12658_s15, 4   ;;  %s15490_s30 = smov %s12557_s10 }
 0x85f   : > { %s15491_s10 = smov %s12561_s11  ;;  %s15492_s11 = smov %s12669_s18 }
 0x860   : > { %s15493_s12 = smov %s12658_s15  ;;  %26 = sbr.rel (!%p24_p11) target bundleno = 11 (0xb), region = 150 }
 0x865   :  { %9713 = vsyncpa [#allocation5], 1 }
 0x866   :  { %9715 = vsyncpa [#allocation5 + $0x1], 1 }
 0x867   :  { %9716 = vsyncpa [#allocation8], 1 }
 0x868   :  { %9717 = vsyncpa [#allocation11], 1 }
 0x869   :  { %9718 = vsyncpa [#allocation14], 1 }
 0x86a   :  { %9719 = vsyncpa [#allocation17], 1 }
 0x86b   :  { %9720 = vsyncpa [#allocation6], 1 }
 0x86c   :  { %9722 = vsyncpa [#allocation6 + $0x1], 1 }

</bundles_post_ra>
